<compile_context>
chip_gen: v5e
topology: v5e:2x2
jax: 0.10.0
libtpu: 0.0.40
codegen_flags: <defaults>
</compile_context>

<pallas_src>
import functools

import jax
import jax.numpy as jnp
import numpy as np
from jax import lax
from jax.experimental import pallas as pl
from jax.experimental.pallas import tpu as pltpu


def _round_up(x, m):
    return ((x + m - 1) // m) * m


def _num_tensorcores_per_chip():
    """Best-effort TensorCores-per-chip count (2 on v7x / megacore, else 1)."""
    try:
        info = pltpu.get_tpu_info()
        for name in ("num_cores", "num_tensorcores", "tensorcores_per_chip",
                     "cores_per_chip"):
            n = getattr(info, name, None)
            if n:
                return int(n)
    except Exception:
        pass
    try:
        d = jax.devices()[0]
        n = getattr(d, "num_cores", None)
        if n:
            return int(n)
        kind = str(getattr(d, "device_kind", "")).lower()
        if any(tag in kind for tag in ("v4", "v5p", "7x", "v7")):
            return 2
    except Exception:
        pass
    return 1


def _vmem_limit_bytes():
    """Generation-aware scoped-VMEM request: 64 MiB (v5e/v6e), <=48 MiB (v7x)."""
    cap = None
    try:
        cap = int(pltpu.get_tpu_info().vmem_capacity_bytes)
    except Exception:
        cap = None
    if cap is not None and cap < 128 * 1024 * 1024:        # v7x: 64 MiB physical
        return min(48 * 1024 * 1024, (cap * 3) // 4)
    if cap is None:
        try:
            kind = str(getattr(jax.devices()[0], "device_kind", "")).lower()
            if "7" in kind:
                return 48 * 1024 * 1024
        except Exception:
            pass
    return 64 * 1024 * 1024                                 # v5e/v6e (128 MiB)


def _pick_time_chunk(T, b_blk, hp, dp, vmem_limit, cap=32):
    """Largest time chunk (<= cap) whose per-chunk working set fits the budget."""
    resident = (dp + hp) * (4 * hp) * 2                     # W_ih^T + W_hh^T, bf16
    budget = max(vmem_limit - resident, vmem_limit // 4) // 2
    per_step = b_blk * (4 * hp * 4          # f32 gate pre-activation scratch
                        + 2 * dp * 2        # double-buffered x chunk (bf16)
                        + 2 * hp * 2)       # double-buffered y chunk (bf16)
    return int(max(1, min(cap, T, budget // max(per_step, 1))))


# -----------------------------------------------------------------------------
# Pallas kernel: one LSTM layer (input projection + recurrence), one grid cell
# covers (batch block, time chunk).  Time is the carried ("arbitrary") axis.
#   x    (TT, B_blk, Dp)   bf16   streamed input chunk
#   wih  (Dp, 4Hp)         bf16   resident W_ih^T (g-gate rows pre-scaled by 2)
#   whh  (Hp, 4Hp)         bf16   resident W_hh^T (g-gate rows pre-scaled by 2)
#   bias (1, 4Hp)          f32    resident folded bias
#   y    (TT, B_blk, Hp)   bf16   per-step hidden states
#   h, c (B_blk, Hp)       f32    carries (resident across the time axis)
#   gx   (TT, B_blk, 4Hp)  f32    VMEM scratch (chunk gate pre-activations)
# -----------------------------------------------------------------------------
def _lstm_layer_kernel(x_ref, wih_ref, whh_ref, b_ref, y_ref, h_ref, c_ref,
                       gx_ref, *, hidden_pad, seq_len, time_chunk, needs_mask,
                       unroll):
    Hp = hidden_pad

    @pl.when(pl.program_id(1) == 0)
    def _init():
        h_ref[...] = jnp.zeros_like(h_ref)
        c_ref[...] = jnp.zeros_like(c_ref)

    # Chunk-wide input projection: one tall MXU matmul with f32 accumulation,
    # bias folded in.  (B_blk is a multiple of 8, so the reshape is layout-free.)
    tt, bb, dp = x_ref.shape
    gx = jnp.dot(x_ref[...].reshape(tt * bb, dp), wih_ref[...],
                 preferred_element_type=jnp.float32)
    gx_ref[...] = gx.reshape(tt, bb, 4 * Hp) + b_ref[...]

    t0 = pl.program_id(1) * time_chunk

    def step(k, carry):
        h, c = carry
        gates = gx_ref[k] + jnp.dot(h.astype(jnp.bfloat16), whh_ref[...],
                                    preferred_element_type=jnp.float32)
        # g-gate rows were pre-scaled by 2 on the host, so a single sigmoid
        # stream covers all four gates: tanh(x) == 2*sigmoid(2x) - 1.
        act = jax.nn.sigmoid(gates)
        i_g = act[:, 0 * Hp:1 * Hp]
        f_g = act[:, 1 * Hp:2 * Hp]
        g_g = 2.0 * act[:, 2 * Hp:3 * Hp] - 1.0     # == tanh of the raw g gate
        o_g = act[:, 3 * Hp:4 * Hp]
        c_new = f_g * c + i_g * g_g
        h_new = o_g * jnp.tanh(c_new)
        if needs_mask:                              # only compiled if T % TT != 0
            valid = (t0 + k) < seq_len
            h_new = jnp.where(valid, h_new, h)
            c_new = jnp.where(valid, c_new, c)
        y_ref[k] = h_new.astype(y_ref.dtype)
        return h_new, c_new

    h_f, c_f = lax.fori_loop(0, time_chunk, step, (h_ref[...], c_ref[...]),
                             unroll=unroll)
    h_ref[...] = h_f
    c_ref[...] = c_f


def lstm_layer_pallas(x_tbd, w_ih, w_hh, b_ih, b_hh):
    """One LSTM layer.

    x_tbd : (T, Bp, D) time-major input, batch padded to a multiple of 8 and any
            padded feature columns exactly zero.
    w_ih  : (4H, D_in), w_hh : (4H, H), b_ih/b_hh : (4H,)   (PyTorch layout)
    returns y (T, Bp, Hp) bf16, h_final (Bp, Hp) f32, c_final (Bp, Hp) f32
    """
    T, Bp, D_in_x = x_tbd.shape
    four_h, D_in_w = w_ih.shape
    H = four_h // 4
    Hp = _round_up(H, 128)
    Dp = _round_up(D_in_x, 128)

    # --- weight prep (host side, tiny tensors) -------------------------------
    # Fold the tanh-as-sigmoid x2 pre-scale into the g-gate rows.
    w_ih_g = w_ih.reshape(4, H, D_in_w).at[2].multiply(2.0)
    w_hh_g = w_hh.reshape(4, H, H).at[2].multiply(2.0)
    bias_g = (b_ih + b_hh).reshape(4, H).at[2].multiply(2.0)

    # Pad each gate block to Hp lanes and the input dim to Dp.  Zero padding
    # keeps the math exact (padded x / h columns stay identically zero).
    w_ih_p = jnp.pad(w_ih_g, ((0, 0), (0, Hp - H), (0, Dp - D_in_w)))
    w_hh_p = jnp.pad(w_hh_g, ((0, 0), (0, Hp - H), (0, Hp - H)))
    bias_p = jnp.pad(bias_g, ((0, 0), (0, Hp - H))).reshape(1, 4 * Hp)
    bias_p = bias_p.astype(jnp.float32)
    wih_t = jnp.transpose(w_ih_p.reshape(4 * Hp, Dp)).astype(jnp.bfloat16)
    whh_t = jnp.transpose(w_hh_p.reshape(4 * Hp, Hp)).astype(jnp.bfloat16)

    # --- block / chunk selection ----------------------------------------------
    # Full batch per block; split into exactly 2 blocks only on 2-TensorCore
    # chips (v7x megacore) when the batch allows it.
    if _num_tensorcores_per_chip() >= 2 and Bp >= 16 and Bp % 16 == 0:
        B_blk = Bp // 2
    else:
        B_blk = Bp

    vmem_limit = _vmem_limit_bytes()
    TT = _pick_time_chunk(T, B_blk, Hp, Dp, vmem_limit)
    T_pad = _round_up(T, TT)

    # --- input prep ------------------------------------------------------------
    x = x_tbd.astype(jnp.bfloat16)
    if Dp != D_in_x or T_pad != T:
        x = jnp.pad(x, ((0, T_pad - T), (0, 0), (0, Dp - D_in_x)))

    # Cap the inner-loop unroll when the per-step working set is large
    # (vreg-pressure guard); fully unroll otherwise for LLO visibility.
    unroll = True if (B_blk * 4 * Hp * 4) <= (64 * 1024) else 4

    kernel = functools.partial(
        _lstm_layer_kernel, hidden_pad=Hp, seq_len=T, time_chunk=TT,
        needs_mask=(T_pad != T), unroll=unroll)

    def run(single_buffer_residents):
        if single_buffer_residents:
            def resident(shape):
                return pl.BlockSpec(shape, lambda b, t: (0, 0),
                                    pipeline_mode=pl.Buffered(1))
        else:
            def resident(shape):
                return pl.BlockSpec(shape, lambda b, t: (0, 0))
        return pl.pallas_call(
            kernel,
            out_shape=(
                jax.ShapeDtypeStruct((T_pad, Bp, Hp), jnp.bfloat16),
                jax.ShapeDtypeStruct((Bp, Hp), jnp.float32),
                jax.ShapeDtypeStruct((Bp, Hp), jnp.float32),
            ),
            grid_spec=pltpu.PrefetchScalarGridSpec(
                num_scalar_prefetch=0,
                grid=(Bp // B_blk, T_pad // TT),
                in_specs=[
                    pl.BlockSpec((TT, B_blk, Dp), lambda b, t: (t, b, 0)),
                    resident((Dp, 4 * Hp)),     # W_ih^T, VMEM resident
                    resident((Hp, 4 * Hp)),     # W_hh^T, VMEM resident
                    resident((1, 4 * Hp)),      # folded bias, VMEM resident
                ],
                out_specs=[
                    pl.BlockSpec((TT, B_blk, Hp), lambda b, t: (t, b, 0)),
                    pl.BlockSpec((B_blk, Hp), lambda b, t: (b, 0)),   # h carry
                    pl.BlockSpec((B_blk, Hp), lambda b, t: (b, 0)),   # c carry
                ],
                scratch_shapes=[pltpu.VMEM((TT, B_blk, 4 * Hp), jnp.float32)],
            ),
            compiler_params=pltpu.CompilerParams(
                dimension_semantics=("parallel", "arbitrary"),
                vmem_limit_bytes=vmem_limit,
            ),
        )(x, wih_t, whh_t, bias_p)

    try:
        y, h_f, c_f = run(True)     # single-buffer the constant-index residents
    except Exception:
        # pipeline_mode=pl.Buffered(1) not supported by this jax build:
        # fall back to default double-buffering (correct, a bit more VMEM).
        y, h_f, c_f = run(False)

    if T_pad != T:
        y = y[:T]
    return y, h_f, c_f


# -----------------------------------------------------------------------------
# Encoder wrapper (embedding gather is glue; LSTM layers run in Pallas).
# -----------------------------------------------------------------------------
def init_encoder_params(key, input_vocab, embedding_dim, hidden_dim, num_layers):
    keys = jax.random.split(key, 1 + 4 * num_layers)
    emb = jax.random.normal(keys[0], (input_vocab, embedding_dim),
                            jnp.float32) * 0.1
    layers = []
    k = 1.0 / np.sqrt(hidden_dim)
    for l in range(num_layers):
        d_in = embedding_dim if l == 0 else hidden_dim
        w_ih = jax.random.uniform(keys[1 + 4 * l], (4 * hidden_dim, d_in),
                                  jnp.float32, -k, k)
        w_hh = jax.random.uniform(keys[2 + 4 * l], (4 * hidden_dim, hidden_dim),
                                  jnp.float32, -k, k)
        b_ih = jax.random.uniform(keys[3 + 4 * l], (4 * hidden_dim,),
                                  jnp.float32, -k, k)
        b_hh = jax.random.uniform(keys[4 + 4 * l], (4 * hidden_dim,),
                                  jnp.float32, -k, k)
        layers.append((w_ih, w_hh, b_ih, b_hh))
    return emb, layers


def encoder_forward(tokens, emb_table, lstm_params):
    """tokens: (B, T) int32.  Returns (hidden, cell): (num_layers, B, H)."""
    B, T = tokens.shape
    embedded = jnp.take(emb_table, tokens, axis=0)        # (B, T, E) — glue gather
    # Dropout is identity in eval mode.  # TODO(synk): train-mode dropout RNG.
    x = jnp.transpose(embedded, (1, 0, 2))                # time-major (T, B, E)

    Bp = _round_up(max(B, 8), 8)                          # sublane-align batch
    if Bp != B:
        x = jnp.pad(x, ((0, 0), (0, Bp - B), (0, 0)))

    hiddens, cells = [], []
    for (w_ih, w_hh, b_ih, b_hh) in lstm_params:
        H = w_hh.shape[1]
        y, h_f, c_f = lstm_layer_pallas(x, w_ih, w_hh, b_ih, b_hh)
        hiddens.append(h_f[:B, :H])
        cells.append(c_f[:B, :H])
        x = y                                             # bf16, padded (T, Bp, Hp)
    # TODO(synk): fuse consecutive layers into one pallas_call to remove the
    # inter-layer (T, Bp, Hp) HBM round-trip (and skip the last layer's y write).
    return jnp.stack(hiddens, axis=0), jnp.stack(cells, axis=0)


# -----------------------------------------------------------------------------
# Pure-JAX f32 reference (for correctness check)
# -----------------------------------------------------------------------------
def _reference_forward(tokens, emb_table, lstm_params):
    embedded = jnp.take(emb_table, tokens, axis=0)        # (B, T, E)
    x = embedded
    hiddens, cells = [], []
    for (w_ih, w_hh, b_ih, b_hh) in lstm_params:
        B, T, _ = x.shape
        H = w_hh.shape[1]
        h = jnp.zeros((B, H), jnp.float32)
        c = jnp.zeros((B, H), jnp.float32)
        ys = []
        for t in range(T):
            g = x[:, t, :] @ w_ih.T + h @ w_hh.T + b_ih + b_hh
            i = jax.nn.sigmoid(g[:, 0 * H:1 * H])
            f = jax.nn.sigmoid(g[:, 1 * H:2 * H])
            gg = jnp.tanh(g[:, 2 * H:3 * H])
            o = jax.nn.sigmoid(g[:, 3 * H:4 * H])
            c = f * c + i * gg
            h = o * jnp.tanh(c)
            ys.append(h)
        x = jnp.stack(ys, axis=1)
        hiddens.append(h)
        cells.append(c)
    return jnp.stack(hiddens, axis=0), jnp.stack(cells, axis=0)


if __name__ == "__main__":
    input_vocab, embedding_dim, hidden_dim, num_layers = 16, 32, 32, 2
    B, T = 2, 8

    key = jax.random.PRNGKey(0)
    k_param, k_tok = jax.random.split(key)
    emb_table, lstm_params = init_encoder_params(
        k_param, input_vocab, embedding_dim, hidden_dim, num_layers)
    tokens = jax.random.randint(k_tok, (B, T), 0, input_vocab, dtype=jnp.int32)

    hidden, cell = encoder_forward(tokens, emb_table, lstm_params)
    hidden, cell = jax.block_until_ready((hidden, cell))

    h_ref, c_ref = _reference_forward(tokens, emb_table, lstm_params)
    assert hidden.shape == (num_layers, B, hidden_dim)
    assert cell.shape == (num_layers, B, hidden_dim)
    # bf16 weights/activations with f32 accumulation -> looser tolerance than f32.
    np.testing.assert_allclose(np.asarray(hidden), np.asarray(h_ref),
                               rtol=3e-2, atol=3e-2)
    np.testing.assert_allclose(np.asarray(cell), np.asarray(c_ref),
                               rtol=3e-2, atol=3e-2)
    print("KERNEL_OK")
</pallas_src>

<mosaic_0001>
module attributes {stable_mosaic.version = 11 : i64} {
  func.func @_lstm_layer_kernel(%arg0: i32, %arg1: i32, %arg2: memref<8x8x128xbf16, #tpu.memory_space<vmem>>, %arg3: memref<128x512xbf16, #tpu.memory_space<vmem>>, %arg4: memref<128x512xbf16, #tpu.memory_space<vmem>>, %arg5: memref<1x512xf32, #tpu.memory_space<vmem>>, %arg6: memref<8x8x128xbf16, #tpu.memory_space<vmem>>, %arg7: memref<8x128xf32, #tpu.memory_space<vmem>>, %arg8: memref<8x128xf32, #tpu.memory_space<vmem>>, %arg9: memref<8x8x512xf32, #tpu.memory_space<vmem>>) attributes {dimension_semantics = [#tpu.dimension_semantics<parallel>, #tpu.dimension_semantics<arbitrary>], iteration_bounds = array<i64: 1, 1>, scalar_prefetch = 0 : i64, scratch_operands = 1 : i64, tpu.core_type = #tpu.core_type<tc>, window_params = [{transform_indices = @transform_0, window_bounds = array<i64: 8, 8, 128>}, {pipeline_mode = #tpu.pipeline_mode<synchronous>, transform_indices = @transform_1, window_bounds = array<i64: 128, 512>}, {pipeline_mode = #tpu.pipeline_mode<synchronous>, transform_indices = @transform_2, window_bounds = array<i64: 128, 512>}, {pipeline_mode = #tpu.pipeline_mode<synchronous>, transform_indices = @transform_3, window_bounds = array<i64: 1, 512>}, {transform_indices = @transform_4, window_bounds = array<i64: 8, 8, 128>}, {transform_indices = @transform_5, window_bounds = array<i64: 8, 128>}, {transform_indices = @transform_6, window_bounds = array<i64: 8, 128>}]} {
    %c0_i32 = arith.constant 0 : i32
    %0 = arith.cmpi eq, %arg1, %c0_i32 : i32
    %1 = arith.extui %0 : i1 to i32
    %c0_i32_0 = arith.constant 0 : i32
    %2 = arith.cmpi ne, %1, %c0_i32_0 : i32
    scf.if %2 {
      %cst_99 = arith.constant 0.000000e+00 : f32
      %257 = vector.broadcast %cst_99 : f32 to vector<8x128xf32>
      %c0_100 = arith.constant 0 : index
      %c0_101 = arith.constant 0 : index
      %258 = vector.load %arg7[%c0_100, %c0_101] : memref<8x128xf32, #tpu.memory_space<vmem>>, vector<8x128xf32>
      tpu.vector_store %arg7[%c0_100, %c0_101], %257 {strides = array<i32>} : memref<8x128xf32, #tpu.memory_space<vmem>>, vector<8x128xf32>,
      %cst_102 = arith.constant 0.000000e+00 : f32
      %259 = vector.broadcast %cst_102 : f32 to vector<8x128xf32>
      %c0_103 = arith.constant 0 : index
      %c0_104 = arith.constant 0 : index
      %260 = vector.load %arg8[%c0_103, %c0_104] : memref<8x128xf32, #tpu.memory_space<vmem>>, vector<8x128xf32>
      tpu.vector_store %arg8[%c0_103, %c0_104], %259 {strides = array<i32>} : memref<8x128xf32, #tpu.memory_space<vmem>>, vector<8x128xf32>,
    } else {
    }
    %c0 = arith.constant 0 : index
    %c0_1 = arith.constant 0 : index
    %c0_2 = arith.constant 0 : index
    %3 = vector.load %arg2[%c0, %c0_1, %c0_2] : memref<8x8x128xbf16, #tpu.memory_space<vmem>>, vector<8x8x128xbf16>
    %4 = vector.shape_cast %3 : vector<8x8x128xbf16> to vector<64x128xbf16>
    %c0_3 = arith.constant 0 : index
    %c0_4 = arith.constant 0 : index
    %5 = vector.load %arg3[%c0_3, %c0_4] : memref<128x512xbf16, #tpu.memory_space<vmem>>, vector<128x512xbf16>
    %cst = arith.constant dense<0.000000e+00> : vector<64x512xf32>
    %6 = tpu.matmul %4, %5, %cst {dimension_numbers = #tpu.dot_dimension_numbers<[1], [0], [0], [1], [0, 0, 1, 1], [], []>} : vector<64x128xbf16>, vector<128x512xbf16>, vector<64x512xf32> -> vector<64x512xf32>
    %7 = vector.shape_cast %6 : vector<64x512xf32> to vector<8x8x512xf32>
    %c0_5 = arith.constant 0 : index
    %c0_6 = arith.constant 0 : index
    %8 = vector.load %arg5[%c0_5, %c0_6] : memref<1x512xf32, #tpu.memory_space<vmem>>, vector<1x512xf32>
    %9 = vector.shape_cast %8 : vector<1x512xf32> to vector<1x1x512xf32>
    %10 = vector.broadcast %9 : vector<1x1x512xf32> to vector<8x8x512xf32>
    %11 = arith.addf %7, %10 : vector<8x8x512xf32>
    %c0_7 = arith.constant 0 : index
    %c0_8 = arith.constant 0 : index
    %c0_9 = arith.constant 0 : index
    %12 = vector.load %arg9[%c0_7, %c0_8, %c0_9] : memref<8x8x512xf32, #tpu.memory_space<vmem>>, vector<8x8x512xf32>
    tpu.vector_store %arg9[%c0_7, %c0_8, %c0_9], %11 {strides = array<i32>} : memref<8x8x512xf32, #tpu.memory_space<vmem>>, vector<8x8x512xf32>,
    %c0_10 = arith.constant 0 : index
    %c0_11 = arith.constant 0 : index
    %13 = vector.load %arg7[%c0_10, %c0_11] : memref<8x128xf32, #tpu.memory_space<vmem>>, vector<8x128xf32>
    %c0_12 = arith.constant 0 : index
    %c0_13 = arith.constant 0 : index
    %14 = vector.load %arg8[%c0_12, %c0_13] : memref<8x128xf32, #tpu.memory_space<vmem>>, vector<8x128xf32>
    %c0_i32_14 = arith.constant 0 : i32
    %15 = arith.index_cast %c0_i32_14 : i32 to index
    %c0_15 = arith.constant 0 : index
    %c0_16 = arith.constant 0 : index
    %16 = vector.load %arg9[%15, %c0_15, %c0_16] : memref<8x8x512xf32, #tpu.memory_space<vmem>>, vector<1x8x512xf32>
    %17 = vector.shape_cast %16 : vector<1x8x512xf32> to vector<8x512xf32>
    %18 = arith.truncf %13 : vector<8x128xf32> to vector<8x128xbf16>
    %c0_17 = arith.constant 0 : index
    %c0_18 = arith.constant 0 : index
    %19 = vector.load %arg4[%c0_17, %c0_18] : memref<128x512xbf16, #tpu.memory_space<vmem>>, vector<128x512xbf16>
    %cst_19 = arith.constant dense<0.000000e+00> : vector<8x512xf32>
    %20 = tpu.matmul %18, %19, %cst_19 {dimension_numbers = #tpu.dot_dimension_numbers<[1], [0], [0], [1], [0, 0, 1, 1], [], []>} : vector<8x128xbf16>, vector<128x512xbf16>, vector<8x512xf32> -> vector<8x512xf32>
    %21 = arith.addf %17, %20 : vector<8x512xf32>
    %22 = arith.negf %21 : vector<8x512xf32>
    %23 = math.exp %22 : vector<8x512xf32>
    %cst_20 = arith.constant 1.000000e+00 : f32
    %24 = vector.broadcast %cst_20 : f32 to vector<8x512xf32>
    %25 = arith.addf %24, %23 : vector<8x512xf32>
    %26 = arith.divf %24, %25 : vector<8x512xf32>
    %27 = vector.extract_strided_slice %26 {offsets = [0, 0], sizes = [8, 128], strides = [1, 1]} : vector<8x512xf32> to vector<8x128xf32>
    %28 = vector.extract_strided_slice %26 {offsets = [0, 128], sizes = [8, 128], strides = [1, 1]} : vector<8x512xf32> to vector<8x128xf32>
    %29 = vector.extract_strided_slice %26 {offsets = [0, 256], sizes = [8, 128], strides = [1, 1]} : vector<8x512xf32> to vector<8x128xf32>
    %cst_21 = arith.constant 2.000000e+00 : f32
    %30 = vector.broadcast %cst_21 : f32 to vector<8x128xf32>
    %31 = arith.mulf %30, %29 : vector<8x128xf32>
    %cst_22 = arith.constant 1.000000e+00 : f32
    %32 = vector.broadcast %cst_22 : f32 to vector<8x128xf32>
    %33 = arith.subf %31, %32 : vector<8x128xf32>
    %34 = vector.extract_strided_slice %26 {offsets = [0, 384], sizes = [8, 128], strides = [1, 1]} : vector<8x512xf32> to vector<8x128xf32>
    %35 = arith.mulf %28, %14 : vector<8x128xf32>
    %36 = arith.mulf %27, %33 : vector<8x128xf32>
    %37 = arith.addf %35, %36 : vector<8x128xf32>
    %38 = math.tanh %37 : vector<8x128xf32>
    %39 = arith.mulf %34, %38 : vector<8x128xf32>
    %40 = arith.truncf %39 : vector<8x128xf32> to vector<8x128xbf16>
    %41 = arith.index_cast %c0_i32_14 : i32 to index
    %c0_23 = arith.constant 0 : index
    %c0_24 = arith.constant 0 : index
    %42 = vector.load %arg6[%41, %c0_23, %c0_24] : memref<8x8x128xbf16, #tpu.memory_space<vmem>>, vector<1x8x128xbf16>
    %43 = vector.shape_cast %42 : vector<1x8x128xbf16> to vector<8x128xbf16>
    %44 = vector.shape_cast %40 : vector<8x128xbf16> to vector<1x8x128xbf16>
    tpu.vector_store %arg6[%41, %c0_23, %c0_24], %44 {strides = array<i32>} : memref<8x8x128xbf16, #tpu.memory_space<vmem>>, vector<1x8x128xbf16>,
    %c1_i32 = arith.constant 1 : i32
    %45 = arith.index_cast %c1_i32 : i32 to index
    %c0_25 = arith.constant 0 : index
    %c0_26 = arith.constant 0 : index
    %46 = vector.load %arg9[%45, %c0_25, %c0_26] : memref<8x8x512xf32, #tpu.memory_space<vmem>>, vector<1x8x512xf32>
    %47 = vector.shape_cast %46 : vector<1x8x512xf32> to vector<8x512xf32>
    %48 = arith.truncf %39 : vector<8x128xf32> to vector<8x128xbf16>
    %c0_27 = arith.constant 0 : index
    %c0_28 = arith.constant 0 : index
    %49 = vector.load %arg4[%c0_27, %c0_28] : memref<128x512xbf16, #tpu.memory_space<vmem>>, vector<128x512xbf16>
    %cst_29 = arith.constant dense<0.000000e+00> : vector<8x512xf32>
    %50 = tpu.matmul %48, %49, %cst_29 {dimension_numbers = #tpu.dot_dimension_numbers<[1], [0], [0], [1], [0, 0, 1, 1], [], []>} : vector<8x128xbf16>, vector<128x512xbf16>, vector<8x512xf32> -> vector<8x512xf32>
    %51 = arith.addf %47, %50 : vector<8x512xf32>
    %52 = arith.negf %51 : vector<8x512xf32>
    %53 = math.exp %52 : vector<8x512xf32>
    %cst_30 = arith.constant 1.000000e+00 : f32
    %54 = vector.broadcast %cst_30 : f32 to vector<8x512xf32>
    %55 = arith.addf %54, %53 : vector<8x512xf32>
    %56 = arith.divf %54, %55 : vector<8x512xf32>
    %57 = vector.extract_strided_slice %56 {offsets = [0, 0], sizes = [8, 128], strides = [1, 1]} : vector<8x512xf32> to vector<8x128xf32>
    %58 = vector.extract_strided_slice %56 {offsets = [0, 128], sizes = [8, 128], strides = [1, 1]} : vector<8x512xf32> to vector<8x128xf32>
    %59 = vector.extract_strided_slice %56 {offsets = [0, 256], sizes = [8, 128], strides = [1, 1]} : vector<8x512xf32> to vector<8x128xf32>
    %cst_31 = arith.constant 2.000000e+00 : f32
    %60 = vector.broadcast %cst_31 : f32 to vector<8x128xf32>
    %61 = arith.mulf %60, %59 : vector<8x128xf32>
    %cst_32 = arith.constant 1.000000e+00 : f32
    %62 = vector.broadcast %cst_32 : f32 to vector<8x128xf32>
    %63 = arith.subf %61, %62 : vector<8x128xf32>
    %64 = vector.extract_strided_slice %56 {offsets = [0, 384], sizes = [8, 128], strides = [1, 1]} : vector<8x512xf32> to vector<8x128xf32>
    %65 = arith.mulf %58, %37 : vector<8x128xf32>
    %66 = arith.mulf %57, %63 : vector<8x128xf32>
    %67 = arith.addf %65, %66 : vector<8x128xf32>
    %68 = math.tanh %67 : vector<8x128xf32>
    %69 = arith.mulf %64, %68 : vector<8x128xf32>
    %70 = arith.truncf %69 : vector<8x128xf32> to vector<8x128xbf16>
    %71 = arith.index_cast %c1_i32 : i32 to index
    %c0_33 = arith.constant 0 : index
    %c0_34 = arith.constant 0 : index
    %72 = vector.load %arg6[%71, %c0_33, %c0_34] : memref<8x8x128xbf16, #tpu.memory_space<vmem>>, vector<1x8x128xbf16>
    %73 = vector.shape_cast %72 : vector<1x8x128xbf16> to vector<8x128xbf16>
    %74 = vector.shape_cast %70 : vector<8x128xbf16> to vector<1x8x128xbf16>
    tpu.vector_store %arg6[%71, %c0_33, %c0_34], %74 {strides = array<i32>} : memref<8x8x128xbf16, #tpu.memory_space<vmem>>, vector<1x8x128xbf16>,
    %c2_i32 = arith.constant 2 : i32
    %75 = arith.index_cast %c2_i32 : i32 to index
    %c0_35 = arith.constant 0 : index
    %c0_36 = arith.constant 0 : index
    %76 = vector.load %arg9[%75, %c0_35, %c0_36] : memref<8x8x512xf32, #tpu.memory_space<vmem>>, vector<1x8x512xf32>
    %77 = vector.shape_cast %76 : vector<1x8x512xf32> to vector<8x512xf32>
    %78 = arith.truncf %69 : vector<8x128xf32> to vector<8x128xbf16>
    %c0_37 = arith.constant 0 : index
    %c0_38 = arith.constant 0 : index
    %79 = vector.load %arg4[%c0_37, %c0_38] : memref<128x512xbf16, #tpu.memory_space<vmem>>, vector<128x512xbf16>
    %cst_39 = arith.constant dense<0.000000e+00> : vector<8x512xf32>
    %80 = tpu.matmul %78, %79, %cst_39 {dimension_numbers = #tpu.dot_dimension_numbers<[1], [0], [0], [1], [0, 0, 1, 1], [], []>} : vector<8x128xbf16>, vector<128x512xbf16>, vector<8x512xf32> -> vector<8x512xf32>
    %81 = arith.addf %77, %80 : vector<8x512xf32>
    %82 = arith.negf %81 : vector<8x512xf32>
    %83 = math.exp %82 : vector<8x512xf32>
    %cst_40 = arith.constant 1.000000e+00 : f32
    %84 = vector.broadcast %cst_40 : f32 to vector<8x512xf32>
    %85 = arith.addf %84, %83 : vector<8x512xf32>
    %86 = arith.divf %84, %85 : vector<8x512xf32>
    %87 = vector.extract_strided_slice %86 {offsets = [0, 0], sizes = [8, 128], strides = [1, 1]} : vector<8x512xf32> to vector<8x128xf32>
    %88 = vector.extract_strided_slice %86 {offsets = [0, 128], sizes = [8, 128], strides = [1, 1]} : vector<8x512xf32> to vector<8x128xf32>
    %89 = vector.extract_strided_slice %86 {offsets = [0, 256], sizes = [8, 128], strides = [1, 1]} : vector<8x512xf32> to vector<8x128xf32>
    %cst_41 = arith.constant 2.000000e+00 : f32
    %90 = vector.broadcast %cst_41 : f32 to vector<8x128xf32>
    %91 = arith.mulf %90, %89 : vector<8x128xf32>
    %cst_42 = arith.constant 1.000000e+00 : f32
    %92 = vector.broadcast %cst_42 : f32 to vector<8x128xf32>
    %93 = arith.subf %91, %92 : vector<8x128xf32>
    %94 = vector.extract_strided_slice %86 {offsets = [0, 384], sizes = [8, 128], strides = [1, 1]} : vector<8x512xf32> to vector<8x128xf32>
    %95 = arith.mulf %88, %67 : vector<8x128xf32>
    %96 = arith.mulf %87, %93 : vector<8x128xf32>
    %97 = arith.addf %95, %96 : vector<8x128xf32>
    %98 = math.tanh %97 : vector<8x128xf32>
    %99 = arith.mulf %94, %98 : vector<8x128xf32>
    %100 = arith.truncf %99 : vector<8x128xf32> to vector<8x128xbf16>
    %101 = arith.index_cast %c2_i32 : i32 to index
    %c0_43 = arith.constant 0 : index
    %c0_44 = arith.constant 0 : index
    %102 = vector.load %arg6[%101, %c0_43, %c0_44] : memref<8x8x128xbf16, #tpu.memory_space<vmem>>, vector<1x8x128xbf16>
    %103 = vector.shape_cast %102 : vector<1x8x128xbf16> to vector<8x128xbf16>
    %104 = vector.shape_cast %100 : vector<8x128xbf16> to vector<1x8x128xbf16>
    tpu.vector_store %arg6[%101, %c0_43, %c0_44], %104 {strides = array<i32>} : memref<8x8x128xbf16, #tpu.memory_space<vmem>>, vector<1x8x128xbf16>,
    %c3_i32 = arith.constant 3 : i32
    %105 = arith.index_cast %c3_i32 : i32 to index
    %c0_45 = arith.constant 0 : index
    %c0_46 = arith.constant 0 : index
    %106 = vector.load %arg9[%105, %c0_45, %c0_46] : memref<8x8x512xf32, #tpu.memory_space<vmem>>, vector<1x8x512xf32>
    %107 = vector.shape_cast %106 : vector<1x8x512xf32> to vector<8x512xf32>
    %108 = arith.truncf %99 : vector<8x128xf32> to vector<8x128xbf16>
    %c0_47 = arith.constant 0 : index
    %c0_48 = arith.constant 0 : index
    %109 = vector.load %arg4[%c0_47, %c0_48] : memref<128x512xbf16, #tpu.memory_space<vmem>>, vector<128x512xbf16>
    %cst_49 = arith.constant dense<0.000000e+00> : vector<8x512xf32>
    %110 = tpu.matmul %108, %109, %cst_49 {dimension_numbers = #tpu.dot_dimension_numbers<[1], [0], [0], [1], [0, 0, 1, 1], [], []>} : vector<8x128xbf16>, vector<128x512xbf16>, vector<8x512xf32> -> vector<8x512xf32>
    %111 = arith.addf %107, %110 : vector<8x512xf32>
    %112 = arith.negf %111 : vector<8x512xf32>
    %113 = math.exp %112 : vector<8x512xf32>
    %cst_50 = arith.constant 1.000000e+00 : f32
    %114 = vector.broadcast %cst_50 : f32 to vector<8x512xf32>
    %115 = arith.addf %114, %113 : vector<8x512xf32>
    %116 = arith.divf %114, %115 : vector<8x512xf32>
    %117 = vector.extract_strided_slice %116 {offsets = [0, 0], sizes = [8, 128], strides = [1, 1]} : vector<8x512xf32> to vector<8x128xf32>
    %118 = vector.extract_strided_slice %116 {offsets = [0, 128], sizes = [8, 128], strides = [1, 1]} : vector<8x512xf32> to vector<8x128xf32>
    %119 = vector.extract_strided_slice %116 {offsets = [0, 256], sizes = [8, 128], strides = [1, 1]} : vector<8x512xf32> to vector<8x128xf32>
    %cst_51 = arith.constant 2.000000e+00 : f32
    %120 = vector.broadcast %cst_51 : f32 to vector<8x128xf32>
    %121 = arith.mulf %120, %119 : vector<8x128xf32>
    %cst_52 = arith.constant 1.000000e+00 : f32
    %122 = vector.broadcast %cst_52 : f32 to vector<8x128xf32>
    %123 = arith.subf %121, %122 : vector<8x128xf32>
    %124 = vector.extract_strided_slice %116 {offsets = [0, 384], sizes = [8, 128], strides = [1, 1]} : vector<8x512xf32> to vector<8x128xf32>
    %125 = arith.mulf %118, %97 : vector<8x128xf32>
    %126 = arith.mulf %117, %123 : vector<8x128xf32>
    %127 = arith.addf %125, %126 : vector<8x128xf32>
    %128 = math.tanh %127 : vector<8x128xf32>
    %129 = arith.mulf %124, %128 : vector<8x128xf32>
    %130 = arith.truncf %129 : vector<8x128xf32> to vector<8x128xbf16>
    %131 = arith.index_cast %c3_i32 : i32 to index
    %c0_53 = arith.constant 0 : index
    %c0_54 = arith.constant 0 : index
    %132 = vector.load %arg6[%131, %c0_53, %c0_54] : memref<8x8x128xbf16, #tpu.memory_space<vmem>>, vector<1x8x128xbf16>
    %133 = vector.shape_cast %132 : vector<1x8x128xbf16> to vector<8x128xbf16>
    %134 = vector.shape_cast %130 : vector<8x128xbf16> to vector<1x8x128xbf16>
    tpu.vector_store %arg6[%131, %c0_53, %c0_54], %134 {strides = array<i32>} : memref<8x8x128xbf16, #tpu.memory_space<vmem>>, vector<1x8x128xbf16>,
    %c4_i32 = arith.constant 4 : i32
    %135 = arith.index_cast %c4_i32 : i32 to index
    %c0_55 = arith.constant 0 : index
    %c0_56 = arith.constant 0 : index
    %136 = vector.load %arg9[%135, %c0_55, %c0_56] : memref<8x8x512xf32, #tpu.memory_space<vmem>>, vector<1x8x512xf32>
    %137 = vector.shape_cast %136 : vector<1x8x512xf32> to vector<8x512xf32>
    %138 = arith.truncf %129 : vector<8x128xf32> to vector<8x128xbf16>
    %c0_57 = arith.constant 0 : index
    %c0_58 = arith.constant 0 : index
    %139 = vector.load %arg4[%c0_57, %c0_58] : memref<128x512xbf16, #tpu.memory_space<vmem>>, vector<128x512xbf16>
    %cst_59 = arith.constant dense<0.000000e+00> : vector<8x512xf32>
    %140 = tpu.matmul %138, %139, %cst_59 {dimension_numbers = #tpu.dot_dimension_numbers<[1], [0], [0], [1], [0, 0, 1, 1], [], []>} : vector<8x128xbf16>, vector<128x512xbf16>, vector<8x512xf32> -> vector<8x512xf32>
    %141 = arith.addf %137, %140 : vector<8x512xf32>
    %142 = arith.negf %141 : vector<8x512xf32>
    %143 = math.exp %142 : vector<8x512xf32>
    %cst_60 = arith.constant 1.000000e+00 : f32
    %144 = vector.broadcast %cst_60 : f32 to vector<8x512xf32>
    %145 = arith.addf %144, %143 : vector<8x512xf32>
    %146 = arith.divf %144, %145 : vector<8x512xf32>
    %147 = vector.extract_strided_slice %146 {offsets = [0, 0], sizes = [8, 128], strides = [1, 1]} : vector<8x512xf32> to vector<8x128xf32>
    %148 = vector.extract_strided_slice %146 {offsets = [0, 128], sizes = [8, 128], strides = [1, 1]} : vector<8x512xf32> to vector<8x128xf32>
    %149 = vector.extract_strided_slice %146 {offsets = [0, 256], sizes = [8, 128], strides = [1, 1]} : vector<8x512xf32> to vector<8x128xf32>
    %cst_61 = arith.constant 2.000000e+00 : f32
    %150 = vector.broadcast %cst_61 : f32 to vector<8x128xf32>
    %151 = arith.mulf %150, %149 : vector<8x128xf32>
    %cst_62 = arith.constant 1.000000e+00 : f32
    %152 = vector.broadcast %cst_62 : f32 to vector<8x128xf32>
    %153 = arith.subf %151, %152 : vector<8x128xf32>
    %154 = vector.extract_strided_slice %146 {offsets = [0, 384], sizes = [8, 128], strides = [1, 1]} : vector<8x512xf32> to vector<8x128xf32>
    %155 = arith.mulf %148, %127 : vector<8x128xf32>
    %156 = arith.mulf %147, %153 : vector<8x128xf32>
    %157 = arith.addf %155, %156 : vector<8x128xf32>
    %158 = math.tanh %157 : vector<8x128xf32>
    %159 = arith.mulf %154, %158 : vector<8x128xf32>
    %160 = arith.truncf %159 : vector<8x128xf32> to vector<8x128xbf16>
    %161 = arith.index_cast %c4_i32 : i32 to index
    %c0_63 = arith.constant 0 : index
    %c0_64 = arith.constant 0 : index
    %162 = vector.load %arg6[%161, %c0_63, %c0_64] : memref<8x8x128xbf16, #tpu.memory_space<vmem>>, vector<1x8x128xbf16>
    %163 = vector.shape_cast %162 : vector<1x8x128xbf16> to vector<8x128xbf16>
    %164 = vector.shape_cast %160 : vector<8x128xbf16> to vector<1x8x128xbf16>
    tpu.vector_store %arg6[%161, %c0_63, %c0_64], %164 {strides = array<i32>} : memref<8x8x128xbf16, #tpu.memory_space<vmem>>, vector<1x8x128xbf16>,
    %c5_i32 = arith.constant 5 : i32
    %165 = arith.index_cast %c5_i32 : i32 to index
    %c0_65 = arith.constant 0 : index
    %c0_66 = arith.constant 0 : index
    %166 = vector.load %arg9[%165, %c0_65, %c0_66] : memref<8x8x512xf32, #tpu.memory_space<vmem>>, vector<1x8x512xf32>
    %167 = vector.shape_cast %166 : vector<1x8x512xf32> to vector<8x512xf32>
    %168 = arith.truncf %159 : vector<8x128xf32> to vector<8x128xbf16>
    %c0_67 = arith.constant 0 : index
    %c0_68 = arith.constant 0 : index
    %169 = vector.load %arg4[%c0_67, %c0_68] : memref<128x512xbf16, #tpu.memory_space<vmem>>, vector<128x512xbf16>
    %cst_69 = arith.constant dense<0.000000e+00> : vector<8x512xf32>
    %170 = tpu.matmul %168, %169, %cst_69 {dimension_numbers = #tpu.dot_dimension_numbers<[1], [0], [0], [1], [0, 0, 1, 1], [], []>} : vector<8x128xbf16>, vector<128x512xbf16>, vector<8x512xf32> -> vector<8x512xf32>
    %171 = arith.addf %167, %170 : vector<8x512xf32>
    %172 = arith.negf %171 : vector<8x512xf32>
    %173 = math.exp %172 : vector<8x512xf32>
    %cst_70 = arith.constant 1.000000e+00 : f32
    %174 = vector.broadcast %cst_70 : f32 to vector<8x512xf32>
    %175 = arith.addf %174, %173 : vector<8x512xf32>
    %176 = arith.divf %174, %175 : vector<8x512xf32>
    %177 = vector.extract_strided_slice %176 {offsets = [0, 0], sizes = [8, 128], strides = [1, 1]} : vector<8x512xf32> to vector<8x128xf32>
    %178 = vector.extract_strided_slice %176 {offsets = [0, 128], sizes = [8, 128], strides = [1, 1]} : vector<8x512xf32> to vector<8x128xf32>
    %179 = vector.extract_strided_slice %176 {offsets = [0, 256], sizes = [8, 128], strides = [1, 1]} : vector<8x512xf32> to vector<8x128xf32>
    %cst_71 = arith.constant 2.000000e+00 : f32
    %180 = vector.broadcast %cst_71 : f32 to vector<8x128xf32>
    %181 = arith.mulf %180, %179 : vector<8x128xf32>
    %cst_72 = arith.constant 1.000000e+00 : f32
    %182 = vector.broadcast %cst_72 : f32 to vector<8x128xf32>
    %183 = arith.subf %181, %182 : vector<8x128xf32>
    %184 = vector.extract_strided_slice %176 {offsets = [0, 384], sizes = [8, 128], strides = [1, 1]} : vector<8x512xf32> to vector<8x128xf32>
    %185 = arith.mulf %178, %157 : vector<8x128xf32>
    %186 = arith.mulf %177, %183 : vector<8x128xf32>
    %187 = arith.addf %185, %186 : vector<8x128xf32>
    %188 = math.tanh %187 : vector<8x128xf32>
    %189 = arith.mulf %184, %188 : vector<8x128xf32>
    %190 = arith.truncf %189 : vector<8x128xf32> to vector<8x128xbf16>
    %191 = arith.index_cast %c5_i32 : i32 to index
    %c0_73 = arith.constant 0 : index
    %c0_74 = arith.constant 0 : index
    %192 = vector.load %arg6[%191, %c0_73, %c0_74] : memref<8x8x128xbf16, #tpu.memory_space<vmem>>, vector<1x8x128xbf16>
    %193 = vector.shape_cast %192 : vector<1x8x128xbf16> to vector<8x128xbf16>
    %194 = vector.shape_cast %190 : vector<8x128xbf16> to vector<1x8x128xbf16>
    tpu.vector_store %arg6[%191, %c0_73, %c0_74], %194 {strides = array<i32>} : memref<8x8x128xbf16, #tpu.memory_space<vmem>>, vector<1x8x128xbf16>,
    %c6_i32 = arith.constant 6 : i32
    %195 = arith.index_cast %c6_i32 : i32 to index
    %c0_75 = arith.constant 0 : index
    %c0_76 = arith.constant 0 : index
    %196 = vector.load %arg9[%195, %c0_75, %c0_76] : memref<8x8x512xf32, #tpu.memory_space<vmem>>, vector<1x8x512xf32>
    %197 = vector.shape_cast %196 : vector<1x8x512xf32> to vector<8x512xf32>
    %198 = arith.truncf %189 : vector<8x128xf32> to vector<8x128xbf16>
    %c0_77 = arith.constant 0 : index
    %c0_78 = arith.constant 0 : index
    %199 = vector.load %arg4[%c0_77, %c0_78] : memref<128x512xbf16, #tpu.memory_space<vmem>>, vector<128x512xbf16>
    %cst_79 = arith.constant dense<0.000000e+00> : vector<8x512xf32>
    %200 = tpu.matmul %198, %199, %cst_79 {dimension_numbers = #tpu.dot_dimension_numbers<[1], [0], [0], [1], [0, 0, 1, 1], [], []>} : vector<8x128xbf16>, vector<128x512xbf16>, vector<8x512xf32> -> vector<8x512xf32>
    %201 = arith.addf %197, %200 : vector<8x512xf32>
    %202 = arith.negf %201 : vector<8x512xf32>
    %203 = math.exp %202 : vector<8x512xf32>
    %cst_80 = arith.constant 1.000000e+00 : f32
    %204 = vector.broadcast %cst_80 : f32 to vector<8x512xf32>
    %205 = arith.addf %204, %203 : vector<8x512xf32>
    %206 = arith.divf %204, %205 : vector<8x512xf32>
    %207 = vector.extract_strided_slice %206 {offsets = [0, 0], sizes = [8, 128], strides = [1, 1]} : vector<8x512xf32> to vector<8x128xf32>
    %208 = vector.extract_strided_slice %206 {offsets = [0, 128], sizes = [8, 128], strides = [1, 1]} : vector<8x512xf32> to vector<8x128xf32>
    %209 = vector.extract_strided_slice %206 {offsets = [0, 256], sizes = [8, 128], strides = [1, 1]} : vector<8x512xf32> to vector<8x128xf32>
    %cst_81 = arith.constant 2.000000e+00 : f32
    %210 = vector.broadcast %cst_81 : f32 to vector<8x128xf32>
    %211 = arith.mulf %210, %209 : vector<8x128xf32>
    %cst_82 = arith.constant 1.000000e+00 : f32
    %212 = vector.broadcast %cst_82 : f32 to vector<8x128xf32>
    %213 = arith.subf %211, %212 : vector<8x128xf32>
    %214 = vector.extract_strided_slice %206 {offsets = [0, 384], sizes = [8, 128], strides = [1, 1]} : vector<8x512xf32> to vector<8x128xf32>
    %215 = arith.mulf %208, %187 : vector<8x128xf32>
    %216 = arith.mulf %207, %213 : vector<8x128xf32>
    %217 = arith.addf %215, %216 : vector<8x128xf32>
    %218 = math.tanh %217 : vector<8x128xf32>
    %219 = arith.mulf %214, %218 : vector<8x128xf32>
    %220 = arith.truncf %219 : vector<8x128xf32> to vector<8x128xbf16>
    %221 = arith.index_cast %c6_i32 : i32 to index
    %c0_83 = arith.constant 0 : index
    %c0_84 = arith.constant 0 : index
    %222 = vector.load %arg6[%221, %c0_83, %c0_84] : memref<8x8x128xbf16, #tpu.memory_space<vmem>>, vector<1x8x128xbf16>
    %223 = vector.shape_cast %222 : vector<1x8x128xbf16> to vector<8x128xbf16>
    %224 = vector.shape_cast %220 : vector<8x128xbf16> to vector<1x8x128xbf16>
    tpu.vector_store %arg6[%221, %c0_83, %c0_84], %224 {strides = array<i32>} : memref<8x8x128xbf16, #tpu.memory_space<vmem>>, vector<1x8x128xbf16>,
    %c7_i32 = arith.constant 7 : i32
    %225 = arith.index_cast %c7_i32 : i32 to index
    %c0_85 = arith.constant 0 : index
    %c0_86 = arith.constant 0 : index
    %226 = vector.load %arg9[%225, %c0_85, %c0_86] : memref<8x8x512xf32, #tpu.memory_space<vmem>>, vector<1x8x512xf32>
    %227 = vector.shape_cast %226 : vector<1x8x512xf32> to vector<8x512xf32>
    %228 = arith.truncf %219 : vector<8x128xf32> to vector<8x128xbf16>
    %c0_87 = arith.constant 0 : index
    %c0_88 = arith.constant 0 : index
    %229 = vector.load %arg4[%c0_87, %c0_88] : memref<128x512xbf16, #tpu.memory_space<vmem>>, vector<128x512xbf16>
    %cst_89 = arith.constant dense<0.000000e+00> : vector<8x512xf32>
    %230 = tpu.matmul %228, %229, %cst_89 {dimension_numbers = #tpu.dot_dimension_numbers<[1], [0], [0], [1], [0, 0, 1, 1], [], []>} : vector<8x128xbf16>, vector<128x512xbf16>, vector<8x512xf32> -> vector<8x512xf32>
    %231 = arith.addf %227, %230 : vector<8x512xf32>
    %232 = arith.negf %231 : vector<8x512xf32>
    %233 = math.exp %232 : vector<8x512xf32>
    %cst_90 = arith.constant 1.000000e+00 : f32
    %234 = vector.broadcast %cst_90 : f32 to vector<8x512xf32>
    %235 = arith.addf %234, %233 : vector<8x512xf32>
    %236 = arith.divf %234, %235 : vector<8x512xf32>
    %237 = vector.extract_strided_slice %236 {offsets = [0, 0], sizes = [8, 128], strides = [1, 1]} : vector<8x512xf32> to vector<8x128xf32>
    %238 = vector.extract_strided_slice %236 {offsets = [0, 128], sizes = [8, 128], strides = [1, 1]} : vector<8x512xf32> to vector<8x128xf32>
    %239 = vector.extract_strided_slice %236 {offsets = [0, 256], sizes = [8, 128], strides = [1, 1]} : vector<8x512xf32> to vector<8x128xf32>
    %cst_91 = arith.constant 2.000000e+00 : f32
    %240 = vector.broadcast %cst_91 : f32 to vector<8x128xf32>
    %241 = arith.mulf %240, %239 : vector<8x128xf32>
    %cst_92 = arith.constant 1.000000e+00 : f32
    %242 = vector.broadcast %cst_92 : f32 to vector<8x128xf32>
    %243 = arith.subf %241, %242 : vector<8x128xf32>
    %244 = vector.extract_strided_slice %236 {offsets = [0, 384], sizes = [8, 128], strides = [1, 1]} : vector<8x512xf32> to vector<8x128xf32>
    %245 = arith.mulf %238, %217 : vector<8x128xf32>
    %246 = arith.mulf %237, %243 : vector<8x128xf32>
    %247 = arith.addf %245, %246 : vector<8x128xf32>
    %248 = math.tanh %247 : vector<8x128xf32>
    %249 = arith.mulf %244, %248 : vector<8x128xf32>
    %250 = arith.truncf %249 : vector<8x128xf32> to vector<8x128xbf16>
    %251 = arith.index_cast %c7_i32 : i32 to index
    %c0_93 = arith.constant 0 : index
    %c0_94 = arith.constant 0 : index
    %252 = vector.load %arg6[%251, %c0_93, %c0_94] : memref<8x8x128xbf16, #tpu.memory_space<vmem>>, vector<1x8x128xbf16>
    %253 = vector.shape_cast %252 : vector<1x8x128xbf16> to vector<8x128xbf16>
    %254 = vector.shape_cast %250 : vector<8x128xbf16> to vector<1x8x128xbf16>
    tpu.vector_store %arg6[%251, %c0_93, %c0_94], %254 {strides = array<i32>} : memref<8x8x128xbf16, #tpu.memory_space<vmem>>, vector<1x8x128xbf16>,
    %c8_i32 = arith.constant 8 : i32
    %c0_95 = arith.constant 0 : index
    %c0_96 = arith.constant 0 : index
    %255 = vector.load %arg7[%c0_95, %c0_96] : memref<8x128xf32, #tpu.memory_space<vmem>>, vector<8x128xf32>
    tpu.vector_store %arg7[%c0_95, %c0_96], %249 {strides = array<i32>} : memref<8x128xf32, #tpu.memory_space<vmem>>, vector<8x128xf32>,
    %c0_97 = arith.constant 0 : index
    %c0_98 = arith.constant 0 : index
    %256 = vector.load %arg8[%c0_97, %c0_98] : memref<8x128xf32, #tpu.memory_space<vmem>>, vector<8x128xf32>
    tpu.vector_store %arg8[%c0_97, %c0_98], %247 {strides = array<i32>} : memref<8x128xf32, #tpu.memory_space<vmem>>, vector<8x128xf32>,
    return
  }
  func.func @transform_0(%arg0: i32, %arg1: i32) -> (i32, i32, i32) {
    %c0_i32 = arith.constant 0 : i32
    %c0_i32_0 = arith.constant 0 : i32
    return %arg1, %arg0, %c0_i32 : i32, i32, i32
  }
  func.func @transform_1(%arg0: i32, %arg1: i32) -> (i32, i32) {
    %c0_i32 = arith.constant 0 : i32
    %c0_i32_0 = arith.constant 0 : i32
    %c0_i32_1 = arith.constant 0 : i32
    return %c0_i32, %c0_i32_0 : i32, i32
  }
  func.func @transform_2(%arg0: i32, %arg1: i32) -> (i32, i32) {
    %c0_i32 = arith.constant 0 : i32
    %c0_i32_0 = arith.constant 0 : i32
    %c0_i32_1 = arith.constant 0 : i32
    return %c0_i32, %c0_i32_0 : i32, i32
  }
  func.func @transform_3(%arg0: i32, %arg1: i32) -> (i32, i32) {
    %c0_i32 = arith.constant 0 : i32
    %c0_i32_0 = arith.constant 0 : i32
    %c0_i32_1 = arith.constant 0 : i32
    return %c0_i32, %c0_i32_0 : i32, i32
  }
  func.func @transform_4(%arg0: i32, %arg1: i32) -> (i32, i32, i32) {
    %c0_i32 = arith.constant 0 : i32
    %c0_i32_0 = arith.constant 0 : i32
    return %arg1, %arg0, %c0_i32 : i32, i32, i32
  }
  func.func @transform_5(%arg0: i32, %arg1: i32) -> (i32, i32) {
    %c0_i32 = arith.constant 0 : i32
    %c0_i32_0 = arith.constant 0 : i32
    return %arg0, %c0_i32 : i32, i32
  }
  func.func @transform_6(%arg0: i32, %arg1: i32) -> (i32, i32) {
    %c0_i32 = arith.constant 0 : i32
    %c0_i32_0 = arith.constant 0 : i32
    return %arg0, %c0_i32 : i32, i32
  }
}

module attributes {stable_mosaic.version = 11 : i64} {
  func.func @_lstm_layer_kernel(%arg0: i32, %arg1: i32, %arg2: memref<8x8x128xbf16, #tpu.memory_space<vmem>>, %arg3: memref<128x512xbf16, #tpu.memory_space<vmem>>, %arg4: memref<128x512xbf16, #tpu.memory_space<vmem>>, %arg5: memref<1x512xf32, #tpu.memory_space<vmem>>, %arg6: memref<8x8x128xbf16, #tpu.memory_space<vmem>>, %arg7: memref<8x128xf32, #tpu.memory_space<vmem>>, %arg8: memref<8x128xf32, #tpu.memory_space<vmem>>, %arg9: memref<8x8x512xf32, #tpu.memory_space<vmem>>) attributes {dimension_semantics = [#tpu.dimension_semantics<parallel>, #tpu.dimension_semantics<arbitrary>], iteration_bounds = array<i64: 1, 1>, scalar_prefetch = 0 : i64, scratch_operands = 1 : i64, tpu.core_type = #tpu.core_type<tc>, window_params = [{transform_indices = @transform_0, window_bounds = array<i64: 8, 8, 128>}, {pipeline_mode = #tpu.pipeline_mode<synchronous>, transform_indices = @transform_1, window_bounds = array<i64: 128, 512>}, {pipeline_mode = #tpu.pipeline_mode<synchronous>, transform_indices = @transform_2, window_bounds = array<i64: 128, 512>}, {pipeline_mode = #tpu.pipeline_mode<synchronous>, transform_indices = @transform_3, window_bounds = array<i64: 1, 512>}, {transform_indices = @transform_4, window_bounds = array<i64: 8, 8, 128>}, {transform_indices = @transform_5, window_bounds = array<i64: 8, 128>}, {transform_indices = @transform_6, window_bounds = array<i64: 8, 128>}]} {
    %c0_i32 = arith.constant 0 : i32
    %0 = arith.cmpi eq, %arg1, %c0_i32 : i32
    %1 = arith.extui %0 : i1 to i32
    %c0_i32_0 = arith.constant 0 : i32
    %2 = arith.cmpi ne, %1, %c0_i32_0 : i32
    scf.if %2 {
      %cst_99 = arith.constant 0.000000e+00 : f32
      %257 = vector.broadcast %cst_99 : f32 to vector<8x128xf32>
      %c0_100 = arith.constant 0 : index
      %c0_101 = arith.constant 0 : index
      %258 = vector.load %arg7[%c0_100, %c0_101] : memref<8x128xf32, #tpu.memory_space<vmem>>, vector<8x128xf32>
      tpu.vector_store %arg7[%c0_100, %c0_101], %257 {strides = array<i32>} : memref<8x128xf32, #tpu.memory_space<vmem>>, vector<8x128xf32>,
      %cst_102 = arith.constant 0.000000e+00 : f32
      %259 = vector.broadcast %cst_102 : f32 to vector<8x128xf32>
      %c0_103 = arith.constant 0 : index
      %c0_104 = arith.constant 0 : index
      %260 = vector.load %arg8[%c0_103, %c0_104] : memref<8x128xf32, #tpu.memory_space<vmem>>, vector<8x128xf32>
      tpu.vector_store %arg8[%c0_103, %c0_104], %259 {strides = array<i32>} : memref<8x128xf32, #tpu.memory_space<vmem>>, vector<8x128xf32>,
    } else {
    }
    %c0 = arith.constant 0 : index
    %c0_1 = arith.constant 0 : index
    %c0_2 = arith.constant 0 : index
    %3 = vector.load %arg2[%c0, %c0_1, %c0_2] : memref<8x8x128xbf16, #tpu.memory_space<vmem>>, vector<8x8x128xbf16>
    %4 = vector.shape_cast %3 : vector<8x8x128xbf16> to vector<64x128xbf16>
    %c0_3 = arith.constant 0 : index
    %c0_4 = arith.constant 0 : index
    %5 = vector.load %arg3[%c0_3, %c0_4] : memref<128x512xbf16, #tpu.memory_space<vmem>>, vector<128x512xbf16>
    %cst = arith.constant dense<0.000000e+00> : vector<64x512xf32>
    %6 = tpu.matmul %4, %5, %cst {dimension_numbers = #tpu.dot_dimension_numbers<[1], [0], [0], [1], [0, 0, 1, 1], [], []>} : vector<64x128xbf16>, vector<128x512xbf16>, vector<64x512xf32> -> vector<64x512xf32>
    %7 = vector.shape_cast %6 : vector<64x512xf32> to vector<8x8x512xf32>
    %c0_5 = arith.constant 0 : index
    %c0_6 = arith.constant 0 : index
    %8 = vector.load %arg5[%c0_5, %c0_6] : memref<1x512xf32, #tpu.memory_space<vmem>>, vector<1x512xf32>
    %9 = vector.shape_cast %8 : vector<1x512xf32> to vector<1x1x512xf32>
    %10 = vector.broadcast %9 : vector<1x1x512xf32> to vector<8x8x512xf32>
    %11 = arith.addf %7, %10 : vector<8x8x512xf32>
    %c0_7 = arith.constant 0 : index
    %c0_8 = arith.constant 0 : index
    %c0_9 = arith.constant 0 : index
    %12 = vector.load %arg9[%c0_7, %c0_8, %c0_9] : memref<8x8x512xf32, #tpu.memory_space<vmem>>, vector<8x8x512xf32>
    tpu.vector_store %arg9[%c0_7, %c0_8, %c0_9], %11 {strides = array<i32>} : memref<8x8x512xf32, #tpu.memory_space<vmem>>, vector<8x8x512xf32>,
    %c0_10 = arith.constant 0 : index
    %c0_11 = arith.constant 0 : index
    %13 = vector.load %arg7[%c0_10, %c0_11] : memref<8x128xf32, #tpu.memory_space<vmem>>, vector<8x128xf32>
    %c0_12 = arith.constant 0 : index
    %c0_13 = arith.constant 0 : index
    %14 = vector.load %arg8[%c0_12, %c0_13] : memref<8x128xf32, #tpu.memory_space<vmem>>, vector<8x128xf32>
    %c0_i32_14 = arith.constant 0 : i32
    %15 = arith.index_cast %c0_i32_14 : i32 to index
    %c0_15 = arith.constant 0 : index
    %c0_16 = arith.constant 0 : index
    %16 = vector.load %arg9[%15, %c0_15, %c0_16] : memref<8x8x512xf32, #tpu.memory_space<vmem>>, vector<1x8x512xf32>
    %17 = vector.shape_cast %16 : vector<1x8x512xf32> to vector<8x512xf32>
    %18 = arith.truncf %13 : vector<8x128xf32> to vector<8x128xbf16>
    %c0_17 = arith.constant 0 : index
    %c0_18 = arith.constant 0 : index
    %19 = vector.load %arg4[%c0_17, %c0_18] : memref<128x512xbf16, #tpu.memory_space<vmem>>, vector<128x512xbf16>
    %cst_19 = arith.constant dense<0.000000e+00> : vector<8x512xf32>
    %20 = tpu.matmul %18, %19, %cst_19 {dimension_numbers = #tpu.dot_dimension_numbers<[1], [0], [0], [1], [0, 0, 1, 1], [], []>} : vector<8x128xbf16>, vector<128x512xbf16>, vector<8x512xf32> -> vector<8x512xf32>
    %21 = arith.addf %17, %20 : vector<8x512xf32>
    %22 = arith.negf %21 : vector<8x512xf32>
    %23 = math.exp %22 : vector<8x512xf32>
    %cst_20 = arith.constant 1.000000e+00 : f32
    %24 = vector.broadcast %cst_20 : f32 to vector<8x512xf32>
    %25 = arith.addf %24, %23 : vector<8x512xf32>
    %26 = arith.divf %24, %25 : vector<8x512xf32>
    %27 = vector.extract_strided_slice %26 {offsets = [0, 0], sizes = [8, 128], strides = [1, 1]} : vector<8x512xf32> to vector<8x128xf32>
    %28 = vector.extract_strided_slice %26 {offsets = [0, 128], sizes = [8, 128], strides = [1, 1]} : vector<8x512xf32> to vector<8x128xf32>
    %29 = vector.extract_strided_slice %26 {offsets = [0, 256], sizes = [8, 128], strides = [1, 1]} : vector<8x512xf32> to vector<8x128xf32>
    %cst_21 = arith.constant 2.000000e+00 : f32
    %30 = vector.broadcast %cst_21 : f32 to vector<8x128xf32>
    %31 = arith.mulf %30, %29 : vector<8x128xf32>
    %cst_22 = arith.constant 1.000000e+00 : f32
    %32 = vector.broadcast %cst_22 : f32 to vector<8x128xf32>
    %33 = arith.subf %31, %32 : vector<8x128xf32>
    %34 = vector.extract_strided_slice %26 {offsets = [0, 384], sizes = [8, 128], strides = [1, 1]} : vector<8x512xf32> to vector<8x128xf32>
    %35 = arith.mulf %28, %14 : vector<8x128xf32>
    %36 = arith.mulf %27, %33 : vector<8x128xf32>
    %37 = arith.addf %35, %36 : vector<8x128xf32>
    %38 = math.tanh %37 : vector<8x128xf32>
    %39 = arith.mulf %34, %38 : vector<8x128xf32>
    %40 = arith.truncf %39 : vector<8x128xf32> to vector<8x128xbf16>
    %41 = arith.index_cast %c0_i32_14 : i32 to index
    %c0_23 = arith.constant 0 : index
    %c0_24 = arith.constant 0 : index
    %42 = vector.load %arg6[%41, %c0_23, %c0_24] : memref<8x8x128xbf16, #tpu.memory_space<vmem>>, vector<1x8x128xbf16>
    %43 = vector.shape_cast %42 : vector<1x8x128xbf16> to vector<8x128xbf16>
    %44 = vector.shape_cast %40 : vector<8x128xbf16> to vector<1x8x128xbf16>
    tpu.vector_store %arg6[%41, %c0_23, %c0_24], %44 {strides = array<i32>} : memref<8x8x128xbf16, #tpu.memory_space<vmem>>, vector<1x8x128xbf16>,
    %c1_i32 = arith.constant 1 : i32
    %45 = arith.index_cast %c1_i32 : i32 to index
    %c0_25 = arith.constant 0 : index
    %c0_26 = arith.constant 0 : index
    %46 = vector.load %arg9[%45, %c0_25, %c0_26] : memref<8x8x512xf32, #tpu.memory_space<vmem>>, vector<1x8x512xf32>
    %47 = vector.shape_cast %46 : vector<1x8x512xf32> to vector<8x512xf32>
    %48 = arith.truncf %39 : vector<8x128xf32> to vector<8x128xbf16>
    %c0_27 = arith.constant 0 : index
    %c0_28 = arith.constant 0 : index
    %49 = vector.load %arg4[%c0_27, %c0_28] : memref<128x512xbf16, #tpu.memory_space<vmem>>, vector<128x512xbf16>
    %cst_29 = arith.constant dense<0.000000e+00> : vector<8x512xf32>
    %50 = tpu.matmul %48, %49, %cst_29 {dimension_numbers = #tpu.dot_dimension_numbers<[1], [0], [0], [1], [0, 0, 1, 1], [], []>} : vector<8x128xbf16>, vector<128x512xbf16>, vector<8x512xf32> -> vector<8x512xf32>
    %51 = arith.addf %47, %50 : vector<8x512xf32>
    %52 = arith.negf %51 : vector<8x512xf32>
    %53 = math.exp %52 : vector<8x512xf32>
    %cst_30 = arith.constant 1.000000e+00 : f32
    %54 = vector.broadcast %cst_30 : f32 to vector<8x512xf32>
    %55 = arith.addf %54, %53 : vector<8x512xf32>
    %56 = arith.divf %54, %55 : vector<8x512xf32>
    %57 = vector.extract_strided_slice %56 {offsets = [0, 0], sizes = [8, 128], strides = [1, 1]} : vector<8x512xf32> to vector<8x128xf32>
    %58 = vector.extract_strided_slice %56 {offsets = [0, 128], sizes = [8, 128], strides = [1, 1]} : vector<8x512xf32> to vector<8x128xf32>
    %59 = vector.extract_strided_slice %56 {offsets = [0, 256], sizes = [8, 128], strides = [1, 1]} : vector<8x512xf32> to vector<8x128xf32>
    %cst_31 = arith.constant 2.000000e+00 : f32
    %60 = vector.broadcast %cst_31 : f32 to vector<8x128xf32>
    %61 = arith.mulf %60, %59 : vector<8x128xf32>
    %cst_32 = arith.constant 1.000000e+00 : f32
    %62 = vector.broadcast %cst_32 : f32 to vector<8x128xf32>
    %63 = arith.subf %61, %62 : vector<8x128xf32>
    %64 = vector.extract_strided_slice %56 {offsets = [0, 384], sizes = [8, 128], strides = [1, 1]} : vector<8x512xf32> to vector<8x128xf32>
    %65 = arith.mulf %58, %37 : vector<8x128xf32>
    %66 = arith.mulf %57, %63 : vector<8x128xf32>
    %67 = arith.addf %65, %66 : vector<8x128xf32>
    %68 = math.tanh %67 : vector<8x128xf32>
    %69 = arith.mulf %64, %68 : vector<8x128xf32>
    %70 = arith.truncf %69 : vector<8x128xf32> to vector<8x128xbf16>
    %71 = arith.index_cast %c1_i32 : i32 to index
    %c0_33 = arith.constant 0 : index
    %c0_34 = arith.constant 0 : index
    %72 = vector.load %arg6[%71, %c0_33, %c0_34] : memref<8x8x128xbf16, #tpu.memory_space<vmem>>, vector<1x8x128xbf16>
    %73 = vector.shape_cast %72 : vector<1x8x128xbf16> to vector<8x128xbf16>
    %74 = vector.shape_cast %70 : vector<8x128xbf16> to vector<1x8x128xbf16>
    tpu.vector_store %arg6[%71, %c0_33, %c0_34], %74 {strides = array<i32>} : memref<8x8x128xbf16, #tpu.memory_space<vmem>>, vector<1x8x128xbf16>,
    %c2_i32 = arith.constant 2 : i32
    %75 = arith.index_cast %c2_i32 : i32 to index
    %c0_35 = arith.constant 0 : index
    %c0_36 = arith.constant 0 : index
    %76 = vector.load %arg9[%75, %c0_35, %c0_36] : memref<8x8x512xf32, #tpu.memory_space<vmem>>, vector<1x8x512xf32>
    %77 = vector.shape_cast %76 : vector<1x8x512xf32> to vector<8x512xf32>
    %78 = arith.truncf %69 : vector<8x128xf32> to vector<8x128xbf16>
    %c0_37 = arith.constant 0 : index
    %c0_38 = arith.constant 0 : index
    %79 = vector.load %arg4[%c0_37, %c0_38] : memref<128x512xbf16, #tpu.memory_space<vmem>>, vector<128x512xbf16>
    %cst_39 = arith.constant dense<0.000000e+00> : vector<8x512xf32>
    %80 = tpu.matmul %78, %79, %cst_39 {dimension_numbers = #tpu.dot_dimension_numbers<[1], [0], [0], [1], [0, 0, 1, 1], [], []>} : vector<8x128xbf16>, vector<128x512xbf16>, vector<8x512xf32> -> vector<8x512xf32>
    %81 = arith.addf %77, %80 : vector<8x512xf32>
    %82 = arith.negf %81 : vector<8x512xf32>
    %83 = math.exp %82 : vector<8x512xf32>
    %cst_40 = arith.constant 1.000000e+00 : f32
    %84 = vector.broadcast %cst_40 : f32 to vector<8x512xf32>
    %85 = arith.addf %84, %83 : vector<8x512xf32>
    %86 = arith.divf %84, %85 : vector<8x512xf32>
    %87 = vector.extract_strided_slice %86 {offsets = [0, 0], sizes = [8, 128], strides = [1, 1]} : vector<8x512xf32> to vector<8x128xf32>
    %88 = vector.extract_strided_slice %86 {offsets = [0, 128], sizes = [8, 128], strides = [1, 1]} : vector<8x512xf32> to vector<8x128xf32>
    %89 = vector.extract_strided_slice %86 {offsets = [0, 256], sizes = [8, 128], strides = [1, 1]} : vector<8x512xf32> to vector<8x128xf32>
    %cst_41 = arith.constant 2.000000e+00 : f32
    %90 = vector.broadcast %cst_41 : f32 to vector<8x128xf32>
    %91 = arith.mulf %90, %89 : vector<8x128xf32>
    %cst_42 = arith.constant 1.000000e+00 : f32
    %92 = vector.broadcast %cst_42 : f32 to vector<8x128xf32>
    %93 = arith.subf %91, %92 : vector<8x128xf32>
    %94 = vector.extract_strided_slice %86 {offsets = [0, 384], sizes = [8, 128], strides = [1, 1]} : vector<8x512xf32> to vector<8x128xf32>
    %95 = arith.mulf %88, %67 : vector<8x128xf32>
    %96 = arith.mulf %87, %93 : vector<8x128xf32>
    %97 = arith.addf %95, %96 : vector<8x128xf32>
    %98 = math.tanh %97 : vector<8x128xf32>
    %99 = arith.mulf %94, %98 : vector<8x128xf32>
    %100 = arith.truncf %99 : vector<8x128xf32> to vector<8x128xbf16>
    %101 = arith.index_cast %c2_i32 : i32 to index
    %c0_43 = arith.constant 0 : index
    %c0_44 = arith.constant 0 : index
    %102 = vector.load %arg6[%101, %c0_43, %c0_44] : memref<8x8x128xbf16, #tpu.memory_space<vmem>>, vector<1x8x128xbf16>
    %103 = vector.shape_cast %102 : vector<1x8x128xbf16> to vector<8x128xbf16>
    %104 = vector.shape_cast %100 : vector<8x128xbf16> to vector<1x8x128xbf16>
    tpu.vector_store %arg6[%101, %c0_43, %c0_44], %104 {strides = array<i32>} : memref<8x8x128xbf16, #tpu.memory_space<vmem>>, vector<1x8x128xbf16>,
    %c3_i32 = arith.constant 3 : i32
    %105 = arith.index_cast %c3_i32 : i32 to index
    %c0_45 = arith.constant 0 : index
    %c0_46 = arith.constant 0 : index
    %106 = vector.load %arg9[%105, %c0_45, %c0_46] : memref<8x8x512xf32, #tpu.memory_space<vmem>>, vector<1x8x512xf32>
    %107 = vector.shape_cast %106 : vector<1x8x512xf32> to vector<8x512xf32>
    %108 = arith.truncf %99 : vector<8x128xf32> to vector<8x128xbf16>
    %c0_47 = arith.constant 0 : index
    %c0_48 = arith.constant 0 : index
    %109 = vector.load %arg4[%c0_47, %c0_48] : memref<128x512xbf16, #tpu.memory_space<vmem>>, vector<128x512xbf16>
    %cst_49 = arith.constant dense<0.000000e+00> : vector<8x512xf32>
    %110 = tpu.matmul %108, %109, %cst_49 {dimension_numbers = #tpu.dot_dimension_numbers<[1], [0], [0], [1], [0, 0, 1, 1], [], []>} : vector<8x128xbf16>, vector<128x512xbf16>, vector<8x512xf32> -> vector<8x512xf32>
    %111 = arith.addf %107, %110 : vector<8x512xf32>
    %112 = arith.negf %111 : vector<8x512xf32>
    %113 = math.exp %112 : vector<8x512xf32>
    %cst_50 = arith.constant 1.000000e+00 : f32
    %114 = vector.broadcast %cst_50 : f32 to vector<8x512xf32>
    %115 = arith.addf %114, %113 : vector<8x512xf32>
    %116 = arith.divf %114, %115 : vector<8x512xf32>
    %117 = vector.extract_strided_slice %116 {offsets = [0, 0], sizes = [8, 128], strides = [1, 1]} : vector<8x512xf32> to vector<8x128xf32>
    %118 = vector.extract_strided_slice %116 {offsets = [0, 128], sizes = [8, 128], strides = [1, 1]} : vector<8x512xf32> to vector<8x128xf32>
    %119 = vector.extract_strided_slice %116 {offsets = [0, 256], sizes = [8, 128], strides = [1, 1]} : vector<8x512xf32> to vector<8x128xf32>
    %cst_51 = arith.constant 2.000000e+00 : f32
    %120 = vector.broadcast %cst_51 : f32 to vector<8x128xf32>
    %121 = arith.mulf %120, %119 : vector<8x128xf32>
    %cst_52 = arith.constant 1.000000e+00 : f32
    %122 = vector.broadcast %cst_52 : f32 to vector<8x128xf32>
    %123 = arith.subf %121, %122 : vector<8x128xf32>
    %124 = vector.extract_strided_slice %116 {offsets = [0, 384], sizes = [8, 128], strides = [1, 1]} : vector<8x512xf32> to vector<8x128xf32>
    %125 = arith.mulf %118, %97 : vector<8x128xf32>
    %126 = arith.mulf %117, %123 : vector<8x128xf32>
    %127 = arith.addf %125, %126 : vector<8x128xf32>
    %128 = math.tanh %127 : vector<8x128xf32>
    %129 = arith.mulf %124, %128 : vector<8x128xf32>
    %130 = arith.truncf %129 : vector<8x128xf32> to vector<8x128xbf16>
    %131 = arith.index_cast %c3_i32 : i32 to index
    %c0_53 = arith.constant 0 : index
    %c0_54 = arith.constant 0 : index
    %132 = vector.load %arg6[%131, %c0_53, %c0_54] : memref<8x8x128xbf16, #tpu.memory_space<vmem>>, vector<1x8x128xbf16>
    %133 = vector.shape_cast %132 : vector<1x8x128xbf16> to vector<8x128xbf16>
    %134 = vector.shape_cast %130 : vector<8x128xbf16> to vector<1x8x128xbf16>
    tpu.vector_store %arg6[%131, %c0_53, %c0_54], %134 {strides = array<i32>} : memref<8x8x128xbf16, #tpu.memory_space<vmem>>, vector<1x8x128xbf16>,
    %c4_i32 = arith.constant 4 : i32
    %135 = arith.index_cast %c4_i32 : i32 to index
    %c0_55 = arith.constant 0 : index
    %c0_56 = arith.constant 0 : index
    %136 = vector.load %arg9[%135, %c0_55, %c0_56] : memref<8x8x512xf32, #tpu.memory_space<vmem>>, vector<1x8x512xf32>
    %137 = vector.shape_cast %136 : vector<1x8x512xf32> to vector<8x512xf32>
    %138 = arith.truncf %129 : vector<8x128xf32> to vector<8x128xbf16>
    %c0_57 = arith.constant 0 : index
    %c0_58 = arith.constant 0 : index
    %139 = vector.load %arg4[%c0_57, %c0_58] : memref<128x512xbf16, #tpu.memory_space<vmem>>, vector<128x512xbf16>
    %cst_59 = arith.constant dense<0.000000e+00> : vector<8x512xf32>
    %140 = tpu.matmul %138, %139, %cst_59 {dimension_numbers = #tpu.dot_dimension_numbers<[1], [0], [0], [1], [0, 0, 1, 1], [], []>} : vector<8x128xbf16>, vector<128x512xbf16>, vector<8x512xf32> -> vector<8x512xf32>
    %141 = arith.addf %137, %140 : vector<8x512xf32>
    %142 = arith.negf %141 : vector<8x512xf32>
    %143 = math.exp %142 : vector<8x512xf32>
    %cst_60 = arith.constant 1.000000e+00 : f32
    %144 = vector.broadcast %cst_60 : f32 to vector<8x512xf32>
    %145 = arith.addf %144, %143 : vector<8x512xf32>
    %146 = arith.divf %144, %145 : vector<8x512xf32>
    %147 = vector.extract_strided_slice %146 {offsets = [0, 0], sizes = [8, 128], strides = [1, 1]} : vector<8x512xf32> to vector<8x128xf32>
    %148 = vector.extract_strided_slice %146 {offsets = [0, 128], sizes = [8, 128], strides = [1, 1]} : vector<8x512xf32> to vector<8x128xf32>
    %149 = vector.extract_strided_slice %146 {offsets = [0, 256], sizes = [8, 128], strides = [1, 1]} : vector<8x512xf32> to vector<8x128xf32>
    %cst_61 = arith.constant 2.000000e+00 : f32
    %150 = vector.broadcast %cst_61 : f32 to vector<8x128xf32>
    %151 = arith.mulf %150, %149 : vector<8x128xf32>
    %cst_62 = arith.constant 1.000000e+00 : f32
    %152 = vector.broadcast %cst_62 : f32 to vector<8x128xf32>
    %153 = arith.subf %151, %152 : vector<8x128xf32>
    %154 = vector.extract_strided_slice %146 {offsets = [0, 384], sizes = [8, 128], strides = [1, 1]} : vector<8x512xf32> to vector<8x128xf32>
    %155 = arith.mulf %148, %127 : vector<8x128xf32>
    %156 = arith.mulf %147, %153 : vector<8x128xf32>
    %157 = arith.addf %155, %156 : vector<8x128xf32>
    %158 = math.tanh %157 : vector<8x128xf32>
    %159 = arith.mulf %154, %158 : vector<8x128xf32>
    %160 = arith.truncf %159 : vector<8x128xf32> to vector<8x128xbf16>
    %161 = arith.index_cast %c4_i32 : i32 to index
    %c0_63 = arith.constant 0 : index
    %c0_64 = arith.constant 0 : index
    %162 = vector.load %arg6[%161, %c0_63, %c0_64] : memref<8x8x128xbf16, #tpu.memory_space<vmem>>, vector<1x8x128xbf16>
    %163 = vector.shape_cast %162 : vector<1x8x128xbf16> to vector<8x128xbf16>
    %164 = vector.shape_cast %160 : vector<8x128xbf16> to vector<1x8x128xbf16>
    tpu.vector_store %arg6[%161, %c0_63, %c0_64], %164 {strides = array<i32>} : memref<8x8x128xbf16, #tpu.memory_space<vmem>>, vector<1x8x128xbf16>,
    %c5_i32 = arith.constant 5 : i32
    %165 = arith.index_cast %c5_i32 : i32 to index
    %c0_65 = arith.constant 0 : index
    %c0_66 = arith.constant 0 : index
    %166 = vector.load %arg9[%165, %c0_65, %c0_66] : memref<8x8x512xf32, #tpu.memory_space<vmem>>, vector<1x8x512xf32>
    %167 = vector.shape_cast %166 : vector<1x8x512xf32> to vector<8x512xf32>
    %168 = arith.truncf %159 : vector<8x128xf32> to vector<8x128xbf16>
    %c0_67 = arith.constant 0 : index
    %c0_68 = arith.constant 0 : index
    %169 = vector.load %arg4[%c0_67, %c0_68] : memref<128x512xbf16, #tpu.memory_space<vmem>>, vector<128x512xbf16>
    %cst_69 = arith.constant dense<0.000000e+00> : vector<8x512xf32>
    %170 = tpu.matmul %168, %169, %cst_69 {dimension_numbers = #tpu.dot_dimension_numbers<[1], [0], [0], [1], [0, 0, 1, 1], [], []>} : vector<8x128xbf16>, vector<128x512xbf16>, vector<8x512xf32> -> vector<8x512xf32>
    %171 = arith.addf %167, %170 : vector<8x512xf32>
    %172 = arith.negf %171 : vector<8x512xf32>
    %173 = math.exp %172 : vector<8x512xf32>
    %cst_70 = arith.constant 1.000000e+00 : f32
    %174 = vector.broadcast %cst_70 : f32 to vector<8x512xf32>
    %175 = arith.addf %174, %173 : vector<8x512xf32>
    %176 = arith.divf %174, %175 : vector<8x512xf32>
    %177 = vector.extract_strided_slice %176 {offsets = [0, 0], sizes = [8, 128], strides = [1, 1]} : vector<8x512xf32> to vector<8x128xf32>
    %178 = vector.extract_strided_slice %176 {offsets = [0, 128], sizes = [8, 128], strides = [1, 1]} : vector<8x512xf32> to vector<8x128xf32>
    %179 = vector.extract_strided_slice %176 {offsets = [0, 256], sizes = [8, 128], strides = [1, 1]} : vector<8x512xf32> to vector<8x128xf32>
    %cst_71 = arith.constant 2.000000e+00 : f32
    %180 = vector.broadcast %cst_71 : f32 to vector<8x128xf32>
    %181 = arith.mulf %180, %179 : vector<8x128xf32>
    %cst_72 = arith.constant 1.000000e+00 : f32
    %182 = vector.broadcast %cst_72 : f32 to vector<8x128xf32>
    %183 = arith.subf %181, %182 : vector<8x128xf32>
    %184 = vector.extract_strided_slice %176 {offsets = [0, 384], sizes = [8, 128], strides = [1, 1]} : vector<8x512xf32> to vector<8x128xf32>
    %185 = arith.mulf %178, %157 : vector<8x128xf32>
    %186 = arith.mulf %177, %183 : vector<8x128xf32>
    %187 = arith.addf %185, %186 : vector<8x128xf32>
    %188 = math.tanh %187 : vector<8x128xf32>
    %189 = arith.mulf %184, %188 : vector<8x128xf32>
    %190 = arith.truncf %189 : vector<8x128xf32> to vector<8x128xbf16>
    %191 = arith.index_cast %c5_i32 : i32 to index
    %c0_73 = arith.constant 0 : index
    %c0_74 = arith.constant 0 : index
    %192 = vector.load %arg6[%191, %c0_73, %c0_74] : memref<8x8x128xbf16, #tpu.memory_space<vmem>>, vector<1x8x128xbf16>
    %193 = vector.shape_cast %192 : vector<1x8x128xbf16> to vector<8x128xbf16>
    %194 = vector.shape_cast %190 : vector<8x128xbf16> to vector<1x8x128xbf16>
    tpu.vector_store %arg6[%191, %c0_73, %c0_74], %194 {strides = array<i32>} : memref<8x8x128xbf16, #tpu.memory_space<vmem>>, vector<1x8x128xbf16>,
    %c6_i32 = arith.constant 6 : i32
    %195 = arith.index_cast %c6_i32 : i32 to index
    %c0_75 = arith.constant 0 : index
    %c0_76 = arith.constant 0 : index
    %196 = vector.load %arg9[%195, %c0_75, %c0_76] : memref<8x8x512xf32, #tpu.memory_space<vmem>>, vector<1x8x512xf32>
    %197 = vector.shape_cast %196 : vector<1x8x512xf32> to vector<8x512xf32>
    %198 = arith.truncf %189 : vector<8x128xf32> to vector<8x128xbf16>
    %c0_77 = arith.constant 0 : index
    %c0_78 = arith.constant 0 : index
    %199 = vector.load %arg4[%c0_77, %c0_78] : memref<128x512xbf16, #tpu.memory_space<vmem>>, vector<128x512xbf16>
    %cst_79 = arith.constant dense<0.000000e+00> : vector<8x512xf32>
    %200 = tpu.matmul %198, %199, %cst_79 {dimension_numbers = #tpu.dot_dimension_numbers<[1], [0], [0], [1], [0, 0, 1, 1], [], []>} : vector<8x128xbf16>, vector<128x512xbf16>, vector<8x512xf32> -> vector<8x512xf32>
    %201 = arith.addf %197, %200 : vector<8x512xf32>
    %202 = arith.negf %201 : vector<8x512xf32>
    %203 = math.exp %202 : vector<8x512xf32>
    %cst_80 = arith.constant 1.000000e+00 : f32
    %204 = vector.broadcast %cst_80 : f32 to vector<8x512xf32>
    %205 = arith.addf %204, %203 : vector<8x512xf32>
    %206 = arith.divf %204, %205 : vector<8x512xf32>
    %207 = vector.extract_strided_slice %206 {offsets = [0, 0], sizes = [8, 128], strides = [1, 1]} : vector<8x512xf32> to vector<8x128xf32>
    %208 = vector.extract_strided_slice %206 {offsets = [0, 128], sizes = [8, 128], strides = [1, 1]} : vector<8x512xf32> to vector<8x128xf32>
    %209 = vector.extract_strided_slice %206 {offsets = [0, 256], sizes = [8, 128], strides = [1, 1]} : vector<8x512xf32> to vector<8x128xf32>
    %cst_81 = arith.constant 2.000000e+00 : f32
    %210 = vector.broadcast %cst_81 : f32 to vector<8x128xf32>
    %211 = arith.mulf %210, %209 : vector<8x128xf32>
    %cst_82 = arith.constant 1.000000e+00 : f32
    %212 = vector.broadcast %cst_82 : f32 to vector<8x128xf32>
    %213 = arith.subf %211, %212 : vector<8x128xf32>
    %214 = vector.extract_strided_slice %206 {offsets = [0, 384], sizes = [8, 128], strides = [1, 1]} : vector<8x512xf32> to vector<8x128xf32>
    %215 = arith.mulf %208, %187 : vector<8x128xf32>
    %216 = arith.mulf %207, %213 : vector<8x128xf32>
    %217 = arith.addf %215, %216 : vector<8x128xf32>
    %218 = math.tanh %217 : vector<8x128xf32>
    %219 = arith.mulf %214, %218 : vector<8x128xf32>
    %220 = arith.truncf %219 : vector<8x128xf32> to vector<8x128xbf16>
    %221 = arith.index_cast %c6_i32 : i32 to index
    %c0_83 = arith.constant 0 : index
    %c0_84 = arith.constant 0 : index
    %222 = vector.load %arg6[%221, %c0_83, %c0_84] : memref<8x8x128xbf16, #tpu.memory_space<vmem>>, vector<1x8x128xbf16>
    %223 = vector.shape_cast %222 : vector<1x8x128xbf16> to vector<8x128xbf16>
    %224 = vector.shape_cast %220 : vector<8x128xbf16> to vector<1x8x128xbf16>
    tpu.vector_store %arg6[%221, %c0_83, %c0_84], %224 {strides = array<i32>} : memref<8x8x128xbf16, #tpu.memory_space<vmem>>, vector<1x8x128xbf16>,
    %c7_i32 = arith.constant 7 : i32
    %225 = arith.index_cast %c7_i32 : i32 to index
    %c0_85 = arith.constant 0 : index
    %c0_86 = arith.constant 0 : index
    %226 = vector.load %arg9[%225, %c0_85, %c0_86] : memref<8x8x512xf32, #tpu.memory_space<vmem>>, vector<1x8x512xf32>
    %227 = vector.shape_cast %226 : vector<1x8x512xf32> to vector<8x512xf32>
    %228 = arith.truncf %219 : vector<8x128xf32> to vector<8x128xbf16>
    %c0_87 = arith.constant 0 : index
    %c0_88 = arith.constant 0 : index
    %229 = vector.load %arg4[%c0_87, %c0_88] : memref<128x512xbf16, #tpu.memory_space<vmem>>, vector<128x512xbf16>
    %cst_89 = arith.constant dense<0.000000e+00> : vector<8x512xf32>
    %230 = tpu.matmul %228, %229, %cst_89 {dimension_numbers = #tpu.dot_dimension_numbers<[1], [0], [0], [1], [0, 0, 1, 1], [], []>} : vector<8x128xbf16>, vector<128x512xbf16>, vector<8x512xf32> -> vector<8x512xf32>
    %231 = arith.addf %227, %230 : vector<8x512xf32>
    %232 = arith.negf %231 : vector<8x512xf32>
    %233 = math.exp %232 : vector<8x512xf32>
    %cst_90 = arith.constant 1.000000e+00 : f32
    %234 = vector.broadcast %cst_90 : f32 to vector<8x512xf32>
    %235 = arith.addf %234, %233 : vector<8x512xf32>
    %236 = arith.divf %234, %235 : vector<8x512xf32>
    %237 = vector.extract_strided_slice %236 {offsets = [0, 0], sizes = [8, 128], strides = [1, 1]} : vector<8x512xf32> to vector<8x128xf32>
    %238 = vector.extract_strided_slice %236 {offsets = [0, 128], sizes = [8, 128], strides = [1, 1]} : vector<8x512xf32> to vector<8x128xf32>
    %239 = vector.extract_strided_slice %236 {offsets = [0, 256], sizes = [8, 128], strides = [1, 1]} : vector<8x512xf32> to vector<8x128xf32>
    %cst_91 = arith.constant 2.000000e+00 : f32
    %240 = vector.broadcast %cst_91 : f32 to vector<8x128xf32>
    %241 = arith.mulf %240, %239 : vector<8x128xf32>
    %cst_92 = arith.constant 1.000000e+00 : f32
    %242 = vector.broadcast %cst_92 : f32 to vector<8x128xf32>
    %243 = arith.subf %241, %242 : vector<8x128xf32>
    %244 = vector.extract_strided_slice %236 {offsets = [0, 384], sizes = [8, 128], strides = [1, 1]} : vector<8x512xf32> to vector<8x128xf32>
    %245 = arith.mulf %238, %217 : vector<8x128xf32>
    %246 = arith.mulf %237, %243 : vector<8x128xf32>
    %247 = arith.addf %245, %246 : vector<8x128xf32>
    %248 = math.tanh %247 : vector<8x128xf32>
    %249 = arith.mulf %244, %248 : vector<8x128xf32>
    %250 = arith.truncf %249 : vector<8x128xf32> to vector<8x128xbf16>
    %251 = arith.index_cast %c7_i32 : i32 to index
    %c0_93 = arith.constant 0 : index
    %c0_94 = arith.constant 0 : index
    %252 = vector.load %arg6[%251, %c0_93, %c0_94] : memref<8x8x128xbf16, #tpu.memory_space<vmem>>, vector<1x8x128xbf16>
    %253 = vector.shape_cast %252 : vector<1x8x128xbf16> to vector<8x128xbf16>
    %254 = vector.shape_cast %250 : vector<8x128xbf16> to vector<1x8x128xbf16>
    tpu.vector_store %arg6[%251, %c0_93, %c0_94], %254 {strides = array<i32>} : memref<8x8x128xbf16, #tpu.memory_space<vmem>>, vector<1x8x128xbf16>,
    %c8_i32 = arith.constant 8 : i32
    %c0_95 = arith.constant 0 : index
    %c0_96 = arith.constant 0 : index
    %255 = vector.load %arg7[%c0_95, %c0_96] : memref<8x128xf32, #tpu.memory_space<vmem>>, vector<8x128xf32>
    tpu.vector_store %arg7[%c0_95, %c0_96], %249 {strides = array<i32>} : memref<8x128xf32, #tpu.memory_space<vmem>>, vector<8x128xf32>,
    %c0_97 = arith.constant 0 : index
    %c0_98 = arith.constant 0 : index
    %256 = vector.load %arg8[%c0_97, %c0_98] : memref<8x128xf32, #tpu.memory_space<vmem>>, vector<8x128xf32>
    tpu.vector_store %arg8[%c0_97, %c0_98], %247 {strides = array<i32>} : memref<8x128xf32, #tpu.memory_space<vmem>>, vector<8x128xf32>,
    return
  }
  func.func @transform_0(%arg0: i32, %arg1: i32) -> (i32, i32, i32) {
    %c0_i32 = arith.constant 0 : i32
    %c0_i32_0 = arith.constant 0 : i32
    return %arg1, %arg0, %c0_i32 : i32, i32, i32
  }
  func.func @transform_1(%arg0: i32, %arg1: i32) -> (i32, i32) {
    %c0_i32 = arith.constant 0 : i32
    %c0_i32_0 = arith.constant 0 : i32
    %c0_i32_1 = arith.constant 0 : i32
    return %c0_i32, %c0_i32_0 : i32, i32
  }
  func.func @transform_2(%arg0: i32, %arg1: i32) -> (i32, i32) {
    %c0_i32 = arith.constant 0 : i32
    %c0_i32_0 = arith.constant 0 : i32
    %c0_i32_1 = arith.constant 0 : i32
    return %c0_i32, %c0_i32_0 : i32, i32
  }
  func.func @transform_3(%arg0: i32, %arg1: i32) -> (i32, i32) {
    %c0_i32 = arith.constant 0 : i32
    %c0_i32_0 = arith.constant 0 : i32
    %c0_i32_1 = arith.constant 0 : i32
    return %c0_i32, %c0_i32_0 : i32, i32
  }
  func.func @transform_4(%arg0: i32, %arg1: i32) -> (i32, i32, i32) {
    %c0_i32 = arith.constant 0 : i32
    %c0_i32_0 = arith.constant 0 : i32
    return %arg1, %arg0, %c0_i32 : i32, i32, i32
  }
  func.func @transform_5(%arg0: i32, %arg1: i32) -> (i32, i32) {
    %c0_i32 = arith.constant 0 : i32
    %c0_i32_0 = arith.constant 0 : i32
    return %arg0, %c0_i32 : i32, i32
  }
  func.func @transform_6(%arg0: i32, %arg1: i32) -> (i32, i32) {
    %c0_i32 = arith.constant 0 : i32
    %c0_i32_0 = arith.constant 0 : i32
    return %arg0, %c0_i32 : i32, i32
  }
}

</mosaic_0001>

<bundles_post_ra>
// kernel: tpu_custom_call.1
= control target key start
LH: loop header
LB: loop body
LE: loop exit
PB: predicated region body
PF: predicated region fallthrough
CT: control target
= control target key end

     0   :  { %12 = vsyncpa [#allocation4], 0  ;;  %s5705_s0 = inlined_call_operand.hbm [shape: bf16[8,8,128], index: 0, kind: input, shape index: {}]   ;;  %s5706_s1 = inlined_call_operand.hbm [shape: bf16[128,512], index: 1, kind: input, shape index: {}]   ;;  %s5707_s2 = inlined_call_operand.hbm [shape: bf16[128,512], index: 2, kind: input, shape index: {}]   ;;  %s5708_s3 = inlined_call_operand.hbm [shape: f32[1,512], index: 3, kind: input, shape index: {}]   ;;  %s5709_s4 = inlined_call_operand.hbm [shape: bf16[8,8,128], index: 4, kind: output, shape index: {0}]   ;;  %s5710_s5 = inlined_call_operand.hbm [shape: f32[8,128], index: 5, kind: output, shape index: {1}]   ;;  %s5711_s6 = inlined_call_operand.hbm [shape: f32[8,128], index: 6, kind: output, shape index: {2}]  }
   0x1   :  { %13 = vsyncpa [#allocation7], 0 }
   0x2   :  { %14 = vsyncpa [#allocation10], 0 }
   0x3   :  { %15 = vsyncpa [#allocation5], 0  ;;  %s34_s23 = sshll.u32 %s5706_s1, 4  ;;  %s35_s23 = int_to_ptr.hbm [resolvable:$true] %s34_s23 }
   0x4   :  { %16 = vsyncpa [#allocation13], 0  ;;  %s5104_s24 = smov [#allocation6]   ;;  %s21_s28 = sshll.u32 %s5705_s0, 4  ;;  %s22_s28 = int_to_ptr.hbm [resolvable:$true] %s21_s28 }
   0x5   :  { %s36_s25 = sshll.u32 %s5104_s24, 4  ;;  %s5105_s29 = smov 256   ;;  %s37_s25 = int_to_ptr.vmem [resolvable:$true] %s36_s25 }
   0x6   :  { %s5106_s30 = smov 16   ;;  %s5107_s7 = smov [#allocation3]  }
   0x7   :  { %42 = dma.hbm_to_vmem [thread:$0]  %s35_s23, 4096, %s37_s25, [#allocation7], %s5105_s29, %s5105_s29, %s5106_s30  }
   0x8   :  { %s23_s8 = sshll.u32 %s5107_s7, 4  ;;  %s5108_s9 = smov 64   ;;  %s24_s8 = int_to_ptr.vmem [resolvable:$true] %s23_s8 }
   0x9   :  { %s5109_s10 = smov 4   ;;  %s47_s12 = sshll.u32 %s5707_s2, 4  ;;  %s48_s12 = int_to_ptr.hbm [resolvable:$true] %s47_s12 }
   0xa   :  { %29 = dma.hbm_to_vmem [thread:$0]  %s22_s28, 512, %s24_s8, [#allocation4], %s5108_s9, %s5108_s9, %s5109_s10  }
   0xb   :  { %s5110_s13 = smov [#allocation8]   ;;  %s61_s16 = sshll.u32 %s5708_s3, 4  ;;  %s62_s16 = int_to_ptr.hbm [resolvable:$true] %s61_s16 }
   0xc   :  { %s49_s0 = sshll.u32 %s5110_s13, 4  ;;  %s5111_s17 = smov [#allocation9]   ;;  %s50_s0 = int_to_ptr.vmem [resolvable:$true] %s49_s0 }
   0xd   :  { %55 = dma.hbm_to_vmem [thread:$0]  %s48_s12, 4096, %s50_s0, [#allocation7], %s5105_s29, %s5105_s29, %s5106_s30  }
   0xe   :  { %s63_s18 = sshll.u32 %s5111_s17, 4  ;;  %s64_s18 = int_to_ptr.vmem [resolvable:$true] %s63_s18 }
   0xf   :  { %66 = dma.hbm_to_vmem [thread:$0]  %s62_s16, 64, %s64_s18, [#allocation10]  }
  0x10   :  { %5094 = dma.done.wait [#allocation4], 512  }
  0x11   :  { %5095 = vsyncadd [#allocation4], 4294966784 }
  0x12   :  { %5096 = dma.done.wait [#allocation7], 8192  }
  0x13   :  { %5097 = vsyncadd [#allocation7], 4294959104 }
  0x14   :  { %5098 = dma.done.wait [#allocation10], 64  }
  0x15   :  { %5099 = vsyncadd [#allocation10], 4294967232  ;;  %v3400_v0 = vld [vmem:[#allocation6 + $0xe0] sm:$0xf]  ;;  %v4512_v1 = vld [vmem:[#allocation6 + $0xec] sm:$0xf0] }
  0x16   :  { %v4510_v2 = vld [vmem:[#allocation6 + $0xe4] sm:$0xf]  ;;  %v3401_v3 = vor.u32 %v4512_v1, %v3400_v0  ;;  %v3402_v4 = vld [vmem:[#allocation6 + $0xf0] sm:$0xf0]  ;;  %v3408_v5 = vld [vmem:[#allocation6 + $0xe8] sm:$0xf] }
  0x17   :  { %v4513_v6 = vld [vmem:[#allocation6 + $0xf4] sm:$0xf0]  ;;  %v3405_v7 = vor.u32 %v4510_v2, %v3402_v4  ;;  %v4511_v9 = vld [vmem:[#allocation6 + $0xec] sm:$0xf]  ;;  %v3410_v10 = vld [vmem:[#allocation6 + $0xf8] sm:$0xf0] }
  0x18   :  { %v3409_v8 = vor.u32 %v4513_v6, %v3408_v5  ;;  %v3384_v11 = vld [vmem:[#allocation6 + $0xc0] sm:$0xf]  ;;  %313 = vmatpush.bf16.msra.mxu0 %v3401_v3  ;;  %v3413_v12 = vor.u32 %v4511_v9, %v3410_v10  ;;  %v4508_v13 = vld [vmem:[#allocation6 + $0xcc] sm:$0xf0]  ;;  %v4506_v14 = vld [vmem:[#allocation6 + $0xc4] sm:$0xf] }
  0x19   :  { %v3386_v15 = vld [vmem:[#allocation6 + $0xd0] sm:$0xf0]  ;;  %342 = vmatpush.bf16.msra.mxu1 %v3405_v7  ;;  %v3385_v16 = vor.u32 %v4508_v13, %v3384_v11  ;;  %v3392_v18 = vld [vmem:[#allocation6 + $0xc8] sm:$0xf]  ;;  %v4509_v19 = vld [vmem:[#allocation6 + $0xd4] sm:$0xf0] }
  0x1a   :  { %371 = vmatpush.bf16.msra.mxu2 %v3409_v8  ;;  %v3389_v17 = vor.u32 %v4506_v14, %v3386_v15  ;;  %v4507_v20 = vld [vmem:[#allocation6 + $0xcc] sm:$0xf]  ;;  %400 = vmatpush.bf16.msra.mxu3 %v3413_v12  ;;  %v3393_v21 = vor.u32 %v4509_v19, %v3392_v18  ;;  %v3394_v22 = vld [vmem:[#allocation6 + $0xd8] sm:$0xf0]  ;;  %v3368_v23 = vld [vmem:[#allocation6 + $0xa0] sm:$0xf] }
  0x1b   :  { %v4504_v24 = vld [vmem:[#allocation6 + $0xac] sm:$0xf0]  ;;  %v3397_v25 = vor.u32 %v4507_v20, %v3394_v22  ;;  %v4502_v26 = vld [vmem:[#allocation6 + $0xa4] sm:$0xf]  ;;  %v3370_v27 = vld [vmem:[#allocation6 + $0xb0] sm:$0xf0] }
  0x1c   :  { %v3376_v28 = vld [vmem:[#allocation6 + $0xa8] sm:$0xf]  ;;  %314 = vmatpush.bf16.msra.mxu0 %v3385_v16  ;;  %v3369_v29 = vor.u32 %v4504_v24, %v3368_v23  ;;  %v4505_v30 = vld [vmem:[#allocation6 + $0xb4] sm:$0xf0]  ;;  %v4503_v31 = vld [vmem:[#allocation6 + $0xac] sm:$0xf]  ;;  %v3373_v33 = vor.u32 %v4502_v26, %v3370_v27 }
  0x1d   :  { %v3378_v32 = vld [vmem:[#allocation6 + $0xb8] sm:$0xf0]  ;;  %343 = vmatpush.bf16.msra.mxu1 %v3389_v17  ;;  %v3377_v34 = vor.u32 %v4505_v30, %v3376_v28  ;;  %v3352_v35 = vld [vmem:[#allocation6 + $0x80] sm:$0xf]  ;;  %v4500_v36 = vld [vmem:[#allocation6 + $0x8c] sm:$0xf0] }
  0x1e   :  { %372 = vmatpush.bf16.msra.mxu2 %v3393_v21  ;;  %v4498_v37 = vld [vmem:[#allocation6 + $0x84] sm:$0xf]  ;;  %401 = vmatpush.bf16.msra.mxu3 %v3397_v25  ;;  %v3381_v38 = vor.u32 %v4503_v31, %v3378_v32  ;;  %v3354_v39 = vld [vmem:[#allocation6 + $0x90] sm:$0xf0]  ;;  %v3360_v40 = vld [vmem:[#allocation6 + $0x88] sm:$0xf]  ;;  %v3353_v44 = vor.u32 %v4500_v36, %v3352_v35 }
  0x1f   :  { %v4501_v41 = vld [vmem:[#allocation6 + $0x94] sm:$0xf0]  ;;  %v4499_v42 = vld [vmem:[#allocation6 + $0x8c] sm:$0xf]  ;;  %v3362_v43 = vld [vmem:[#allocation6 + $0x98] sm:$0xf0]  ;;  %v3357_v45 = vor.u32 %v4498_v37, %v3354_v39 }
  0x20   :  { %315 = vmatpush.bf16.msra.mxu0 %v3369_v29  ;;  %v3361_v46 = vor.u32 %v4501_v41, %v3360_v40  ;;  %v3336_v47 = vld [vmem:[#allocation6 + $0x60] sm:$0xf]  ;;  %v4496_v48 = vld [vmem:[#allocation6 + $0x6c] sm:$0xf0]  ;;  %v4494_v49 = vld [vmem:[#allocation6 + $0x64] sm:$0xf]  ;;  %v3365_v50 = vor.u32 %v4499_v42, %v3362_v43 }
  0x21   :  { %344 = vmatpush.bf16.msra.mxu1 %v3373_v33  ;;  %v3338_v51 = vld [vmem:[#allocation6 + $0x70] sm:$0xf0]  ;;  %v3344_v52 = vld [vmem:[#allocation6 + $0x68] sm:$0xf]  ;;  %v4497_v53 = vld [vmem:[#allocation6 + $0x74] sm:$0xf0]  ;;  %v3337_v56 = vor.u32 %v4496_v48, %v3336_v47 }
  0x22   :  { %373 = vmatpush.bf16.msra.mxu2 %v3377_v34  ;;  %402 = vmatpush.bf16.msra.mxu3 %v3381_v38  ;;  %v4495_v54 = vld [vmem:[#allocation6 + $0x6c] sm:$0xf]  ;;  %v3346_v55 = vld [vmem:[#allocation6 + $0x78] sm:$0xf0]  ;;  %v3341_v57 = vor.u32 %v4494_v49, %v3338_v51  ;;  %v3345_v58 = vor.u32 %v4497_v53, %v3344_v52  ;;  %v3320_v59 = vld [vmem:[#allocation6 + $0x40] sm:$0xf] }
  0x23   :  { %v4492_v60 = vld [vmem:[#allocation6 + $0x4c] sm:$0xf0]  ;;  %v4490_v61 = vld [vmem:[#allocation6 + $0x44] sm:$0xf]  ;;  %v3349_v62 = vor.u32 %v4495_v54, %v3346_v55  ;;  %v3322_v63 = vld [vmem:[#allocation6 + $0x50] sm:$0xf0] }
  0x24   :  { %316 = vmatpush.bf16.msra.mxu0 %v3353_v44  ;;  %v3328_v0 = vld [vmem:[#allocation6 + $0x48] sm:$0xf]  ;;  %v4493_v1 = vld [vmem:[#allocation6 + $0x54] sm:$0xf0]  ;;  %v4491_v2 = vld [vmem:[#allocation6 + $0x4c] sm:$0xf]  ;;  %v3321_v4 = vor.u32 %v4492_v60, %v3320_v59  ;;  %v3325_v5 = vor.u32 %v4490_v61, %v3322_v63 }
  0x25   :  { %345 = vmatpush.bf16.msra.mxu1 %v3357_v45  ;;  %v3330_v3 = vld [vmem:[#allocation6 + $0x58] sm:$0xf0]  ;;  %v3329_v6 = vor.u32 %v4493_v1, %v3328_v0  ;;  %v3304_v7 = vld [vmem:[#allocation6 + $0x20] sm:$0xf]  ;;  %v4488_v8 = vld [vmem:[#allocation6 + $0x2c] sm:$0xf0] }
  0x26   :  { %374 = vmatpush.bf16.msra.mxu2 %v3361_v46  ;;  %403 = vmatpush.bf16.msra.mxu3 %v3365_v50  ;;  %v4486_v9 = vld [vmem:[#allocation6 + $0x24] sm:$0xf]  ;;  %v3333_v10 = vor.u32 %v4491_v2, %v3330_v3  ;;  %v3306_v11 = vld [vmem:[#allocation6 + $0x30] sm:$0xf0]  ;;  %v3312_v12 = vld [vmem:[#allocation6 + $0x28] sm:$0xf]  ;;  %v3305_v16 = vor.u32 %v4488_v8, %v3304_v7 }
  0x27   :  { %v4489_v13 = vld [vmem:[#allocation6 + $0x34] sm:$0xf0]  ;;  %v4487_v14 = vld [vmem:[#allocation6 + $0x2c] sm:$0xf]  ;;  %v3314_v15 = vld [vmem:[#allocation6 + $0x38] sm:$0xf0]  ;;  %v3309_v18 = vor.u32 %v4486_v9, %v3306_v11 }
  0x28   :  { %317 = vmatpush.bf16.msra.mxu0 %v3337_v56  ;;  %v3288_v17 = vld [vmem:[#allocation6] sm:$0xf]  ;;  %v3313_v19 = vor.u32 %v4489_v13, %v3312_v12  ;;  %v4484_v20 = vld [vmem:[#allocation6 + $0xc] sm:$0xf0]  ;;  %v4482_v21 = vld [vmem:[#allocation6 + $0x4] sm:$0xf]  ;;  %v3317_v23 = vor.u32 %v4487_v14, %v3314_v15 }
  0x29   :  { %346 = vmatpush.bf16.msra.mxu1 %v3341_v57  ;;  %v3290_v22 = vld [vmem:[#allocation6 + $0x10] sm:$0xf0]  ;;  %v3296_v24 = vld [vmem:[#allocation6 + $0x8] sm:$0xf]  ;;  %v4485_v25 = vld [vmem:[#allocation6 + $0x14] sm:$0xf0]  ;;  %v3289_v30 = vor.u32 %v4484_v20, %v3288_v17 }
  0x2a   :  { %375 = vmatpush.bf16.msra.mxu2 %v3345_v58  ;;  %404 = vmatpush.bf16.msra.mxu3 %v3349_v62  ;;  %v4483_v26 = vld [vmem:[#allocation6 + $0xc] sm:$0xf]  ;;  %v3298_v27 = vld [vmem:[#allocation6 + $0x18] sm:$0xf0]  ;;  %v3536_v28 = vld [vmem:[#allocation8 + $0xe8] sm:$0xf]  ;;  %v3293_v33 = vor.u32 %v4482_v21, %v3290_v22  ;;  %v3297_v34 = vor.u32 %v4485_v25, %v3296_v24 }
  0x2b   :  { %v4545_v29 = vld [vmem:[#allocation8 + $0xf4] sm:$0xf0]  ;;  %v4542_v31 = vld [vmem:[#allocation8 + $0xe4] sm:$0xf]  ;;  %v3530_v32 = vld [vmem:[#allocation8 + $0xf0] sm:$0xf0]  ;;  %v3301_v36 = vor.u32 %v4483_v26, %v3298_v27 }
  0x2c   :  { %318 = vmatpush.bf16.msra.mxu0 %v3321_v4  ;;  %v4478_v35 = vld [vmem:[#allocation3] sm:$0xff]  ;;  %v3537_v37 = vor.u32 %v4545_v29, %v3536_v28  ;;  %v3520_v38 = vld [vmem:[#allocation8 + $0xc8] sm:$0xf]  ;;  %v4544_v40 = vld [vmem:[#allocation8 + $0xec] sm:$0xf0]  ;;  %v3533_v42 = vor.u32 %v4542_v31, %v3530_v32  ;;  %s5113_s2 = smov [#allocation12]  }
  0x2d   :  { %347 = vmatpush.bf16.msra.mxu1 %v3325_v5  ;;  %v3528_v39 = vld [vmem:[#allocation8 + $0xe0] sm:$0xf]  ;;  %v4541_v41 = vld [vmem:[#allocation8 + $0xd4] sm:$0xf0]  ;;  %v4543_v43 = vld [vmem:[#allocation8 + $0xec] sm:$0xf] }
  0x2e   :  { %376 = vmatpush.bf16.msra.mxu2 %v3329_v6  ;;  %405 = vmatpush.bf16.msra.mxu3 %v3333_v10  ;;  %v3538_v44 = vld [vmem:[#allocation8 + $0xf8] sm:$0xf0]  ;;  %v4538_v45 = vld [vmem:[#allocation8 + $0xc4] sm:$0xf]  ;;  %v3514_v46 = vld [vmem:[#allocation8 + $0xd0] sm:$0xf0]  ;;  %v3529_v47 = vor.u32 %v4544_v40, %v3528_v39  ;;  %v3521_v48 = vor.u32 %v4541_v41, %v3520_v38 }
  0x2f   :  { %v3541_v49 = vor.u32 %v4543_v43, %v3538_v44  ;;  %v3504_v50 = vld [vmem:[#allocation8 + $0xa8] sm:$0xf]  ;;  %v3512_v51 = vld [vmem:[#allocation8 + $0xc0] sm:$0xf]  ;;  %v4540_v52 = vld [vmem:[#allocation8 + $0xcc] sm:$0xf0]  ;;  %v3517_v54 = vor.u32 %v4538_v45, %v3514_v46 }
  0x30   :  { %319 = vmatpush.bf16.msra.mxu0 %v3305_v16  ;;  %v4537_v53 = vld [vmem:[#allocation8 + $0xb4] sm:$0xf0]  ;;  %v4539_v55 = vld [vmem:[#allocation8 + $0xcc] sm:$0xf]  ;;  %v3522_v56 = vld [vmem:[#allocation8 + $0xd8] sm:$0xf0]  ;;  %v3513_v59 = vor.u32 %v4540_v52, %v3512_v51 }
  0x31   :  { %348 = vmatpush.bf16.msra.mxu1 %v3309_v18  ;;  %v4534_v57 = vld [vmem:[#allocation8 + $0xa4] sm:$0xf]  ;;  %v3498_v58 = vld [vmem:[#allocation8 + $0xb0] sm:$0xf0]  ;;  %v3505_v60 = vor.u32 %v4537_v53, %v3504_v50  ;;  %v3525_v61 = vor.u32 %v4539_v55, %v3522_v56  ;;  %v3488_v62 = vld [vmem:[#allocation8 + $0x88] sm:$0xf] }
  0x32   :  { %377 = vmatpush.bf16.msra.mxu2 %v3313_v19  ;;  %406 = vmatpush.bf16.msra.mxu3 %v3317_v23  ;;  %v3496_v63 = vld [vmem:[#allocation8 + $0xa0] sm:$0xf]  ;;  %v4536_v0 = vld [vmem:[#allocation8 + $0xac] sm:$0xf0]  ;;  %v4533_v1 = vld [vmem:[#allocation8 + $0x94] sm:$0xf0]  ;;  %v3501_v2 = vor.u32 %v4534_v57, %v3498_v58 }
  0x33   :  { %v4535_v3 = vld [vmem:[#allocation8 + $0xac] sm:$0xf]  ;;  %v3506_v4 = vld [vmem:[#allocation8 + $0xb8] sm:$0xf0]  ;;  %v4530_v5 = vld [vmem:[#allocation8 + $0x84] sm:$0xf]  ;;  %v3497_v7 = vor.u32 %v4536_v0, %v3496_v63  ;;  %v3489_v8 = vor.u32 %v4533_v1, %v3488_v62 }
  0x34   :  { %320 = vmatpush.bf16.msra.mxu0 %v3289_v30  ;;  %v3482_v6 = vld [vmem:[#allocation8 + $0x90] sm:$0xf0]  ;;  %v3509_v9 = vor.u32 %v4535_v3, %v3506_v4  ;;  %v3472_v10 = vld [vmem:[#allocation8 + $0x68] sm:$0xf]  ;;  %v3480_v11 = vld [vmem:[#allocation8 + $0x80] sm:$0xf] }
  0x35   :  { %349 = vmatpush.bf16.msra.mxu1 %v3293_v33  ;;  %v4532_v12 = vld [vmem:[#allocation8 + $0x8c] sm:$0xf0]  ;;  %v4529_v13 = vld [vmem:[#allocation8 + $0x74] sm:$0xf0]  ;;  %v3485_v14 = vor.u32 %v4530_v5, %v3482_v6  ;;  %v4531_v15 = vld [vmem:[#allocation8 + $0x8c] sm:$0xf] }
  0x36   :  { %378 = vmatpush.bf16.msra.mxu2 %v3297_v34  ;;  %407 = vmatpush.bf16.msra.mxu3 %v3301_v36  ;;  %v3490_v16 = vld [vmem:[#allocation8 + $0x98] sm:$0xf0]  ;;  %v4526_v17 = vld [vmem:[#allocation8 + $0x64] sm:$0xf]  ;;  %v3466_v18 = vld [vmem:[#allocation8 + $0x70] sm:$0xf0]  ;;  %v3481_v20 = vor.u32 %v4532_v12, %v3480_v11  ;;  %v3473_v21 = vor.u32 %v4529_v13, %v3472_v10 }
  0x37   :  { %321 = vmatmul.bf16.vlgmr.msra.gmra.mxu0 %v4478_v35  ;;  %v4479_v19 = vld [vmem:[#allocation3 + $0x8] sm:$0xff]  ;;  %v3493_v22 = vor.u32 %v4531_v15, %v3490_v16  ;;  %v3464_v24 = vld [vmem:[#allocation8 + $0x60] sm:$0xf]  ;;  %v4528_v25 = vld [vmem:[#allocation8 + $0x6c] sm:$0xf0]  ;;  %v3469_v27 = vor.u32 %v4526_v17, %v3466_v18  ;;  %v5112_v4 = vmov 0.0|0.0  }
  0x38   :  { %350 = vmatmul.bf16.vlgmr.msra.gmra.mxu1 %v4478_v35  ;;  %702 = vmatpush.bf16.msrb.mxu0 %v3529_v47  ;;  %v3456_v23 = vld [vmem:[#allocation8 + $0x48] sm:$0xf]  ;;  %v4525_v26 = vld [vmem:[#allocation8 + $0x54] sm:$0xf0]  ;;  %v4527_v28 = vld [vmem:[#allocation8 + $0x6c] sm:$0xf]  ;;  %v3465_v30 = vor.u32 %v4528_v25, %v3464_v24 }
  0x39   :  { %715 = vmatpush.bf16.msrb.mxu1 %v3533_v42  ;;  %379 = vmatmul.bf16.vlgmr.msra.gmra.mxu2 %v4478_v35  ;;  %v3474_v29 = vld [vmem:[#allocation8 + $0x78] sm:$0xf0]  ;;  %v3457_v31 = vor.u32 %v4525_v26, %v3456_v23  ;;  %v3440_v33 = vld [vmem:[#allocation8 + $0x28] sm:$0xf]  ;;  %v4521_v34 = vld [vmem:[#allocation8 + $0x34] sm:$0xf0] }
  0x3a   :  { %728 = vmatpush.bf16.msrb.mxu2 %v3537_v37  ;;  %408 = vmatmul.bf16.vlgmr.msra.gmra.mxu3 %v4478_v35  ;;  %v3477_v32 = vor.u32 %v4527_v28, %v3474_v29  ;;  %v3448_v35 = vld [vmem:[#allocation8 + $0x40] sm:$0xf]  ;;  %v3441_v36 = vor.u32 %v4521_v34, %v3440_v33  ;;  %v4524_v37 = vld [vmem:[#allocation8 + $0x4c] sm:$0xf0]  ;;  %v4522_v38 = vld [vmem:[#allocation8 + $0x44] sm:$0xf] }
  0x3b   :  { %741 = vmatpush.bf16.msrb.mxu3 %v3541_v49  ;;  %v3450_v39 = vld [vmem:[#allocation8 + $0x50] sm:$0xf0]  ;;  %v3449_v40 = vor.u32 %v4524_v37, %v3448_v35  ;;  %v4523_v42 = vld [vmem:[#allocation8 + $0x4c] sm:$0xf]  ;;  %v3458_v43 = vld [vmem:[#allocation8 + $0x58] sm:$0xf0] }
  0x3c   :  { %703 = vmatpush.bf16.msrb.mxu0 %v3513_v59  ;;  %v3453_v41 = vor.u32 %v4522_v38, %v3450_v39  ;;  %v3424_v44 = vld [vmem:[#allocation8 + $0x8] sm:$0xf]  ;;  %v3461_v45 = vor.u32 %v4523_v42, %v3458_v43  ;;  %v4517_v46 = vld [vmem:[#allocation8 + $0x14] sm:$0xf0]  ;;  %v3432_v47 = vld [vmem:[#allocation8 + $0x20] sm:$0xf] }
  0x3d   :  { %716 = vmatpush.bf16.msrb.mxu1 %v3517_v54  ;;  %v4518_v50 = vld [vmem:[#allocation8 + $0x24] sm:$0xf]  ;;  %v3434_v51 = vld [vmem:[#allocation8 + $0x30] sm:$0xf0]  ;;  %v4519_v52 = vld [vmem:[#allocation8 + $0x2c] sm:$0xf]  ;;  %v3425_v53 = vor.u32 %v4517_v46, %v3424_v44 }
  0x3e   :  { %729 = vmatpush.bf16.msrb.mxu2 %v3521_v48  ;;  %v4520_v48 = vld [vmem:[#allocation8 + $0x2c] sm:$0xf0]  ;;  %v3437_v54 = vor.u32 %v4518_v50, %v3434_v51  ;;  %v3442_v55 = vld [vmem:[#allocation8 + $0x38] sm:$0xf0]  ;;  %v3416_v56 = vld [vmem:[#allocation8] sm:$0xf] }
  0x3f   :  { %742 = vmatpush.bf16.msrb.mxu3 %v3525_v61  ;;  %v3433_v49 = vor.u32 %v4520_v48, %v3432_v47  ;;  %v4516_v57 = vld [vmem:[#allocation8 + $0xc] sm:$0xf0]  ;;  %v3445_v58 = vor.u32 %v4519_v52, %v3442_v55  ;;  %v4514_v59 = vld [vmem:[#allocation8 + $0x4] sm:$0xf]  ;;  %v4515_v61 = vld [vmem:[#allocation8 + $0xc] sm:$0xf] }
  0x40   :  { %704 = vmatpush.bf16.msrb.mxu0 %v3497_v7  ;;  %v3426_v62 = vld [vmem:[#allocation8 + $0x18] sm:$0xf0]  ;;  %v3417_v63 = vor.u32 %v4516_v57, %v3416_v56  ;;  %v429_v7 = vld [vmem:[#allocation9] sm:$0xf]  ;;  %s3236_s3 = sshll.u32 %s5113_s2, 4  ;;  %s3238_s21 = sshll.u32 %s5710_s5, 4  ;;  %s3237_s3 = int_to_ptr.vmem [resolvable:$true] %s3236_s3  ;;  %s3239_s21 = int_to_ptr.hbm [resolvable:$true] %s3238_s21 }
  0x41   :  { %717 = vmatpush.bf16.msrb.mxu1 %v3501_v2  ;;  %v3429_v1 = vor.u32 %v4515_v61, %v3426_v62  ;;  %v4480_v2 = vld [vmem:[#allocation3 + $0x10] sm:$0xff]  ;;  %v4481_v3 = vld [vmem:[#allocation3 + $0x18] sm:$0xff]  ;;  %v5184_v16 = vperm.slane %v429_v7, 3  ;;  %v5186_v17 = vperm.slane %v429_v7, 2  ;;  %s5114_s22 = smov [#allocation14]   ;;  %s3249_s26 = sshll.u32 %s5711_s6, 4  ;;  %s3250_s26 = int_to_ptr.hbm [resolvable:$true] %s3249_s26 }
  0x42   :  { %730 = vmatpush.bf16.msrb.mxu2 %v3505_v60  ;;  %v3418_v60 = vld [vmem:[#allocation8 + $0x10] sm:$0xf0]  ;;  %s3247_s23 = sshll.u32 %s5114_s22, 4  ;;  %s5115_s27 = smov [#allocation11]   ;;  %s3248_s23 = int_to_ptr.vmem [resolvable:$true] %s3247_s23 }
  0x43   :  { %743 = vmatpush.bf16.msrb.mxu3 %v3509_v9  ;;  %v3421_v0 = vor.u32 %v4514_v59, %v3418_v60  ;;  %v5172_v9 = vperm.slane %v429_v7, 1  ;;  %s3222_s28 = sshll.u32 %s5115_s27, 4  ;;  %s3224_s7 = sshll.u32 %s5709_s4, 4  ;;  %s3223_s28 = int_to_ptr.vmem [resolvable:$true] %s3222_s28  ;;  %s3225_s7 = int_to_ptr.hbm [resolvable:$true] %s3224_s7 }
  0x44   :  { %705 = vmatpush.bf16.msrb.mxu0 %v3481_v20 }
  0x45   :  { %718 = vmatpush.bf16.msrb.mxu1 %v3485_v14 }
  0x46   :  { %731 = vmatpush.bf16.msrb.mxu2 %v3489_v8  ;;  %v5170_v8 = vperm.slane %v429_v7, 0 }
  0x47   :  { %744 = vmatpush.bf16.msrb.mxu3 %v3493_v22  ;;  %326 = vmatmul.bf16.gmra.mxu0 %v4479_v19 }
  0x48   :  { %355 = vmatmul.bf16.gmra.mxu1 %v4479_v19  ;;  %706 = vmatpush.bf16.msrb.mxu0 %v3465_v30 }
  0x49   :  { %719 = vmatpush.bf16.msrb.mxu1 %v3469_v27  ;;  %384 = vmatmul.bf16.gmra.mxu2 %v4479_v19 }
  0x4a   :  { %732 = vmatpush.bf16.msrb.mxu2 %v3473_v21  ;;  %413 = vmatmul.bf16.gmra.mxu3 %v4479_v19 }
  0x4b   :  { %745 = vmatpush.bf16.msrb.mxu3 %v3477_v32 }
  0x4c   :  { %707 = vmatpush.bf16.msrb.mxu0 %v3449_v40 }
  0x4d   :  { %720 = vmatpush.bf16.msrb.mxu1 %v3453_v41 }
  0x4e   :  { %733 = vmatpush.bf16.msrb.mxu2 %v3457_v31 }
  0x4f   :  { %746 = vmatpush.bf16.msrb.mxu3 %v3461_v45 }
  0x50   :  { %708 = vmatpush.bf16.msrb.mxu0 %v3433_v49 }
  0x51   :  { %721 = vmatpush.bf16.msrb.mxu1 %v3437_v54 }
  0x52   :  { %734 = vmatpush.bf16.msrb.mxu2 %v3441_v36 }
  0x53   :  { %747 = vmatpush.bf16.msrb.mxu3 %v3445_v58 }
  0x54   :  { %709 = vmatpush.bf16.msrb.mxu0 %v3417_v63 }
  0x55   :  { %722 = vmatpush.bf16.msrb.mxu1 %v3421_v0 }
  0x56   :  { %735 = vmatpush.bf16.msrb.mxu2 %v3425_v53 }
  0x57   :  { %748 = vmatpush.bf16.msrb.mxu3 %v3429_v1  ;;  %331 = vmatmul.bf16.gmra.mxu0 %v4480_v2 }
  0x58   :  { %360 = vmatmul.bf16.gmra.mxu1 %v4480_v2 }
  0x59   :  { %389 = vmatmul.bf16.gmra.mxu2 %v4480_v2 }
  0x5a   :  { %418 = vmatmul.bf16.gmra.mxu3 %v4480_v2  ;;  %v3661_v2 = vld [vmem:[#allocation8 + $0xe0] sm:$0xf] }
  0x67   :  { %336 = vmatmul.bf16.gmra.mxu0 %v4481_v3 }
  0x68   :  { %365 = vmatmul.bf16.gmra.mxu1 %v4481_v3 }
  0x69   :  { %394 = vmatmul.bf16.gmra.mxu2 %v4481_v3 }
  0x6a   :  { %423 = vmatmul.bf16.gmra.mxu3 %v4481_v3  ;;  %v4576_v3 = vld [vmem:[#allocation8 + $0xec] sm:$0xf0] }
  0x6b   :  { %v3662_v7 = vor.u32 %v4576_v3, %v3661_v2 }
  0x6d   :  { %1040 = vmatpush.bf16.msra.mxu0 %v3662_v7 }
  0x77   :  { %710 = vmatmul.bf16.vlgmr.msrb.gmra.mxu0 %v5112_v4 }
  0x78   :  { %723 = vmatmul.bf16.vlgmr.msrb.gmra.mxu1 %v5112_v4 }
  0x79   :  { %736 = vmatmul.bf16.vlgmr.msrb.gmra.mxu2 %v5112_v4 }
  0x7a   :  { %749 = vmatmul.bf16.vlgmr.msrb.gmra.mxu3 %v5112_v4  ;;  %v4574_v4 = vld [vmem:[#allocation8 + $0xe4] sm:$0xf] }
  0xb4   :  { %v5166_v5 = vpop.f32.mrf.mxu0 }
  0xb5   :  { %v5168_v6 = vpop.f32.mrf.mxu1 }
  0xbc   :  { %v5174_v10 = vpop.f32.mrf.mxu2  ;;  %v324_v12 = vpop.f32.mrf.mxu0 }
  0xbd   :  { %v5176_v11 = vpop.f32.mrf.mxu3  ;;  %v5179_v13 = vadd.f32 %v5170_v8, %v324_v12  ;;  %v353_v14 = vpop.f32.mrf.mxu1  ;;  %v3663_v12 = vld [vmem:[#allocation8 + $0xf0] sm:$0xf0] }
  0xbe   :  { %v5182_v15 = vadd.f32 %v5172_v9, %v353_v14  ;;  %v3669_v14 = vld [vmem:[#allocation8 + $0xe8] sm:$0xf] }
  0xc4   :  { %v382_v18 = vpop.f32.mrf.mxu2  ;;  %v327_v21 = vpop.f32.mrf.mxu0 }
  0xc5   :  { %v5189_v19 = vadd.f32 %v5186_v17, %v382_v18  ;;  %v411_v20 = vpop.f32.mrf.mxu3  ;;  %v5195_v23 = vadd.f32 %v5170_v8, %v327_v21  ;;  %v356_v24 = vpop.f32.mrf.mxu1  ;;  %v4577_v18 = vld [vmem:[#allocation8 + $0xf4] sm:$0xf0] }
  0xc6   :  { %v5192_v22 = vadd.f32 %v5184_v16, %v411_v20  ;;  %v5198_v25 = vadd.f32 %v5172_v9, %v356_v24  ;;  %v3666_v20 = vor.u32 %v4574_v4, %v3663_v12  ;;  %v3670_v21 = vor.u32 %v4577_v18, %v3669_v14  ;;  %v4575_v24 = vld [vmem:[#allocation8 + $0xec] sm:$0xf]  ;;  %v4566_v4 = vld [vmem:[#allocation8 + $0xa4] sm:$0xf]  ;;  %v3631_v14 = vld [vmem:[#allocation8 + $0xb0] sm:$0xf0] }
  0xc7   :  { %v3637_v18 = vld [vmem:[#allocation8 + $0xa8] sm:$0xf] }
  0xc8   :  { %1053 = vmatpush.bf16.msra.mxu1 %v3666_v20  ;;  %1066 = vmatpush.bf16.msra.mxu2 %v3670_v21  ;;  %v3634_v21 = vor.u32 %v4566_v4, %v3631_v14  ;;  %v3599_v14 = vld [vmem:[#allocation8 + $0x70] sm:$0xf0] }
  0xcc   :  { %v385_v26 = vpop.f32.mrf.mxu2  ;;  %v329_v29 = vpop.f32.mrf.mxu0 }
  0xcd   :  { %v5201_v27 = vadd.f32 %v5186_v17, %v385_v26  ;;  %v414_v28 = vpop.f32.mrf.mxu3  ;;  %v5207_v31 = vadd.f32 %v5170_v8, %v329_v29  ;;  %v358_v32 = vpop.f32.mrf.mxu1  ;;  %v3671_v26 = vld [vmem:[#allocation8 + $0xf8] sm:$0xf0]  ;;  %v3645_v29 = vld [vmem:[#allocation8 + $0xc0] sm:$0xf] }
  0xce   :  { %v5204_v30 = vadd.f32 %v5184_v16, %v414_v28  ;;  %v5210_v33 = vadd.f32 %v5172_v9, %v358_v32  ;;  %v3674_v28 = vor.u32 %v4575_v24, %v3671_v26  ;;  %v4572_v32 = vld [vmem:[#allocation8 + $0xcc] sm:$0xf0]  ;;  %v4569_v24 = vld [vmem:[#allocation8 + $0xb4] sm:$0xf0]  ;;  %v4567_v26 = vld [vmem:[#allocation8 + $0xac] sm:$0xf] }
  0xd0   :  { %1079 = vmatpush.bf16.msra.mxu3 %v3674_v28  ;;  %v3638_v28 = vor.u32 %v4569_v24, %v3637_v18  ;;  %v3605_v24 = vld [vmem:[#allocation8 + $0x68] sm:$0xf] }
  0xd4   :  { %v387_v34 = vpop.f32.mrf.mxu2  ;;  %v332_v37 = vpop.f32.mrf.mxu0 }
  0xd5   :  { %v5213_v35 = vadd.f32 %v5186_v17, %v387_v34  ;;  %v416_v36 = vpop.f32.mrf.mxu3  ;;  %v5219_v39 = vadd.f32 %v5170_v8, %v332_v37  ;;  %v361_v40 = vpop.f32.mrf.mxu1  ;;  %v4570_v34 = vld [vmem:[#allocation8 + $0xc4] sm:$0xf] }
  0xd6   :  { %v5216_v38 = vadd.f32 %v5184_v16, %v416_v36  ;;  %v5222_v41 = vadd.f32 %v5172_v9, %v361_v40  ;;  %v439_v36 = vadd.f32 %v5170_v8, %v5166_v5  ;;  %v3646_v40 = vor.u32 %v4572_v32, %v3645_v29  ;;  %v3639_v29 = vld [vmem:[#allocation8 + $0xb8] sm:$0xf0] }
  0xd7   :  { %v441_v32 = vadd.f32 %v5186_v17, %v5174_v10 }
  0xd8   :  { %1041 = vmatpush.bf16.msra.mxu0 %v3646_v40  ;;  %v4562_v40 = vld [vmem:[#allocation8 + $0x84] sm:$0xf] }
  0xdc   :  { %v390_v42 = vpop.f32.mrf.mxu2  ;;  %v334_v45 = vpop.f32.mrf.mxu0 }
  0xdd   :  { %v5225_v43 = vadd.f32 %v5186_v17, %v390_v42  ;;  %v419_v44 = vpop.f32.mrf.mxu3  ;;  %v5231_v47 = vadd.f32 %v5170_v8, %v334_v45  ;;  %v363_v48 = vpop.f32.mrf.mxu1  ;;  %v3647_v42 = vld [vmem:[#allocation8 + $0xd0] sm:$0xf0]  ;;  %v4573_v45 = vld [vmem:[#allocation8 + $0xd4] sm:$0xf0] }
  0xde   :  { %v5228_v46 = vadd.f32 %v5184_v16, %v419_v44  ;;  %v5234_v49 = vadd.f32 %v5172_v9, %v363_v48  ;;  %v3653_v44 = vld [vmem:[#allocation8 + $0xc8] sm:$0xf]  ;;  %v440_v48 = vadd.f32 %v5172_v9, %v5168_v6  ;;  %v3629_v6 = vld [vmem:[#allocation8 + $0xa0] sm:$0xf] }
  0xe4   :  { %v392_v50 = vpop.f32.mrf.mxu2  ;;  %v337_v53 = vpop.f32.mrf.mxu0 }
  0xe5   :  { %v5237_v51 = vadd.f32 %v5186_v17, %v392_v50  ;;  %v421_v52 = vpop.f32.mrf.mxu3  ;;  %v5243_v55 = vadd.f32 %v5170_v8, %v337_v53  ;;  %v366_v56 = vpop.f32.mrf.mxu1 }
  0xe6   :  { %v5240_v54 = vadd.f32 %v5184_v16, %v421_v52  ;;  %v5246_v57 = vadd.f32 %v5172_v9, %v366_v56  ;;  %v3650_v56 = vor.u32 %v4570_v34, %v3647_v42  ;;  %v3642_v34 = vor.u32 %v4567_v26, %v3639_v29  ;;  %v4561_v26 = vld [vmem:[#allocation8 + $0x74] sm:$0xf0] }
  0xe7   :  { %v442_v42 = vadd.f32 %v5184_v16, %v5176_v11  ;;  %v3597_v11 = vld [vmem:[#allocation8 + $0x60] sm:$0xf]  ;;  %v3606_v29 = vor.u32 %v4561_v26, %v3605_v24  ;;  %v4553_v24 = vld [vmem:[#allocation8 + $0x34] sm:$0xf0]  ;;  %v4551_v26 = vld [vmem:[#allocation8 + $0x2c] sm:$0xf] }
  0xe8   :  { %1054 = vmatpush.bf16.msra.mxu1 %v3650_v56 }
  0xec   :  { %v395_v58 = vpop.f32.mrf.mxu2  ;;  %v339_v61 = vpop.f32.mrf.mxu0  ;;  %1055 = vmatpush.bf16.msra.mxu1 %v3634_v21 }
  0xed   :  { %v5249_v59 = vadd.f32 %v5186_v17, %v395_v58  ;;  %v424_v60 = vpop.f32.mrf.mxu3  ;;  %v5255_v63 = vadd.f32 %v5170_v8, %v339_v61  ;;  %v368_v0 = vpop.f32.mrf.mxu1  ;;  %v3654_v58 = vor.u32 %v4573_v45, %v3653_v44  ;;  %v3655_v61 = vld [vmem:[#allocation8 + $0xd8] sm:$0xf0] }
  0xee   :  { %v5252_v62 = vadd.f32 %v5184_v16, %v424_v60  ;;  %v5258_v1 = vadd.f32 %v5172_v9, %v368_v0  ;;  %v4571_v60 = vld [vmem:[#allocation8 + $0xcc] sm:$0xf]  ;;  %v4568_v9 = vld [vmem:[#allocation8 + $0xac] sm:$0xf0] }
  0xef   :  { %v3658_v2 = vor.u32 %v4571_v60, %v3655_v61  ;;  %1067 = vmatpush.bf16.msra.mxu2 %v3654_v58  ;;  %v3630_v12 = vor.u32 %v4568_v9, %v3629_v6  ;;  %v4563_v61 = vld [vmem:[#allocation8 + $0x8c] sm:$0xf] }
  0xf1   :  { %1080 = vmatpush.bf16.msra.mxu3 %v3658_v2  ;;  %1042 = vmatpush.bf16.msra.mxu0 %v3630_v12  ;;  %v4558_v12 = vld [vmem:[#allocation8 + $0x64] sm:$0xf] }
  0xf2   :  { %v3602_v21 = vor.u32 %v4558_v12, %v3599_v14  ;;  %v3567_v12 = vld [vmem:[#allocation8 + $0x30] sm:$0xf0]  ;;  %v3573_v14 = vld [vmem:[#allocation8 + $0x28] sm:$0xf] }
  0xf3   :  { %1068 = vmatpush.bf16.msra.mxu2 %v3638_v28 }
  0xf4   :  { %v397_v37 = vpop.f32.mrf.mxu2  ;;  %v711_v53 = vpop.f32.mrf.mxu0 }
  0xf5   :  { %v5265_v50 = vadd.f32 %v5186_v17, %v397_v37  ;;  %v426_v52 = vpop.f32.mrf.mxu3  ;;  %v754_v8 = vadd.f32 %v711_v53, %v439_v36  ;;  %v724_v0 = vpop.f32.mrf.mxu1  ;;  %v3613_v36 = vld [vmem:[#allocation8 + $0x80] sm:$0xf]  ;;  %v4564_v37 = vld [vmem:[#allocation8 + $0x8c] sm:$0xf0]  ;;  %v4565_v53 = vld [vmem:[#allocation8 + $0x94] sm:$0xf0]  ;;  %1081 = vmatpush.bf16.msra.mxu3 %v3642_v34 }
  0xf6   :  { %v5268_v5 = vadd.f32 %v5184_v16, %v426_v52  ;;  %v755_v3 = vadd.f32 %v724_v0, %v440_v48  ;;  %v3614_v45 = vor.u32 %v4564_v37, %v3613_v36  ;;  %v3615_v48 = vld [vmem:[#allocation8 + $0x90] sm:$0xf0]  ;;  %v3621_v52 = vld [vmem:[#allocation8 + $0x88] sm:$0xf]  ;;  %v4560_v16 = vld [vmem:[#allocation8 + $0x6c] sm:$0xf0] }
  0xf7   :  { %v3542_v7 = vmul.f32 -1.442695, %v754_v8  ;;  %v3618_v10 = vor.u32 %v4562_v40, %v3615_v48  ;;  %v3622_v17 = vor.u32 %v4565_v53, %v3621_v52  ;;  %v3623_v8 = vld [vmem:[#allocation8 + $0x98] sm:$0xf0]  ;;  %v3581_v36 = vld [vmem:[#allocation8 + $0x40] sm:$0xf] }
  0xf8   :  { %v3543_v20 = vmul.f32 -1.442695, %v755_v3  ;;  %1043 = vmatpush.bf16.msra.mxu0 %v3614_v45  ;;  %v3626_v3 = vor.u32 %v4563_v61, %v3623_v8  ;;  %v3607_v34 = vld [vmem:[#allocation8 + $0x78] sm:$0xf0]  ;;  %v4556_v40 = vld [vmem:[#allocation8 + $0x4c] sm:$0xf0] }
  0xf9   :  { %4782 = vpow2.f32 %v3542_v7  ;;  %1056 = vmatpush.bf16.msra.mxu1 %v3618_v10  ;;  %1069 = vmatpush.bf16.msra.mxu2 %v3622_v17  ;;  %v3598_v7 = vor.u32 %v4560_v16, %v3597_v11  ;;  %v3582_v45 = vor.u32 %v4556_v40, %v3581_v36  ;;  %v4554_v48 = vld [vmem:[#allocation8 + $0x44] sm:$0xf]  ;;  %v3583_v52 = vld [vmem:[#allocation8 + $0x50] sm:$0xf0]  ;;  %v4555_v17 = vld [vmem:[#allocation8 + $0x4c] sm:$0xf] }
  0xfa   :  { %4784 = vpow2.f32 %v3543_v20  ;;  %1082 = vmatpush.bf16.msra.mxu3 %v3626_v3  ;;  %v3586_v53 = vor.u32 %v4554_v48, %v3583_v52  ;;  %v3591_v61 = vld [vmem:[#allocation8 + $0x58] sm:$0xf0]  ;;  %v3565_v8 = vld [vmem:[#allocation8 + $0x20] sm:$0xf]  ;;  %v3557_v48 = vld [vmem:[#allocation8 + $0x8] sm:$0xf] }
  0xfb   :  { %v3594_v3 = vor.u32 %v4555_v17, %v3591_v61  ;;  %v4549_v52 = vld [vmem:[#allocation8 + $0x14] sm:$0xf0] }
  0xfc   :  { %v737_v44 = vpop.f32.mrf.mxu2  ;;  %v713_v60 = vpop.f32.mrf.mxu0  ;;  %1044 = vmatpush.bf16.msra.mxu0 %v3598_v7  ;;  %v4550_v7 = vld [vmem:[#allocation8 + $0x24] sm:$0xf]  ;;  %v3558_v61 = vor.u32 %v4549_v52, %v3557_v48 }
  0xfd   :  { %v756_v56 = vadd.f32 %v737_v44, %v441_v32  ;;  %v750_v58 = vpop.f32.mrf.mxu3  ;;  %v726_v2 = vpop.f32.mrf.mxu1  ;;  %v4559_v32 = vld [vmem:[#allocation8 + $0x6c] sm:$0xf]  ;;  %1057 = vmatpush.bf16.msra.mxu1 %v3602_v21  ;;  %1070 = vmatpush.bf16.msra.mxu2 %v3606_v29  ;;  %v3575_v29 = vld [vmem:[#allocation8 + $0x38] sm:$0xf0]  ;;  %v3570_v40 = vor.u32 %v4550_v7, %v3567_v12 }
  0xfe   :  { %v757_v0 = vadd.f32 %v750_v58, %v442_v42  ;;  %v3610_v44 = vor.u32 %v4559_v32, %v3607_v34  ;;  %v4557_v58 = vld [vmem:[#allocation8 + $0x54] sm:$0xf0]  ;;  %v3549_v32 = vld [vmem:[#allocation8] sm:$0xf]  ;;  %v4548_v34 = vld [vmem:[#allocation8 + $0xc] sm:$0xf0] }
  0xff   :  { %v3544_v6 = vmul.f32 -1.442695, %v756_v56  ;;  %v4783_v9 = vpop.eup %4782  ;;  %v3589_v56 = vld [vmem:[#allocation8 + $0x48] sm:$0xf] }
 0x100   :  { %v3545_v4 = vmul.f32 -1.442695, %v757_v0  ;;  %v4785_v18 = vpop.eup %4784  ;;  %v5274_v20 = vadd.f32 1.0, %v4783_v9  ;;  %1083 = vmatpush.bf16.msra.mxu3 %v3610_v44  ;;  %1045 = vmatpush.bf16.msra.mxu0 %v3582_v45  ;;  %v3590_v10 = vor.u32 %v4557_v58, %v3589_v56  ;;  %v3578_v44 = vor.u32 %v4551_v26, %v3575_v29  ;;  %v3551_v45 = vld [vmem:[#allocation8 + $0x10] sm:$0xf0] }
 0x101   :  { %4786 = vpow2.f32 %v3544_v6  ;;  %v5276_v28 = vadd.f32 1.0, %v4785_v18  ;;  %1058 = vmatpush.bf16.msra.mxu1 %v3586_v53  ;;  %v4552_v6 = vld [vmem:[#allocation8 + $0x2c] sm:$0xf0]  ;;  %v3550_v56 = vor.u32 %v4548_v34, %v3549_v32  ;;  %v4547_v58 = vld [vmem:[#allocation8 + $0xc] sm:$0xf] }
 0x102   :  { %4788 = vpow2.f32 %v3545_v4  ;;  %1071 = vmatpush.bf16.msra.mxu2 %v3590_v10  ;;  %v3566_v9 = vor.u32 %v4552_v6, %v3565_v8  ;;  %vm779_vm6 = vweird.f32 %v5274_v20  ;;  %v3802_v34 = vld [vmem:[#allocation8 + $0xe8] sm:$0xf] }
 0x103   :  { %4790 = vrcp.f32 %v5274_v20  ;;  %vm794_vm2 = vweird.f32 %v5276_v28  ;;  %v800_v26 = vand.u32 2147483648, %v5276_v28 }
 0x104   :  { %4792 = vrcp.f32 %v5276_v28  ;;  %v739_v37 = vpop.f32.mrf.mxu2  ;;  %1084 = vmatpush.bf16.msra.mxu3 %v3594_v3  ;;  %1046 = vmatpush.bf16.msra.mxu0 %v3566_v9 }
 0x105   :  { %v752_v42 = vpop.f32.mrf.mxu3  ;;  %v4546_v37 = vld [vmem:[#allocation8 + $0x4] sm:$0xf]  ;;  %1059 = vmatpush.bf16.msra.mxu1 %v3570_v40  ;;  %v783_v40 = vand.u32 2147483647, %v5274_v20 }
 0x106   :  { %v3574_v42 = vor.u32 %v4553_v24, %v3573_v14  ;;  %v3554_v17 = vor.u32 %v4546_v37, %v3551_v45  ;;  %v798_v24 = vand.u32 2147483647, %v5276_v28  ;;  %v785_v37 = vand.u32 2147483648, %v5274_v20 }
 0x107   :  { %v4787_v60 = vpop.eup %4786  ;;  %v801_v45 = vor.u32 1.1754944e-38, %v800_v26  ;;  %vm784_vm11 = vcmp.eq.f32.partialorder %v783_v40, 8.507059e+37  ;;  %v4606_v26 = vld [vmem:[#allocation8 + $0xe4] sm:$0xf] }
 0x108   :  { %v4789_v0 = vpop.eup %4788  ;;  %v5280_v2 = vadd.f32 1.0, %v4787_v60  ;;  %v3559_v60 = vld [vmem:[#allocation8 + $0x18] sm:$0xf0]  ;;  %1072 = vmatpush.bf16.msra.mxu2 %v3574_v42  ;;  %1085 = vmatpush.bf16.msra.mxu3 %v3578_v44  ;;  %vm799_vm10 = vcmp.eq.f32.partialorder %v798_v24, 8.507059e+37  ;;  %v4608_v24 = vld [vmem:[#allocation8 + $0xec] sm:$0xf0] }
 0x109   :  { %v5282_v11 = vpop.eup %4790  ;;  %v5284_v16 = vadd.f32 1.0, %v4789_v0  ;;  %1047 = vmatpush.bf16.msra.mxu0 %v3550_v56  ;;  %v3562_v3 = vor.u32 %v4547_v58, %v3559_v60  ;;  %1060 = vmatpush.bf16.msra.mxu1 %v3554_v17  ;;  %v786_v56 = vor.u32 1.1754944e-38, %v785_v37  ;;  %v4607_v37 = vld [vmem:[#allocation8 + $0xec] sm:$0xf] }
 0x10a   :  { %v5286_v4 = vpop.eup %4792  ;;  %4794 = vrcp.f32 %v5280_v2  ;;  %v775_v18 = vmul.f32 %v5282_v11, %v5274_v20  ;;  %v815_v12 = vand.u32 2147483648, %v5280_v2  ;;  %vm780_vm3 = vweird.f32 %v5282_v11 }
 0x10b   :  { %v790_v21 = vmul.f32 %v5286_v4, %v5276_v28  ;;  %4796 = vrcp.f32 %v5284_v16  ;;  %vm795_vm0 = vweird.f32 %v5286_v4  ;;  %vm809_vm5 = vweird.f32 %v5280_v2  ;;  %vm781_vm9 = vmor %vm779_vm6, %vm780_vm3 }
 0x10c   :  { %v776_v53 = vsub.f32 1.0, %v775_v18  ;;  %1073 = vmatpush.bf16.msra.mxu2 %v3558_v61  ;;  %1086 = vmatpush.bf16.msra.mxu3 %v3562_v3  ;;  %vm5309_vm4 = vmor %vm794_vm2, %vm795_vm0  ;;  %v816_v28 = vor.u32 1.1754944e-38, %v815_v12  ;;  %vm824_vm13 = vweird.f32 %v5284_v16 }
 0x10d   :  { %v791_v36 = vsub.f32 1.0, %v790_v21  ;;  %v813_v21 = vand.u32 2147483647, %v5280_v2 }
 0x10e   :  { %v777_v9 = vmul.f32 %v5282_v11, %v776_v53 }
 0x10f   :  { %v792_v8 = vmul.f32 %v5286_v4, %v791_v36  ;;  %vm814_vm8 = vcmp.eq.f32.partialorder %v813_v21, 8.507059e+37  ;;  %v3794_v21 = vld [vmem:[#allocation8 + $0xe0] sm:$0xf] }
 0x110   :  { %v4795_v10 = vpop.eup %4794  ;;  %v778_v32 = vadd.f32 %v5282_v11, %v777_v9 }
 0x111   :  { %v805_v0 = vmul.f32 %v4795_v10, %v5280_v2  ;;  %v4797_v6 = vpop.eup %4796  ;;  %v793_v14 = vadd.f32 %v5286_v4, %v792_v8  ;;  %vm810_vm1 = vweird.f32 %v4795_v10 }
 0x112   :  { %v820_v29 = vmul.f32 %v4797_v6, %v5284_v16  ;;  %vm811_vm7 = vmor %vm809_vm5, %vm810_vm1  ;;  %v782_v2 = vsel %vm781_vm9, %v5282_v11, %v778_v32  ;;  %vm825_vm12 = vweird.f32 %v4797_v6  ;;  %v828_v11 = vand.u32 2147483647, %v5284_v16  ;;  %v3796_v32 = vld [vmem:[#allocation8 + $0xf0] sm:$0xf0] }
 0x113   :  { %v806_v7 = vsub.f32 1.0, %v805_v0  ;;  %v797_v42 = vsel %vm5309_vm4, %v5286_v4, %v793_v14  ;;  %v787_v17 = vsel %vm784_vm11, %v786_v56, %v782_v2  ;;  %vm826_vm14 = vmor %vm824_vm13, %vm825_vm12  ;;  %v3786_v2 = vld [vmem:[#allocation8 + $0xc8] sm:$0xf] }
 0x114   :  { %v821_v52 = vsub.f32 1.0, %v820_v29  ;;  %v802_v58 = vsel %vm799_vm10, %v801_v45, %v797_v42  ;;  %vm829_vm15 = vcmp.eq.f32.partialorder %v828_v11, 8.507059e+37  ;;  %v3795_v29 = vor.u32 %v4608_v24, %v3794_v21  ;;  %v3778_v42 = vld [vmem:[#allocation8 + $0xc0] sm:$0xf]  ;;  %v4602_v45 = vld [vmem:[#allocation8 + $0xc4] sm:$0xf] }
 0x115   :  { %v807_v18 = vmul.f32 %v4795_v10, %v806_v7  ;;  %v836_v61 = vmul.f32 0.0, %v802_v58  ;;  %v3762_v11 = vld [vmem:[#allocation8 + $0xa0] sm:$0xf]  ;;  %v3770_v24 = vld [vmem:[#allocation8 + $0xa8] sm:$0xf] }
 0x116   :  { %v822_v20 = vmul.f32 %v4797_v6, %v821_v52  ;;  %1379 = vmatpush.bf16.msrb.mxu0 %v3795_v29  ;;  %v3780_v52 = vld [vmem:[#allocation8 + $0xd0] sm:$0xf0]  ;;  %v4599_v29 = vld [vmem:[#allocation8 + $0xac] sm:$0xf] }
 0x117   :  { %v808_v36 = vadd.f32 %v4795_v10, %v807_v18 }
 0x118   :  { %v823_v4 = vadd.f32 %v4797_v6, %v822_v20  ;;  %v4603_v20 = vld [vmem:[#allocation8 + $0xcc] sm:$0xf] }
 0x119   :  { %v812_v44 = vsel %vm811_vm7, %v4795_v10, %v808_v36  ;;  %v830_v10 = vand.u32 2147483648, %v5284_v16  ;;  %v4609_v16 = vld [vmem:[#allocation8 + $0xf4] sm:$0xf0]  ;;  %v3799_v36 = vor.u32 %v4606_v26, %v3796_v32 }
 0x11a   :  { %v817_v48 = vsel %vm814_vm8, %v816_v28, %v812_v44  ;;  %v827_v3 = vsel %vm826_vm14, %v4797_v6, %v823_v4  ;;  %v3803_v6 = vor.u32 %v4609_v16, %v3802_v34  ;;  %v3804_v28 = vld [vmem:[#allocation8 + $0xf8] sm:$0xf0]  ;;  %v4604_v44 = vld [vmem:[#allocation8 + $0xcc] sm:$0xf0]  ;;  %v4601_v26 = vld [vmem:[#allocation8 + $0xb4] sm:$0xf0] }
 0x11b   :  { %v834_v53 = vmul.f32 2.0, %v817_v48  ;;  %v831_v9 = vor.u32 1.1754944e-38, %v830_v10  ;;  %v3807_v40 = vor.u32 %v4607_v37, %v3804_v28  ;;  %1392 = vmatpush.bf16.msrb.mxu1 %v3799_v36  ;;  %v3779_v48 = vor.u32 %v4604_v44, %v3778_v42  ;;  %v3746_v34 = vld [vmem:[#allocation8 + $0x80] sm:$0xf]  ;;  %v4596_v16 = vld [vmem:[#allocation8 + $0x8c] sm:$0xf0] }
 0x11c   :  { %1405 = vmatpush.bf16.msrb.mxu2 %v3803_v6  ;;  %v4594_v36 = vld [vmem:[#allocation8 + $0x84] sm:$0xf]  ;;  %v3747_v28 = vor.u32 %v4596_v16, %v3746_v34  ;;  %v3754_v42 = vld [vmem:[#allocation8 + $0x88] sm:$0xf]  ;;  %v4597_v44 = vld [vmem:[#allocation8 + $0x94] sm:$0xf0] }
 0x11d   :  { %v3546_v60 = vadd.f32 -1.0, %v834_v53  ;;  %v832_v12 = vsel %vm829_vm15, %v831_v9, %v827_v3  ;;  %1418 = vmatpush.bf16.msrb.mxu3 %v3807_v40  ;;  %v4605_v53 = vld [vmem:[#allocation8 + $0xd4] sm:$0xf0]  ;;  %1380 = vmatpush.bf16.msrb.mxu0 %v3779_v48  ;;  %v4600_v3 = vld [vmem:[#allocation8 + $0xac] sm:$0xf0] }
 0x11e   :  { %v4598_v9 = vld [vmem:[#allocation8 + $0xa4] sm:$0xf]  ;;  %v3748_v40 = vld [vmem:[#allocation8 + $0x90] sm:$0xf0] }
 0x11f   :  { %v837_v8 = vmul.f32 %v3546_v60, %v787_v17  ;;  %v3783_v60 = vor.u32 %v4602_v45, %v3780_v52  ;;  %v3787_v17 = vor.u32 %v4605_v53, %v3786_v2  ;;  %v3751_v53 = vor.u32 %v4594_v36, %v3748_v40  ;;  %v4586_v36 = vld [vmem:[#allocation8 + $0x44] sm:$0xf]  ;;  %v4589_v40 = vld [vmem:[#allocation8 + $0x54] sm:$0xf0] }
 0x121   :  { %v5321_v0 = vadd.f32 %v837_v8, %v836_v61  ;;  %v3788_v61 = vld [vmem:[#allocation8 + $0xd8] sm:$0xf0]  ;;  %1393 = vmatpush.bf16.msrb.mxu1 %v3783_v60  ;;  %1406 = vmatpush.bf16.msrb.mxu2 %v3787_v17 }
 0x122   :  { %v3791_v10 = vor.u32 %v4603_v20, %v3788_v61  ;;  %v3756_v60 = vld [vmem:[#allocation8 + $0x98] sm:$0xf0] }
 0x123   :  { %4798 = vtanh.f32 %v5321_v0 }
 0x124   :  { %1419 = vmatpush.bf16.msrb.mxu3 %v3791_v10  ;;  %v4592_v10 = vld [vmem:[#allocation8 + $0x6c] sm:$0xf0] }
 0x129   :  { %v4799_v7 = vpop.eup %4798 }
 0x12a   :  { %v840_v14 = vmul.f32 %v4799_v7, %v832_v12 }
 0x12c   :  { %v841_v18 = vpack.c.bf16 %v840_v14, %v840_v14  ;;  %v3763_v14 = vor.u32 %v4600_v3, %v3762_v11  ;;  %v4590_v11 = vld [vmem:[#allocation8 + $0x64] sm:$0xf] }
 0x12e   :  { %842 = vst [vmem:[#allocation11] sm:$0xf] %v841_v18  ;;  %1048 = vmatmul.bf16.vlgmr.msra.gmra.mxu0 %v841_v18  ;;  %1061 = vmatmul.bf16.vlgmr.msra.gmra.mxu1 %v841_v18 }
 0x12f   :  { %1074 = vmatmul.bf16.vlgmr.msra.gmra.mxu2 %v841_v18  ;;  %1087 = vmatmul.bf16.vlgmr.msra.gmra.mxu3 %v841_v18  ;;  %v3764_v18 = vld [vmem:[#allocation8 + $0xb0] sm:$0xf0] }
 0x130   :  { %v3767_v21 = vor.u32 %v4598_v9, %v3764_v18  ;;  %1381 = vmatpush.bf16.msrb.mxu0 %v3763_v14  ;;  %v4593_v14 = vld [vmem:[#allocation8 + $0x74] sm:$0xf0] }
 0x132   :  { %1394 = vmatpush.bf16.msrb.mxu1 %v3767_v21 }
 0x134   :  { %1382 = vmatpush.bf16.msrb.mxu0 %v3747_v28  ;;  %v3722_v28 = vld [vmem:[#allocation8 + $0x48] sm:$0xf] }
 0x136   :  { %1395 = vmatpush.bf16.msrb.mxu1 %v3751_v53 }
 0x1ab   :  { %v1049_v56 = vpop.f32.mrf.mxu0  ;;  %v1062_v58 = vpop.f32.mrf.mxu1 }
 0x1ac   :  { %v1092_v8 = vadd.f32 %v1049_v56, %v5179_v13  ;;  %v1093_v4 = vadd.f32 %v1062_v58, %v5182_v15  ;;  %v3771_v13 = vor.u32 %v4601_v26, %v3770_v24  ;;  %v3772_v15 = vld [vmem:[#allocation8 + $0xb8] sm:$0xf0]  ;;  %v3755_v56 = vor.u32 %v4597_v44, %v3754_v42  ;;  %v4595_v58 = vld [vmem:[#allocation8 + $0x8c] sm:$0xf] }
 0x1ad   :  { %v3775_v32 = vor.u32 %v4599_v29, %v3772_v15  ;;  %v3759_v17 = vor.u32 %v4595_v58, %v3756_v60  ;;  %v4591_v24 = vld [vmem:[#allocation8 + $0x6c] sm:$0xf]  ;;  %v3740_v26 = vld [vmem:[#allocation8 + $0x78] sm:$0xf0]  ;;  %v3714_v29 = vld [vmem:[#allocation8 + $0x40] sm:$0xf]  ;;  %v3723_v44 = vor.u32 %v4589_v40, %v3722_v28 }
 0x1ae   :  { %v3675_v7 = vmul.f32 -1.442695, %v1092_v8  ;;  %v3676_v12 = vmul.f32 -1.442695, %v1093_v4  ;;  %1407 = vmatpush.bf16.msrb.mxu2 %v3771_v13  ;;  %v3730_v8 = vld [vmem:[#allocation8 + $0x60] sm:$0xf]  ;;  %v3743_v34 = vor.u32 %v4591_v24, %v3740_v26 }
 0x1af   :  { %1420 = vmatpush.bf16.msrb.mxu3 %v3775_v32  ;;  %v3731_v9 = vor.u32 %v4592_v10, %v3730_v8  ;;  %v4588_v32 = vld [vmem:[#allocation8 + $0x4c] sm:$0xf0]  ;;  %v4582_v8 = vld [vmem:[#allocation8 + $0x24] sm:$0xf]  ;;  %v3706_v10 = vld [vmem:[#allocation8 + $0x28] sm:$0xf] }
 0x1b0   :  { %4800 = vpow2.f32 %v3675_v7  ;;  %v3715_v16 = vor.u32 %v4588_v32, %v3714_v29  ;;  %v4584_v58 = vld [vmem:[#allocation8 + $0x2c] sm:$0xf0]  ;;  %v4578_v24 = vld [vmem:[#allocation8 + $0x4] sm:$0xf]  ;;  %v3690_v32 = vld [vmem:[#allocation8 + $0x8] sm:$0xf] }
 0x1b1   :  { %4802 = vpow2.f32 %v3676_v12  ;;  %v3738_v12 = vld [vmem:[#allocation8 + $0x68] sm:$0xf]  ;;  %1383 = vmatpush.bf16.msrb.mxu0 %v3731_v9  ;;  %v4583_v9 = vld [vmem:[#allocation8 + $0x2c] sm:$0xf] }
 0x1b2   :  { %v1075_v6 = vpop.f32.mrf.mxu2  ;;  %v1088_v37 = vpop.f32.mrf.mxu3  ;;  %1408 = vmatpush.bf16.msrb.mxu2 %v3755_v56  ;;  %v3739_v21 = vor.u32 %v4593_v14, %v3738_v12  ;;  %v3682_v12 = vld [vmem:[#allocation8] sm:$0xf]  ;;  %v4580_v14 = vld [vmem:[#allocation8 + $0xc] sm:$0xf0] }
 0x1b3   :  { %v1094_v45 = vadd.f32 %v1075_v6, %v5189_v19  ;;  %v1095_v48 = vadd.f32 %v1088_v37, %v5192_v22  ;;  %v1051_v52 = vpop.f32.mrf.mxu0  ;;  %v1064_v2 = vpop.f32.mrf.mxu1  ;;  %v3732_v19 = vld [vmem:[#allocation8 + $0x70] sm:$0xf0]  ;;  %1421 = vmatpush.bf16.msrb.mxu3 %v3759_v17 }
 0x1b4   :  { %v3735_v7 = vor.u32 %v4590_v11, %v3732_v19  ;;  %v3716_v6 = vld [vmem:[#allocation8 + $0x50] sm:$0xf0]  ;;  %v3698_v52 = vld [vmem:[#allocation8 + $0x20] sm:$0xf] }
 0x1b5   :  { %v3677_v20 = vmul.f32 -1.442695, %v1094_v45  ;;  %v3678_v61 = vmul.f32 -1.442695, %v1095_v48  ;;  %v3719_v37 = vor.u32 %v4586_v36, %v3716_v6  ;;  %1384 = vmatpush.bf16.msrb.mxu0 %v3715_v16  ;;  %v4587_v45 = vld [vmem:[#allocation8 + $0x4c] sm:$0xf]  ;;  %v3683_v36 = vor.u32 %v4580_v14, %v3682_v12 }
 0x1b6   :  { %v4801_v4 = vpop.eup %4800  ;;  %1396 = vmatpush.bf16.msrb.mxu1 %v3735_v7  ;;  %1409 = vmatpush.bf16.msrb.mxu2 %v3739_v21  ;;  %v3724_v48 = vld [vmem:[#allocation8 + $0x58] sm:$0xf0]  ;;  %v4579_v6 = vld [vmem:[#allocation8 + $0xc] sm:$0xf] }
 0x1b7   :  { %v4803_v3 = vpop.eup %4802  ;;  %v5331_v22 = vadd.f32 1.0, %v4801_v4  ;;  %4804 = vpow2.f32 %v3677_v20  ;;  %1422 = vmatpush.bf16.msrb.mxu3 %v3743_v34  ;;  %v3727_v56 = vor.u32 %v4587_v45, %v3724_v48  ;;  %v3699_v20 = vor.u32 %v4584_v58, %v3698_v52  ;;  %v3700_v4 = vld [vmem:[#allocation8 + $0x30] sm:$0xf0]  ;;  %v3708_v7 = vld [vmem:[#allocation8 + $0x38] sm:$0xf0] }
 0x1b8   :  { %v5333_v18 = vadd.f32 1.0, %v4803_v3  ;;  %4806 = vpow2.f32 %v3678_v61  ;;  %v4585_v3 = vld [vmem:[#allocation8 + $0x34] sm:$0xf0]  ;;  %v3703_v26 = vor.u32 %v4582_v8, %v3700_v4 }
 0x1b9   :  { %4808 = vrcp.f32 %v5331_v22  ;;  %1385 = vmatpush.bf16.msrb.mxu0 %v3699_v20  ;;  %v3707_v29 = vor.u32 %v4585_v3, %v3706_v10  ;;  %v4581_v34 = vld [vmem:[#allocation8 + $0x14] sm:$0xf0]  ;;  %vm1117_vm6 = vweird.f32 %v5331_v22  ;;  %v1123_v12 = vand.u32 2147483648, %v5331_v22 }
 0x1ba   :  { %4810 = vrcp.f32 %v5333_v18  ;;  %v1077_v13 = vpop.f32.mrf.mxu2  ;;  %v1090_v15 = vpop.f32.mrf.mxu3  ;;  %1397 = vmatpush.bf16.msrb.mxu1 %v3719_v37  ;;  %1410 = vmatpush.bf16.msrb.mxu2 %v3723_v44  ;;  %v3692_v37 = vld [vmem:[#allocation8 + $0x18] sm:$0xf0]  ;;  %vm1132_vm2 = vweird.f32 %v5333_v18  ;;  %v1136_v10 = vand.u32 2147483647, %v5333_v18  ;;  %v1121_v14 = vand.u32 2147483647, %v5331_v22 }
 0x1bb   :  { %1423 = vmatpush.bf16.msrb.mxu3 %v3727_v56  ;;  %v3711_v13 = vor.u32 %v4583_v9, %v3708_v7  ;;  %v3684_v15 = vld [vmem:[#allocation8 + $0x10] sm:$0xf0]  ;;  %v3695_v48 = vor.u32 %v4579_v6, %v3692_v37 }
 0x1bc   :  { %v3687_v40 = vor.u32 %v4578_v24, %v3684_v15  ;;  %vm1137_vm10 = vcmp.eq.f32.partialorder %v1136_v10, 8.507059e+37  ;;  %vm1122_vm11 = vcmp.eq.f32.partialorder %v1121_v14, 8.507059e+37  ;;  %v3935_v10 = vld [vmem:[#allocation8 + $0xe8] sm:$0xf] }
 0x1bd   :  { %v4805_v42 = vpop.eup %4804  ;;  %1386 = vmatpush.bf16.msrb.mxu0 %v3683_v36 }
 0x1be   :  { %v4807_v2 = vpop.eup %4806  ;;  %v5337_v53 = vadd.f32 1.0, %v4805_v42  ;;  %1398 = vmatpush.bf16.msrb.mxu1 %v3703_v26  ;;  %1411 = vmatpush.bf16.msrb.mxu2 %v3707_v29  ;;  %v3691_v42 = vor.u32 %v4581_v34, %v3690_v32  ;;  %v1124_v32 = vor.u32 1.1754944e-38, %v1123_v12  ;;  %v4636_v12 = vld [vmem:[#allocation8 + $0xcc] sm:$0xf0] }
 0x1bf   :  { %v5339_v60 = vpop.eup %4808  ;;  %v5341_v17 = vadd.f32 1.0, %v4807_v2  ;;  %1424 = vmatpush.bf16.msrb.mxu3 %v3711_v13 }
 0x1c0   :  { %v5343_v61 = vpop.eup %4810  ;;  %4812 = vrcp.f32 %v5337_v53  ;;  %v1113_v11 = vmul.f32 %v5339_v60, %v5331_v22  ;;  %v1153_v58 = vand.u32 2147483648, %v5337_v53  ;;  %v1151_v4 = vand.u32 2147483647, %v5337_v53 }
 0x1c1   :  { %v1128_v19 = vmul.f32 %v5343_v61, %v5333_v18  ;;  %4814 = vrcp.f32 %v5341_v17  ;;  %vm1133_vm0 = vweird.f32 %v5343_v61  ;;  %vm1118_vm3 = vweird.f32 %v5339_v60 }
 0x1c2   :  { %v1114_v16 = vsub.f32 1.0, %v1113_v11  ;;  %1399 = vmatpush.bf16.msrb.mxu1 %v3687_v40  ;;  %1412 = vmatpush.bf16.msrb.mxu2 %v3691_v42  ;;  %v1138_v11 = vand.u32 2147483648, %v5333_v18  ;;  %vm5366_vm4 = vmor %vm1132_vm2, %vm1133_vm0  ;;  %vm1147_vm5 = vweird.f32 %v5337_v53  ;;  %v1154_v18 = vor.u32 1.1754944e-38, %v1153_v58  ;;  %v4640_v58 = vld [vmem:[#allocation8 + $0xec] sm:$0xf0] }
 0x1c3   :  { %v1129_v21 = vsub.f32 1.0, %v1128_v19  ;;  %1425 = vmatpush.bf16.msrb.mxu3 %v3695_v48  ;;  %vm1152_vm8 = vcmp.eq.f32.partialorder %v1151_v4, 8.507059e+37  ;;  %vm1119_vm9 = vmor %vm1117_vm6, %vm1118_vm3  ;;  %v1168_v40 = vand.u32 2147483648, %v5341_v17  ;;  %vm1162_vm13 = vweird.f32 %v5341_v17  ;;  %v3929_v4 = vld [vmem:[#allocation8 + $0xf0] sm:$0xf0] }
 0x1c4   :  { %v1115_v2 = vmul.f32 %v5339_v60, %v1114_v16  ;;  %v1139_v26 = vor.u32 1.1754944e-38, %v1138_v11 }
 0x1c5   :  { %v1130_v44 = vmul.f32 %v5343_v61, %v1129_v21 }
 0x1c6   :  { %v4813_v28 = vpop.eup %4812  ;;  %v1116_v3 = vadd.f32 %v5339_v60, %v1115_v2 }
 0x1c7   :  { %v1143_v45 = vmul.f32 %v4813_v28, %v5337_v53  ;;  %v4815_v52 = vpop.eup %4814  ;;  %v1131_v20 = vadd.f32 %v5343_v61, %v1130_v44  ;;  %vm1148_vm1 = vweird.f32 %v4813_v28  ;;  %v1169_v44 = vor.u32 1.1754944e-38, %v1168_v40 }
 0x1c8   :  { %v1158_v19 = vmul.f32 %v4815_v52, %v5341_v17  ;;  %vm1149_vm7 = vmor %vm1147_vm5, %vm1148_vm1  ;;  %v1120_v53 = vsel %vm1119_vm9, %v5339_v60, %v1116_v3  ;;  %vm1163_vm12 = vweird.f32 %v4815_v52  ;;  %v1166_v60 = vand.u32 2147483647, %v5341_v17  ;;  %v4641_v17 = vld [vmem:[#allocation8 + $0xf4] sm:$0xf0]  ;;  %v3937_v3 = vld [vmem:[#allocation8 + $0xf8] sm:$0xf0] }
 0x1c9   :  { %v1144_v56 = vsub.f32 1.0, %v1143_v45  ;;  %v1135_v21 = vsel %vm5366_vm4, %v5343_v61, %v1131_v20  ;;  %v1125_v36 = vsel %vm1122_vm11, %v1124_v32, %v1120_v53  ;;  %vm1164_vm14 = vmor %vm1162_vm13, %vm1163_vm12  ;;  %v4638_v20 = vld [vmem:[#allocation8 + $0xe4] sm:$0xf]  ;;  %v4635_v32 = vld [vmem:[#allocation8 + $0xcc] sm:$0xf] }
 0x1ca   :  { %v1159_v13 = vsub.f32 1.0, %v1158_v19  ;;  %v1140_v34 = vsel %vm1137_vm10, %v1139_v26, %v1135_v21  ;;  %vm1167_vm15 = vcmp.eq.f32.partialorder %v1166_v60, 8.507059e+37  ;;  %v3932_v11 = vor.u32 %v4638_v20, %v3929_v4  ;;  %v4639_v19 = vld [vmem:[#allocation8 + $0xec] sm:$0xf]  ;;  %v3913_v21 = vld [vmem:[#allocation8 + $0xd0] sm:$0xf0] }
 0x1cb   :  { %v1145_v8 = vmul.f32 %v4813_v28, %v1144_v56  ;;  %v1174_v6 = vmul.f32 %v1140_v34, %v5321_v0  ;;  %v3927_v56 = vld [vmem:[#allocation8 + $0xe0] sm:$0xf]  ;;  %v3940_v9 = vor.u32 %v4639_v19, %v3937_v3  ;;  %v4637_v26 = vld [vmem:[#allocation8 + $0xd4] sm:$0xf0]  ;;  %v3921_v34 = vld [vmem:[#allocation8 + $0xd8] sm:$0xf0] }
 0x1cc   :  { %v1160_v22 = vmul.f32 %v4815_v52, %v1159_v13  ;;  %1731 = vmatpush.bf16.msra.mxu1 %v3932_v11  ;;  %v4628_v20 = vld [vmem:[#allocation8 + $0x8c] sm:$0xf0]  ;;  %v3881_v11 = vld [vmem:[#allocation8 + $0x90] sm:$0xf0]  ;;  %v4629_v19 = vld [vmem:[#allocation8 + $0x94] sm:$0xf0] }
 0x1cd   :  { %v1146_v7 = vadd.f32 %v4813_v28, %v1145_v8  ;;  %v3928_v8 = vor.u32 %v4640_v58, %v3927_v56  ;;  %1757 = vmatpush.bf16.msra.mxu3 %v3940_v9  ;;  %v3879_v58 = vld [vmem:[#allocation8 + $0x80] sm:$0xf] }
 0x1cf   :  { %v1150_v24 = vsel %vm1149_vm7, %v4813_v28, %v1146_v7  ;;  %v1161_v28 = vadd.f32 %v4815_v52, %v1160_v22  ;;  %1718 = vmatpush.bf16.msra.mxu0 %v3928_v8  ;;  %v3911_v7 = vld [vmem:[#allocation8 + $0xc0] sm:$0xf]  ;;  %v3924_v22 = vor.u32 %v4635_v32, %v3921_v34  ;;  %v4626_v8 = vld [vmem:[#allocation8 + $0x84] sm:$0xf]  ;;  %v4624_v32 = vld [vmem:[#allocation8 + $0x6c] sm:$0xf0] }
 0x1d0   :  { %v1155_v29 = vsel %vm1152_vm8, %v1154_v18, %v1150_v24  ;;  %v4634_v18 = vld [vmem:[#allocation8 + $0xc4] sm:$0xf]  ;;  %v3912_v14 = vor.u32 %v4636_v12, %v3911_v7  ;;  %v3919_v24 = vld [vmem:[#allocation8 + $0xc8] sm:$0xf] }
 0x1d1   :  { %v1172_v15 = vmul.f32 2.0, %v1155_v29  ;;  %v1165_v42 = vsel %vm1164_vm14, %v4815_v52, %v1161_v28  ;;  %v3936_v52 = vor.u32 %v4641_v17, %v3935_v10  ;;  %v3916_v53 = vor.u32 %v4634_v18, %v3913_v21  ;;  %v4630_v28 = vld [vmem:[#allocation8 + $0xa4] sm:$0xf]  ;;  %1758 = vmatpush.bf16.msra.mxu3 %v3924_v22  ;;  %v4627_v21 = vld [vmem:[#allocation8 + $0x8c] sm:$0xf] }
 0x1d2   :  { %v1170_v48 = vsel %vm1167_vm15, %v1169_v44, %v1165_v42  ;;  %v3897_v44 = vld [vmem:[#allocation8 + $0xb0] sm:$0xf0]  ;;  %v3880_v17 = vor.u32 %v4628_v20, %v3879_v58  ;;  %v3884_v18 = vor.u32 %v4626_v8, %v3881_v11  ;;  %v4622_v34 = vld [vmem:[#allocation8 + $0x64] sm:$0xf]  ;;  %v3855_v20 = vld [vmem:[#allocation8 + $0x48] sm:$0xf] }
 0x1d3   :  { %v3679_v16 = vadd.f32 -1.0, %v1172_v15  ;;  %1744 = vmatpush.bf16.msra.mxu2 %v3936_v52  ;;  %v3920_v15 = vor.u32 %v4637_v26, %v3919_v24  ;;  %1719 = vmatpush.bf16.msra.mxu0 %v3912_v14  ;;  %v3887_v52 = vld [vmem:[#allocation8 + $0x88] sm:$0xf]  ;;  %v3889_v24 = vld [vmem:[#allocation8 + $0x98] sm:$0xf0] }
 0x1d4   :  { %1732 = vmatpush.bf16.msra.mxu1 %v3916_v53  ;;  %v3888_v14 = vor.u32 %v4629_v19, %v3887_v52  ;;  %v3892_v26 = vor.u32 %v4627_v21, %v3889_v24  ;;  %v3863_v53 = vld [vmem:[#allocation8 + $0x60] sm:$0xf]  ;;  %v4621_v8 = vld [vmem:[#allocation8 + $0x54] sm:$0xf0]  ;;  %v3857_v11 = vld [vmem:[#allocation8 + $0x58] sm:$0xf0] }
 0x1d5   :  { %v1175_v37 = vmul.f32 %v3679_v16, %v1125_v36  ;;  %v3831_v52 = vld [vmem:[#allocation8 + $0x20] sm:$0xf]  ;;  %v4614_v24 = vld [vmem:[#allocation8 + $0x24] sm:$0xf] }
 0x1d7   :  { %v5379_v61 = vadd.f32 %v1175_v37, %v1174_v6  ;;  %1745 = vmatpush.bf16.msra.mxu2 %v3920_v15  ;;  %v3895_v6 = vld [vmem:[#allocation8 + $0xa0] sm:$0xf]  ;;  %v4632_v37 = vld [vmem:[#allocation8 + $0xac] sm:$0xf0] }
 0x1d8   :  { %v3896_v42 = vor.u32 %v4632_v37, %v3895_v6  ;;  %v3871_v6 = vld [vmem:[#allocation8 + $0x68] sm:$0xf]  ;;  %v4625_v37 = vld [vmem:[#allocation8 + $0x74] sm:$0xf0] }
 0x1d9   :  { %4816 = vtanh.f32 %v5379_v61 }
 0x1da   :  { %1720 = vmatpush.bf16.msra.mxu0 %v3896_v42  ;;  %v3873_v42 = vld [vmem:[#allocation8 + $0x78] sm:$0xf0] }
 0x1de   :  { %1721 = vmatpush.bf16.msra.mxu0 %v3880_v17  ;;  %v4619_v17 = vld [vmem:[#allocation8 + $0x4c] sm:$0xf] }
 0x1df   :  { %v4817_v45 = vpop.eup %4816 }
 0x1e0   :  { %v1178_v0 = vmul.f32 %v4817_v45, %v1170_v48  ;;  %v3900_v45 = vor.u32 %v4630_v28, %v3897_v44  ;;  %v3903_v48 = vld [vmem:[#allocation8 + $0xa8] sm:$0xf]  ;;  %v3847_v44 = vld [vmem:[#allocation8 + $0x40] sm:$0xf] }
 0x1e2   :  { %v1179_v2 = vpack.c.bf16 %v1178_v0, %v1178_v0  ;;  %v4633_v0 = vld [vmem:[#allocation8 + $0xb4] sm:$0xf0]  ;;  %1733 = vmatpush.bf16.msra.mxu1 %v3900_v45 }
 0x1e4   :  { %1181 = vst [vmem:[#allocation11 + $0x4] sm:$0xf] %v1179_v2  ;;  %1387 = vmatmul.bf16.vlgmr.msrb.gmra.mxu0 %v1179_v2  ;;  %1400 = vmatmul.bf16.vlgmr.msrb.gmra.mxu1 %v1179_v2 }
 0x1e5   :  { %1413 = vmatmul.bf16.vlgmr.msrb.gmra.mxu2 %v1179_v2  ;;  %1426 = vmatmul.bf16.vlgmr.msrb.gmra.mxu3 %v1179_v2  ;;  %v4631_v2 = vld [vmem:[#allocation8 + $0xac] sm:$0xf] }
 0x1e6   :  { %1734 = vmatpush.bf16.msra.mxu1 %v3884_v18 }
 0x261   :  { %v1388_v29 = vpop.f32.mrf.mxu0  ;;  %v1401_v13 = vpop.f32.mrf.mxu1 }
 0x262   :  { %v1431_v16 = vadd.f32 %v1388_v29, %v5195_v23  ;;  %v1432_v36 = vadd.f32 %v1401_v13, %v5198_v25  ;;  %v3904_v23 = vor.u32 %v4633_v0, %v3903_v48  ;;  %v3905_v25 = vld [vmem:[#allocation8 + $0xb8] sm:$0xf0]  ;;  %v4620_v0 = vld [vmem:[#allocation8 + $0x4c] sm:$0xf0] }
 0x263   :  { %v3908_v56 = vor.u32 %v4631_v2, %v3905_v25  ;;  %v4618_v25 = vld [vmem:[#allocation8 + $0x44] sm:$0xf] }
 0x264   :  { %v3808_v40 = vmul.f32 -1.442695, %v1431_v16  ;;  %v3809_v60 = vmul.f32 -1.442695, %v1432_v36  ;;  %1746 = vmatpush.bf16.msra.mxu2 %v3904_v23  ;;  %v3864_v36 = vor.u32 %v4624_v32, %v3863_v53  ;;  %v3848_v23 = vor.u32 %v4620_v0, %v3847_v44  ;;  %v4615_v32 = vld [vmem:[#allocation8 + $0x2c] sm:$0xf] }
 0x265   :  { %1759 = vmatpush.bf16.msra.mxu3 %v3908_v56  ;;  %v3849_v56 = vld [vmem:[#allocation8 + $0x50] sm:$0xf0]  ;;  %v4613_v44 = vld [vmem:[#allocation8 + $0x14] sm:$0xf0]  ;;  %v4611_v0 = vld [vmem:[#allocation8 + $0xc] sm:$0xf] }
 0x266   :  { %4818 = vpow2.f32 %v3808_v40  ;;  %v3872_v40 = vor.u32 %v4625_v37, %v3871_v6  ;;  %1722 = vmatpush.bf16.msra.mxu0 %v3864_v36  ;;  %v3852_v58 = vor.u32 %v4618_v25, %v3849_v56 }
 0x267   :  { %4820 = vpow2.f32 %v3809_v60  ;;  %v4623_v60 = vld [vmem:[#allocation8 + $0x6c] sm:$0xf] }
 0x268   :  { %v1414_v4 = vpop.f32.mrf.mxu2  ;;  %v1427_v10 = vpop.f32.mrf.mxu3  ;;  %1747 = vmatpush.bf16.msra.mxu2 %v3888_v14  ;;  %v3876_v2 = vor.u32 %v4623_v60, %v3873_v42  ;;  %v3817_v60 = vld [vmem:[#allocation8 + $0x10] sm:$0xf0]  ;;  %v3823_v42 = vld [vmem:[#allocation8 + $0x8] sm:$0xf] }
 0x269   :  { %v1433_v3 = vadd.f32 %v1414_v4, %v5201_v27  ;;  %v1434_v9 = vadd.f32 %v1427_v10, %v5204_v30  ;;  %v1390_v7 = vpop.f32.mrf.mxu0  ;;  %v1403_v12 = vpop.f32.mrf.mxu1  ;;  %v3865_v27 = vld [vmem:[#allocation8 + $0x70] sm:$0xf0]  ;;  %1760 = vmatpush.bf16.msra.mxu3 %v3892_v26  ;;  %v3856_v10 = vor.u32 %v4621_v8, %v3855_v20  ;;  %v3824_v56 = vor.u32 %v4613_v44, %v3823_v42 }
 0x26a   :  { %v3868_v22 = vor.u32 %v4622_v34, %v3865_v27  ;;  %1723 = vmatpush.bf16.msra.mxu0 %v3848_v23  ;;  %v4616_v7 = vld [vmem:[#allocation8 + $0x2c] sm:$0xf0]  ;;  %v3833_v26 = vld [vmem:[#allocation8 + $0x30] sm:$0xf0]  ;;  %v3841_v34 = vld [vmem:[#allocation8 + $0x38] sm:$0xf0] }
 0x26b   :  { %v3810_v29 = vmul.f32 -1.442695, %v1433_v3  ;;  %v3811_v13 = vmul.f32 -1.442695, %v1434_v9  ;;  %v3860_v9 = vor.u32 %v4619_v17, %v3857_v11  ;;  %v3832_v14 = vor.u32 %v4616_v7, %v3831_v52  ;;  %v3815_v27 = vld [vmem:[#allocation8] sm:$0xf] }
 0x26c   :  { %v4819_v15 = vpop.eup %4818  ;;  %1735 = vmatpush.bf16.msra.mxu1 %v3868_v22  ;;  %1748 = vmatpush.bf16.msra.mxu2 %v3872_v40  ;;  %v4610_v22 = vld [vmem:[#allocation8 + $0x4] sm:$0xf]  ;;  %v3836_v6 = vor.u32 %v4614_v24, %v3833_v26  ;;  %v3844_v40 = vor.u32 %v4615_v32, %v3841_v34 }
 0x26d   :  { %v4821_v16 = vpop.eup %4820  ;;  %v5389_v30 = vadd.f32 1.0, %v4819_v15  ;;  %4822 = vpow2.f32 %v3810_v29  ;;  %1761 = vmatpush.bf16.msra.mxu3 %v3876_v2  ;;  %v3839_v29 = vld [vmem:[#allocation8 + $0x28] sm:$0xf]  ;;  %v4617_v15 = vld [vmem:[#allocation8 + $0x34] sm:$0xf0]  ;;  %v3820_v25 = vor.u32 %v4610_v22, %v3817_v60 }
 0x26e   :  { %v5391_v28 = vadd.f32 1.0, %v4821_v16  ;;  %4824 = vpow2.f32 %v3811_v13  ;;  %1724 = vmatpush.bf16.msra.mxu0 %v3832_v14  ;;  %v4612_v16 = vld [vmem:[#allocation8 + $0xc] sm:$0xf0]  ;;  %v3840_v37 = vor.u32 %v4617_v15, %v3839_v29  ;;  %v3825_v2 = vld [vmem:[#allocation8 + $0x18] sm:$0xf0] }
 0x26f   :  { %4826 = vrcp.f32 %v5389_v30  ;;  %v3828_v8 = vor.u32 %v4611_v0, %v3825_v2  ;;  %vm1456_vm6 = vweird.f32 %v5389_v30  ;;  %v1460_v15 = vand.u32 2147483647, %v5389_v30 }
 0x270   :  { %4828 = vrcp.f32 %v5391_v28  ;;  %v1416_v45 = vpop.f32.mrf.mxu2  ;;  %v1429_v48 = vpop.f32.mrf.mxu3  ;;  %1736 = vmatpush.bf16.msra.mxu1 %v3852_v58  ;;  %1749 = vmatpush.bf16.msra.mxu2 %v3856_v10  ;;  %vm1471_vm2 = vweird.f32 %v5391_v28  ;;  %v1475_v7 = vand.u32 2147483647, %v5391_v28  ;;  %v1477_v14 = vand.u32 2147483648, %v5391_v28 }
 0x271   :  { %1762 = vmatpush.bf16.msra.mxu3 %v3860_v9  ;;  %v3816_v48 = vor.u32 %v4612_v16, %v3815_v27  ;;  %vm1461_vm11 = vcmp.eq.f32.partialorder %v1460_v15, 8.507059e+37 }
 0x272   :  { %v1478_v27 = vor.u32 1.1754944e-38, %v1477_v14  ;;  %vm1476_vm10 = vcmp.eq.f32.partialorder %v1475_v7, 8.507059e+37  ;;  %v4044_v14 = vld [vmem:[#allocation8 + $0xc0] sm:$0xf] }
 0x273   :  { %v4823_v4 = vpop.eup %4822  ;;  %1725 = vmatpush.bf16.msra.mxu0 %v3816_v48 }
 0x274   :  { %v4825_v19 = vpop.eup %4824  ;;  %v5395_v3 = vadd.f32 1.0, %v4823_v4  ;;  %1737 = vmatpush.bf16.msra.mxu1 %v3836_v6  ;;  %1750 = vmatpush.bf16.msra.mxu2 %v3840_v37 }
 0x275   :  { %v5397_v12 = vpop.eup %4826  ;;  %v5399_v18 = vadd.f32 1.0, %v4825_v19  ;;  %1763 = vmatpush.bf16.msra.mxu3 %v3844_v40 }
 0x276   :  { %v5401_v21 = vpop.eup %4828  ;;  %4830 = vrcp.f32 %v5395_v3  ;;  %v1452_v13 = vmul.f32 %v5397_v12, %v5389_v30  ;;  %v1492_v11 = vand.u32 2147483648, %v5395_v3  ;;  %v1490_v9 = vand.u32 2147483647, %v5395_v3 }
 0x277   :  { %v1467_v53 = vmul.f32 %v5401_v21, %v5391_v28  ;;  %4832 = vrcp.f32 %v5399_v18  ;;  %vm1472_vm0 = vweird.f32 %v5401_v21  ;;  %vm1457_vm3 = vweird.f32 %v5397_v12 }
 0x278   :  { %v1453_v45 = vsub.f32 1.0, %v1452_v13  ;;  %1738 = vmatpush.bf16.msra.mxu1 %v3820_v25  ;;  %1751 = vmatpush.bf16.msra.mxu2 %v3824_v56  ;;  %vm5424_vm4 = vmor %vm1471_vm2, %vm1472_vm0  ;;  %vm1486_vm5 = vweird.f32 %v5395_v3  ;;  %v1493_v28 = vor.u32 1.1754944e-38, %v1492_v11  ;;  %vm1491_vm8 = vcmp.eq.f32.partialorder %v1490_v9, 8.507059e+37  ;;  %v4068_v11 = vld [vmem:[#allocation8 + $0xe8] sm:$0xf] }
 0x279   :  { %v1468_v36 = vsub.f32 1.0, %v1467_v53  ;;  %1764 = vmatpush.bf16.msra.mxu3 %v3828_v8  ;;  %v1462_v53 = vand.u32 2147483648, %v5389_v30  ;;  %vm1458_vm9 = vmor %vm1456_vm6, %vm1457_vm3  ;;  %v1507_v48 = vand.u32 2147483648, %v5399_v18  ;;  %vm1501_vm13 = vweird.f32 %v5399_v18  ;;  %v4670_v8 = vld [vmem:[#allocation8 + $0xe4] sm:$0xf] }
 0x27a   :  { %v1454_v10 = vmul.f32 %v5397_v12, %v1453_v45  ;;  %v4070_v9 = vld [vmem:[#allocation8 + $0xf8] sm:$0xf0] }
 0x27b   :  { %v1469_v58 = vmul.f32 %v5401_v21, %v1468_v36  ;;  %v1463_v6 = vor.u32 1.1754944e-38, %v1462_v53  ;;  %v1508_v2 = vor.u32 1.1754944e-38, %v1507_v48  ;;  %v4052_v53 = vld [vmem:[#allocation8 + $0xc8] sm:$0xf] }
 0x27c   :  { %v4831_v23 = vpop.eup %4830  ;;  %v1455_v26 = vadd.f32 %v5397_v12, %v1454_v10 }
 0x27d   :  { %v1482_v20 = vmul.f32 %v4831_v23, %v5395_v3  ;;  %v4833_v4 = vpop.eup %4832  ;;  %v1470_v52 = vadd.f32 %v5401_v21, %v1469_v58  ;;  %vm1487_vm1 = vweird.f32 %v4831_v23  ;;  %v4060_v58 = vld [vmem:[#allocation8 + $0xe0] sm:$0xf] }
 0x27e   :  { %v1497_v24 = vmul.f32 %v4833_v4, %v5399_v18  ;;  %vm1488_vm7 = vmor %vm1486_vm5, %vm1487_vm1  ;;  %v1459_v3 = vsel %vm1458_vm9, %v5397_v12, %v1455_v26  ;;  %vm1502_vm12 = vweird.f32 %v4833_v4  ;;  %v1505_v12 = vand.u32 2147483647, %v5399_v18  ;;  %v4673_v18 = vld [vmem:[#allocation8 + $0xf4] sm:$0xf0]  ;;  %v4666_v26 = vld [vmem:[#allocation8 + $0xc4] sm:$0xf] }
 0x27f   :  { %v1483_v17 = vsub.f32 1.0, %v1482_v20  ;;  %v1474_v32 = vsel %vm5424_vm4, %v5401_v21, %v1470_v52  ;;  %v1464_v60 = vsel %vm1461_vm11, %v1463_v6, %v1459_v3  ;;  %vm1503_vm14 = vmor %vm1501_vm13, %vm1502_vm12  ;;  %v4672_v20 = vld [vmem:[#allocation8 + $0xec] sm:$0xf0] }
 0x280   :  { %v1498_v36 = vsub.f32 1.0, %v1497_v24  ;;  %v1479_v37 = vsel %vm1476_vm10, %v1478_v27, %v1474_v32  ;;  %vm1506_vm15 = vcmp.eq.f32.partialorder %v1505_v12, 8.507059e+37  ;;  %v4061_v10 = vor.u32 %v4672_v20, %v4060_v58  ;;  %v4668_v24 = vld [vmem:[#allocation8 + $0xcc] sm:$0xf0]  ;;  %v4036_v12 = vld [vmem:[#allocation8 + $0xa8] sm:$0xf] }
 0x281   :  { %v1484_v19 = vmul.f32 %v4831_v23, %v1483_v17  ;;  %v1513_v42 = vmul.f32 %v1479_v37, %v5379_v61  ;;  %v4062_v17 = vld [vmem:[#allocation8 + $0xf0] sm:$0xf0]  ;;  %v4045_v29 = vor.u32 %v4668_v24, %v4044_v14  ;;  %v4028_v37 = vld [vmem:[#allocation8 + $0xa0] sm:$0xf]  ;;  %v4659_v14 = vld [vmem:[#allocation8 + $0x8c] sm:$0xf] }
 0x282   :  { %v1499_v30 = vmul.f32 %v4833_v4, %v1498_v36  ;;  %v4065_v52 = vor.u32 %v4670_v8, %v4062_v17  ;;  %2057 = vmatpush.bf16.msrb.mxu0 %v4061_v10  ;;  %v4054_v36 = vld [vmem:[#allocation8 + $0xd8] sm:$0xf0]  ;;  %v4014_v10 = vld [vmem:[#allocation8 + $0x90] sm:$0xf0]  ;;  %v4020_v17 = vld [vmem:[#allocation8 + $0x88] sm:$0xf] }
 0x283   :  { %v1485_v13 = vadd.f32 %v4831_v23, %v1484_v19  ;;  %v4671_v19 = vld [vmem:[#allocation8 + $0xec] sm:$0xf]  ;;  %v4022_v24 = vld [vmem:[#allocation8 + $0x98] sm:$0xf0] }
 0x284   :  { %v1500_v45 = vadd.f32 %v4833_v4, %v1499_v30  ;;  %v4073_v7 = vor.u32 %v4671_v19, %v4070_v9  ;;  %2070 = vmatpush.bf16.msrb.mxu1 %v4065_v52 }
 0x285   :  { %v1489_v34 = vsel %vm1488_vm7, %v4831_v23, %v1485_v13  ;;  %v4046_v13 = vld [vmem:[#allocation8 + $0xd0] sm:$0xf0] }
 0x286   :  { %v1494_v16 = vsel %vm1491_vm8, %v1493_v28, %v1489_v34  ;;  %v1504_v0 = vsel %vm1503_vm14, %v4833_v4, %v1500_v45  ;;  %v4069_v4 = vor.u32 %v4673_v18, %v4068_v11  ;;  %2096 = vmatpush.bf16.msrb.mxu3 %v4073_v7  ;;  %v4669_v28 = vld [vmem:[#allocation8 + $0xd4] sm:$0xf0]  ;;  %v4049_v34 = vor.u32 %v4666_v26, %v4046_v13  ;;  %v4030_v45 = vld [vmem:[#allocation8 + $0xb0] sm:$0xf0] }
 0x287   :  { %v1511_v22 = vmul.f32 2.0, %v1494_v16  ;;  %v1509_v25 = vsel %vm1506_vm15, %v1508_v2, %v1504_v0  ;;  %v4053_v27 = vor.u32 %v4669_v28, %v4052_v53  ;;  %v4667_v16 = vld [vmem:[#allocation8 + $0xcc] sm:$0xf]  ;;  %2058 = vmatpush.bf16.msrb.mxu0 %v4045_v29  ;;  %v4665_v0 = vld [vmem:[#allocation8 + $0xb4] sm:$0xf0]  ;;  %v4025_v26 = vor.u32 %v4659_v14, %v4022_v24 }
 0x288   :  { %2083 = vmatpush.bf16.msrb.mxu2 %v4069_v4  ;;  %v4057_v6 = vor.u32 %v4667_v16, %v4054_v36  ;;  %2071 = vmatpush.bf16.msrb.mxu1 %v4049_v34  ;;  %v4663_v2 = vld [vmem:[#allocation8 + $0xac] sm:$0xf]  ;;  %v4661_v11 = vld [vmem:[#allocation8 + $0x94] sm:$0xf0]  ;;  %v3996_v53 = vld [vmem:[#allocation8 + $0x60] sm:$0xf] }
 0x289   :  { %v3812_v40 = vadd.f32 -1.0, %v1511_v22  ;;  %v4021_v7 = vor.u32 %v4661_v11, %v4020_v17  ;;  %v4004_v36 = vld [vmem:[#allocation8 + $0x68] sm:$0xf]  ;;  %v4648_v17 = vld [vmem:[#allocation8 + $0x2c] sm:$0xf0] }
 0x28a   :  { %2097 = vmatpush.bf16.msrb.mxu3 %v4057_v6 }
 0x28b   :  { %v1514_v44 = vmul.f32 %v3812_v40, %v1464_v60  ;;  %v4664_v40 = vld [vmem:[#allocation8 + $0xac] sm:$0xf0]  ;;  %v4662_v60 = vld [vmem:[#allocation8 + $0xa4] sm:$0xf] }
 0x28c   :  { %2084 = vmatpush.bf16.msrb.mxu2 %v4053_v27  ;;  %v4033_v48 = vor.u32 %v4662_v60, %v4030_v45  ;;  %v3980_v60 = vld [vmem:[#allocation8 + $0x40] sm:$0xf] }
 0x28d   :  { %v5437_v21 = vadd.f32 %v1514_v44, %v1513_v42  ;;  %v4029_v44 = vor.u32 %v4664_v40, %v4028_v37  ;;  %v4655_v37 = vld [vmem:[#allocation8 + $0x6c] sm:$0xf]  ;;  %v4006_v40 = vld [vmem:[#allocation8 + $0x78] sm:$0xf0] }
 0x28e   :  { %2072 = vmatpush.bf16.msrb.mxu1 %v4033_v48  ;;  %v4009_v45 = vor.u32 %v4655_v37, %v4006_v40  ;;  %v4643_v40 = vld [vmem:[#allocation8 + $0xc] sm:$0xf] }
 0x28f   :  { %4834 = vtanh.f32 %v5437_v21  ;;  %2059 = vmatpush.bf16.msrb.mxu0 %v4029_v44  ;;  %v4652_v44 = vld [vmem:[#allocation8 + $0x4c] sm:$0xf0] }
 0x290   :  { %v3981_v48 = vor.u32 %v4652_v44, %v3980_v60  ;;  %v3958_v60 = vld [vmem:[#allocation8 + $0x18] sm:$0xf0] }
 0x295   :  { %v4835_v23 = vpop.eup %4834 }
 0x296   :  { %v1517_v61 = vmul.f32 %v4835_v23, %v1509_v25  ;;  %v4012_v25 = vld [vmem:[#allocation8 + $0x80] sm:$0xf] }
 0x298   :  { %v1518_v56 = vpack.c.bf16 %v1517_v61, %v1517_v61  ;;  %v4660_v61 = vld [vmem:[#allocation8 + $0x8c] sm:$0xf0] }
 0x299   :  { %v4013_v8 = vor.u32 %v4660_v61, %v4012_v25  ;;  %v4651_v61 = vld [vmem:[#allocation8 + $0x4c] sm:$0xf] }
 0x29a   :  { %1520 = vst [vmem:[#allocation11 + $0x8] sm:$0xf] %v1518_v56  ;;  %1726 = vmatmul.bf16.vlgmr.msra.gmra.mxu0 %v1518_v56  ;;  %1739 = vmatmul.bf16.vlgmr.msra.gmra.mxu1 %v1518_v56 }
 0x29b   :  { %1752 = vmatmul.bf16.vlgmr.msra.gmra.mxu2 %v1518_v56  ;;  %1765 = vmatmul.bf16.vlgmr.msra.gmra.mxu3 %v1518_v56  ;;  %v4658_v56 = vld [vmem:[#allocation8 + $0x84] sm:$0xf] }
 0x29c   :  { %v4017_v9 = vor.u32 %v4658_v56, %v4014_v10  ;;  %2060 = vmatpush.bf16.msrb.mxu0 %v4013_v8  ;;  %v3990_v56 = vld [vmem:[#allocation8 + $0x58] sm:$0xf0] }
 0x29d   :  { %v3993_v10 = vor.u32 %v4651_v61, %v3990_v56 }
 0x29e   :  { %2073 = vmatpush.bf16.msrb.mxu1 %v4017_v9  ;;  %v3966_v9 = vld [vmem:[#allocation8 + $0x30] sm:$0xf0] }
 0x317   :  { %v1727_v15 = vpop.f32.mrf.mxu0  ;;  %v1740_v32 = vpop.f32.mrf.mxu1 }
 0x318   :  { %v1770_v3 = vadd.f32 %v1727_v15, %v5207_v31  ;;  %v1771_v22 = vadd.f32 %v1740_v32, %v5210_v33  ;;  %v4037_v31 = vor.u32 %v4665_v0, %v4036_v12  ;;  %v4038_v33 = vld [vmem:[#allocation8 + $0xb8] sm:$0xf0]  ;;  %v4656_v15 = vld [vmem:[#allocation8 + $0x6c] sm:$0xf0]  ;;  %v4654_v32 = vld [vmem:[#allocation8 + $0x64] sm:$0xf] }
 0x319   :  { %v4041_v23 = vor.u32 %v4663_v2, %v4038_v33  ;;  %v3997_v27 = vor.u32 %v4656_v15, %v3996_v53  ;;  %v4650_v12 = vld [vmem:[#allocation8 + $0x44] sm:$0xf]  ;;  %v3982_v0 = vld [vmem:[#allocation8 + $0x50] sm:$0xf0]  ;;  %v4653_v33 = vld [vmem:[#allocation8 + $0x54] sm:$0xf0] }
 0x31a   :  { %v3941_v30 = vmul.f32 -1.442695, %v1770_v3  ;;  %v3942_v42 = vmul.f32 -1.442695, %v1771_v22  ;;  %2085 = vmatpush.bf16.msrb.mxu2 %v4037_v31  ;;  %v4657_v3 = vld [vmem:[#allocation8 + $0x74] sm:$0xf0]  ;;  %v3985_v2 = vor.u32 %v4650_v12, %v3982_v0  ;;  %v3961_v12 = vor.u32 %v4643_v40, %v3958_v60 }
 0x31b   :  { %2098 = vmatpush.bf16.msrb.mxu3 %v4041_v23  ;;  %v4005_v6 = vor.u32 %v4657_v3, %v4004_v36  ;;  %2061 = vmatpush.bf16.msrb.mxu0 %v3997_v27  ;;  %v3988_v31 = vld [vmem:[#allocation8 + $0x48] sm:$0xf]  ;;  %v3948_v53 = vld [vmem:[#allocation8] sm:$0xf]  ;;  %v4645_v3 = vld [vmem:[#allocation8 + $0x14] sm:$0xf0] }
 0x31c   :  { %4836 = vpow2.f32 %v3941_v30  ;;  %v3989_v25 = vor.u32 %v4653_v33, %v3988_v31  ;;  %v3956_v36 = vld [vmem:[#allocation8 + $0x8] sm:$0xf]  ;;  %v4193_v60 = vld [vmem:[#allocation8 + $0xe0] sm:$0xf] }
 0x31d   :  { %4838 = vpow2.f32 %v3942_v42  ;;  %v3957_v44 = vor.u32 %v4645_v3, %v3956_v36 }
 0x31e   :  { %v1753_v58 = vpop.f32.mrf.mxu2  ;;  %v1766_v20 = vpop.f32.mrf.mxu3  ;;  %2086 = vmatpush.bf16.msrb.mxu2 %v4021_v7  ;;  %v3972_v7 = vld [vmem:[#allocation8 + $0x28] sm:$0xf] }
 0x31f   :  { %v1772_v18 = vadd.f32 %v1753_v58, %v5213_v35  ;;  %v1773_v52 = vadd.f32 %v1766_v20, %v5216_v38  ;;  %v1729_v4 = vpop.f32.mrf.mxu0  ;;  %v1742_v19 = vpop.f32.mrf.mxu1  ;;  %v3998_v35 = vld [vmem:[#allocation8 + $0x70] sm:$0xf0]  ;;  %2099 = vmatpush.bf16.msrb.mxu3 %v4025_v26  ;;  %2062 = vmatpush.bf16.msrb.mxu0 %v3981_v48  ;;  %v3964_v58 = vld [vmem:[#allocation8 + $0x20] sm:$0xf]  ;;  %v4649_v26 = vld [vmem:[#allocation8 + $0x34] sm:$0xf0] }
 0x320   :  { %v4001_v16 = vor.u32 %v4654_v32, %v3998_v35  ;;  %v4646_v19 = vld [vmem:[#allocation8 + $0x24] sm:$0xf] }
 0x321   :  { %v3943_v29 = vmul.f32 -1.442695, %v1772_v18  ;;  %v3944_v13 = vmul.f32 -1.442695, %v1773_v52  ;;  %v3965_v52 = vor.u32 %v4648_v17, %v3964_v58  ;;  %v4642_v32 = vld [vmem:[#allocation8 + $0x4] sm:$0xf]  ;;  %v3969_v35 = vor.u32 %v4646_v19, %v3966_v9 }
 0x322   :  { %v4837_v28 = vpop.eup %4836  ;;  %2074 = vmatpush.bf16.msrb.mxu1 %v4001_v16  ;;  %2087 = vmatpush.bf16.msrb.mxu2 %v4005_v6  ;;  %v3950_v16 = vld [vmem:[#allocation8 + $0x10] sm:$0xf0] }
 0x323   :  { %v4839_v34 = vpop.eup %4838  ;;  %v5447_v38 = vadd.f32 1.0, %v4837_v28  ;;  %4840 = vpow2.f32 %v3943_v29  ;;  %2100 = vmatpush.bf16.msrb.mxu3 %v4009_v45  ;;  %2063 = vmatpush.bf16.msrb.mxu0 %v3965_v52  ;;  %v4647_v29 = vld [vmem:[#allocation8 + $0x2c] sm:$0xf]  ;;  %v4644_v28 = vld [vmem:[#allocation8 + $0xc] sm:$0xf0] }
 0x324   :  { %v5449_v22 = vadd.f32 1.0, %v4839_v34  ;;  %4842 = vpow2.f32 %v3944_v13  ;;  %v3974_v13 = vld [vmem:[#allocation8 + $0x38] sm:$0xf0]  ;;  %v3973_v34 = vor.u32 %v4649_v26, %v3972_v7  ;;  %v3949_v37 = vor.u32 %v4644_v28, %v3948_v53 }
 0x325   :  { %4844 = vrcp.f32 %v5447_v38  ;;  %v3977_v27 = vor.u32 %v4647_v29, %v3974_v13  ;;  %vm1795_vm6 = vweird.f32 %v5447_v38  ;;  %v1801_v19 = vand.u32 2147483648, %v5447_v38 }
 0x326   :  { %4846 = vrcp.f32 %v5449_v22  ;;  %v1755_v30 = vpop.f32.mrf.mxu2  ;;  %v1768_v42 = vpop.f32.mrf.mxu3  ;;  %2075 = vmatpush.bf16.msrb.mxu1 %v3985_v2  ;;  %2088 = vmatpush.bf16.msrb.mxu2 %v3989_v25  ;;  %vm1810_vm2 = vweird.f32 %v5449_v22  ;;  %v1814_v56 = vand.u32 2147483647, %v5449_v22  ;;  %v1816_v58 = vand.u32 2147483648, %v5449_v22 }
 0x327   :  { %2101 = vmatpush.bf16.msrb.mxu3 %v3993_v10  ;;  %v3953_v42 = vor.u32 %v4642_v32, %v3950_v16  ;;  %2064 = vmatpush.bf16.msrb.mxu0 %v3949_v37  ;;  %v1799_v9 = vand.u32 2147483647, %v5447_v38  ;;  %v1802_v53 = vor.u32 1.1754944e-38, %v1801_v19 }
 0x328   :  { %vm1815_vm10 = vcmp.eq.f32.partialorder %v1814_v56, 8.507059e+37 }
 0x329   :  { %v4841_v23 = vpop.eup %4840  ;;  %vm1800_vm11 = vcmp.eq.f32.partialorder %v1799_v9, 8.507059e+37  ;;  %v4699_v9 = vld [vmem:[#allocation8 + $0xcc] sm:$0xf] }
 0x32a   :  { %v4843_v20 = vpop.eup %4842  ;;  %v5453_v8 = vadd.f32 1.0, %v4841_v23  ;;  %2076 = vmatpush.bf16.msrb.mxu1 %v3969_v35  ;;  %2089 = vmatpush.bf16.msrb.mxu2 %v3973_v34 }
 0x32b   :  { %v5455_v11 = vpop.eup %4844  ;;  %v5457_v18 = vadd.f32 1.0, %v4843_v20  ;;  %2102 = vmatpush.bf16.msrb.mxu3 %v3977_v27 }
 0x32c   :  { %v5459_v4 = vpop.eup %4846  ;;  %4848 = vrcp.f32 %v5453_v8  ;;  %v1791_v14 = vmul.f32 %v5455_v11, %v5447_v38  ;;  %v1831_v33 = vand.u32 2147483648, %v5453_v8  ;;  %v1829_v61 = vand.u32 2147483647, %v5453_v8 }
 0x32d   :  { %v1806_v24 = vmul.f32 %v5459_v4, %v5449_v22  ;;  %4850 = vrcp.f32 %v5457_v18  ;;  %vm1811_vm0 = vweird.f32 %v5459_v4  ;;  %vm1796_vm3 = vweird.f32 %v5455_v11 }
 0x32e   :  { %v1792_v6 = vsub.f32 1.0, %v1791_v14  ;;  %2077 = vmatpush.bf16.msrb.mxu1 %v3953_v42  ;;  %2090 = vmatpush.bf16.msrb.mxu2 %v3957_v44  ;;  %vm5482_vm4 = vmor %vm1810_vm2, %vm1811_vm0  ;;  %vm1825_vm5 = vweird.f32 %v5453_v8  ;;  %v1832_v22 = vor.u32 1.1754944e-38, %v1831_v33  ;;  %vm1830_vm8 = vcmp.eq.f32.partialorder %v1829_v61, 8.507059e+37  ;;  %v4702_v42 = vld [vmem:[#allocation8 + $0xe4] sm:$0xf] }
 0x32f   :  { %v1807_v15 = vsub.f32 1.0, %v1806_v24  ;;  %2103 = vmatpush.bf16.msrb.mxu3 %v3961_v12  ;;  %vm1797_vm9 = vmor %vm1795_vm6, %vm1796_vm3  ;;  %v1817_v24 = vor.u32 1.1754944e-38, %v1816_v58  ;;  %v1846_v16 = vand.u32 2147483648, %v5457_v18  ;;  %vm1840_vm13 = vweird.f32 %v5457_v18  ;;  %v4698_v61 = vld [vmem:[#allocation8 + $0xc4] sm:$0xf] }
 0x330   :  { %v1793_v2 = vmul.f32 %v5455_v11, %v1792_v6  ;;  %v4179_v58 = vld [vmem:[#allocation8 + $0xd0] sm:$0xf0] }
 0x331   :  { %v1808_v45 = vmul.f32 %v5459_v4, %v1807_v15  ;;  %v1847_v3 = vor.u32 1.1754944e-38, %v1846_v16  ;;  %v4182_v19 = vor.u32 %v4698_v61, %v4179_v58  ;;  %v4686_v58 = vld [vmem:[#allocation8 + $0x64] sm:$0xf] }
 0x332   :  { %v4849_v30 = vpop.eup %4848  ;;  %v1794_v10 = vadd.f32 %v5455_v11, %v1793_v2  ;;  %v4703_v2 = vld [vmem:[#allocation8 + $0xec] sm:$0xf] }
 0x333   :  { %v1821_v48 = vmul.f32 %v4849_v30, %v5453_v8  ;;  %v4851_v0 = vpop.eup %4850  ;;  %v1809_v23 = vadd.f32 %v5459_v4, %v1808_v45  ;;  %vm1826_vm1 = vweird.f32 %v4849_v30  ;;  %v4195_v45 = vld [vmem:[#allocation8 + $0xf0] sm:$0xf0] }
 0x334   :  { %v1836_v20 = vmul.f32 %v4851_v0, %v5457_v18  ;;  %vm1827_vm7 = vmor %vm1825_vm5, %vm1826_vm1  ;;  %v1798_v8 = vsel %vm1797_vm9, %v5455_v11, %v1794_v10  ;;  %vm1841_vm12 = vweird.f32 %v4851_v0  ;;  %v1844_v11 = vand.u32 2147483647, %v5457_v18  ;;  %v4705_v18 = vld [vmem:[#allocation8 + $0xf4] sm:$0xf0] }
 0x335   :  { %v1822_v31 = vsub.f32 1.0, %v1821_v48  ;;  %v1813_v7 = vsel %vm5482_vm4, %v5459_v4, %v1809_v23  ;;  %v1803_v32 = vsel %vm1800_vm11, %v1802_v53, %v1798_v8  ;;  %vm1842_vm14 = vmor %vm1840_vm13, %vm1841_vm12  ;;  %v4201_v48 = vld [vmem:[#allocation8 + $0xe8] sm:$0xf]  ;;  %v4198_v12 = vor.u32 %v4702_v42, %v4195_v45  ;;  %v4177_v23 = vld [vmem:[#allocation8 + $0xc0] sm:$0xf] }
 0x336   :  { %v1837_v29 = vsub.f32 1.0, %v1836_v20  ;;  %v1818_v28 = vsel %vm1815_vm10, %v1817_v24, %v1813_v7  ;;  %vm1845_vm15 = vcmp.eq.f32.partialorder %v1844_v11, 8.507059e+37  ;;  %v4185_v20 = vld [vmem:[#allocation8 + $0xc8] sm:$0xf]  ;;  %v4701_v10 = vld [vmem:[#allocation8 + $0xd4] sm:$0xf0] }
 0x337   :  { %v1823_v25 = vmul.f32 %v4849_v30, %v1822_v31  ;;  %v1852_v35 = vmul.f32 %v1818_v28, %v5437_v21  ;;  %v4203_v31 = vld [vmem:[#allocation8 + $0xf8] sm:$0xf0]  ;;  %2409 = vmatpush.bf16.msra.mxu1 %v4198_v12  ;;  %v4696_v8 = vld [vmem:[#allocation8 + $0xac] sm:$0xf0]  ;;  %v4145_v11 = vld [vmem:[#allocation8 + $0x80] sm:$0xf] }
 0x338   :  { %v1838_v38 = vmul.f32 %v4851_v0, %v1837_v29  ;;  %v4206_v33 = vor.u32 %v4703_v2, %v4203_v31  ;;  %v4187_v7 = vld [vmem:[#allocation8 + $0xd8] sm:$0xf0]  ;;  %v4161_v29 = vld [vmem:[#allocation8 + $0xa0] sm:$0xf] }
 0x339   :  { %v1824_v52 = vadd.f32 %v4849_v30, %v1823_v25  ;;  %v4700_v25 = vld [vmem:[#allocation8 + $0xcc] sm:$0xf0]  ;;  %v4155_v2 = vld [vmem:[#allocation8 + $0x98] sm:$0xf0] }
 0x33a   :  { %v1839_v27 = vadd.f32 %v4851_v0, %v1838_v38  ;;  %2435 = vmatpush.bf16.msra.mxu3 %v4206_v33  ;;  %v4178_v56 = vor.u32 %v4700_v25, %v4177_v23  ;;  %v4129_v25 = vld [vmem:[#allocation8 + $0x60] sm:$0xf] }
 0x33b   :  { %v1828_v14 = vsel %vm1827_vm7, %v4849_v30, %v1824_v52  ;;  %v4704_v30 = vld [vmem:[#allocation8 + $0xec] sm:$0xf0]  ;;  %2410 = vmatpush.bf16.msra.mxu1 %v4182_v19  ;;  %v4689_v19 = vld [vmem:[#allocation8 + $0x74] sm:$0xf0] }
 0x33c   :  { %v1833_v26 = vsel %vm1830_vm8, %v1832_v22, %v1828_v14  ;;  %v1843_v36 = vsel %vm1842_vm14, %v4851_v0, %v1839_v27  ;;  %v4194_v44 = vor.u32 %v4704_v30, %v4193_v60  ;;  %v4202_v0 = vor.u32 %v4705_v18, %v4201_v48  ;;  %v4695_v27 = vld [vmem:[#allocation8 + $0xac] sm:$0xf]  ;;  %v4153_v60 = vld [vmem:[#allocation8 + $0x88] sm:$0xf]  ;;  %v4693_v30 = vld [vmem:[#allocation8 + $0x94] sm:$0xf0] }
 0x33d   :  { %v1850_v13 = vmul.f32 2.0, %v1833_v26  ;;  %v1848_v37 = vsel %vm1845_vm15, %v1847_v3, %v1843_v36  ;;  %v4186_v22 = vor.u32 %v4701_v10, %v4185_v20  ;;  %v4190_v26 = vor.u32 %v4699_v9, %v4187_v7  ;;  %v4692_v36 = vld [vmem:[#allocation8 + $0x8c] sm:$0xf0]  ;;  %v4690_v3 = vld [vmem:[#allocation8 + $0x84] sm:$0xf] }
 0x33e   :  { %2396 = vmatpush.bf16.msra.mxu0 %v4194_v44  ;;  %2422 = vmatpush.bf16.msra.mxu2 %v4202_v0  ;;  %v4154_v12 = vor.u32 %v4693_v30, %v4153_v60  ;;  %v4691_v0 = vld [vmem:[#allocation8 + $0x8c] sm:$0xf]  ;;  %v4678_v30 = vld [vmem:[#allocation8 + $0x24] sm:$0xf] }
 0x33f   :  { %v3945_v15 = vadd.f32 -1.0, %v1850_v13  ;;  %v4694_v13 = vld [vmem:[#allocation8 + $0xa4] sm:$0xf]  ;;  %2436 = vmatpush.bf16.msra.mxu3 %v4190_v26  ;;  %v4158_v31 = vor.u32 %v4691_v0, %v4155_v2  ;;  %v4687_v7 = vld [vmem:[#allocation8 + $0x6c] sm:$0xf] }
 0x340   :  { %v4107_v0 = vld [vmem:[#allocation8 + $0x38] sm:$0xf0]  ;;  %v4081_v2 = vld [vmem:[#allocation8] sm:$0xf] }
 0x341   :  { %v1853_v34 = vmul.f32 %v3945_v15, %v1803_v32  ;;  %v4162_v15 = vor.u32 %v4696_v8, %v4161_v29  ;;  %v4163_v32 = vld [vmem:[#allocation8 + $0xb0] sm:$0xf0]  ;;  %v4684_v8 = vld [vmem:[#allocation8 + $0x4c] sm:$0xf0] }
 0x342   :  { %2397 = vmatpush.bf16.msra.mxu0 %v4178_v56  ;;  %2423 = vmatpush.bf16.msra.mxu2 %v4186_v22  ;;  %v4166_v38 = vor.u32 %v4694_v13, %v4163_v32  ;;  %v4688_v56 = vld [vmem:[#allocation8 + $0x6c] sm:$0xf0] }
 0x343   :  { %v5495_v4 = vadd.f32 %v1853_v34, %v1852_v35  ;;  %v4169_v35 = vld [vmem:[#allocation8 + $0xa8] sm:$0xf]  ;;  %v4697_v34 = vld [vmem:[#allocation8 + $0xb4] sm:$0xf0]  ;;  %v4130_v10 = vor.u32 %v4688_v56, %v4129_v25 }
 0x344   :  { %2411 = vmatpush.bf16.msra.mxu1 %v4166_v38  ;;  %v4121_v38 = vld [vmem:[#allocation8 + $0x48] sm:$0xf] }
 0x345   :  { %4852 = vtanh.f32 %v5495_v4 }
 0x346   :  { %2398 = vmatpush.bf16.msra.mxu0 %v4162_v15  ;;  %v4115_v15 = vld [vmem:[#allocation8 + $0x50] sm:$0xf0] }
 0x34b   :  { %v4853_v6 = vpop.eup %4852 }
 0x34c   :  { %v1856_v21 = vmul.f32 %v4853_v6, %v1848_v37 }
 0x34e   :  { %v1857_v40 = vpack.c.bf16 %v1856_v21, %v1856_v21  ;;  %v4146_v21 = vor.u32 %v4692_v36, %v4145_v11 }
 0x350   :  { %1859 = vst [vmem:[#allocation11 + $0xc] sm:$0xf] %v1857_v40  ;;  %2065 = vmatmul.bf16.vlgmr.msrb.gmra.mxu0 %v1857_v40  ;;  %2078 = vmatmul.bf16.vlgmr.msrb.gmra.mxu1 %v1857_v40 }
 0x351   :  { %2091 = vmatmul.bf16.vlgmr.msrb.gmra.mxu2 %v1857_v40  ;;  %2104 = vmatmul.bf16.vlgmr.msrb.gmra.mxu3 %v1857_v40  ;;  %v4147_v40 = vld [vmem:[#allocation8 + $0x90] sm:$0xf0] }
 0x352   :  { %v4150_v18 = vor.u32 %v4690_v3, %v4147_v40  ;;  %2399 = vmatpush.bf16.msra.mxu0 %v4146_v21 }
 0x354   :  { %2412 = vmatpush.bf16.msra.mxu1 %v4150_v18  ;;  %v4681_v18 = vld [vmem:[#allocation8 + $0x34] sm:$0xf0] }
 0x356   :  { %2400 = vmatpush.bf16.msra.mxu0 %v4130_v10 }
 0x3cd   :  { %v2066_v17 = vpop.f32.mrf.mxu0  ;;  %v2079_v52 = vpop.f32.mrf.mxu1 }
 0x3ce   :  { %v2109_v14 = vadd.f32 %v2066_v17, %v5219_v39  ;;  %v2110_v24 = vadd.f32 %v2079_v52, %v5222_v41  ;;  %v4170_v39 = vor.u32 %v4697_v34, %v4169_v35  ;;  %v4171_v41 = vld [vmem:[#allocation8 + $0xb8] sm:$0xf0]  ;;  %v4137_v52 = vld [vmem:[#allocation8 + $0x68] sm:$0xf]  ;;  %v4685_v35 = vld [vmem:[#allocation8 + $0x54] sm:$0xf0] }
 0x3cf   :  { %v4174_v16 = vor.u32 %v4695_v27, %v4171_v41  ;;  %v4138_v9 = vor.u32 %v4689_v19, %v4137_v52  ;;  %v4122_v27 = vor.u32 %v4685_v35, %v4121_v38  ;;  %v4123_v41 = vld [vmem:[#allocation8 + $0x58] sm:$0xf0]  ;;  %v4675_v52 = vld [vmem:[#allocation8 + $0xc] sm:$0xf] }
 0x3d0   :  { %v4074_v53 = vmul.f32 -1.442695, %v2109_v14  ;;  %v4075_v28 = vmul.f32 -1.442695, %v2110_v24  ;;  %2424 = vmatpush.bf16.msra.mxu2 %v4170_v39  ;;  %v4139_v14 = vld [vmem:[#allocation8 + $0x78] sm:$0xf0] }
 0x3d1   :  { %2437 = vmatpush.bf16.msra.mxu3 %v4174_v16  ;;  %v4113_v24 = vld [vmem:[#allocation8 + $0x40] sm:$0xf]  ;;  %v4142_v13 = vor.u32 %v4687_v7, %v4139_v14  ;;  %v4683_v39 = vld [vmem:[#allocation8 + $0x4c] sm:$0xf]  ;;  %v4091_v19 = vld [vmem:[#allocation8 + $0x18] sm:$0xf0] }
 0x3d2   :  { %4854 = vpow2.f32 %v4074_v53  ;;  %v4114_v53 = vor.u32 %v4684_v8, %v4113_v24  ;;  %v4097_v16 = vld [vmem:[#allocation8 + $0x20] sm:$0xf]  ;;  %v4126_v3 = vor.u32 %v4683_v39, %v4123_v41  ;;  %v4731_v41 = vld [vmem:[#allocation8 + $0xcc] sm:$0xf] }
 0x3d3   :  { %4856 = vpow2.f32 %v4075_v28  ;;  %v4682_v28 = vld [vmem:[#allocation8 + $0x44] sm:$0xf] }
 0x3d4   :  { %v2092_v6 = vpop.f32.mrf.mxu2  ;;  %v2105_v37 = vpop.f32.mrf.mxu3  ;;  %2425 = vmatpush.bf16.msra.mxu2 %v4154_v12  ;;  %v4118_v32 = vor.u32 %v4682_v28, %v4115_v15  ;;  %2401 = vmatpush.bf16.msra.mxu0 %v4114_v53  ;;  %v4679_v12 = vld [vmem:[#allocation8 + $0x2c] sm:$0xf] }
 0x3d5   :  { %v2111_v42 = vadd.f32 %v2092_v6, %v5225_v43  ;;  %v2112_v44 = vadd.f32 %v2105_v37, %v5228_v46  ;;  %v2068_v45 = vpop.f32.mrf.mxu0  ;;  %v2081_v48 = vpop.f32.mrf.mxu1  ;;  %v4131_v43 = vld [vmem:[#allocation8 + $0x70] sm:$0xf0]  ;;  %2438 = vmatpush.bf16.msra.mxu3 %v4158_v31  ;;  %v4680_v6 = vld [vmem:[#allocation8 + $0x2c] sm:$0xf0]  ;;  %v4110_v56 = vor.u32 %v4679_v12, %v4107_v0 }
 0x3d6   :  { %v4134_v17 = vor.u32 %v4686_v58, %v4131_v43  ;;  %v4098_v40 = vor.u32 %v4680_v6, %v4097_v16  ;;  %v4676_v31 = vld [vmem:[#allocation8 + $0xc] sm:$0xf0]  ;;  %v4083_v58 = vld [vmem:[#allocation8 + $0x10] sm:$0xf0]  ;;  %v4089_v43 = vld [vmem:[#allocation8 + $0x8] sm:$0xf] }
 0x3d7   :  { %v4076_v33 = vmul.f32 -1.442695, %v2111_v42  ;;  %v4077_v23 = vmul.f32 -1.442695, %v2112_v44  ;;  %v4099_v42 = vld [vmem:[#allocation8 + $0x30] sm:$0xf0] }
 0x3d8   :  { %v4855_v61 = vpop.eup %4854  ;;  %2413 = vmatpush.bf16.msra.mxu1 %v4134_v17  ;;  %2426 = vmatpush.bf16.msra.mxu2 %v4138_v9  ;;  %v4105_v44 = vld [vmem:[#allocation8 + $0x28] sm:$0xf]  ;;  %v4102_v25 = vor.u32 %v4678_v30, %v4099_v42  ;;  %v4082_v17 = vor.u32 %v4676_v31, %v4081_v2 }
 0x3d9   :  { %v4857_v20 = vpop.eup %4856  ;;  %v5505_v46 = vadd.f32 1.0, %v4855_v61  ;;  %4858 = vpow2.f32 %v4076_v33  ;;  %2439 = vmatpush.bf16.msra.mxu3 %v4142_v13  ;;  %2402 = vmatpush.bf16.msra.mxu0 %v4098_v40  ;;  %v4106_v61 = vor.u32 %v4681_v18, %v4105_v44 }
 0x3da   :  { %v5507_v22 = vadd.f32 1.0, %v4857_v20  ;;  %4860 = vpow2.f32 %v4077_v23  ;;  %v4674_v23 = vld [vmem:[#allocation8 + $0x4] sm:$0xf]  ;;  %v4677_v20 = vld [vmem:[#allocation8 + $0x14] sm:$0xf0] }
 0x3db   :  { %4862 = vrcp.f32 %v5505_v46  ;;  %v4086_v7 = vor.u32 %v4674_v23, %v4083_v58  ;;  %v4090_v14 = vor.u32 %v4677_v20, %v4089_v43  ;;  %vm2134_vm6 = vweird.f32 %v5505_v46  ;;  %v4326_v20 = vld [vmem:[#allocation8 + $0xe0] sm:$0xf] }
 0x3dc   :  { %4864 = vrcp.f32 %v5507_v22  ;;  %v2094_v26 = vpop.f32.mrf.mxu2  ;;  %v2107_v29 = vpop.f32.mrf.mxu3  ;;  %2414 = vmatpush.bf16.msra.mxu1 %v4118_v32  ;;  %2427 = vmatpush.bf16.msra.mxu2 %v4122_v27  ;;  %vm2149_vm2 = vweird.f32 %v5507_v22  ;;  %v2153_v35 = vand.u32 2147483647, %v5507_v22 }
 0x3dd   :  { %2440 = vmatpush.bf16.msra.mxu3 %v4126_v3  ;;  %2403 = vmatpush.bf16.msra.mxu0 %v4082_v17  ;;  %v4094_v29 = vor.u32 %v4675_v52, %v4091_v19  ;;  %v2138_v3 = vand.u32 2147483647, %v5505_v46  ;;  %v4734_v17 = vld [vmem:[#allocation8 + $0xe4] sm:$0xf]  ;;  %v4328_v19 = vld [vmem:[#allocation8 + $0xf0] sm:$0xf0] }
 0x3de   :  { %vm2154_vm10 = vcmp.eq.f32.partialorder %v2153_v35, 8.507059e+37 }
 0x3df   :  { %v4859_v34 = vpop.eup %4858  ;;  %vm2139_vm11 = vcmp.eq.f32.partialorder %v2138_v3, 8.507059e+37 }
 0x3e0   :  { %v4861_v11 = vpop.eup %4860  ;;  %v5511_v36 = vadd.f32 1.0, %v4859_v34  ;;  %2415 = vmatpush.bf16.msra.mxu1 %v4102_v25  ;;  %2428 = vmatpush.bf16.msra.mxu2 %v4106_v61  ;;  %v2155_v34 = vand.u32 2147483648, %v5507_v22 }
 0x3e1   :  { %v5513_v37 = vpop.eup %4862  ;;  %v5515_v21 = vadd.f32 1.0, %v4861_v11  ;;  %2441 = vmatpush.bf16.msra.mxu3 %v4110_v56  ;;  %v2140_v11 = vand.u32 2147483648, %v5505_v46 }
 0x3e2   :  { %v5517_v60 = vpop.eup %4864  ;;  %4866 = vrcp.f32 %v5511_v36  ;;  %v2130_v45 = vmul.f32 %v5513_v37, %v5505_v46  ;;  %v2170_v28 = vand.u32 2147483648, %v5511_v36  ;;  %v2168_v38 = vand.u32 2147483647, %v5511_v36 }
 0x3e3   :  { %v2145_v48 = vmul.f32 %v5517_v60, %v5507_v22  ;;  %4868 = vrcp.f32 %v5515_v21  ;;  %vm2150_vm0 = vweird.f32 %v5517_v60  ;;  %vm2135_vm3 = vweird.f32 %v5513_v37 }
 0x3e4   :  { %v2131_v10 = vsub.f32 1.0, %v2130_v45  ;;  %2416 = vmatpush.bf16.msra.mxu1 %v4086_v7  ;;  %2429 = vmatpush.bf16.msra.mxu2 %v4090_v14  ;;  %vm5540_vm4 = vmor %vm2149_vm2, %vm2150_vm0  ;;  %vm2164_vm5 = vweird.f32 %v5511_v36  ;;  %v2171_v22 = vor.u32 1.1754944e-38, %v2170_v28  ;;  %vm2169_vm8 = vcmp.eq.f32.partialorder %v2168_v38, 8.507059e+37  ;;  %v4733_v38 = vld [vmem:[#allocation8 + $0xd4] sm:$0xf0] }
 0x3e5   :  { %v2146_v33 = vsub.f32 1.0, %v2145_v48  ;;  %2442 = vmatpush.bf16.msra.mxu3 %v4094_v29  ;;  %vm2136_vm9 = vmor %vm2134_vm6, %vm2135_vm3  ;;  %v2156_v30 = vor.u32 1.1754944e-38, %v2155_v34  ;;  %v2141_v48 = vor.u32 1.1754944e-38, %v2140_v11  ;;  %v2185_v23 = vand.u32 2147483648, %v5515_v21 }
 0x3e6   :  { %v2132_v13 = vmul.f32 %v5513_v37, %v2131_v10  ;;  %vm2179_vm13 = vweird.f32 %v5515_v21  ;;  %v4736_v10 = vld [vmem:[#allocation8 + $0xec] sm:$0xf0]  ;;  %v4331_v7 = vor.u32 %v4734_v17, %v4328_v19  ;;  %v4723_v19 = vld [vmem:[#allocation8 + $0x8c] sm:$0xf] }
 0x3e7   :  { %v2147_v24 = vmul.f32 %v5517_v60, %v2146_v33  ;;  %v2186_v61 = vor.u32 1.1754944e-38, %v2185_v23  ;;  %v4327_v52 = vor.u32 %v4736_v10, %v4326_v20 }
 0x3e8   :  { %v4867_v9 = vpop.eup %4866  ;;  %v2133_v39 = vadd.f32 %v5513_v37, %v2132_v13  ;;  %2748 = vmatpush.bf16.msrb.mxu1 %v4331_v7  ;;  %v4732_v13 = vld [vmem:[#allocation8 + $0xcc] sm:$0xf0] }
 0x3e9   :  { %v2160_v26 = vmul.f32 %v4867_v9, %v5511_v36  ;;  %v4869_v8 = vpop.eup %4868  ;;  %v2148_v15 = vadd.f32 %v5517_v60, %v2147_v24  ;;  %vm2165_vm1 = vweird.f32 %v4867_v9  ;;  %v4735_v24 = vld [vmem:[#allocation8 + $0xec] sm:$0xf]  ;;  %2735 = vmatpush.bf16.msrb.mxu0 %v4327_v52 }
 0x3ea   :  { %v2175_v27 = vmul.f32 %v4869_v8, %v5515_v21  ;;  %vm2166_vm7 = vmor %vm2164_vm5, %vm2165_vm1  ;;  %v2137_v36 = vsel %vm2136_vm9, %v5513_v37, %v2133_v39  ;;  %vm2180_vm12 = vweird.f32 %v4869_v8  ;;  %v2183_v37 = vand.u32 2147483647, %v5515_v21  ;;  %v4737_v21 = vld [vmem:[#allocation8 + $0xf4] sm:$0xf0] }
 0x3eb   :  { %v2161_v53 = vsub.f32 1.0, %v2160_v26  ;;  %v2152_v6 = vsel %vm5540_vm4, %v5517_v60, %v2148_v15  ;;  %v2142_v0 = vsel %vm2139_vm11, %v2141_v48, %v2137_v36  ;;  %vm2181_vm14 = vmor %vm2179_vm13, %vm2180_vm12  ;;  %v4336_v26 = vld [vmem:[#allocation8 + $0xf8] sm:$0xf0]  ;;  %v4312_v15 = vld [vmem:[#allocation8 + $0xd0] sm:$0xf0] }
 0x3ec   :  { %v2176_v44 = vsub.f32 1.0, %v2175_v27  ;;  %v2157_v18 = vsel %vm2154_vm10, %v2156_v30, %v2152_v6  ;;  %vm2184_vm15 = vcmp.eq.f32.partialorder %v2183_v37, 8.507059e+37  ;;  %v4339_v29 = vor.u32 %v4735_v24, %v4336_v26  ;;  %v4294_v6 = vld [vmem:[#allocation8 + $0xa0] sm:$0xf]  ;;  %v4726_v30 = vld [vmem:[#allocation8 + $0xa4] sm:$0xf] }
 0x3ed   :  { %v2162_v32 = vmul.f32 %v4867_v9, %v2161_v53  ;;  %v2191_v2 = vmul.f32 %v2157_v18, %v5495_v4  ;;  %v4730_v53 = vld [vmem:[#allocation8 + $0xc4] sm:$0xf]  ;;  %v4302_v18 = vld [vmem:[#allocation8 + $0xa8] sm:$0xf]  ;;  %v4262_v24 = vld [vmem:[#allocation8 + $0x60] sm:$0xf] }
 0x3ee   :  { %v2177_v46 = vmul.f32 %v4869_v8, %v2176_v44  ;;  %2774 = vmatpush.bf16.msrb.mxu3 %v4339_v29  ;;  %v4315_v27 = vor.u32 %v4730_v53, %v4312_v15  ;;  %v4720_v29 = vld [vmem:[#allocation8 + $0x6c] sm:$0xf0]  ;;  %v4270_v15 = vld [vmem:[#allocation8 + $0x68] sm:$0xf] }
 0x3ef   :  { %v2163_v16 = vadd.f32 %v4867_v9, %v2162_v32  ;;  %v4318_v32 = vld [vmem:[#allocation8 + $0xc8] sm:$0xf]  ;;  %v4263_v53 = vor.u32 %v4720_v29, %v4262_v24 }
 0x3f0   :  { %v2178_v33 = vadd.f32 %v4869_v8, %v2177_v46  ;;  %v4319_v39 = vor.u32 %v4733_v38, %v4318_v32  ;;  %2749 = vmatpush.bf16.msrb.mxu1 %v4315_v27  ;;  %v4721_v32 = vld [vmem:[#allocation8 + $0x74] sm:$0xf0]  ;;  %v4272_v27 = vld [vmem:[#allocation8 + $0x78] sm:$0xf0]  ;;  %v4222_v24 = vld [vmem:[#allocation8 + $0x8] sm:$0xf] }
 0x3f1   :  { %v2167_v40 = vsel %vm2166_vm7, %v4867_v9, %v2163_v16  ;;  %v4334_v9 = vld [vmem:[#allocation8 + $0xe8] sm:$0xf]  ;;  %v4320_v16 = vld [vmem:[#allocation8 + $0xd8] sm:$0xf0] }
 0x3f2   :  { %v2172_v42 = vsel %vm2169_vm8, %v2171_v22, %v2167_v40  ;;  %v2182_v25 = vsel %vm2181_vm14, %v4869_v8, %v2178_v33  ;;  %v4335_v14 = vor.u32 %v4737_v21, %v4334_v9  ;;  %v4310_v8 = vld [vmem:[#allocation8 + $0xc0] sm:$0xf]  ;;  %v4323_v3 = vor.u32 %v4731_v41, %v4320_v16  ;;  %v4728_v40 = vld [vmem:[#allocation8 + $0xac] sm:$0xf0]  ;;  %v4722_v33 = vld [vmem:[#allocation8 + $0x84] sm:$0xf] }
 0x3f3   :  { %v2189_v45 = vmul.f32 2.0, %v2172_v42  ;;  %v2187_v58 = vsel %vm2184_vm15, %v2186_v61, %v2182_v25  ;;  %v4311_v28 = vor.u32 %v4732_v13, %v4310_v8  ;;  %v4295_v36 = vor.u32 %v4728_v40, %v4294_v6  ;;  %v4280_v61 = vld [vmem:[#allocation8 + $0x90] sm:$0xf0]  ;;  %v4288_v9 = vld [vmem:[#allocation8 + $0x98] sm:$0xf0] }
 0x3f4   :  { %2761 = vmatpush.bf16.msrb.mxu2 %v4335_v14  ;;  %2775 = vmatpush.bf16.msrb.mxu3 %v4323_v3  ;;  %v4283_v17 = vor.u32 %v4722_v33, %v4280_v61  ;;  %v4291_v21 = vor.u32 %v4723_v19, %v4288_v9  ;;  %v4718_v8 = vld [vmem:[#allocation8 + $0x64] sm:$0xf]  ;;  %v4248_v40 = vld [vmem:[#allocation8 + $0x50] sm:$0xf0]  ;;  %v4238_v61 = vld [vmem:[#allocation8 + $0x28] sm:$0xf] }
 0x3f5   :  { %v4078_v12 = vadd.f32 -1.0, %v2189_v45  ;;  %2736 = vmatpush.bf16.msrb.mxu0 %v4311_v28  ;;  %v4296_v45 = vld [vmem:[#allocation8 + $0xb0] sm:$0xf0]  ;;  %v4714_v6 = vld [vmem:[#allocation8 + $0x44] sm:$0xf] }
 0x3f6   :  { %v4299_v48 = vor.u32 %v4726_v30, %v4296_v45  ;;  %v4251_v30 = vor.u32 %v4714_v6, %v4248_v40  ;;  %v4706_v19 = vld [vmem:[#allocation8 + $0x4] sm:$0xf] }
 0x3f7   :  { %v2192_v31 = vmul.f32 %v4078_v12, %v2142_v0  ;;  %v4729_v12 = vld [vmem:[#allocation8 + $0xb4] sm:$0xf0]  ;;  %v4727_v0 = vld [vmem:[#allocation8 + $0xac] sm:$0xf] }
 0x3f8   :  { %2762 = vmatpush.bf16.msrb.mxu2 %v4319_v39  ;;  %2750 = vmatpush.bf16.msrb.mxu1 %v4299_v48  ;;  %v4246_v39 = vld [vmem:[#allocation8 + $0x40] sm:$0xf]  ;;  %v4715_v48 = vld [vmem:[#allocation8 + $0x4c] sm:$0xf] }
 0x3f9   :  { %v5553_v60 = vadd.f32 %v2192_v31, %v2191_v2  ;;  %2737 = vmatpush.bf16.msrb.mxu0 %v4295_v36  ;;  %v4278_v2 = vld [vmem:[#allocation8 + $0x80] sm:$0xf]  ;;  %v4724_v31 = vld [vmem:[#allocation8 + $0x8c] sm:$0xf0] }
 0x3fa   :  { %v4279_v25 = vor.u32 %v4724_v31, %v4278_v2 }
 0x3fb   :  { %4870 = vtanh.f32 %v5553_v60 }
 0x3fc   :  { %2751 = vmatpush.bf16.msrb.mxu1 %v4283_v17  ;;  %v4708_v17 = vld [vmem:[#allocation8 + $0xc] sm:$0xf0] }
 0x3fd   :  { %2738 = vmatpush.bf16.msrb.mxu0 %v4279_v25  ;;  %v4232_v25 = vld [vmem:[#allocation8 + $0x30] sm:$0xf0] }
 0x401   :  { %v4871_v56 = vpop.eup %4870  ;;  %2739 = vmatpush.bf16.msrb.mxu0 %v4263_v53 }
 0x402   :  { %v2195_v4 = vmul.f32 %v4871_v56, %v2187_v58  ;;  %v4286_v56 = vld [vmem:[#allocation8 + $0x88] sm:$0xf]  ;;  %v4725_v58 = vld [vmem:[#allocation8 + $0x94] sm:$0xf0] }
 0x403   :  { %v4287_v52 = vor.u32 %v4725_v58, %v4286_v56 }
 0x404   :  { %v2196_v43 = vpack.c.bf16 %v2195_v4, %v2195_v4 }
 0x406   :  { %2198 = vst [vmem:[#allocation11 + $0x10] sm:$0xf] %v2196_v43  ;;  %2404 = vmatmul.bf16.vlgmr.msra.gmra.mxu0 %v2196_v43  ;;  %2417 = vmatmul.bf16.vlgmr.msra.gmra.mxu1 %v2196_v43 }
 0x407   :  { %2430 = vmatmul.bf16.vlgmr.msra.gmra.mxu2 %v2196_v43  ;;  %2443 = vmatmul.bf16.vlgmr.msra.gmra.mxu3 %v2196_v43 }
 0x483   :  { %v2405_v35 = vpop.f32.mrf.mxu0  ;;  %v2418_v34 = vpop.f32.mrf.mxu1 }
 0x484   :  { %v2448_v11 = vadd.f32 %v2405_v35, %v5231_v47  ;;  %v2449_v22 = vadd.f32 %v2418_v34, %v5234_v49  ;;  %v4303_v47 = vor.u32 %v4729_v12, %v4302_v18  ;;  %v4304_v49 = vld [vmem:[#allocation8 + $0xb8] sm:$0xf0]  ;;  %v4271_v35 = vor.u32 %v4721_v32, %v4270_v15  ;;  %v4719_v34 = vld [vmem:[#allocation8 + $0x6c] sm:$0xf]  ;;  %v4230_v12 = vld [vmem:[#allocation8 + $0x20] sm:$0xf] }
 0x485   :  { %v4307_v46 = vor.u32 %v4727_v0, %v4304_v49  ;;  %v4256_v18 = vld [vmem:[#allocation8 + $0x58] sm:$0xf0] }
 0x486   :  { %v4207_v42 = vmul.f32 -1.442695, %v2448_v11  ;;  %v4208_v44 = vmul.f32 -1.442695, %v2449_v22  ;;  %2763 = vmatpush.bf16.msrb.mxu2 %v4303_v47  ;;  %v4716_v11 = vld [vmem:[#allocation8 + $0x4c] sm:$0xf0]  ;;  %v4275_v22 = vor.u32 %v4719_v34, %v4272_v27  ;;  %v4259_v49 = vor.u32 %v4715_v48, %v4256_v18 }
 0x487   :  { %2776 = vmatpush.bf16.msrb.mxu3 %v4307_v46  ;;  %v4247_v3 = vor.u32 %v4716_v11, %v4246_v39  ;;  %v4712_v46 = vld [vmem:[#allocation8 + $0x2c] sm:$0xf0] }
 0x488   :  { %4872 = vpow2.f32 %v4207_v42  ;;  %v4254_v42 = vld [vmem:[#allocation8 + $0x48] sm:$0xf]  ;;  %v4231_v33 = vor.u32 %v4712_v46, %v4230_v12 }
 0x489   :  { %4874 = vpow2.f32 %v4208_v44  ;;  %v4717_v44 = vld [vmem:[#allocation8 + $0x54] sm:$0xf0]  ;;  %2740 = vmatpush.bf16.msrb.mxu0 %v4247_v3 }
 0x48a   :  { %v2431_v23 = vpop.f32.mrf.mxu2  ;;  %v2444_v37 = vpop.f32.mrf.mxu3  ;;  %2764 = vmatpush.bf16.msrb.mxu2 %v4287_v52  ;;  %v4255_v45 = vor.u32 %v4717_v44, %v4254_v42 }
 0x48b   :  { %v2450_v4 = vadd.f32 %v2431_v23, %v5237_v51  ;;  %v2451_v43 = vadd.f32 %v2444_v37, %v5240_v54  ;;  %v2407_v20 = vpop.f32.mrf.mxu0  ;;  %v2420_v10 = vpop.f32.mrf.mxu1  ;;  %v4264_v51 = vld [vmem:[#allocation8 + $0x70] sm:$0xf0]  ;;  %2777 = vmatpush.bf16.msrb.mxu3 %v4291_v21  ;;  %v4710_v37 = vld [vmem:[#allocation8 + $0x24] sm:$0xf] }
 0x48c   :  { %v4267_v28 = vor.u32 %v4718_v8, %v4264_v51  ;;  %v4240_v20 = vld [vmem:[#allocation8 + $0x38] sm:$0xf0]  ;;  %v4214_v10 = vld [vmem:[#allocation8] sm:$0xf]  ;;  %v4235_v9 = vor.u32 %v4710_v37, %v4232_v25  ;;  %v4707_v51 = vld [vmem:[#allocation8 + $0xc] sm:$0xf] }
 0x48d   :  { %v4209_v7 = vmul.f32 -1.442695, %v2450_v4  ;;  %v4210_v14 = vmul.f32 -1.442695, %v2451_v43  ;;  %2741 = vmatpush.bf16.msrb.mxu0 %v4231_v33  ;;  %v4713_v4 = vld [vmem:[#allocation8 + $0x34] sm:$0xf0]  ;;  %v4215_v8 = vor.u32 %v4708_v17, %v4214_v10 }
 0x48e   :  { %v4873_v26 = vpop.eup %4872  ;;  %2752 = vmatpush.bf16.msrb.mxu1 %v4267_v28  ;;  %2765 = vmatpush.bf16.msrb.mxu2 %v4271_v35  ;;  %v4711_v43 = vld [vmem:[#allocation8 + $0x2c] sm:$0xf]  ;;  %v4239_v21 = vor.u32 %v4713_v4, %v4238_v61 }
 0x48f   :  { %v4875_v13 = vpop.eup %4874  ;;  %v5563_v54 = vadd.f32 1.0, %v4873_v26  ;;  %4876 = vpow2.f32 %v4209_v7  ;;  %2778 = vmatpush.bf16.msrb.mxu3 %v4275_v22  ;;  %v4243_v7 = vor.u32 %v4711_v43, %v4240_v20  ;;  %v4709_v26 = vld [vmem:[#allocation8 + $0x14] sm:$0xf0] }
 0x490   :  { %v5565_v38 = vadd.f32 1.0, %v4875_v13  ;;  %4878 = vpow2.f32 %v4210_v14  ;;  %v4216_v14 = vld [vmem:[#allocation8 + $0x10] sm:$0xf0]  ;;  %v4224_v13 = vld [vmem:[#allocation8 + $0x18] sm:$0xf0]  ;;  %v4223_v15 = vor.u32 %v4709_v26, %v4222_v24 }
 0x491   :  { %4880 = vrcp.f32 %v5563_v54  ;;  %v4219_v28 = vor.u32 %v4706_v19, %v4216_v14  ;;  %2742 = vmatpush.bf16.msrb.mxu0 %v4215_v8  ;;  %v4227_v34 = vor.u32 %v4707_v51, %v4224_v13  ;;  %vm2473_vm6 = vweird.f32 %v5563_v54  ;;  %v4766_v14 = vld [vmem:[#allocation8 + $0xe4] sm:$0xf]  ;;  %v4461_v26 = vld [vmem:[#allocation8 + $0xf0] sm:$0xf0]  ;;  %v4767_v13 = vld [vmem:[#allocation8 + $0xec] sm:$0xf] }
 0x492   :  { %4882 = vrcp.f32 %v5565_v38  ;;  %v2433_v41 = vpop.f32.mrf.mxu2  ;;  %v2446_v16 = vpop.f32.mrf.mxu3  ;;  %2753 = vmatpush.bf16.msrb.mxu1 %v4251_v30  ;;  %2766 = vmatpush.bf16.msrb.mxu2 %v4255_v45  ;;  %vm2488_vm2 = vweird.f32 %v5565_v38  ;;  %v2492_v6 = vand.u32 2147483647, %v5565_v38  ;;  %v2494_v40 = vand.u32 2147483648, %v5565_v38 }
 0x493   :  { %2779 = vmatpush.bf16.msrb.mxu3 %v4259_v49  ;;  %v2479_v45 = vand.u32 2147483648, %v5563_v54  ;;  %v2477_v48 = vand.u32 2147483647, %v5563_v54  ;;  %v4464_v8 = vor.u32 %v4766_v14, %v4461_v26 }
 0x494   :  { %vm2493_vm10 = vcmp.eq.f32.partialorder %v2492_v6, 8.507059e+37  ;;  %v4763_v6 = vld [vmem:[#allocation8 + $0xcc] sm:$0xf] }
 0x495   :  { %v4877_v36 = vpop.eup %4876  ;;  %v2480_v37 = vor.u32 1.1754944e-38, %v2479_v45  ;;  %vm2478_vm11 = vcmp.eq.f32.partialorder %v2477_v48, 8.507059e+37  ;;  %v4760_v45 = vld [vmem:[#allocation8 + $0xac] sm:$0xf0] }
 0x496   :  { %v4879_v0 = vpop.eup %4878  ;;  %v5569_v47 = vadd.f32 1.0, %v4877_v36  ;;  %2754 = vmatpush.bf16.msrb.mxu1 %v4235_v9  ;;  %2767 = vmatpush.bf16.msrb.mxu2 %v4239_v21  ;;  %v4459_v21 = vld [vmem:[#allocation8 + $0xe0] sm:$0xf] }
 0x497   :  { %v5571_v2 = vpop.eup %4880  ;;  %v5573_v31 = vadd.f32 1.0, %v4879_v0  ;;  %2780 = vmatpush.bf16.msrb.mxu3 %v4243_v7  ;;  %v2495_v0 = vor.u32 1.1754944e-38, %v2494_v40  ;;  %v4768_v7 = vld [vmem:[#allocation8 + $0xec] sm:$0xf0]  ;;  %v4453_v40 = vld [vmem:[#allocation8 + $0xd8] sm:$0xf0] }
 0x498   :  { %v5575_v23 = vpop.eup %4882  ;;  %4884 = vrcp.f32 %v5569_v47  ;;  %v2469_v56 = vmul.f32 %v5571_v2, %v5563_v54  ;;  %v2509_v16 = vand.u32 2147483648, %v5569_v47  ;;  %v2507_v3 = vand.u32 2147483647, %v5569_v47 }
 0x499   :  { %v2484_v58 = vmul.f32 %v5575_v23, %v5565_v38  ;;  %4886 = vrcp.f32 %v5573_v31  ;;  %vm2489_vm0 = vweird.f32 %v5575_v23  ;;  %vm2474_vm3 = vweird.f32 %v5571_v2 }
 0x49a   :  { %v2470_v29 = vsub.f32 1.0, %v2469_v56  ;;  %2755 = vmatpush.bf16.msrb.mxu1 %v4219_v28  ;;  %2768 = vmatpush.bf16.msrb.mxu2 %v4223_v15  ;;  %vm5598_vm4 = vmor %vm2488_vm2, %vm2489_vm0  ;;  %vm2503_vm5 = vweird.f32 %v5569_v47  ;;  %v2510_v38 = vor.u32 1.1754944e-38, %v2509_v16  ;;  %vm2508_vm8 = vcmp.eq.f32.partialorder %v2507_v3, 8.507059e+37  ;;  %v4443_v15 = vld [vmem:[#allocation8 + $0xc0] sm:$0xf] }
 0x49b   :  { %v2485_v52 = vsub.f32 1.0, %v2484_v58  ;;  %2781 = vmatpush.bf16.msrb.mxu3 %v4227_v34  ;;  %vm2475_vm9 = vmor %vm2473_vm6, %vm2474_vm3  ;;  %v2524_v20 = vand.u32 2147483648, %v5573_v31  ;;  %vm2518_vm13 = vweird.f32 %v5573_v31  ;;  %v4460_v24 = vor.u32 %v4768_v7, %v4459_v21  ;;  %v4755_v21 = vld [vmem:[#allocation8 + $0x8c] sm:$0xf]  ;;  %v4421_v7 = vld [vmem:[#allocation8 + $0x98] sm:$0xf0] }
 0x49c   :  { %v2471_v39 = vmul.f32 %v5571_v2, %v2470_v29  ;;  %v4467_v29 = vld [vmem:[#allocation8 + $0xe8] sm:$0xf]  ;;  %v4456_v44 = vor.u32 %v4763_v6, %v4453_v40  ;;  %v4424_v14 = vor.u32 %v4755_v21, %v4421_v7  ;;  %v4746_v40 = vld [vmem:[#allocation8 + $0x44] sm:$0xf]  ;;  %v4349_v21 = vld [vmem:[#allocation8 + $0x10] sm:$0xf0] }
 0x49d   :  { %v2486_v32 = vmul.f32 %v5575_v23, %v2485_v52  ;;  %v2525_v17 = vor.u32 1.1754944e-38, %v2524_v20  ;;  %3074 = vmatpush.bf16.msra.mxu0 %v4460_v24  ;;  %v4419_v20 = vld [vmem:[#allocation8 + $0x88] sm:$0xf] }
 0x49e   :  { %v4885_v53 = vpop.eup %4884  ;;  %v2472_v42 = vadd.f32 %v5571_v2, %v2471_v39  ;;  %3087 = vmatpush.bf16.msra.mxu1 %v4464_v8  ;;  %v4451_v39 = vld [vmem:[#allocation8 + $0xc8] sm:$0xf]  ;;  %v4752_v8 = vld [vmem:[#allocation8 + $0x6c] sm:$0xf0] }
 0x49f   :  { %v2499_v35 = vmul.f32 %v4885_v53, %v5569_v47  ;;  %v4887_v27 = vpop.eup %4886  ;;  %v2487_v11 = vadd.f32 %v5575_v23, %v2486_v32  ;;  %vm2504_vm1 = vweird.f32 %v4885_v53  ;;  %v4764_v32 = vld [vmem:[#allocation8 + $0xcc] sm:$0xf0]  ;;  %v4355_v7 = vld [vmem:[#allocation8 + $0x8] sm:$0xf] }
 0x4a0   :  { %v2514_v30 = vmul.f32 %v4887_v27, %v5573_v31  ;;  %vm2505_vm7 = vmor %vm2503_vm5, %vm2504_vm1  ;;  %v2476_v47 = vsel %vm2475_vm9, %v5571_v2, %v2472_v42  ;;  %vm2519_vm12 = vweird.f32 %v4887_v27  ;;  %v2522_v2 = vand.u32 2147483647, %v5573_v31  ;;  %v4769_v31 = vld [vmem:[#allocation8 + $0xf4] sm:$0xf0] }
 0x4a1   :  { %v2500_v41 = vsub.f32 1.0, %v2499_v35  ;;  %v2491_v18 = vsel %vm5598_vm4, %v5575_v23, %v2487_v11  ;;  %v2481_v56 = vsel %vm2478_vm11, %v2480_v37, %v2476_v47  ;;  %vm2520_vm14 = vmor %vm2518_vm13, %vm2519_vm12  ;;  %v4468_v51 = vor.u32 %v4769_v31, %v4467_v29  ;;  %v4762_v35 = vld [vmem:[#allocation8 + $0xc4] sm:$0xf]  ;;  %v4761_v47 = vld [vmem:[#allocation8 + $0xb4] sm:$0xf0] }
 0x4a2   :  { %v2515_v46 = vsub.f32 1.0, %v2514_v30  ;;  %v2496_v25 = vsel %vm2493_vm10, %v2495_v0, %v2491_v18  ;;  %vm2523_vm15 = vcmp.eq.f32.partialorder %v2522_v2, 8.507059e+37  ;;  %v4444_v34 = vor.u32 %v4764_v32, %v4443_v15  ;;  %v4429_v0 = vld [vmem:[#allocation8 + $0xb0] sm:$0xf0]  ;;  %v4757_v2 = vld [vmem:[#allocation8 + $0x94] sm:$0xf0] }
 0x4a3   :  { %v2501_v22 = vmul.f32 %v4885_v53, %v2500_v41  ;;  %v2530_v58 = vmul.f32 %v2496_v25, %v5553_v60  ;;  %3100 = vmatpush.bf16.msra.mxu2 %v4468_v51  ;;  %v4765_v41 = vld [vmem:[#allocation8 + $0xd4] sm:$0xf0]  ;;  %v4411_v25 = vld [vmem:[#allocation8 + $0x80] sm:$0xf]  ;;  %v4750_v51 = vld [vmem:[#allocation8 + $0x64] sm:$0xf] }
 0x4a4   :  { %v2516_v54 = vmul.f32 %v4887_v27, %v2515_v46  ;;  %v4452_v3 = vor.u32 %v4765_v41, %v4451_v39  ;;  %3075 = vmatpush.bf16.msra.mxu0 %v4444_v34  ;;  %v4435_v46 = vld [vmem:[#allocation8 + $0xa8] sm:$0xf]  ;;  %v4395_v29 = vld [vmem:[#allocation8 + $0x60] sm:$0xf]  ;;  %v4753_v32 = vld [vmem:[#allocation8 + $0x74] sm:$0xf0] }
 0x4a5   :  { %v2502_v36 = vadd.f32 %v4885_v53, %v2501_v22  ;;  %v4403_v15 = vld [vmem:[#allocation8 + $0x68] sm:$0xf]  ;;  %v4405_v39 = vld [vmem:[#allocation8 + $0x78] sm:$0xf0]  ;;  %v4379_v41 = vld [vmem:[#allocation8 + $0x40] sm:$0xf] }
 0x4a6   :  { %v2517_v43 = vadd.f32 %v4887_v27, %v2516_v54  ;;  %v4404_v34 = vor.u32 %v4753_v32, %v4403_v15 }
 0x4a7   :  { %v2506_v12 = vsel %vm2505_vm7, %v4885_v53, %v2502_v36  ;;  %v4469_v53 = vld [vmem:[#allocation8 + $0xf8] sm:$0xf0]  ;;  %3101 = vmatpush.bf16.msra.mxu2 %v4452_v3  ;;  %v4427_v36 = vld [vmem:[#allocation8 + $0xa0] sm:$0xf] }
 0x4a8   :  { %v2511_v49 = vsel %vm2508_vm8, %v2510_v38, %v2506_v12  ;;  %v2521_v10 = vsel %vm2520_vm14, %v4887_v27, %v2517_v43  ;;  %v4472_v28 = vor.u32 %v4767_v13, %v4469_v53  ;;  %v4445_v27 = vld [vmem:[#allocation8 + $0xd0] sm:$0xf0]  ;;  %v4758_v38 = vld [vmem:[#allocation8 + $0xa4] sm:$0xf]  ;;  %v4428_v12 = vor.u32 %v4760_v45, %v4427_v36  ;;  %v4749_v36 = vld [vmem:[#allocation8 + $0x54] sm:$0xf0] }
 0x4a9   :  { %v2528_v33 = vmul.f32 2.0, %v2511_v49  ;;  %v2526_v19 = vsel %vm2523_vm15, %v2525_v17, %v2521_v10  ;;  %v4448_v22 = vor.u32 %v4762_v35, %v4445_v27  ;;  %v4432_v49 = vor.u32 %v4758_v38, %v4429_v0  ;;  %v4413_v43 = vld [vmem:[#allocation8 + $0x90] sm:$0xf0]  ;;  %v4751_v27 = vld [vmem:[#allocation8 + $0x6c] sm:$0xf] }
 0x4aa   :  { %3113 = vmatpush.bf16.msra.mxu3 %v4472_v28  ;;  %3076 = vmatpush.bf16.msra.mxu0 %v4428_v12  ;;  %v4396_v53 = vor.u32 %v4752_v8, %v4395_v29  ;;  %v4408_v3 = vor.u32 %v4751_v27, %v4405_v39  ;;  %v4363_v12 = vld [vmem:[#allocation8 + $0x20] sm:$0xf]  ;;  %v4739_v29 = vld [vmem:[#allocation8 + $0xc] sm:$0xf] }
 0x4ab   :  { %v4211_v61 = vadd.f32 -1.0, %v2528_v33  ;;  %3088 = vmatpush.bf16.msra.mxu1 %v4448_v22  ;;  %v4759_v33 = vld [vmem:[#allocation8 + $0xac] sm:$0xf]  ;;  %v4748_v22 = vld [vmem:[#allocation8 + $0x4c] sm:$0xf0] }
 0x4ac   :  { %v4380_v6 = vor.u32 %v4748_v22, %v4379_v41 }
 0x4ad   :  { %v2531_v4 = vmul.f32 %v4211_v61, %v2481_v56  ;;  %v4756_v61 = vld [vmem:[#allocation8 + $0x8c] sm:$0xf0]  ;;  %v4754_v56 = vld [vmem:[#allocation8 + $0x84] sm:$0xf] }
 0x4ae   :  { %3114 = vmatpush.bf16.msra.mxu3 %v4456_v44  ;;  %v4387_v44 = vld [vmem:[#allocation8 + $0x48] sm:$0xf] }
 0x4af   :  { %v5611_v23 = vadd.f32 %v2531_v4, %v2530_v58  ;;  %3089 = vmatpush.bf16.msra.mxu1 %v4432_v49  ;;  %v4412_v4 = vor.u32 %v4756_v61, %v4411_v25  ;;  %v4388_v38 = vor.u32 %v4749_v36, %v4387_v44  ;;  %v4742_v25 = vld [vmem:[#allocation8 + $0x24] sm:$0xf]  ;;  %v4365_v61 = vld [vmem:[#allocation8 + $0x30] sm:$0xf0] }
 0x4b1   :  { %4888 = vtanh.f32 %v5611_v23  ;;  %3077 = vmatpush.bf16.msra.mxu0 %v4412_v4  ;;  %v4745_v4 = vld [vmem:[#allocation8 + $0x34] sm:$0xf0] }
 0x4b5   :  { %3078 = vmatpush.bf16.msra.mxu0 %v4396_v53 }
 0x4b7   :  { %v4889_v52 = vpop.eup %4888 }
 0x4b8   :  { %v2534_v60 = vmul.f32 %v4889_v52, %v2526_v19 }
 0x4b9   :  { %3079 = vmatpush.bf16.msra.mxu0 %v4380_v6 }
 0x4ba   :  { %v2535_v9 = vpack.c.bf16 %v2534_v60, %v2534_v60  ;;  %v4416_v60 = vor.u32 %v4754_v56, %v4413_v43  ;;  %v4371_v56 = vld [vmem:[#allocation8 + $0x28] sm:$0xf]  ;;  %v4743_v43 = vld [vmem:[#allocation8 + $0x2c] sm:$0xf] }
 0x4bc   :  { %2537 = vst [vmem:[#allocation11 + $0x14] sm:$0xf] %v2535_v9  ;;  %2743 = vmatmul.bf16.vlgmr.msrb.gmra.mxu0 %v2535_v9  ;;  %2756 = vmatmul.bf16.vlgmr.msrb.gmra.mxu1 %v2535_v9 }
 0x4bd   :  { %2769 = vmatmul.bf16.vlgmr.msrb.gmra.mxu2 %v2535_v9  ;;  %2782 = vmatmul.bf16.vlgmr.msrb.gmra.mxu3 %v2535_v9  ;;  %v4420_v9 = vor.u32 %v4757_v2, %v4419_v20  ;;  %v4373_v20 = vld [vmem:[#allocation8 + $0x38] sm:$0xf0]  ;;  %v4347_v2 = vld [vmem:[#allocation8] sm:$0xf] }
 0x4be   :  { %3090 = vmatpush.bf16.msra.mxu1 %v4416_v60  ;;  %v4372_v60 = vor.u32 %v4745_v4, %v4371_v56 }
 0x539   :  { %v2744_v16 = vpop.f32.mrf.mxu0  ;;  %v2757_v11 = vpop.f32.mrf.mxu1 }
 0x53a   :  { %v2787_v30 = vadd.f32 %v2744_v16, %v5243_v55  ;;  %v2788_v42 = vadd.f32 %v2757_v11, %v5246_v57  ;;  %v4436_v55 = vor.u32 %v4761_v47, %v4435_v46  ;;  %v4437_v57 = vld [vmem:[#allocation8 + $0xb8] sm:$0xf0]  ;;  %v4744_v47 = vld [vmem:[#allocation8 + $0x2c] sm:$0xf0] }
 0x53b   :  { %v4440_v37 = vor.u32 %v4759_v33, %v4437_v57  ;;  %v4364_v57 = vor.u32 %v4744_v47, %v4363_v12 }
 0x53c   :  { %v4340_v48 = vmul.f32 -1.442695, %v2787_v30  ;;  %v4341_v18 = vmul.f32 -1.442695, %v2788_v42  ;;  %3102 = vmatpush.bf16.msra.mxu2 %v4436_v55  ;;  %v4381_v30 = vld [vmem:[#allocation8 + $0x50] sm:$0xf0] }
 0x53d   :  { %3115 = vmatpush.bf16.msra.mxu3 %v4440_v37  ;;  %v4384_v42 = vor.u32 %v4746_v40, %v4381_v30  ;;  %3080 = vmatpush.bf16.msra.mxu0 %v4364_v57 }
 0x53e   :  { %4890 = vpow2.f32 %v4340_v48  ;;  %v4747_v48 = vld [vmem:[#allocation8 + $0x4c] sm:$0xf] }
 0x53f   :  { %4892 = vpow2.f32 %v4341_v18  ;;  %v4389_v18 = vld [vmem:[#allocation8 + $0x58] sm:$0xf0] }
 0x540   :  { %v2770_v54 = vpop.f32.mrf.mxu2  ;;  %v2783_v58 = vpop.f32.mrf.mxu3  ;;  %3103 = vmatpush.bf16.msra.mxu2 %v4420_v9  ;;  %v4392_v46 = vor.u32 %v4747_v48, %v4389_v18  ;;  %v4376_v9 = vor.u32 %v4743_v43, %v4373_v20 }
 0x541   :  { %v2789_v10 = vadd.f32 %v2770_v54, %v5249_v59  ;;  %v2790_v17 = vadd.f32 %v2783_v58, %v5252_v62  ;;  %v2746_v52 = vpop.f32.mrf.mxu0  ;;  %v2759_v19 = vpop.f32.mrf.mxu1  ;;  %v4397_v59 = vld [vmem:[#allocation8 + $0x70] sm:$0xf0]  ;;  %3116 = vmatpush.bf16.msra.mxu3 %v4424_v14  ;;  %v4741_v14 = vld [vmem:[#allocation8 + $0x14] sm:$0xf0] }
 0x542   :  { %v4400_v28 = vor.u32 %v4750_v51, %v4397_v59  ;;  %v4738_v52 = vld [vmem:[#allocation8 + $0x4] sm:$0xf]  ;;  %v4368_v19 = vor.u32 %v4742_v25, %v4365_v61  ;;  %v4356_v59 = vor.u32 %v4741_v14, %v4355_v7 }
 0x543   :  { %v4342_v24 = vmul.f32 -1.442695, %v2789_v10  ;;  %v4343_v26 = vmul.f32 -1.442695, %v2790_v17  ;;  %v4740_v10 = vld [vmem:[#allocation8 + $0xc] sm:$0xf0]  ;;  %v4352_v51 = vor.u32 %v4738_v52, %v4349_v21 }
 0x544   :  { %v4891_v31 = vpop.eup %4890  ;;  %3091 = vmatpush.bf16.msra.mxu1 %v4400_v28  ;;  %3104 = vmatpush.bf16.msra.mxu2 %v4404_v34 }
 0x545   :  { %v4893_v13 = vpop.eup %4892  ;;  %v5621_v62 = vadd.f32 1.0, %v4891_v31  ;;  %4894 = vpow2.f32 %v4342_v24  ;;  %3117 = vmatpush.bf16.msra.mxu3 %v4408_v3  ;;  %v4357_v31 = vld [vmem:[#allocation8 + $0x18] sm:$0xf0] }
 0x546   :  { %v5623_v35 = vadd.f32 1.0, %v4893_v13  ;;  %4896 = vpow2.f32 %v4343_v26  ;;  %v4348_v26 = vor.u32 %v4740_v10, %v4347_v2  ;;  %v4360_v28 = vor.u32 %v4739_v29, %v4357_v31 }
 0x547   :  { %4898 = vrcp.f32 %v5621_v62  ;;  %vm2812_vm6 = vweird.f32 %v5621_v62  ;;  %v2816_v44 = vand.u32 2147483647, %v5621_v62 }
 0x548   :  { %4900 = vrcp.f32 %v5623_v35  ;;  %v2772_v16 = vpop.f32.mrf.mxu2  ;;  %v2785_v11 = vpop.f32.mrf.mxu3  ;;  %3092 = vmatpush.bf16.msra.mxu1 %v4384_v42  ;;  %3105 = vmatpush.bf16.msra.mxu2 %v4388_v38  ;;  %vm2827_vm2 = vweird.f32 %v5623_v35  ;;  %v2833_v22 = vand.u32 2147483648, %v5623_v35  ;;  %v2818_v42 = vand.u32 2147483648, %v5621_v62 }
 0x549   :  { %3118 = vmatpush.bf16.msra.mxu3 %v4392_v46  ;;  %3081 = vmatpush.bf16.msra.mxu0 %v4348_v26  ;;  %v2831_v11 = vand.u32 2147483647, %v5623_v35  ;;  %vm2817_vm11 = vcmp.eq.f32.partialorder %v2816_v44, 8.507059e+37 }
 0x54a   :  { %v2834_v38 = vor.u32 1.1754944e-38, %v2833_v22 }
 0x54b   :  { %v4895_v45 = vpop.eup %4894  ;;  %vm2832_vm10 = vcmp.eq.f32.partialorder %v2831_v11, 8.507059e+37 }
 0x54c   :  { %v4897_v0 = vpop.eup %4896  ;;  %v5627_v49 = vadd.f32 1.0, %v4895_v45  ;;  %3093 = vmatpush.bf16.msra.mxu1 %v4368_v19  ;;  %3106 = vmatpush.bf16.msra.mxu2 %v4372_v60 }
 0x54d   :  { %v5629_v33 = vpop.eup %4898  ;;  %v5631_v55 = vadd.f32 1.0, %v4897_v0  ;;  %3119 = vmatpush.bf16.msra.mxu3 %v4376_v9 }
 0x54e   :  { %v5633_v37 = vpop.eup %4900  ;;  %4902 = vrcp.f32 %v5627_v49  ;;  %v2808_v54 = vmul.f32 %v5629_v33, %v5621_v62  ;;  %v2848_v27 = vand.u32 2147483648, %v5627_v49  ;;  %v2846_v16 = vand.u32 2147483647, %v5627_v49 }
 0x54f   :  { %v2823_v58 = vmul.f32 %v5633_v37, %v5623_v35  ;;  %4904 = vrcp.f32 %v5631_v55  ;;  %vm2828_vm0 = vweird.f32 %v5633_v37  ;;  %vm2813_vm3 = vweird.f32 %v5629_v33 }
 0x550   :  { %v2809_v24 = vsub.f32 1.0, %v2808_v54  ;;  %3094 = vmatpush.bf16.msra.mxu1 %v4352_v51  ;;  %3107 = vmatpush.bf16.msra.mxu2 %v4356_v59  ;;  %vm5656_vm4 = vmor %vm2827_vm2, %vm2828_vm0  ;;  %vm2842_vm5 = vweird.f32 %v5627_v49  ;;  %v2849_v35 = vor.u32 1.1754944e-38, %v2848_v27  ;;  %vm2847_vm8 = vcmp.eq.f32.partialorder %v2846_v16, 8.507059e+37 }
 0x551   :  { %v2824_v17 = vsub.f32 1.0, %v2823_v58  ;;  %3120 = vmatpush.bf16.msra.mxu3 %v4360_v28  ;;  %vm2814_vm9 = vmor %vm2812_vm6, %vm2813_vm3  ;;  %v2863_v54 = vand.u32 2147483648, %v5631_v55  ;;  %vm2857_vm13 = vweird.f32 %v5631_v55 }
 0x552   :  { %v2810_v32 = vmul.f32 %v5629_v33, %v2809_v24 }
 0x553   :  { %v2825_v13 = vmul.f32 %v5633_v37, %v2824_v17  ;;  %v2864_v4 = vor.u32 1.1754944e-38, %v2863_v54 }
 0x554   :  { %v4903_v8 = vpop.eup %4902  ;;  %v2811_v6 = vadd.f32 %v5629_v33, %v2810_v32 }
 0x555   :  { %v2838_v53 = vmul.f32 %v4903_v8, %v5627_v49  ;;  %v4905_v15 = vpop.eup %4904  ;;  %v2826_v39 = vadd.f32 %v5633_v37, %v2825_v13  ;;  %vm2843_vm1 = vweird.f32 %v4903_v8  ;;  %v2819_v49 = vor.u32 1.1754944e-38, %v2818_v42 }
 0x556   :  { %v2853_v3 = vmul.f32 %v4905_v15, %v5631_v55  ;;  %vm2844_vm7 = vmor %vm2842_vm5, %vm2843_vm1  ;;  %v2815_v12 = vsel %vm2814_vm9, %v5629_v33, %v2811_v6  ;;  %vm2858_vm12 = vweird.f32 %v4905_v15  ;;  %v2861_v33 = vand.u32 2147483647, %v5631_v55 }
 0x557   :  { %v2839_v34 = vsub.f32 1.0, %v2838_v53  ;;  %v2830_v36 = vsel %vm5656_vm4, %v5633_v37, %v2826_v39  ;;  %v2820_v57 = vsel %vm2817_vm11, %v2819_v49, %v2815_v12  ;;  %vm2859_vm14 = vmor %vm2857_vm13, %vm2858_vm12 }
 0x558   :  { %v2854_v18 = vsub.f32 1.0, %v2853_v3  ;;  %v2835_v46 = vsel %vm2832_vm10, %v2834_v38, %v2830_v36  ;;  %vm2862_vm15 = vcmp.eq.f32.partialorder %v2861_v33, 8.507059e+37 }
 0x559   :  { %v2840_v41 = vmul.f32 %v4903_v8, %v2839_v34  ;;  %v2869_v25 = vmul.f32 %v2835_v46, %v5611_v23 }
 0x55a   :  { %v2855_v62 = vmul.f32 %v4905_v15, %v2854_v18 }
 0x55b   :  { %v2841_v30 = vadd.f32 %v4903_v8, %v2840_v41 }
 0x55c   :  { %v2856_v56 = vadd.f32 %v4905_v15, %v2855_v62 }
 0x55d   :  { %v2845_v45 = vsel %vm2844_vm7, %v4903_v8, %v2841_v30 }
 0x55e   :  { %v2850_v48 = vsel %vm2847_vm8, %v2849_v35, %v2845_v45  ;;  %v2860_v58 = vsel %vm2859_vm14, %v4905_v15, %v2856_v56 }
 0x55f   :  { %v2867_v0 = vmul.f32 2.0, %v2850_v48  ;;  %v2865_v20 = vsel %vm2862_vm15, %v2864_v4, %v2860_v58 }
 0x561   :  { %v4344_v47 = vadd.f32 -1.0, %v2867_v0 }
 0x563   :  { %v2870_v61 = vmul.f32 %v4344_v47, %v2820_v57 }
 0x565   :  { %v5669_v37 = vadd.f32 %v2870_v61, %v2869_v25 }
 0x567   :  { %4906 = vtanh.f32 %v5669_v37 }
 0x56d   :  { %v4907_v43 = vpop.eup %4906 }
 0x56e   :  { %v2873_v23 = vmul.f32 %v4907_v43, %v2865_v20 }
 0x570   :  { %v2874_v2 = vpack.c.bf16 %v2873_v23, %v2873_v23 }
 0x572   :  { %2876 = vst [vmem:[#allocation11 + $0x18] sm:$0xf] %v2874_v2  ;;  %3082 = vmatmul.bf16.vlgmr.msra.gmra.mxu0 %v2874_v2  ;;  %3095 = vmatmul.bf16.vlgmr.msra.gmra.mxu1 %v2874_v2 }
 0x573   :  { %3108 = vmatmul.bf16.vlgmr.msra.gmra.mxu2 %v2874_v2  ;;  %3121 = vmatmul.bf16.vlgmr.msra.gmra.mxu3 %v2874_v2 }
 0x5ef   :  { %v3083_v10 = vpop.f32.mrf.mxu0  ;;  %v3096_v17 = vpop.f32.mrf.mxu1 }
 0x5f0   :  { %v3126_v52 = vadd.f32 %v3083_v10, %v5255_v63  ;;  %v3127_v19 = vadd.f32 %v3096_v17, %v5258_v1 }
 0x5f2   :  { %v4473_v55 = vmul.f32 -1.442695, %v3126_v52  ;;  %v4474_v60 = vmul.f32 -1.442695, %v3127_v19 }
 0x5f4   :  { %4908 = vpow2.f32 %v4473_v55 }
 0x5f5   :  { %4910 = vpow2.f32 %v4474_v60 }
 0x5f6   :  { %v3109_v9 = vpop.f32.mrf.mxu2  ;;  %v3122_v21 = vpop.f32.mrf.mxu3 }
 0x5f7   :  { %v3128_v7 = vadd.f32 %v3109_v9, %v5265_v50  ;;  %v3129_v14 = vadd.f32 %v3122_v21, %v5268_v5  ;;  %v3085_v24 = vpop.f32.mrf.mxu0  ;;  %v3098_v26 = vpop.f32.mrf.mxu1 }
 0x5f9   :  { %v4475_v29 = vmul.f32 -1.442695, %v3128_v7  ;;  %v4476_v31 = vmul.f32 -1.442695, %v3129_v14 }
 0x5fa   :  { %v4909_v8 = vpop.eup %4908 }
 0x5fb   :  { %v4911_v51 = vpop.eup %4910  ;;  %v3142_v59 = vadd.f32 1.0, %v4909_v8  ;;  %4912 = vpow2.f32 %v4475_v29 }
 0x5fc   :  { %v3143_v63 = vadd.f32 1.0, %v4911_v51  ;;  %4914 = vpow2.f32 %v4476_v31 }
 0x5fd   :  { %4916 = vrcp.f32 %v3142_v59  ;;  %vm3151_vm6 = vweird.f32 %v3142_v59  ;;  %v3157_v0 = vand.u32 2147483648, %v3142_v59  ;;  %v3155_v46 = vand.u32 2147483647, %v3142_v59 }
 0x5fe   :  { %4918 = vrcp.f32 %v3143_v63  ;;  %v3111_v1 = vpop.f32.mrf.mxu2  ;;  %v3124_v13 = vpop.f32.mrf.mxu3  ;;  %vm3166_vm2 = vweird.f32 %v3143_v63  ;;  %v3170_v36 = vand.u32 2147483647, %v3143_v63  ;;  %v3172_v45 = vand.u32 2147483648, %v3143_v63 }
 0x5ff   :  { %v3158_v33 = vor.u32 1.1754944e-38, %v3157_v0  ;;  %vm3156_vm11 = vcmp.eq.f32.partialorder %v3155_v46, 8.507059e+37 }
 0x600   :  { %v3173_v62 = vor.u32 1.1754944e-38, %v3172_v45  ;;  %vm3171_vm10 = vcmp.eq.f32.partialorder %v3170_v36, 8.507059e+37 }
 0x601   :  { %v4913_v53 = vpop.eup %4912 }
 0x602   :  { %v4915_v28 = vpop.eup %4914  ;;  %v3144_v15 = vadd.f32 1.0, %v4913_v53 }
 0x603   :  { %v4917_v50 = vpop.eup %4916  ;;  %v5679_v32 = vadd.f32 1.0, %v4915_v28 }
 0x604   :  { %v4919_v5 = vpop.eup %4918  ;;  %4920 = vrcp.f32 %v3144_v15  ;;  %v3147_v34 = vmul.f32 %v4917_v50, %v3142_v59  ;;  %v3187_v30 = vand.u32 2147483648, %v3144_v15  ;;  %v3185_v44 = vand.u32 2147483647, %v3144_v15 }
 0x605   :  { %v3162_v27 = vmul.f32 %v4919_v5, %v3143_v63  ;;  %4922 = vrcp.f32 %v5679_v32  ;;  %vm3167_vm0 = vweird.f32 %v4919_v5  ;;  %vm3152_vm3 = vweird.f32 %v4917_v50 }
 0x606   :  { %v3148_v41 = vsub.f32 1.0, %v3147_v34  ;;  %vm5683_vm4 = vmor %vm3166_vm2, %vm3167_vm0  ;;  %vm3181_vm5 = vweird.f32 %v3144_v15  ;;  %v3188_v49 = vor.u32 1.1754944e-38, %v3187_v30  ;;  %vm3186_vm8 = vcmp.eq.f32.partialorder %v3185_v44, 8.507059e+37 }
 0x607   :  { %v3163_v39 = vsub.f32 1.0, %v3162_v27  ;;  %vm3153_vm9 = vmor %vm3151_vm6, %vm3152_vm3  ;;  %v3202_v52 = vand.u32 2147483648, %v5679_v32  ;;  %vm3196_vm13 = vweird.f32 %v5679_v32  ;;  %v3200_v19 = vand.u32 2147483647, %v5679_v32 }
 0x608   :  { %v3149_v6 = vmul.f32 %v4917_v50, %v3148_v41 }
 0x609   :  { %v3164_v11 = vmul.f32 %v4919_v5, %v3163_v39  ;;  %v3203_v60 = vor.u32 1.1754944e-38, %v3202_v52  ;;  %vm3201_vm15 = vcmp.eq.f32.partialorder %v3200_v19, 8.507059e+37 }
 0x60a   :  { %v4921_v16 = vpop.eup %4920  ;;  %v3150_v48 = vadd.f32 %v4917_v50, %v3149_v6 }
 0x60b   :  { %v3177_v22 = vmul.f32 %v4921_v16, %v3144_v15  ;;  %v4923_v3 = vpop.eup %4922  ;;  %v3165_v42 = vadd.f32 %v4919_v5, %v3164_v11  ;;  %vm3182_vm1 = vweird.f32 %v4921_v16 }
 0x60c   :  { %v3192_v38 = vmul.f32 %v4923_v3, %v5679_v32  ;;  %vm3183_vm7 = vmor %vm3181_vm5, %vm3182_vm1  ;;  %v3154_v56 = vsel %vm3153_vm9, %v4917_v50, %v3150_v48  ;;  %vm3197_vm12 = vweird.f32 %v4923_v3 }
 0x60d   :  { %v3178_v40 = vsub.f32 1.0, %v3177_v22  ;;  %v3169_v47 = vsel %vm5683_vm4, %v4919_v5, %v3165_v42  ;;  %v3159_v43 = vsel %vm3156_vm11, %v3158_v33, %v3154_v56  ;;  %vm3198_vm14 = vmor %vm3196_vm13, %vm3197_vm12 }
 0x60e   :  { %v3193_v61 = vsub.f32 1.0, %v3192_v38  ;;  %v3174_v58 = vsel %vm3171_vm10, %v3173_v62, %v3169_v47 }
 0x60f   :  { %v3179_v35 = vmul.f32 %v4921_v16, %v3178_v40  ;;  %v3208_v23 = vmul.f32 %v3174_v58, %v5669_v37 }
 0x610   :  { %v3194_v20 = vmul.f32 %v4923_v3, %v3193_v61 }
 0x611   :  { %v3180_v12 = vadd.f32 %v4921_v16, %v3179_v35 }
 0x612   :  { %v3195_v17 = vadd.f32 %v4923_v3, %v3194_v20 }
 0x613   :  { %v3184_v57 = vsel %vm3183_vm7, %v4921_v16, %v3180_v12 }
 0x614   :  { %v3189_v25 = vsel %vm3186_vm8, %v3188_v49, %v3184_v57  ;;  %v3199_v55 = vsel %vm3198_vm14, %v4923_v3, %v3195_v17 }
 0x615   :  { %v3206_v54 = vmul.f32 2.0, %v3189_v25  ;;  %v3204_v9 = vsel %vm3201_vm15, %v3203_v60, %v3199_v55 }
 0x617   :  { %v4477_v4 = vadd.f32 -1.0, %v3206_v54 }
 0x619   :  { %v3209_v2 = vmul.f32 %v4477_v4, %v3159_v43 }
 0x61b   :  { %v3210_v10 = vadd.f32 %v3209_v2, %v3208_v23 }
 0x61d   :  { %4924 = vtanh.f32 %v3210_v10  ;;  %3217 = vst [vmem:[#allocation14] sm:$0xff] %v3210_v10 }
 0x623   :  { %v4925_v37 = vpop.eup %4924 }
 0x624   :  { %v3212_v21 = vmul.f32 %v4925_v37, %v3204_v9 }
 0x626   :  { %v3213_v7 = vpack.c.bf16 %v3212_v21, %v3212_v21  ;;  %3216 = vst [vmem:[#allocation12] sm:$0xff] %v3212_v21 }
 0x627   :  { %3241 = dma.vmem_to_hbm [thread:$0]  %s3237_s3, 128, %s3239_s21, [#allocation13]  }
 0x628   :  { %3215 = vst [vmem:[#allocation11 + $0x1c] sm:$0xf] %v3213_v7  ;;  %3252 = dma.vmem_to_hbm [thread:$0]  %s3248_s23, 128, %s3250_s26, [#allocation13]  }
 0x629   :  { %3230 = dma.vmem_to_hbm [thread:$0]  %s3223_s28, 512, %s3225_s7, [#allocation5], %s5108_s9, %s5108_s9, %s5109_s10  }
 0x62a   :  { %5100 = dma.done.wait [#allocation5], 512  }
 0x62b   :  { %5101 = vsyncadd [#allocation5], 4294966784 }
 0x62c   :  { %5102 = dma.done.wait [#allocation13], 256  }
 0x62d   :  { %5103 = vsyncadd [#allocation13], 4294967040 }
 0x62e   :  { %3265 = vsyncpa [#allocation4], 1 }
 0x62f   :  { %3266 = vsyncpa [#allocation7], 1 }
 0x630   :  { %3267 = vsyncpa [#allocation10], 1 }
 0x631   :  { %3268 = vsyncpa [#allocation5], 1 }
 0x632   :  { %3269 = vsyncpa [#allocation13], 1 }

// kernel: tpu_custom_call.1
= control target key start
LH: loop header
LB: loop body
LE: loop exit
PB: predicated region body
PF: predicated region fallthrough
CT: control target
= control target key end

     0   :  { %12 = vsyncpa [#allocation4], 0  ;;  %s5705_s0 = inlined_call_operand.hbm [shape: bf16[8,8,128], index: 0, kind: input, shape index: {}]   ;;  %s5706_s1 = inlined_call_operand.hbm [shape: bf16[128,512], index: 1, kind: input, shape index: {}]   ;;  %s5707_s2 = inlined_call_operand.hbm [shape: bf16[128,512], index: 2, kind: input, shape index: {}]   ;;  %s5708_s3 = inlined_call_operand.hbm [shape: f32[1,512], index: 3, kind: input, shape index: {}]   ;;  %s5709_s4 = inlined_call_operand.hbm [shape: bf16[8,8,128], index: 4, kind: output, shape index: {0}]   ;;  %s5710_s5 = inlined_call_operand.hbm [shape: f32[8,128], index: 5, kind: output, shape index: {1}]   ;;  %s5711_s6 = inlined_call_operand.hbm [shape: f32[8,128], index: 6, kind: output, shape index: {2}]  }
   0x1   :  { %13 = vsyncpa [#allocation7], 0 }
   0x2   :  { %14 = vsyncpa [#allocation10], 0 }
   0x3   :  { %15 = vsyncpa [#allocation5], 0  ;;  %s34_s23 = sshll.u32 %s5706_s1, 4  ;;  %s35_s23 = int_to_ptr.hbm [resolvable:$true] %s34_s23 }
   0x4   :  { %16 = vsyncpa [#allocation13], 0  ;;  %s5104_s24 = smov [#allocation6]   ;;  %s21_s28 = sshll.u32 %s5705_s0, 4  ;;  %s22_s28 = int_to_ptr.hbm [resolvable:$true] %s21_s28 }
   0x5   :  { %s36_s25 = sshll.u32 %s5104_s24, 4  ;;  %s5105_s29 = smov 256   ;;  %s37_s25 = int_to_ptr.vmem [resolvable:$true] %s36_s25 }
   0x6   :  { %s5106_s30 = smov 16   ;;  %s5107_s7 = smov [#allocation3]  }
   0x7   :  { %42 = dma.hbm_to_vmem [thread:$0]  %s35_s23, 4096, %s37_s25, [#allocation7], %s5105_s29, %s5105_s29, %s5106_s30  }
   0x8   :  { %s23_s8 = sshll.u32 %s5107_s7, 4  ;;  %s5108_s9 = smov 64   ;;  %s24_s8 = int_to_ptr.vmem [resolvable:$true] %s23_s8 }
   0x9   :  { %s5109_s10 = smov 4   ;;  %s47_s12 = sshll.u32 %s5707_s2, 4  ;;  %s48_s12 = int_to_ptr.hbm [resolvable:$true] %s47_s12 }
   0xa   :  { %29 = dma.hbm_to_vmem [thread:$0]  %s22_s28, 512, %s24_s8, [#allocation4], %s5108_s9, %s5108_s9, %s5109_s10  }
   0xb   :  { %s5110_s13 = smov [#allocation8]   ;;  %s61_s16 = sshll.u32 %s5708_s3, 4  ;;  %s62_s16 = int_to_ptr.hbm [resolvable:$true] %s61_s16 }
   0xc   :  { %s49_s0 = sshll.u32 %s5110_s13, 4  ;;  %s5111_s17 = smov [#allocation9]   ;;  %s50_s0 = int_to_ptr.vmem [resolvable:$true] %s49_s0 }
   0xd   :  { %55 = dma.hbm_to_vmem [thread:$0]  %s48_s12, 4096, %s50_s0, [#allocation7], %s5105_s29, %s5105_s29, %s5106_s30  }
   0xe   :  { %s63_s18 = sshll.u32 %s5111_s17, 4  ;;  %s64_s18 = int_to_ptr.vmem [resolvable:$true] %s63_s18 }
   0xf   :  { %66 = dma.hbm_to_vmem [thread:$0]  %s62_s16, 64, %s64_s18, [#allocation10]  }
  0x10   :  { %5094 = dma.done.wait [#allocation4], 512  }
  0x11   :  { %5095 = vsyncadd [#allocation4], 4294966784 }
  0x12   :  { %5096 = dma.done.wait [#allocation7], 8192  }
  0x13   :  { %5097 = vsyncadd [#allocation7], 4294959104 }
  0x14   :  { %5098 = dma.done.wait [#allocation10], 64  }
  0x15   :  { %5099 = vsyncadd [#allocation10], 4294967232  ;;  %v3400_v0 = vld [vmem:[#allocation6 + $0xe0] sm:$0xf]  ;;  %v4512_v1 = vld [vmem:[#allocation6 + $0xec] sm:$0xf0] }
  0x16   :  { %v4510_v2 = vld [vmem:[#allocation6 + $0xe4] sm:$0xf]  ;;  %v3401_v3 = vor.u32 %v4512_v1, %v3400_v0  ;;  %v3402_v4 = vld [vmem:[#allocation6 + $0xf0] sm:$0xf0]  ;;  %v3408_v5 = vld [vmem:[#allocation6 + $0xe8] sm:$0xf] }
  0x17   :  { %v4513_v6 = vld [vmem:[#allocation6 + $0xf4] sm:$0xf0]  ;;  %v3405_v7 = vor.u32 %v4510_v2, %v3402_v4  ;;  %v4511_v9 = vld [vmem:[#allocation6 + $0xec] sm:$0xf]  ;;  %v3410_v10 = vld [vmem:[#allocation6 + $0xf8] sm:$0xf0] }
  0x18   :  { %v3409_v8 = vor.u32 %v4513_v6, %v3408_v5  ;;  %v3384_v11 = vld [vmem:[#allocation6 + $0xc0] sm:$0xf]  ;;  %313 = vmatpush.bf16.msra.mxu0 %v3401_v3  ;;  %v3413_v12 = vor.u32 %v4511_v9, %v3410_v10  ;;  %v4508_v13 = vld [vmem:[#allocation6 + $0xcc] sm:$0xf0]  ;;  %v4506_v14 = vld [vmem:[#allocation6 + $0xc4] sm:$0xf] }
  0x19   :  { %v3386_v15 = vld [vmem:[#allocation6 + $0xd0] sm:$0xf0]  ;;  %342 = vmatpush.bf16.msra.mxu1 %v3405_v7  ;;  %v3385_v16 = vor.u32 %v4508_v13, %v3384_v11  ;;  %v3392_v18 = vld [vmem:[#allocation6 + $0xc8] sm:$0xf]  ;;  %v4509_v19 = vld [vmem:[#allocation6 + $0xd4] sm:$0xf0] }
  0x1a   :  { %371 = vmatpush.bf16.msra.mxu2 %v3409_v8  ;;  %v3389_v17 = vor.u32 %v4506_v14, %v3386_v15  ;;  %v4507_v20 = vld [vmem:[#allocation6 + $0xcc] sm:$0xf]  ;;  %400 = vmatpush.bf16.msra.mxu3 %v3413_v12  ;;  %v3393_v21 = vor.u32 %v4509_v19, %v3392_v18  ;;  %v3394_v22 = vld [vmem:[#allocation6 + $0xd8] sm:$0xf0]  ;;  %v3368_v23 = vld [vmem:[#allocation6 + $0xa0] sm:$0xf] }
  0x1b   :  { %v4504_v24 = vld [vmem:[#allocation6 + $0xac] sm:$0xf0]  ;;  %v3397_v25 = vor.u32 %v4507_v20, %v3394_v22  ;;  %v4502_v26 = vld [vmem:[#allocation6 + $0xa4] sm:$0xf]  ;;  %v3370_v27 = vld [vmem:[#allocation6 + $0xb0] sm:$0xf0] }
  0x1c   :  { %v3376_v28 = vld [vmem:[#allocation6 + $0xa8] sm:$0xf]  ;;  %314 = vmatpush.bf16.msra.mxu0 %v3385_v16  ;;  %v3369_v29 = vor.u32 %v4504_v24, %v3368_v23  ;;  %v4505_v30 = vld [vmem:[#allocation6 + $0xb4] sm:$0xf0]  ;;  %v4503_v31 = vld [vmem:[#allocation6 + $0xac] sm:$0xf]  ;;  %v3373_v33 = vor.u32 %v4502_v26, %v3370_v27 }
  0x1d   :  { %v3378_v32 = vld [vmem:[#allocation6 + $0xb8] sm:$0xf0]  ;;  %343 = vmatpush.bf16.msra.mxu1 %v3389_v17  ;;  %v3377_v34 = vor.u32 %v4505_v30, %v3376_v28  ;;  %v3352_v35 = vld [vmem:[#allocation6 + $0x80] sm:$0xf]  ;;  %v4500_v36 = vld [vmem:[#allocation6 + $0x8c] sm:$0xf0] }
  0x1e   :  { %372 = vmatpush.bf16.msra.mxu2 %v3393_v21  ;;  %v4498_v37 = vld [vmem:[#allocation6 + $0x84] sm:$0xf]  ;;  %401 = vmatpush.bf16.msra.mxu3 %v3397_v25  ;;  %v3381_v38 = vor.u32 %v4503_v31, %v3378_v32  ;;  %v3354_v39 = vld [vmem:[#allocation6 + $0x90] sm:$0xf0]  ;;  %v3360_v40 = vld [vmem:[#allocation6 + $0x88] sm:$0xf]  ;;  %v3353_v44 = vor.u32 %v4500_v36, %v3352_v35 }
  0x1f   :  { %v4501_v41 = vld [vmem:[#allocation6 + $0x94] sm:$0xf0]  ;;  %v4499_v42 = vld [vmem:[#allocation6 + $0x8c] sm:$0xf]  ;;  %v3362_v43 = vld [vmem:[#allocation6 + $0x98] sm:$0xf0]  ;;  %v3357_v45 = vor.u32 %v4498_v37, %v3354_v39 }
  0x20   :  { %315 = vmatpush.bf16.msra.mxu0 %v3369_v29  ;;  %v3361_v46 = vor.u32 %v4501_v41, %v3360_v40  ;;  %v3336_v47 = vld [vmem:[#allocation6 + $0x60] sm:$0xf]  ;;  %v4496_v48 = vld [vmem:[#allocation6 + $0x6c] sm:$0xf0]  ;;  %v4494_v49 = vld [vmem:[#allocation6 + $0x64] sm:$0xf]  ;;  %v3365_v50 = vor.u32 %v4499_v42, %v3362_v43 }
  0x21   :  { %344 = vmatpush.bf16.msra.mxu1 %v3373_v33  ;;  %v3338_v51 = vld [vmem:[#allocation6 + $0x70] sm:$0xf0]  ;;  %v3344_v52 = vld [vmem:[#allocation6 + $0x68] sm:$0xf]  ;;  %v4497_v53 = vld [vmem:[#allocation6 + $0x74] sm:$0xf0]  ;;  %v3337_v56 = vor.u32 %v4496_v48, %v3336_v47 }
  0x22   :  { %373 = vmatpush.bf16.msra.mxu2 %v3377_v34  ;;  %402 = vmatpush.bf16.msra.mxu3 %v3381_v38  ;;  %v4495_v54 = vld [vmem:[#allocation6 + $0x6c] sm:$0xf]  ;;  %v3346_v55 = vld [vmem:[#allocation6 + $0x78] sm:$0xf0]  ;;  %v3341_v57 = vor.u32 %v4494_v49, %v3338_v51  ;;  %v3345_v58 = vor.u32 %v4497_v53, %v3344_v52  ;;  %v3320_v59 = vld [vmem:[#allocation6 + $0x40] sm:$0xf] }
  0x23   :  { %v4492_v60 = vld [vmem:[#allocation6 + $0x4c] sm:$0xf0]  ;;  %v4490_v61 = vld [vmem:[#allocation6 + $0x44] sm:$0xf]  ;;  %v3349_v62 = vor.u32 %v4495_v54, %v3346_v55  ;;  %v3322_v63 = vld [vmem:[#allocation6 + $0x50] sm:$0xf0] }
  0x24   :  { %316 = vmatpush.bf16.msra.mxu0 %v3353_v44  ;;  %v3328_v0 = vld [vmem:[#allocation6 + $0x48] sm:$0xf]  ;;  %v4493_v1 = vld [vmem:[#allocation6 + $0x54] sm:$0xf0]  ;;  %v4491_v2 = vld [vmem:[#allocation6 + $0x4c] sm:$0xf]  ;;  %v3321_v4 = vor.u32 %v4492_v60, %v3320_v59  ;;  %v3325_v5 = vor.u32 %v4490_v61, %v3322_v63 }
  0x25   :  { %345 = vmatpush.bf16.msra.mxu1 %v3357_v45  ;;  %v3330_v3 = vld [vmem:[#allocation6 + $0x58] sm:$0xf0]  ;;  %v3329_v6 = vor.u32 %v4493_v1, %v3328_v0  ;;  %v3304_v7 = vld [vmem:[#allocation6 + $0x20] sm:$0xf]  ;;  %v4488_v8 = vld [vmem:[#allocation6 + $0x2c] sm:$0xf0] }
  0x26   :  { %374 = vmatpush.bf16.msra.mxu2 %v3361_v46  ;;  %403 = vmatpush.bf16.msra.mxu3 %v3365_v50  ;;  %v4486_v9 = vld [vmem:[#allocation6 + $0x24] sm:$0xf]  ;;  %v3333_v10 = vor.u32 %v4491_v2, %v3330_v3  ;;  %v3306_v11 = vld [vmem:[#allocation6 + $0x30] sm:$0xf0]  ;;  %v3312_v12 = vld [vmem:[#allocation6 + $0x28] sm:$0xf]  ;;  %v3305_v16 = vor.u32 %v4488_v8, %v3304_v7 }
  0x27   :  { %v4489_v13 = vld [vmem:[#allocation6 + $0x34] sm:$0xf0]  ;;  %v4487_v14 = vld [vmem:[#allocation6 + $0x2c] sm:$0xf]  ;;  %v3314_v15 = vld [vmem:[#allocation6 + $0x38] sm:$0xf0]  ;;  %v3309_v18 = vor.u32 %v4486_v9, %v3306_v11 }
  0x28   :  { %317 = vmatpush.bf16.msra.mxu0 %v3337_v56  ;;  %v3288_v17 = vld [vmem:[#allocation6] sm:$0xf]  ;;  %v3313_v19 = vor.u32 %v4489_v13, %v3312_v12  ;;  %v4484_v20 = vld [vmem:[#allocation6 + $0xc] sm:$0xf0]  ;;  %v4482_v21 = vld [vmem:[#allocation6 + $0x4] sm:$0xf]  ;;  %v3317_v23 = vor.u32 %v4487_v14, %v3314_v15 }
  0x29   :  { %346 = vmatpush.bf16.msra.mxu1 %v3341_v57  ;;  %v3290_v22 = vld [vmem:[#allocation6 + $0x10] sm:$0xf0]  ;;  %v3296_v24 = vld [vmem:[#allocation6 + $0x8] sm:$0xf]  ;;  %v4485_v25 = vld [vmem:[#allocation6 + $0x14] sm:$0xf0]  ;;  %v3289_v30 = vor.u32 %v4484_v20, %v3288_v17 }
  0x2a   :  { %375 = vmatpush.bf16.msra.mxu2 %v3345_v58  ;;  %404 = vmatpush.bf16.msra.mxu3 %v3349_v62  ;;  %v4483_v26 = vld [vmem:[#allocation6 + $0xc] sm:$0xf]  ;;  %v3298_v27 = vld [vmem:[#allocation6 + $0x18] sm:$0xf0]  ;;  %v3536_v28 = vld [vmem:[#allocation8 + $0xe8] sm:$0xf]  ;;  %v3293_v33 = vor.u32 %v4482_v21, %v3290_v22  ;;  %v3297_v34 = vor.u32 %v4485_v25, %v3296_v24 }
  0x2b   :  { %v4545_v29 = vld [vmem:[#allocation8 + $0xf4] sm:$0xf0]  ;;  %v4542_v31 = vld [vmem:[#allocation8 + $0xe4] sm:$0xf]  ;;  %v3530_v32 = vld [vmem:[#allocation8 + $0xf0] sm:$0xf0]  ;;  %v3301_v36 = vor.u32 %v4483_v26, %v3298_v27 }
  0x2c   :  { %318 = vmatpush.bf16.msra.mxu0 %v3321_v4  ;;  %v4478_v35 = vld [vmem:[#allocation3] sm:$0xff]  ;;  %v3537_v37 = vor.u32 %v4545_v29, %v3536_v28  ;;  %v3520_v38 = vld [vmem:[#allocation8 + $0xc8] sm:$0xf]  ;;  %v4544_v40 = vld [vmem:[#allocation8 + $0xec] sm:$0xf0]  ;;  %v3533_v42 = vor.u32 %v4542_v31, %v3530_v32  ;;  %s5113_s2 = smov [#allocation12]  }
  0x2d   :  { %347 = vmatpush.bf16.msra.mxu1 %v3325_v5  ;;  %v3528_v39 = vld [vmem:[#allocation8 + $0xe0] sm:$0xf]  ;;  %v4541_v41 = vld [vmem:[#allocation8 + $0xd4] sm:$0xf0]  ;;  %v4543_v43 = vld [vmem:[#allocation8 + $0xec] sm:$0xf] }
  0x2e   :  { %376 = vmatpush.bf16.msra.mxu2 %v3329_v6  ;;  %405 = vmatpush.bf16.msra.mxu3 %v3333_v10  ;;  %v3538_v44 = vld [vmem:[#allocation8 + $0xf8] sm:$0xf0]  ;;  %v4538_v45 = vld [vmem:[#allocation8 + $0xc4] sm:$0xf]  ;;  %v3514_v46 = vld [vmem:[#allocation8 + $0xd0] sm:$0xf0]  ;;  %v3529_v47 = vor.u32 %v4544_v40, %v3528_v39  ;;  %v3521_v48 = vor.u32 %v4541_v41, %v3520_v38 }
  0x2f   :  { %v3541_v49 = vor.u32 %v4543_v43, %v3538_v44  ;;  %v3504_v50 = vld [vmem:[#allocation8 + $0xa8] sm:$0xf]  ;;  %v3512_v51 = vld [vmem:[#allocation8 + $0xc0] sm:$0xf]  ;;  %v4540_v52 = vld [vmem:[#allocation8 + $0xcc] sm:$0xf0]  ;;  %v3517_v54 = vor.u32 %v4538_v45, %v3514_v46 }
  0x30   :  { %319 = vmatpush.bf16.msra.mxu0 %v3305_v16  ;;  %v4537_v53 = vld [vmem:[#allocation8 + $0xb4] sm:$0xf0]  ;;  %v4539_v55 = vld [vmem:[#allocation8 + $0xcc] sm:$0xf]  ;;  %v3522_v56 = vld [vmem:[#allocation8 + $0xd8] sm:$0xf0]  ;;  %v3513_v59 = vor.u32 %v4540_v52, %v3512_v51 }
  0x31   :  { %348 = vmatpush.bf16.msra.mxu1 %v3309_v18  ;;  %v4534_v57 = vld [vmem:[#allocation8 + $0xa4] sm:$0xf]  ;;  %v3498_v58 = vld [vmem:[#allocation8 + $0xb0] sm:$0xf0]  ;;  %v3505_v60 = vor.u32 %v4537_v53, %v3504_v50  ;;  %v3525_v61 = vor.u32 %v4539_v55, %v3522_v56  ;;  %v3488_v62 = vld [vmem:[#allocation8 + $0x88] sm:$0xf] }
  0x32   :  { %377 = vmatpush.bf16.msra.mxu2 %v3313_v19  ;;  %406 = vmatpush.bf16.msra.mxu3 %v3317_v23  ;;  %v3496_v63 = vld [vmem:[#allocation8 + $0xa0] sm:$0xf]  ;;  %v4536_v0 = vld [vmem:[#allocation8 + $0xac] sm:$0xf0]  ;;  %v4533_v1 = vld [vmem:[#allocation8 + $0x94] sm:$0xf0]  ;;  %v3501_v2 = vor.u32 %v4534_v57, %v3498_v58 }
  0x33   :  { %v4535_v3 = vld [vmem:[#allocation8 + $0xac] sm:$0xf]  ;;  %v3506_v4 = vld [vmem:[#allocation8 + $0xb8] sm:$0xf0]  ;;  %v4530_v5 = vld [vmem:[#allocation8 + $0x84] sm:$0xf]  ;;  %v3497_v7 = vor.u32 %v4536_v0, %v3496_v63  ;;  %v3489_v8 = vor.u32 %v4533_v1, %v3488_v62 }
  0x34   :  { %320 = vmatpush.bf16.msra.mxu0 %v3289_v30  ;;  %v3482_v6 = vld [vmem:[#allocation8 + $0x90] sm:$0xf0]  ;;  %v3509_v9 = vor.u32 %v4535_v3, %v3506_v4  ;;  %v3472_v10 = vld [vmem:[#allocation8 + $0x68] sm:$0xf]  ;;  %v3480_v11 = vld [vmem:[#allocation8 + $0x80] sm:$0xf] }
  0x35   :  { %349 = vmatpush.bf16.msra.mxu1 %v3293_v33  ;;  %v4532_v12 = vld [vmem:[#allocation8 + $0x8c] sm:$0xf0]  ;;  %v4529_v13 = vld [vmem:[#allocation8 + $0x74] sm:$0xf0]  ;;  %v3485_v14 = vor.u32 %v4530_v5, %v3482_v6  ;;  %v4531_v15 = vld [vmem:[#allocation8 + $0x8c] sm:$0xf] }
  0x36   :  { %378 = vmatpush.bf16.msra.mxu2 %v3297_v34  ;;  %407 = vmatpush.bf16.msra.mxu3 %v3301_v36  ;;  %v3490_v16 = vld [vmem:[#allocation8 + $0x98] sm:$0xf0]  ;;  %v4526_v17 = vld [vmem:[#allocation8 + $0x64] sm:$0xf]  ;;  %v3466_v18 = vld [vmem:[#allocation8 + $0x70] sm:$0xf0]  ;;  %v3481_v20 = vor.u32 %v4532_v12, %v3480_v11  ;;  %v3473_v21 = vor.u32 %v4529_v13, %v3472_v10 }
  0x37   :  { %321 = vmatmul.bf16.vlgmr.msra.gmra.mxu0 %v4478_v35  ;;  %v4479_v19 = vld [vmem:[#allocation3 + $0x8] sm:$0xff]  ;;  %v3493_v22 = vor.u32 %v4531_v15, %v3490_v16  ;;  %v3464_v24 = vld [vmem:[#allocation8 + $0x60] sm:$0xf]  ;;  %v4528_v25 = vld [vmem:[#allocation8 + $0x6c] sm:$0xf0]  ;;  %v3469_v27 = vor.u32 %v4526_v17, %v3466_v18  ;;  %v5112_v4 = vmov 0.0|0.0  }
  0x38   :  { %350 = vmatmul.bf16.vlgmr.msra.gmra.mxu1 %v4478_v35  ;;  %702 = vmatpush.bf16.msrb.mxu0 %v3529_v47  ;;  %v3456_v23 = vld [vmem:[#allocation8 + $0x48] sm:$0xf]  ;;  %v4525_v26 = vld [vmem:[#allocation8 + $0x54] sm:$0xf0]  ;;  %v4527_v28 = vld [vmem:[#allocation8 + $0x6c] sm:$0xf]  ;;  %v3465_v30 = vor.u32 %v4528_v25, %v3464_v24 }
  0x39   :  { %715 = vmatpush.bf16.msrb.mxu1 %v3533_v42  ;;  %379 = vmatmul.bf16.vlgmr.msra.gmra.mxu2 %v4478_v35  ;;  %v3474_v29 = vld [vmem:[#allocation8 + $0x78] sm:$0xf0]  ;;  %v3457_v31 = vor.u32 %v4525_v26, %v3456_v23  ;;  %v3440_v33 = vld [vmem:[#allocation8 + $0x28] sm:$0xf]  ;;  %v4521_v34 = vld [vmem:[#allocation8 + $0x34] sm:$0xf0] }
  0x3a   :  { %728 = vmatpush.bf16.msrb.mxu2 %v3537_v37  ;;  %408 = vmatmul.bf16.vlgmr.msra.gmra.mxu3 %v4478_v35  ;;  %v3477_v32 = vor.u32 %v4527_v28, %v3474_v29  ;;  %v3448_v35 = vld [vmem:[#allocation8 + $0x40] sm:$0xf]  ;;  %v3441_v36 = vor.u32 %v4521_v34, %v3440_v33  ;;  %v4524_v37 = vld [vmem:[#allocation8 + $0x4c] sm:$0xf0]  ;;  %v4522_v38 = vld [vmem:[#allocation8 + $0x44] sm:$0xf] }
  0x3b   :  { %741 = vmatpush.bf16.msrb.mxu3 %v3541_v49  ;;  %v3450_v39 = vld [vmem:[#allocation8 + $0x50] sm:$0xf0]  ;;  %v3449_v40 = vor.u32 %v4524_v37, %v3448_v35  ;;  %v4523_v42 = vld [vmem:[#allocation8 + $0x4c] sm:$0xf]  ;;  %v3458_v43 = vld [vmem:[#allocation8 + $0x58] sm:$0xf0] }
  0x3c   :  { %703 = vmatpush.bf16.msrb.mxu0 %v3513_v59  ;;  %v3453_v41 = vor.u32 %v4522_v38, %v3450_v39  ;;  %v3424_v44 = vld [vmem:[#allocation8 + $0x8] sm:$0xf]  ;;  %v3461_v45 = vor.u32 %v4523_v42, %v3458_v43  ;;  %v4517_v46 = vld [vmem:[#allocation8 + $0x14] sm:$0xf0]  ;;  %v3432_v47 = vld [vmem:[#allocation8 + $0x20] sm:$0xf] }
  0x3d   :  { %716 = vmatpush.bf16.msrb.mxu1 %v3517_v54  ;;  %v4518_v50 = vld [vmem:[#allocation8 + $0x24] sm:$0xf]  ;;  %v3434_v51 = vld [vmem:[#allocation8 + $0x30] sm:$0xf0]  ;;  %v4519_v52 = vld [vmem:[#allocation8 + $0x2c] sm:$0xf]  ;;  %v3425_v53 = vor.u32 %v4517_v46, %v3424_v44 }
  0x3e   :  { %729 = vmatpush.bf16.msrb.mxu2 %v3521_v48  ;;  %v4520_v48 = vld [vmem:[#allocation8 + $0x2c] sm:$0xf0]  ;;  %v3437_v54 = vor.u32 %v4518_v50, %v3434_v51  ;;  %v3442_v55 = vld [vmem:[#allocation8 + $0x38] sm:$0xf0]  ;;  %v3416_v56 = vld [vmem:[#allocation8] sm:$0xf] }
  0x3f   :  { %742 = vmatpush.bf16.msrb.mxu3 %v3525_v61  ;;  %v3433_v49 = vor.u32 %v4520_v48, %v3432_v47  ;;  %v4516_v57 = vld [vmem:[#allocation8 + $0xc] sm:$0xf0]  ;;  %v3445_v58 = vor.u32 %v4519_v52, %v3442_v55  ;;  %v4514_v59 = vld [vmem:[#allocation8 + $0x4] sm:$0xf]  ;;  %v4515_v61 = vld [vmem:[#allocation8 + $0xc] sm:$0xf] }
  0x40   :  { %704 = vmatpush.bf16.msrb.mxu0 %v3497_v7  ;;  %v3426_v62 = vld [vmem:[#allocation8 + $0x18] sm:$0xf0]  ;;  %v3417_v63 = vor.u32 %v4516_v57, %v3416_v56  ;;  %v429_v7 = vld [vmem:[#allocation9] sm:$0xf]  ;;  %s3236_s3 = sshll.u32 %s5113_s2, 4  ;;  %s3238_s21 = sshll.u32 %s5710_s5, 4  ;;  %s3237_s3 = int_to_ptr.vmem [resolvable:$true] %s3236_s3  ;;  %s3239_s21 = int_to_ptr.hbm [resolvable:$true] %s3238_s21 }
  0x41   :  { %717 = vmatpush.bf16.msrb.mxu1 %v3501_v2  ;;  %v3429_v1 = vor.u32 %v4515_v61, %v3426_v62  ;;  %v4480_v2 = vld [vmem:[#allocation3 + $0x10] sm:$0xff]  ;;  %v4481_v3 = vld [vmem:[#allocation3 + $0x18] sm:$0xff]  ;;  %v5184_v16 = vperm.slane %v429_v7, 3  ;;  %v5186_v17 = vperm.slane %v429_v7, 2  ;;  %s5114_s22 = smov [#allocation14]   ;;  %s3249_s26 = sshll.u32 %s5711_s6, 4  ;;  %s3250_s26 = int_to_ptr.hbm [resolvable:$true] %s3249_s26 }
  0x42   :  { %730 = vmatpush.bf16.msrb.mxu2 %v3505_v60  ;;  %v3418_v60 = vld [vmem:[#allocation8 + $0x10] sm:$0xf0]  ;;  %s3247_s23 = sshll.u32 %s5114_s22, 4  ;;  %s5115_s27 = smov [#allocation11]   ;;  %s3248_s23 = int_to_ptr.vmem [resolvable:$true] %s3247_s23 }
  0x43   :  { %743 = vmatpush.bf16.msrb.mxu3 %v3509_v9  ;;  %v3421_v0 = vor.u32 %v4514_v59, %v3418_v60  ;;  %v5172_v9 = vperm.slane %v429_v7, 1  ;;  %s3222_s28 = sshll.u32 %s5115_s27, 4  ;;  %s3224_s7 = sshll.u32 %s5709_s4, 4  ;;  %s3223_s28 = int_to_ptr.vmem [resolvable:$true] %s3222_s28  ;;  %s3225_s7 = int_to_ptr.hbm [resolvable:$true] %s3224_s7 }
  0x44   :  { %705 = vmatpush.bf16.msrb.mxu0 %v3481_v20 }
  0x45   :  { %718 = vmatpush.bf16.msrb.mxu1 %v3485_v14 }
  0x46   :  { %731 = vmatpush.bf16.msrb.mxu2 %v3489_v8  ;;  %v5170_v8 = vperm.slane %v429_v7, 0 }
  0x47   :  { %744 = vmatpush.bf16.msrb.mxu3 %v3493_v22  ;;  %326 = vmatmul.bf16.gmra.mxu0 %v4479_v19 }
  0x48   :  { %355 = vmatmul.bf16.gmra.mxu1 %v4479_v19  ;;  %706 = vmatpush.bf16.msrb.mxu0 %v3465_v30 }
  0x49   :  { %719 = vmatpush.bf16.msrb.mxu1 %v3469_v27  ;;  %384 = vmatmul.bf16.gmra.mxu2 %v4479_v19 }
  0x4a   :  { %732 = vmatpush.bf16.msrb.mxu2 %v3473_v21  ;;  %413 = vmatmul.bf16.gmra.mxu3 %v4479_v19 }
  0x4b   :  { %745 = vmatpush.bf16.msrb.mxu3 %v3477_v32 }
  0x4c   :  { %707 = vmatpush.bf16.msrb.mxu0 %v3449_v40 }
  0x4d   :  { %720 = vmatpush.bf16.msrb.mxu1 %v3453_v41 }
  0x4e   :  { %733 = vmatpush.bf16.msrb.mxu2 %v3457_v31 }
  0x4f   :  { %746 = vmatpush.bf16.msrb.mxu3 %v3461_v45 }
  0x50   :  { %708 = vmatpush.bf16.msrb.mxu0 %v3433_v49 }
  0x51   :  { %721 = vmatpush.bf16.msrb.mxu1 %v3437_v54 }
  0x52   :  { %734 = vmatpush.bf16.msrb.mxu2 %v3441_v36 }
  0x53   :  { %747 = vmatpush.bf16.msrb.mxu3 %v3445_v58 }
  0x54   :  { %709 = vmatpush.bf16.msrb.mxu0 %v3417_v63 }
  0x55   :  { %722 = vmatpush.bf16.msrb.mxu1 %v3421_v0 }
  0x56   :  { %735 = vmatpush.bf16.msrb.mxu2 %v3425_v53 }
  0x57   :  { %748 = vmatpush.bf16.msrb.mxu3 %v3429_v1  ;;  %331 = vmatmul.bf16.gmra.mxu0 %v4480_v2 }
  0x58   :  { %360 = vmatmul.bf16.gmra.mxu1 %v4480_v2 }
  0x59   :  { %389 = vmatmul.bf16.gmra.mxu2 %v4480_v2 }
  0x5a   :  { %418 = vmatmul.bf16.gmra.mxu3 %v4480_v2  ;;  %v3661_v2 = vld [vmem:[#allocation8 + $0xe0] sm:$0xf] }
  0x67   :  { %336 = vmatmul.bf16.gmra.mxu0 %v4481_v3 }
  0x68   :  { %365 = vmatmul.bf16.gmra.mxu1 %v4481_v3 }
  0x69   :  { %394 = vmatmul.bf16.gmra.mxu2 %v4481_v3 }
  0x6a   :  { %423 = vmatmul.bf16.gmra.mxu3 %v4481_v3  ;;  %v4576_v3 = vld [vmem:[#allocation8 + $0xec] sm:$0xf0] }
  0x6b   :  { %v3662_v7 = vor.u32 %v4576_v3, %v3661_v2 }
  0x6d   :  { %1040 = vmatpush.bf16.msra.mxu0 %v3662_v7 }
  0x77   :  { %710 = vmatmul.bf16.vlgmr.msrb.gmra.mxu0 %v5112_v4 }
  0x78   :  { %723 = vmatmul.bf16.vlgmr.msrb.gmra.mxu1 %v5112_v4 }
  0x79   :  { %736 = vmatmul.bf16.vlgmr.msrb.gmra.mxu2 %v5112_v4 }
  0x7a   :  { %749 = vmatmul.bf16.vlgmr.msrb.gmra.mxu3 %v5112_v4  ;;  %v4574_v4 = vld [vmem:[#allocation8 + $0xe4] sm:$0xf] }
  0xb4   :  { %v5166_v5 = vpop.f32.mrf.mxu0 }
  0xb5   :  { %v5168_v6 = vpop.f32.mrf.mxu1 }
  0xbc   :  { %v5174_v10 = vpop.f32.mrf.mxu2  ;;  %v324_v12 = vpop.f32.mrf.mxu0 }
  0xbd   :  { %v5176_v11 = vpop.f32.mrf.mxu3  ;;  %v5179_v13 = vadd.f32 %v5170_v8, %v324_v12  ;;  %v353_v14 = vpop.f32.mrf.mxu1  ;;  %v3663_v12 = vld [vmem:[#allocation8 + $0xf0] sm:$0xf0] }
  0xbe   :  { %v5182_v15 = vadd.f32 %v5172_v9, %v353_v14  ;;  %v3669_v14 = vld [vmem:[#allocation8 + $0xe8] sm:$0xf] }
  0xc4   :  { %v382_v18 = vpop.f32.mrf.mxu2  ;;  %v327_v21 = vpop.f32.mrf.mxu0 }
  0xc5   :  { %v5189_v19 = vadd.f32 %v5186_v17, %v382_v18  ;;  %v411_v20 = vpop.f32.mrf.mxu3  ;;  %v5195_v23 = vadd.f32 %v5170_v8, %v327_v21  ;;  %v356_v24 = vpop.f32.mrf.mxu1  ;;  %v4577_v18 = vld [vmem:[#allocation8 + $0xf4] sm:$0xf0] }
  0xc6   :  { %v5192_v22 = vadd.f32 %v5184_v16, %v411_v20  ;;  %v5198_v25 = vadd.f32 %v5172_v9, %v356_v24  ;;  %v3666_v20 = vor.u32 %v4574_v4, %v3663_v12  ;;  %v3670_v21 = vor.u32 %v4577_v18, %v3669_v14  ;;  %v4575_v24 = vld [vmem:[#allocation8 + $0xec] sm:$0xf]  ;;  %v4566_v4 = vld [vmem:[#allocation8 + $0xa4] sm:$0xf]  ;;  %v3631_v14 = vld [vmem:[#allocation8 + $0xb0] sm:$0xf0] }
  0xc7   :  { %v3637_v18 = vld [vmem:[#allocation8 + $0xa8] sm:$0xf] }
  0xc8   :  { %1053 = vmatpush.bf16.msra.mxu1 %v3666_v20  ;;  %1066 = vmatpush.bf16.msra.mxu2 %v3670_v21  ;;  %v3634_v21 = vor.u32 %v4566_v4, %v3631_v14  ;;  %v3599_v14 = vld [vmem:[#allocation8 + $0x70] sm:$0xf0] }
  0xcc   :  { %v385_v26 = vpop.f32.mrf.mxu2  ;;  %v329_v29 = vpop.f32.mrf.mxu0 }
  0xcd   :  { %v5201_v27 = vadd.f32 %v5186_v17, %v385_v26  ;;  %v414_v28 = vpop.f32.mrf.mxu3  ;;  %v5207_v31 = vadd.f32 %v5170_v8, %v329_v29  ;;  %v358_v32 = vpop.f32.mrf.mxu1  ;;  %v3671_v26 = vld [vmem:[#allocation8 + $0xf8] sm:$0xf0]  ;;  %v3645_v29 = vld [vmem:[#allocation8 + $0xc0] sm:$0xf] }
  0xce   :  { %v5204_v30 = vadd.f32 %v5184_v16, %v414_v28  ;;  %v5210_v33 = vadd.f32 %v5172_v9, %v358_v32  ;;  %v3674_v28 = vor.u32 %v4575_v24, %v3671_v26  ;;  %v4572_v32 = vld [vmem:[#allocation8 + $0xcc] sm:$0xf0]  ;;  %v4569_v24 = vld [vmem:[#allocation8 + $0xb4] sm:$0xf0]  ;;  %v4567_v26 = vld [vmem:[#allocation8 + $0xac] sm:$0xf] }
  0xd0   :  { %1079 = vmatpush.bf16.msra.mxu3 %v3674_v28  ;;  %v3638_v28 = vor.u32 %v4569_v24, %v3637_v18  ;;  %v3605_v24 = vld [vmem:[#allocation8 + $0x68] sm:$0xf] }
  0xd4   :  { %v387_v34 = vpop.f32.mrf.mxu2  ;;  %v332_v37 = vpop.f32.mrf.mxu0 }
  0xd5   :  { %v5213_v35 = vadd.f32 %v5186_v17, %v387_v34  ;;  %v416_v36 = vpop.f32.mrf.mxu3  ;;  %v5219_v39 = vadd.f32 %v5170_v8, %v332_v37  ;;  %v361_v40 = vpop.f32.mrf.mxu1  ;;  %v4570_v34 = vld [vmem:[#allocation8 + $0xc4] sm:$0xf] }
  0xd6   :  { %v5216_v38 = vadd.f32 %v5184_v16, %v416_v36  ;;  %v5222_v41 = vadd.f32 %v5172_v9, %v361_v40  ;;  %v439_v36 = vadd.f32 %v5170_v8, %v5166_v5  ;;  %v3646_v40 = vor.u32 %v4572_v32, %v3645_v29  ;;  %v3639_v29 = vld [vmem:[#allocation8 + $0xb8] sm:$0xf0] }
  0xd7   :  { %v441_v32 = vadd.f32 %v5186_v17, %v5174_v10 }
  0xd8   :  { %1041 = vmatpush.bf16.msra.mxu0 %v3646_v40  ;;  %v4562_v40 = vld [vmem:[#allocation8 + $0x84] sm:$0xf] }
  0xdc   :  { %v390_v42 = vpop.f32.mrf.mxu2  ;;  %v334_v45 = vpop.f32.mrf.mxu0 }
  0xdd   :  { %v5225_v43 = vadd.f32 %v5186_v17, %v390_v42  ;;  %v419_v44 = vpop.f32.mrf.mxu3  ;;  %v5231_v47 = vadd.f32 %v5170_v8, %v334_v45  ;;  %v363_v48 = vpop.f32.mrf.mxu1  ;;  %v3647_v42 = vld [vmem:[#allocation8 + $0xd0] sm:$0xf0]  ;;  %v4573_v45 = vld [vmem:[#allocation8 + $0xd4] sm:$0xf0] }
  0xde   :  { %v5228_v46 = vadd.f32 %v5184_v16, %v419_v44  ;;  %v5234_v49 = vadd.f32 %v5172_v9, %v363_v48  ;;  %v3653_v44 = vld [vmem:[#allocation8 + $0xc8] sm:$0xf]  ;;  %v440_v48 = vadd.f32 %v5172_v9, %v5168_v6  ;;  %v3629_v6 = vld [vmem:[#allocation8 + $0xa0] sm:$0xf] }
  0xe4   :  { %v392_v50 = vpop.f32.mrf.mxu2  ;;  %v337_v53 = vpop.f32.mrf.mxu0 }
  0xe5   :  { %v5237_v51 = vadd.f32 %v5186_v17, %v392_v50  ;;  %v421_v52 = vpop.f32.mrf.mxu3  ;;  %v5243_v55 = vadd.f32 %v5170_v8, %v337_v53  ;;  %v366_v56 = vpop.f32.mrf.mxu1 }
  0xe6   :  { %v5240_v54 = vadd.f32 %v5184_v16, %v421_v52  ;;  %v5246_v57 = vadd.f32 %v5172_v9, %v366_v56  ;;  %v3650_v56 = vor.u32 %v4570_v34, %v3647_v42  ;;  %v3642_v34 = vor.u32 %v4567_v26, %v3639_v29  ;;  %v4561_v26 = vld [vmem:[#allocation8 + $0x74] sm:$0xf0] }
  0xe7   :  { %v442_v42 = vadd.f32 %v5184_v16, %v5176_v11  ;;  %v3597_v11 = vld [vmem:[#allocation8 + $0x60] sm:$0xf]  ;;  %v3606_v29 = vor.u32 %v4561_v26, %v3605_v24  ;;  %v4553_v24 = vld [vmem:[#allocation8 + $0x34] sm:$0xf0]  ;;  %v4551_v26 = vld [vmem:[#allocation8 + $0x2c] sm:$0xf] }
  0xe8   :  { %1054 = vmatpush.bf16.msra.mxu1 %v3650_v56 }
  0xec   :  { %v395_v58 = vpop.f32.mrf.mxu2  ;;  %v339_v61 = vpop.f32.mrf.mxu0  ;;  %1055 = vmatpush.bf16.msra.mxu1 %v3634_v21 }
  0xed   :  { %v5249_v59 = vadd.f32 %v5186_v17, %v395_v58  ;;  %v424_v60 = vpop.f32.mrf.mxu3  ;;  %v5255_v63 = vadd.f32 %v5170_v8, %v339_v61  ;;  %v368_v0 = vpop.f32.mrf.mxu1  ;;  %v3654_v58 = vor.u32 %v4573_v45, %v3653_v44  ;;  %v3655_v61 = vld [vmem:[#allocation8 + $0xd8] sm:$0xf0] }
  0xee   :  { %v5252_v62 = vadd.f32 %v5184_v16, %v424_v60  ;;  %v5258_v1 = vadd.f32 %v5172_v9, %v368_v0  ;;  %v4571_v60 = vld [vmem:[#allocation8 + $0xcc] sm:$0xf]  ;;  %v4568_v9 = vld [vmem:[#allocation8 + $0xac] sm:$0xf0] }
  0xef   :  { %v3658_v2 = vor.u32 %v4571_v60, %v3655_v61  ;;  %1067 = vmatpush.bf16.msra.mxu2 %v3654_v58  ;;  %v3630_v12 = vor.u32 %v4568_v9, %v3629_v6  ;;  %v4563_v61 = vld [vmem:[#allocation8 + $0x8c] sm:$0xf] }
  0xf1   :  { %1080 = vmatpush.bf16.msra.mxu3 %v3658_v2  ;;  %1042 = vmatpush.bf16.msra.mxu0 %v3630_v12  ;;  %v4558_v12 = vld [vmem:[#allocation8 + $0x64] sm:$0xf] }
  0xf2   :  { %v3602_v21 = vor.u32 %v4558_v12, %v3599_v14  ;;  %v3567_v12 = vld [vmem:[#allocation8 + $0x30] sm:$0xf0]  ;;  %v3573_v14 = vld [vmem:[#allocation8 + $0x28] sm:$0xf] }
  0xf3   :  { %1068 = vmatpush.bf16.msra.mxu2 %v3638_v28 }
  0xf4   :  { %v397_v37 = vpop.f32.mrf.mxu2  ;;  %v711_v53 = vpop.f32.mrf.mxu0 }
  0xf5   :  { %v5265_v50 = vadd.f32 %v5186_v17, %v397_v37  ;;  %v426_v52 = vpop.f32.mrf.mxu3  ;;  %v754_v8 = vadd.f32 %v711_v53, %v439_v36  ;;  %v724_v0 = vpop.f32.mrf.mxu1  ;;  %v3613_v36 = vld [vmem:[#allocation8 + $0x80] sm:$0xf]  ;;  %v4564_v37 = vld [vmem:[#allocation8 + $0x8c] sm:$0xf0]  ;;  %v4565_v53 = vld [vmem:[#allocation8 + $0x94] sm:$0xf0]  ;;  %1081 = vmatpush.bf16.msra.mxu3 %v3642_v34 }
  0xf6   :  { %v5268_v5 = vadd.f32 %v5184_v16, %v426_v52  ;;  %v755_v3 = vadd.f32 %v724_v0, %v440_v48  ;;  %v3614_v45 = vor.u32 %v4564_v37, %v3613_v36  ;;  %v3615_v48 = vld [vmem:[#allocation8 + $0x90] sm:$0xf0]  ;;  %v3621_v52 = vld [vmem:[#allocation8 + $0x88] sm:$0xf]  ;;  %v4560_v16 = vld [vmem:[#allocation8 + $0x6c] sm:$0xf0] }
  0xf7   :  { %v3542_v7 = vmul.f32 -1.442695, %v754_v8  ;;  %v3618_v10 = vor.u32 %v4562_v40, %v3615_v48  ;;  %v3622_v17 = vor.u32 %v4565_v53, %v3621_v52  ;;  %v3623_v8 = vld [vmem:[#allocation8 + $0x98] sm:$0xf0]  ;;  %v3581_v36 = vld [vmem:[#allocation8 + $0x40] sm:$0xf] }
  0xf8   :  { %v3543_v20 = vmul.f32 -1.442695, %v755_v3  ;;  %1043 = vmatpush.bf16.msra.mxu0 %v3614_v45  ;;  %v3626_v3 = vor.u32 %v4563_v61, %v3623_v8  ;;  %v3607_v34 = vld [vmem:[#allocation8 + $0x78] sm:$0xf0]  ;;  %v4556_v40 = vld [vmem:[#allocation8 + $0x4c] sm:$0xf0] }
  0xf9   :  { %4782 = vpow2.f32 %v3542_v7  ;;  %1056 = vmatpush.bf16.msra.mxu1 %v3618_v10  ;;  %1069 = vmatpush.bf16.msra.mxu2 %v3622_v17  ;;  %v3598_v7 = vor.u32 %v4560_v16, %v3597_v11  ;;  %v3582_v45 = vor.u32 %v4556_v40, %v3581_v36  ;;  %v4554_v48 = vld [vmem:[#allocation8 + $0x44] sm:$0xf]  ;;  %v3583_v52 = vld [vmem:[#allocation8 + $0x50] sm:$0xf0]  ;;  %v4555_v17 = vld [vmem:[#allocation8 + $0x4c] sm:$0xf] }
  0xfa   :  { %4784 = vpow2.f32 %v3543_v20  ;;  %1082 = vmatpush.bf16.msra.mxu3 %v3626_v3  ;;  %v3586_v53 = vor.u32 %v4554_v48, %v3583_v52  ;;  %v3591_v61 = vld [vmem:[#allocation8 + $0x58] sm:$0xf0]  ;;  %v3565_v8 = vld [vmem:[#allocation8 + $0x20] sm:$0xf]  ;;  %v3557_v48 = vld [vmem:[#allocation8 + $0x8] sm:$0xf] }
  0xfb   :  { %v3594_v3 = vor.u32 %v4555_v17, %v3591_v61  ;;  %v4549_v52 = vld [vmem:[#allocation8 + $0x14] sm:$0xf0] }
  0xfc   :  { %v737_v44 = vpop.f32.mrf.mxu2  ;;  %v713_v60 = vpop.f32.mrf.mxu0  ;;  %1044 = vmatpush.bf16.msra.mxu0 %v3598_v7  ;;  %v4550_v7 = vld [vmem:[#allocation8 + $0x24] sm:$0xf]  ;;  %v3558_v61 = vor.u32 %v4549_v52, %v3557_v48 }
  0xfd   :  { %v756_v56 = vadd.f32 %v737_v44, %v441_v32  ;;  %v750_v58 = vpop.f32.mrf.mxu3  ;;  %v726_v2 = vpop.f32.mrf.mxu1  ;;  %v4559_v32 = vld [vmem:[#allocation8 + $0x6c] sm:$0xf]  ;;  %1057 = vmatpush.bf16.msra.mxu1 %v3602_v21  ;;  %1070 = vmatpush.bf16.msra.mxu2 %v3606_v29  ;;  %v3575_v29 = vld [vmem:[#allocation8 + $0x38] sm:$0xf0]  ;;  %v3570_v40 = vor.u32 %v4550_v7, %v3567_v12 }
  0xfe   :  { %v757_v0 = vadd.f32 %v750_v58, %v442_v42  ;;  %v3610_v44 = vor.u32 %v4559_v32, %v3607_v34  ;;  %v4557_v58 = vld [vmem:[#allocation8 + $0x54] sm:$0xf0]  ;;  %v3549_v32 = vld [vmem:[#allocation8] sm:$0xf]  ;;  %v4548_v34 = vld [vmem:[#allocation8 + $0xc] sm:$0xf0] }
  0xff   :  { %v3544_v6 = vmul.f32 -1.442695, %v756_v56  ;;  %v4783_v9 = vpop.eup %4782  ;;  %v3589_v56 = vld [vmem:[#allocation8 + $0x48] sm:$0xf] }
 0x100   :  { %v3545_v4 = vmul.f32 -1.442695, %v757_v0  ;;  %v4785_v18 = vpop.eup %4784  ;;  %v5274_v20 = vadd.f32 1.0, %v4783_v9  ;;  %1083 = vmatpush.bf16.msra.mxu3 %v3610_v44  ;;  %1045 = vmatpush.bf16.msra.mxu0 %v3582_v45  ;;  %v3590_v10 = vor.u32 %v4557_v58, %v3589_v56  ;;  %v3578_v44 = vor.u32 %v4551_v26, %v3575_v29  ;;  %v3551_v45 = vld [vmem:[#allocation8 + $0x10] sm:$0xf0] }
 0x101   :  { %4786 = vpow2.f32 %v3544_v6  ;;  %v5276_v28 = vadd.f32 1.0, %v4785_v18  ;;  %1058 = vmatpush.bf16.msra.mxu1 %v3586_v53  ;;  %v4552_v6 = vld [vmem:[#allocation8 + $0x2c] sm:$0xf0]  ;;  %v3550_v56 = vor.u32 %v4548_v34, %v3549_v32  ;;  %v4547_v58 = vld [vmem:[#allocation8 + $0xc] sm:$0xf] }
 0x102   :  { %4788 = vpow2.f32 %v3545_v4  ;;  %1071 = vmatpush.bf16.msra.mxu2 %v3590_v10  ;;  %v3566_v9 = vor.u32 %v4552_v6, %v3565_v8  ;;  %vm779_vm6 = vweird.f32 %v5274_v20  ;;  %v3802_v34 = vld [vmem:[#allocation8 + $0xe8] sm:$0xf] }
 0x103   :  { %4790 = vrcp.f32 %v5274_v20  ;;  %vm794_vm2 = vweird.f32 %v5276_v28  ;;  %v800_v26 = vand.u32 2147483648, %v5276_v28 }
 0x104   :  { %4792 = vrcp.f32 %v5276_v28  ;;  %v739_v37 = vpop.f32.mrf.mxu2  ;;  %1084 = vmatpush.bf16.msra.mxu3 %v3594_v3  ;;  %1046 = vmatpush.bf16.msra.mxu0 %v3566_v9 }
 0x105   :  { %v752_v42 = vpop.f32.mrf.mxu3  ;;  %v4546_v37 = vld [vmem:[#allocation8 + $0x4] sm:$0xf]  ;;  %1059 = vmatpush.bf16.msra.mxu1 %v3570_v40  ;;  %v783_v40 = vand.u32 2147483647, %v5274_v20 }
 0x106   :  { %v3574_v42 = vor.u32 %v4553_v24, %v3573_v14  ;;  %v3554_v17 = vor.u32 %v4546_v37, %v3551_v45  ;;  %v798_v24 = vand.u32 2147483647, %v5276_v28  ;;  %v785_v37 = vand.u32 2147483648, %v5274_v20 }
 0x107   :  { %v4787_v60 = vpop.eup %4786  ;;  %v801_v45 = vor.u32 1.1754944e-38, %v800_v26  ;;  %vm784_vm11 = vcmp.eq.f32.partialorder %v783_v40, 8.507059e+37  ;;  %v4606_v26 = vld [vmem:[#allocation8 + $0xe4] sm:$0xf] }
 0x108   :  { %v4789_v0 = vpop.eup %4788  ;;  %v5280_v2 = vadd.f32 1.0, %v4787_v60  ;;  %v3559_v60 = vld [vmem:[#allocation8 + $0x18] sm:$0xf0]  ;;  %1072 = vmatpush.bf16.msra.mxu2 %v3574_v42  ;;  %1085 = vmatpush.bf16.msra.mxu3 %v3578_v44  ;;  %vm799_vm10 = vcmp.eq.f32.partialorder %v798_v24, 8.507059e+37  ;;  %v4608_v24 = vld [vmem:[#allocation8 + $0xec] sm:$0xf0] }
 0x109   :  { %v5282_v11 = vpop.eup %4790  ;;  %v5284_v16 = vadd.f32 1.0, %v4789_v0  ;;  %1047 = vmatpush.bf16.msra.mxu0 %v3550_v56  ;;  %v3562_v3 = vor.u32 %v4547_v58, %v3559_v60  ;;  %1060 = vmatpush.bf16.msra.mxu1 %v3554_v17  ;;  %v786_v56 = vor.u32 1.1754944e-38, %v785_v37  ;;  %v4607_v37 = vld [vmem:[#allocation8 + $0xec] sm:$0xf] }
 0x10a   :  { %v5286_v4 = vpop.eup %4792  ;;  %4794 = vrcp.f32 %v5280_v2  ;;  %v775_v18 = vmul.f32 %v5282_v11, %v5274_v20  ;;  %v815_v12 = vand.u32 2147483648, %v5280_v2  ;;  %vm780_vm3 = vweird.f32 %v5282_v11 }
 0x10b   :  { %v790_v21 = vmul.f32 %v5286_v4, %v5276_v28  ;;  %4796 = vrcp.f32 %v5284_v16  ;;  %vm795_vm0 = vweird.f32 %v5286_v4  ;;  %vm809_vm5 = vweird.f32 %v5280_v2  ;;  %vm781_vm9 = vmor %vm779_vm6, %vm780_vm3 }
 0x10c   :  { %v776_v53 = vsub.f32 1.0, %v775_v18  ;;  %1073 = vmatpush.bf16.msra.mxu2 %v3558_v61  ;;  %1086 = vmatpush.bf16.msra.mxu3 %v3562_v3  ;;  %vm5309_vm4 = vmor %vm794_vm2, %vm795_vm0  ;;  %v816_v28 = vor.u32 1.1754944e-38, %v815_v12  ;;  %vm824_vm13 = vweird.f32 %v5284_v16 }
 0x10d   :  { %v791_v36 = vsub.f32 1.0, %v790_v21  ;;  %v813_v21 = vand.u32 2147483647, %v5280_v2 }
 0x10e   :  { %v777_v9 = vmul.f32 %v5282_v11, %v776_v53 }
 0x10f   :  { %v792_v8 = vmul.f32 %v5286_v4, %v791_v36  ;;  %vm814_vm8 = vcmp.eq.f32.partialorder %v813_v21, 8.507059e+37  ;;  %v3794_v21 = vld [vmem:[#allocation8 + $0xe0] sm:$0xf] }
 0x110   :  { %v4795_v10 = vpop.eup %4794  ;;  %v778_v32 = vadd.f32 %v5282_v11, %v777_v9 }
 0x111   :  { %v805_v0 = vmul.f32 %v4795_v10, %v5280_v2  ;;  %v4797_v6 = vpop.eup %4796  ;;  %v793_v14 = vadd.f32 %v5286_v4, %v792_v8  ;;  %vm810_vm1 = vweird.f32 %v4795_v10 }
 0x112   :  { %v820_v29 = vmul.f32 %v4797_v6, %v5284_v16  ;;  %vm811_vm7 = vmor %vm809_vm5, %vm810_vm1  ;;  %v782_v2 = vsel %vm781_vm9, %v5282_v11, %v778_v32  ;;  %vm825_vm12 = vweird.f32 %v4797_v6  ;;  %v828_v11 = vand.u32 2147483647, %v5284_v16  ;;  %v3796_v32 = vld [vmem:[#allocation8 + $0xf0] sm:$0xf0] }
 0x113   :  { %v806_v7 = vsub.f32 1.0, %v805_v0  ;;  %v797_v42 = vsel %vm5309_vm4, %v5286_v4, %v793_v14  ;;  %v787_v17 = vsel %vm784_vm11, %v786_v56, %v782_v2  ;;  %vm826_vm14 = vmor %vm824_vm13, %vm825_vm12  ;;  %v3786_v2 = vld [vmem:[#allocation8 + $0xc8] sm:$0xf] }
 0x114   :  { %v821_v52 = vsub.f32 1.0, %v820_v29  ;;  %v802_v58 = vsel %vm799_vm10, %v801_v45, %v797_v42  ;;  %vm829_vm15 = vcmp.eq.f32.partialorder %v828_v11, 8.507059e+37  ;;  %v3795_v29 = vor.u32 %v4608_v24, %v3794_v21  ;;  %v3778_v42 = vld [vmem:[#allocation8 + $0xc0] sm:$0xf]  ;;  %v4602_v45 = vld [vmem:[#allocation8 + $0xc4] sm:$0xf] }
 0x115   :  { %v807_v18 = vmul.f32 %v4795_v10, %v806_v7  ;;  %v836_v61 = vmul.f32 0.0, %v802_v58  ;;  %v3762_v11 = vld [vmem:[#allocation8 + $0xa0] sm:$0xf]  ;;  %v3770_v24 = vld [vmem:[#allocation8 + $0xa8] sm:$0xf] }
 0x116   :  { %v822_v20 = vmul.f32 %v4797_v6, %v821_v52  ;;  %1379 = vmatpush.bf16.msrb.mxu0 %v3795_v29  ;;  %v3780_v52 = vld [vmem:[#allocation8 + $0xd0] sm:$0xf0]  ;;  %v4599_v29 = vld [vmem:[#allocation8 + $0xac] sm:$0xf] }
 0x117   :  { %v808_v36 = vadd.f32 %v4795_v10, %v807_v18 }
 0x118   :  { %v823_v4 = vadd.f32 %v4797_v6, %v822_v20  ;;  %v4603_v20 = vld [vmem:[#allocation8 + $0xcc] sm:$0xf] }
 0x119   :  { %v812_v44 = vsel %vm811_vm7, %v4795_v10, %v808_v36  ;;  %v830_v10 = vand.u32 2147483648, %v5284_v16  ;;  %v4609_v16 = vld [vmem:[#allocation8 + $0xf4] sm:$0xf0]  ;;  %v3799_v36 = vor.u32 %v4606_v26, %v3796_v32 }
 0x11a   :  { %v817_v48 = vsel %vm814_vm8, %v816_v28, %v812_v44  ;;  %v827_v3 = vsel %vm826_vm14, %v4797_v6, %v823_v4  ;;  %v3803_v6 = vor.u32 %v4609_v16, %v3802_v34  ;;  %v3804_v28 = vld [vmem:[#allocation8 + $0xf8] sm:$0xf0]  ;;  %v4604_v44 = vld [vmem:[#allocation8 + $0xcc] sm:$0xf0]  ;;  %v4601_v26 = vld [vmem:[#allocation8 + $0xb4] sm:$0xf0] }
 0x11b   :  { %v834_v53 = vmul.f32 2.0, %v817_v48  ;;  %v831_v9 = vor.u32 1.1754944e-38, %v830_v10  ;;  %v3807_v40 = vor.u32 %v4607_v37, %v3804_v28  ;;  %1392 = vmatpush.bf16.msrb.mxu1 %v3799_v36  ;;  %v3779_v48 = vor.u32 %v4604_v44, %v3778_v42  ;;  %v3746_v34 = vld [vmem:[#allocation8 + $0x80] sm:$0xf]  ;;  %v4596_v16 = vld [vmem:[#allocation8 + $0x8c] sm:$0xf0] }
 0x11c   :  { %1405 = vmatpush.bf16.msrb.mxu2 %v3803_v6  ;;  %v4594_v36 = vld [vmem:[#allocation8 + $0x84] sm:$0xf]  ;;  %v3747_v28 = vor.u32 %v4596_v16, %v3746_v34  ;;  %v3754_v42 = vld [vmem:[#allocation8 + $0x88] sm:$0xf]  ;;  %v4597_v44 = vld [vmem:[#allocation8 + $0x94] sm:$0xf0] }
 0x11d   :  { %v3546_v60 = vadd.f32 -1.0, %v834_v53  ;;  %v832_v12 = vsel %vm829_vm15, %v831_v9, %v827_v3  ;;  %1418 = vmatpush.bf16.msrb.mxu3 %v3807_v40  ;;  %v4605_v53 = vld [vmem:[#allocation8 + $0xd4] sm:$0xf0]  ;;  %1380 = vmatpush.bf16.msrb.mxu0 %v3779_v48  ;;  %v4600_v3 = vld [vmem:[#allocation8 + $0xac] sm:$0xf0] }
 0x11e   :  { %v4598_v9 = vld [vmem:[#allocation8 + $0xa4] sm:$0xf]  ;;  %v3748_v40 = vld [vmem:[#allocation8 + $0x90] sm:$0xf0] }
 0x11f   :  { %v837_v8 = vmul.f32 %v3546_v60, %v787_v17  ;;  %v3783_v60 = vor.u32 %v4602_v45, %v3780_v52  ;;  %v3787_v17 = vor.u32 %v4605_v53, %v3786_v2  ;;  %v3751_v53 = vor.u32 %v4594_v36, %v3748_v40  ;;  %v4586_v36 = vld [vmem:[#allocation8 + $0x44] sm:$0xf]  ;;  %v4589_v40 = vld [vmem:[#allocation8 + $0x54] sm:$0xf0] }
 0x121   :  { %v5321_v0 = vadd.f32 %v837_v8, %v836_v61  ;;  %v3788_v61 = vld [vmem:[#allocation8 + $0xd8] sm:$0xf0]  ;;  %1393 = vmatpush.bf16.msrb.mxu1 %v3783_v60  ;;  %1406 = vmatpush.bf16.msrb.mxu2 %v3787_v17 }
 0x122   :  { %v3791_v10 = vor.u32 %v4603_v20, %v3788_v61  ;;  %v3756_v60 = vld [vmem:[#allocation8 + $0x98] sm:$0xf0] }
 0x123   :  { %4798 = vtanh.f32 %v5321_v0 }
 0x124   :  { %1419 = vmatpush.bf16.msrb.mxu3 %v3791_v10  ;;  %v4592_v10 = vld [vmem:[#allocation8 + $0x6c] sm:$0xf0] }
 0x129   :  { %v4799_v7 = vpop.eup %4798 }
 0x12a   :  { %v840_v14 = vmul.f32 %v4799_v7, %v832_v12 }
 0x12c   :  { %v841_v18 = vpack.c.bf16 %v840_v14, %v840_v14  ;;  %v3763_v14 = vor.u32 %v4600_v3, %v3762_v11  ;;  %v4590_v11 = vld [vmem:[#allocation8 + $0x64] sm:$0xf] }
 0x12e   :  { %842 = vst [vmem:[#allocation11] sm:$0xf] %v841_v18  ;;  %1048 = vmatmul.bf16.vlgmr.msra.gmra.mxu0 %v841_v18  ;;  %1061 = vmatmul.bf16.vlgmr.msra.gmra.mxu1 %v841_v18 }
 0x12f   :  { %1074 = vmatmul.bf16.vlgmr.msra.gmra.mxu2 %v841_v18  ;;  %1087 = vmatmul.bf16.vlgmr.msra.gmra.mxu3 %v841_v18  ;;  %v3764_v18 = vld [vmem:[#allocation8 + $0xb0] sm:$0xf0] }
 0x130   :  { %v3767_v21 = vor.u32 %v4598_v9, %v3764_v18  ;;  %1381 = vmatpush.bf16.msrb.mxu0 %v3763_v14  ;;  %v4593_v14 = vld [vmem:[#allocation8 + $0x74] sm:$0xf0] }
 0x132   :  { %1394 = vmatpush.bf16.msrb.mxu1 %v3767_v21 }
 0x134   :  { %1382 = vmatpush.bf16.msrb.mxu0 %v3747_v28  ;;  %v3722_v28 = vld [vmem:[#allocation8 + $0x48] sm:$0xf] }
 0x136   :  { %1395 = vmatpush.bf16.msrb.mxu1 %v3751_v53 }
 0x1ab   :  { %v1049_v56 = vpop.f32.mrf.mxu0  ;;  %v1062_v58 = vpop.f32.mrf.mxu1 }
 0x1ac   :  { %v1092_v8 = vadd.f32 %v1049_v56, %v5179_v13  ;;  %v1093_v4 = vadd.f32 %v1062_v58, %v5182_v15  ;;  %v3771_v13 = vor.u32 %v4601_v26, %v3770_v24  ;;  %v3772_v15 = vld [vmem:[#allocation8 + $0xb8] sm:$0xf0]  ;;  %v3755_v56 = vor.u32 %v4597_v44, %v3754_v42  ;;  %v4595_v58 = vld [vmem:[#allocation8 + $0x8c] sm:$0xf] }
 0x1ad   :  { %v3775_v32 = vor.u32 %v4599_v29, %v3772_v15  ;;  %v3759_v17 = vor.u32 %v4595_v58, %v3756_v60  ;;  %v4591_v24 = vld [vmem:[#allocation8 + $0x6c] sm:$0xf]  ;;  %v3740_v26 = vld [vmem:[#allocation8 + $0x78] sm:$0xf0]  ;;  %v3714_v29 = vld [vmem:[#allocation8 + $0x40] sm:$0xf]  ;;  %v3723_v44 = vor.u32 %v4589_v40, %v3722_v28 }
 0x1ae   :  { %v3675_v7 = vmul.f32 -1.442695, %v1092_v8  ;;  %v3676_v12 = vmul.f32 -1.442695, %v1093_v4  ;;  %1407 = vmatpush.bf16.msrb.mxu2 %v3771_v13  ;;  %v3730_v8 = vld [vmem:[#allocation8 + $0x60] sm:$0xf]  ;;  %v3743_v34 = vor.u32 %v4591_v24, %v3740_v26 }
 0x1af   :  { %1420 = vmatpush.bf16.msrb.mxu3 %v3775_v32  ;;  %v3731_v9 = vor.u32 %v4592_v10, %v3730_v8  ;;  %v4588_v32 = vld [vmem:[#allocation8 + $0x4c] sm:$0xf0]  ;;  %v4582_v8 = vld [vmem:[#allocation8 + $0x24] sm:$0xf]  ;;  %v3706_v10 = vld [vmem:[#allocation8 + $0x28] sm:$0xf] }
 0x1b0   :  { %4800 = vpow2.f32 %v3675_v7  ;;  %v3715_v16 = vor.u32 %v4588_v32, %v3714_v29  ;;  %v4584_v58 = vld [vmem:[#allocation8 + $0x2c] sm:$0xf0]  ;;  %v4578_v24 = vld [vmem:[#allocation8 + $0x4] sm:$0xf]  ;;  %v3690_v32 = vld [vmem:[#allocation8 + $0x8] sm:$0xf] }
 0x1b1   :  { %4802 = vpow2.f32 %v3676_v12  ;;  %v3738_v12 = vld [vmem:[#allocation8 + $0x68] sm:$0xf]  ;;  %1383 = vmatpush.bf16.msrb.mxu0 %v3731_v9  ;;  %v4583_v9 = vld [vmem:[#allocation8 + $0x2c] sm:$0xf] }
 0x1b2   :  { %v1075_v6 = vpop.f32.mrf.mxu2  ;;  %v1088_v37 = vpop.f32.mrf.mxu3  ;;  %1408 = vmatpush.bf16.msrb.mxu2 %v3755_v56  ;;  %v3739_v21 = vor.u32 %v4593_v14, %v3738_v12  ;;  %v3682_v12 = vld [vmem:[#allocation8] sm:$0xf]  ;;  %v4580_v14 = vld [vmem:[#allocation8 + $0xc] sm:$0xf0] }
 0x1b3   :  { %v1094_v45 = vadd.f32 %v1075_v6, %v5189_v19  ;;  %v1095_v48 = vadd.f32 %v1088_v37, %v5192_v22  ;;  %v1051_v52 = vpop.f32.mrf.mxu0  ;;  %v1064_v2 = vpop.f32.mrf.mxu1  ;;  %v3732_v19 = vld [vmem:[#allocation8 + $0x70] sm:$0xf0]  ;;  %1421 = vmatpush.bf16.msrb.mxu3 %v3759_v17 }
 0x1b4   :  { %v3735_v7 = vor.u32 %v4590_v11, %v3732_v19  ;;  %v3716_v6 = vld [vmem:[#allocation8 + $0x50] sm:$0xf0]  ;;  %v3698_v52 = vld [vmem:[#allocation8 + $0x20] sm:$0xf] }
 0x1b5   :  { %v3677_v20 = vmul.f32 -1.442695, %v1094_v45  ;;  %v3678_v61 = vmul.f32 -1.442695, %v1095_v48  ;;  %v3719_v37 = vor.u32 %v4586_v36, %v3716_v6  ;;  %1384 = vmatpush.bf16.msrb.mxu0 %v3715_v16  ;;  %v4587_v45 = vld [vmem:[#allocation8 + $0x4c] sm:$0xf]  ;;  %v3683_v36 = vor.u32 %v4580_v14, %v3682_v12 }
 0x1b6   :  { %v4801_v4 = vpop.eup %4800  ;;  %1396 = vmatpush.bf16.msrb.mxu1 %v3735_v7  ;;  %1409 = vmatpush.bf16.msrb.mxu2 %v3739_v21  ;;  %v3724_v48 = vld [vmem:[#allocation8 + $0x58] sm:$0xf0]  ;;  %v4579_v6 = vld [vmem:[#allocation8 + $0xc] sm:$0xf] }
 0x1b7   :  { %v4803_v3 = vpop.eup %4802  ;;  %v5331_v22 = vadd.f32 1.0, %v4801_v4  ;;  %4804 = vpow2.f32 %v3677_v20  ;;  %1422 = vmatpush.bf16.msrb.mxu3 %v3743_v34  ;;  %v3727_v56 = vor.u32 %v4587_v45, %v3724_v48  ;;  %v3699_v20 = vor.u32 %v4584_v58, %v3698_v52  ;;  %v3700_v4 = vld [vmem:[#allocation8 + $0x30] sm:$0xf0]  ;;  %v3708_v7 = vld [vmem:[#allocation8 + $0x38] sm:$0xf0] }
 0x1b8   :  { %v5333_v18 = vadd.f32 1.0, %v4803_v3  ;;  %4806 = vpow2.f32 %v3678_v61  ;;  %v4585_v3 = vld [vmem:[#allocation8 + $0x34] sm:$0xf0]  ;;  %v3703_v26 = vor.u32 %v4582_v8, %v3700_v4 }
 0x1b9   :  { %4808 = vrcp.f32 %v5331_v22  ;;  %1385 = vmatpush.bf16.msrb.mxu0 %v3699_v20  ;;  %v3707_v29 = vor.u32 %v4585_v3, %v3706_v10  ;;  %v4581_v34 = vld [vmem:[#allocation8 + $0x14] sm:$0xf0]  ;;  %vm1117_vm6 = vweird.f32 %v5331_v22  ;;  %v1123_v12 = vand.u32 2147483648, %v5331_v22 }
 0x1ba   :  { %4810 = vrcp.f32 %v5333_v18  ;;  %v1077_v13 = vpop.f32.mrf.mxu2  ;;  %v1090_v15 = vpop.f32.mrf.mxu3  ;;  %1397 = vmatpush.bf16.msrb.mxu1 %v3719_v37  ;;  %1410 = vmatpush.bf16.msrb.mxu2 %v3723_v44  ;;  %v3692_v37 = vld [vmem:[#allocation8 + $0x18] sm:$0xf0]  ;;  %vm1132_vm2 = vweird.f32 %v5333_v18  ;;  %v1136_v10 = vand.u32 2147483647, %v5333_v18  ;;  %v1121_v14 = vand.u32 2147483647, %v5331_v22 }
 0x1bb   :  { %1423 = vmatpush.bf16.msrb.mxu3 %v3727_v56  ;;  %v3711_v13 = vor.u32 %v4583_v9, %v3708_v7  ;;  %v3684_v15 = vld [vmem:[#allocation8 + $0x10] sm:$0xf0]  ;;  %v3695_v48 = vor.u32 %v4579_v6, %v3692_v37 }
 0x1bc   :  { %v3687_v40 = vor.u32 %v4578_v24, %v3684_v15  ;;  %vm1137_vm10 = vcmp.eq.f32.partialorder %v1136_v10, 8.507059e+37  ;;  %vm1122_vm11 = vcmp.eq.f32.partialorder %v1121_v14, 8.507059e+37  ;;  %v3935_v10 = vld [vmem:[#allocation8 + $0xe8] sm:$0xf] }
 0x1bd   :  { %v4805_v42 = vpop.eup %4804  ;;  %1386 = vmatpush.bf16.msrb.mxu0 %v3683_v36 }
 0x1be   :  { %v4807_v2 = vpop.eup %4806  ;;  %v5337_v53 = vadd.f32 1.0, %v4805_v42  ;;  %1398 = vmatpush.bf16.msrb.mxu1 %v3703_v26  ;;  %1411 = vmatpush.bf16.msrb.mxu2 %v3707_v29  ;;  %v3691_v42 = vor.u32 %v4581_v34, %v3690_v32  ;;  %v1124_v32 = vor.u32 1.1754944e-38, %v1123_v12  ;;  %v4636_v12 = vld [vmem:[#allocation8 + $0xcc] sm:$0xf0] }
 0x1bf   :  { %v5339_v60 = vpop.eup %4808  ;;  %v5341_v17 = vadd.f32 1.0, %v4807_v2  ;;  %1424 = vmatpush.bf16.msrb.mxu3 %v3711_v13 }
 0x1c0   :  { %v5343_v61 = vpop.eup %4810  ;;  %4812 = vrcp.f32 %v5337_v53  ;;  %v1113_v11 = vmul.f32 %v5339_v60, %v5331_v22  ;;  %v1153_v58 = vand.u32 2147483648, %v5337_v53  ;;  %v1151_v4 = vand.u32 2147483647, %v5337_v53 }
 0x1c1   :  { %v1128_v19 = vmul.f32 %v5343_v61, %v5333_v18  ;;  %4814 = vrcp.f32 %v5341_v17  ;;  %vm1133_vm0 = vweird.f32 %v5343_v61  ;;  %vm1118_vm3 = vweird.f32 %v5339_v60 }
 0x1c2   :  { %v1114_v16 = vsub.f32 1.0, %v1113_v11  ;;  %1399 = vmatpush.bf16.msrb.mxu1 %v3687_v40  ;;  %1412 = vmatpush.bf16.msrb.mxu2 %v3691_v42  ;;  %v1138_v11 = vand.u32 2147483648, %v5333_v18  ;;  %vm5366_vm4 = vmor %vm1132_vm2, %vm1133_vm0  ;;  %vm1147_vm5 = vweird.f32 %v5337_v53  ;;  %v1154_v18 = vor.u32 1.1754944e-38, %v1153_v58  ;;  %v4640_v58 = vld [vmem:[#allocation8 + $0xec] sm:$0xf0] }
 0x1c3   :  { %v1129_v21 = vsub.f32 1.0, %v1128_v19  ;;  %1425 = vmatpush.bf16.msrb.mxu3 %v3695_v48  ;;  %vm1152_vm8 = vcmp.eq.f32.partialorder %v1151_v4, 8.507059e+37  ;;  %vm1119_vm9 = vmor %vm1117_vm6, %vm1118_vm3  ;;  %v1168_v40 = vand.u32 2147483648, %v5341_v17  ;;  %vm1162_vm13 = vweird.f32 %v5341_v17  ;;  %v3929_v4 = vld [vmem:[#allocation8 + $0xf0] sm:$0xf0] }
 0x1c4   :  { %v1115_v2 = vmul.f32 %v5339_v60, %v1114_v16  ;;  %v1139_v26 = vor.u32 1.1754944e-38, %v1138_v11 }
 0x1c5   :  { %v1130_v44 = vmul.f32 %v5343_v61, %v1129_v21 }
 0x1c6   :  { %v4813_v28 = vpop.eup %4812  ;;  %v1116_v3 = vadd.f32 %v5339_v60, %v1115_v2 }
 0x1c7   :  { %v1143_v45 = vmul.f32 %v4813_v28, %v5337_v53  ;;  %v4815_v52 = vpop.eup %4814  ;;  %v1131_v20 = vadd.f32 %v5343_v61, %v1130_v44  ;;  %vm1148_vm1 = vweird.f32 %v4813_v28  ;;  %v1169_v44 = vor.u32 1.1754944e-38, %v1168_v40 }
 0x1c8   :  { %v1158_v19 = vmul.f32 %v4815_v52, %v5341_v17  ;;  %vm1149_vm7 = vmor %vm1147_vm5, %vm1148_vm1  ;;  %v1120_v53 = vsel %vm1119_vm9, %v5339_v60, %v1116_v3  ;;  %vm1163_vm12 = vweird.f32 %v4815_v52  ;;  %v1166_v60 = vand.u32 2147483647, %v5341_v17  ;;  %v4641_v17 = vld [vmem:[#allocation8 + $0xf4] sm:$0xf0]  ;;  %v3937_v3 = vld [vmem:[#allocation8 + $0xf8] sm:$0xf0] }
 0x1c9   :  { %v1144_v56 = vsub.f32 1.0, %v1143_v45  ;;  %v1135_v21 = vsel %vm5366_vm4, %v5343_v61, %v1131_v20  ;;  %v1125_v36 = vsel %vm1122_vm11, %v1124_v32, %v1120_v53  ;;  %vm1164_vm14 = vmor %vm1162_vm13, %vm1163_vm12  ;;  %v4638_v20 = vld [vmem:[#allocation8 + $0xe4] sm:$0xf]  ;;  %v4635_v32 = vld [vmem:[#allocation8 + $0xcc] sm:$0xf] }
 0x1ca   :  { %v1159_v13 = vsub.f32 1.0, %v1158_v19  ;;  %v1140_v34 = vsel %vm1137_vm10, %v1139_v26, %v1135_v21  ;;  %vm1167_vm15 = vcmp.eq.f32.partialorder %v1166_v60, 8.507059e+37  ;;  %v3932_v11 = vor.u32 %v4638_v20, %v3929_v4  ;;  %v4639_v19 = vld [vmem:[#allocation8 + $0xec] sm:$0xf]  ;;  %v3913_v21 = vld [vmem:[#allocation8 + $0xd0] sm:$0xf0] }
 0x1cb   :  { %v1145_v8 = vmul.f32 %v4813_v28, %v1144_v56  ;;  %v1174_v6 = vmul.f32 %v1140_v34, %v5321_v0  ;;  %v3927_v56 = vld [vmem:[#allocation8 + $0xe0] sm:$0xf]  ;;  %v3940_v9 = vor.u32 %v4639_v19, %v3937_v3  ;;  %v4637_v26 = vld [vmem:[#allocation8 + $0xd4] sm:$0xf0]  ;;  %v3921_v34 = vld [vmem:[#allocation8 + $0xd8] sm:$0xf0] }
 0x1cc   :  { %v1160_v22 = vmul.f32 %v4815_v52, %v1159_v13  ;;  %1731 = vmatpush.bf16.msra.mxu1 %v3932_v11  ;;  %v4628_v20 = vld [vmem:[#allocation8 + $0x8c] sm:$0xf0]  ;;  %v3881_v11 = vld [vmem:[#allocation8 + $0x90] sm:$0xf0]  ;;  %v4629_v19 = vld [vmem:[#allocation8 + $0x94] sm:$0xf0] }
 0x1cd   :  { %v1146_v7 = vadd.f32 %v4813_v28, %v1145_v8  ;;  %v3928_v8 = vor.u32 %v4640_v58, %v3927_v56  ;;  %1757 = vmatpush.bf16.msra.mxu3 %v3940_v9  ;;  %v3879_v58 = vld [vmem:[#allocation8 + $0x80] sm:$0xf] }
 0x1cf   :  { %v1150_v24 = vsel %vm1149_vm7, %v4813_v28, %v1146_v7  ;;  %v1161_v28 = vadd.f32 %v4815_v52, %v1160_v22  ;;  %1718 = vmatpush.bf16.msra.mxu0 %v3928_v8  ;;  %v3911_v7 = vld [vmem:[#allocation8 + $0xc0] sm:$0xf]  ;;  %v3924_v22 = vor.u32 %v4635_v32, %v3921_v34  ;;  %v4626_v8 = vld [vmem:[#allocation8 + $0x84] sm:$0xf]  ;;  %v4624_v32 = vld [vmem:[#allocation8 + $0x6c] sm:$0xf0] }
 0x1d0   :  { %v1155_v29 = vsel %vm1152_vm8, %v1154_v18, %v1150_v24  ;;  %v4634_v18 = vld [vmem:[#allocation8 + $0xc4] sm:$0xf]  ;;  %v3912_v14 = vor.u32 %v4636_v12, %v3911_v7  ;;  %v3919_v24 = vld [vmem:[#allocation8 + $0xc8] sm:$0xf] }
 0x1d1   :  { %v1172_v15 = vmul.f32 2.0, %v1155_v29  ;;  %v1165_v42 = vsel %vm1164_vm14, %v4815_v52, %v1161_v28  ;;  %v3936_v52 = vor.u32 %v4641_v17, %v3935_v10  ;;  %v3916_v53 = vor.u32 %v4634_v18, %v3913_v21  ;;  %v4630_v28 = vld [vmem:[#allocation8 + $0xa4] sm:$0xf]  ;;  %1758 = vmatpush.bf16.msra.mxu3 %v3924_v22  ;;  %v4627_v21 = vld [vmem:[#allocation8 + $0x8c] sm:$0xf] }
 0x1d2   :  { %v1170_v48 = vsel %vm1167_vm15, %v1169_v44, %v1165_v42  ;;  %v3897_v44 = vld [vmem:[#allocation8 + $0xb0] sm:$0xf0]  ;;  %v3880_v17 = vor.u32 %v4628_v20, %v3879_v58  ;;  %v3884_v18 = vor.u32 %v4626_v8, %v3881_v11  ;;  %v4622_v34 = vld [vmem:[#allocation8 + $0x64] sm:$0xf]  ;;  %v3855_v20 = vld [vmem:[#allocation8 + $0x48] sm:$0xf] }
 0x1d3   :  { %v3679_v16 = vadd.f32 -1.0, %v1172_v15  ;;  %1744 = vmatpush.bf16.msra.mxu2 %v3936_v52  ;;  %v3920_v15 = vor.u32 %v4637_v26, %v3919_v24  ;;  %1719 = vmatpush.bf16.msra.mxu0 %v3912_v14  ;;  %v3887_v52 = vld [vmem:[#allocation8 + $0x88] sm:$0xf]  ;;  %v3889_v24 = vld [vmem:[#allocation8 + $0x98] sm:$0xf0] }
 0x1d4   :  { %1732 = vmatpush.bf16.msra.mxu1 %v3916_v53  ;;  %v3888_v14 = vor.u32 %v4629_v19, %v3887_v52  ;;  %v3892_v26 = vor.u32 %v4627_v21, %v3889_v24  ;;  %v3863_v53 = vld [vmem:[#allocation8 + $0x60] sm:$0xf]  ;;  %v4621_v8 = vld [vmem:[#allocation8 + $0x54] sm:$0xf0]  ;;  %v3857_v11 = vld [vmem:[#allocation8 + $0x58] sm:$0xf0] }
 0x1d5   :  { %v1175_v37 = vmul.f32 %v3679_v16, %v1125_v36  ;;  %v3831_v52 = vld [vmem:[#allocation8 + $0x20] sm:$0xf]  ;;  %v4614_v24 = vld [vmem:[#allocation8 + $0x24] sm:$0xf] }
 0x1d7   :  { %v5379_v61 = vadd.f32 %v1175_v37, %v1174_v6  ;;  %1745 = vmatpush.bf16.msra.mxu2 %v3920_v15  ;;  %v3895_v6 = vld [vmem:[#allocation8 + $0xa0] sm:$0xf]  ;;  %v4632_v37 = vld [vmem:[#allocation8 + $0xac] sm:$0xf0] }
 0x1d8   :  { %v3896_v42 = vor.u32 %v4632_v37, %v3895_v6  ;;  %v3871_v6 = vld [vmem:[#allocation8 + $0x68] sm:$0xf]  ;;  %v4625_v37 = vld [vmem:[#allocation8 + $0x74] sm:$0xf0] }
 0x1d9   :  { %4816 = vtanh.f32 %v5379_v61 }
 0x1da   :  { %1720 = vmatpush.bf16.msra.mxu0 %v3896_v42  ;;  %v3873_v42 = vld [vmem:[#allocation8 + $0x78] sm:$0xf0] }
 0x1de   :  { %1721 = vmatpush.bf16.msra.mxu0 %v3880_v17  ;;  %v4619_v17 = vld [vmem:[#allocation8 + $0x4c] sm:$0xf] }
 0x1df   :  { %v4817_v45 = vpop.eup %4816 }
 0x1e0   :  { %v1178_v0 = vmul.f32 %v4817_v45, %v1170_v48  ;;  %v3900_v45 = vor.u32 %v4630_v28, %v3897_v44  ;;  %v3903_v48 = vld [vmem:[#allocation8 + $0xa8] sm:$0xf]  ;;  %v3847_v44 = vld [vmem:[#allocation8 + $0x40] sm:$0xf] }
 0x1e2   :  { %v1179_v2 = vpack.c.bf16 %v1178_v0, %v1178_v0  ;;  %v4633_v0 = vld [vmem:[#allocation8 + $0xb4] sm:$0xf0]  ;;  %1733 = vmatpush.bf16.msra.mxu1 %v3900_v45 }
 0x1e4   :  { %1181 = vst [vmem:[#allocation11 + $0x4] sm:$0xf] %v1179_v2  ;;  %1387 = vmatmul.bf16.vlgmr.msrb.gmra.mxu0 %v1179_v2  ;;  %1400 = vmatmul.bf16.vlgmr.msrb.gmra.mxu1 %v1179_v2 }
 0x1e5   :  { %1413 = vmatmul.bf16.vlgmr.msrb.gmra.mxu2 %v1179_v2  ;;  %1426 = vmatmul.bf16.vlgmr.msrb.gmra.mxu3 %v1179_v2  ;;  %v4631_v2 = vld [vmem:[#allocation8 + $0xac] sm:$0xf] }
 0x1e6   :  { %1734 = vmatpush.bf16.msra.mxu1 %v3884_v18 }
 0x261   :  { %v1388_v29 = vpop.f32.mrf.mxu0  ;;  %v1401_v13 = vpop.f32.mrf.mxu1 }
 0x262   :  { %v1431_v16 = vadd.f32 %v1388_v29, %v5195_v23  ;;  %v1432_v36 = vadd.f32 %v1401_v13, %v5198_v25  ;;  %v3904_v23 = vor.u32 %v4633_v0, %v3903_v48  ;;  %v3905_v25 = vld [vmem:[#allocation8 + $0xb8] sm:$0xf0]  ;;  %v4620_v0 = vld [vmem:[#allocation8 + $0x4c] sm:$0xf0] }
 0x263   :  { %v3908_v56 = vor.u32 %v4631_v2, %v3905_v25  ;;  %v4618_v25 = vld [vmem:[#allocation8 + $0x44] sm:$0xf] }
 0x264   :  { %v3808_v40 = vmul.f32 -1.442695, %v1431_v16  ;;  %v3809_v60 = vmul.f32 -1.442695, %v1432_v36  ;;  %1746 = vmatpush.bf16.msra.mxu2 %v3904_v23  ;;  %v3864_v36 = vor.u32 %v4624_v32, %v3863_v53  ;;  %v3848_v23 = vor.u32 %v4620_v0, %v3847_v44  ;;  %v4615_v32 = vld [vmem:[#allocation8 + $0x2c] sm:$0xf] }
 0x265   :  { %1759 = vmatpush.bf16.msra.mxu3 %v3908_v56  ;;  %v3849_v56 = vld [vmem:[#allocation8 + $0x50] sm:$0xf0]  ;;  %v4613_v44 = vld [vmem:[#allocation8 + $0x14] sm:$0xf0]  ;;  %v4611_v0 = vld [vmem:[#allocation8 + $0xc] sm:$0xf] }
 0x266   :  { %4818 = vpow2.f32 %v3808_v40  ;;  %v3872_v40 = vor.u32 %v4625_v37, %v3871_v6  ;;  %1722 = vmatpush.bf16.msra.mxu0 %v3864_v36  ;;  %v3852_v58 = vor.u32 %v4618_v25, %v3849_v56 }
 0x267   :  { %4820 = vpow2.f32 %v3809_v60  ;;  %v4623_v60 = vld [vmem:[#allocation8 + $0x6c] sm:$0xf] }
 0x268   :  { %v1414_v4 = vpop.f32.mrf.mxu2  ;;  %v1427_v10 = vpop.f32.mrf.mxu3  ;;  %1747 = vmatpush.bf16.msra.mxu2 %v3888_v14  ;;  %v3876_v2 = vor.u32 %v4623_v60, %v3873_v42  ;;  %v3817_v60 = vld [vmem:[#allocation8 + $0x10] sm:$0xf0]  ;;  %v3823_v42 = vld [vmem:[#allocation8 + $0x8] sm:$0xf] }
 0x269   :  { %v1433_v3 = vadd.f32 %v1414_v4, %v5201_v27  ;;  %v1434_v9 = vadd.f32 %v1427_v10, %v5204_v30  ;;  %v1390_v7 = vpop.f32.mrf.mxu0  ;;  %v1403_v12 = vpop.f32.mrf.mxu1  ;;  %v3865_v27 = vld [vmem:[#allocation8 + $0x70] sm:$0xf0]  ;;  %1760 = vmatpush.bf16.msra.mxu3 %v3892_v26  ;;  %v3856_v10 = vor.u32 %v4621_v8, %v3855_v20  ;;  %v3824_v56 = vor.u32 %v4613_v44, %v3823_v42 }
 0x26a   :  { %v3868_v22 = vor.u32 %v4622_v34, %v3865_v27  ;;  %1723 = vmatpush.bf16.msra.mxu0 %v3848_v23  ;;  %v4616_v7 = vld [vmem:[#allocation8 + $0x2c] sm:$0xf0]  ;;  %v3833_v26 = vld [vmem:[#allocation8 + $0x30] sm:$0xf0]  ;;  %v3841_v34 = vld [vmem:[#allocation8 + $0x38] sm:$0xf0] }
 0x26b   :  { %v3810_v29 = vmul.f32 -1.442695, %v1433_v3  ;;  %v3811_v13 = vmul.f32 -1.442695, %v1434_v9  ;;  %v3860_v9 = vor.u32 %v4619_v17, %v3857_v11  ;;  %v3832_v14 = vor.u32 %v4616_v7, %v3831_v52  ;;  %v3815_v27 = vld [vmem:[#allocation8] sm:$0xf] }
 0x26c   :  { %v4819_v15 = vpop.eup %4818  ;;  %1735 = vmatpush.bf16.msra.mxu1 %v3868_v22  ;;  %1748 = vmatpush.bf16.msra.mxu2 %v3872_v40  ;;  %v4610_v22 = vld [vmem:[#allocation8 + $0x4] sm:$0xf]  ;;  %v3836_v6 = vor.u32 %v4614_v24, %v3833_v26  ;;  %v3844_v40 = vor.u32 %v4615_v32, %v3841_v34 }
 0x26d   :  { %v4821_v16 = vpop.eup %4820  ;;  %v5389_v30 = vadd.f32 1.0, %v4819_v15  ;;  %4822 = vpow2.f32 %v3810_v29  ;;  %1761 = vmatpush.bf16.msra.mxu3 %v3876_v2  ;;  %v3839_v29 = vld [vmem:[#allocation8 + $0x28] sm:$0xf]  ;;  %v4617_v15 = vld [vmem:[#allocation8 + $0x34] sm:$0xf0]  ;;  %v3820_v25 = vor.u32 %v4610_v22, %v3817_v60 }
 0x26e   :  { %v5391_v28 = vadd.f32 1.0, %v4821_v16  ;;  %4824 = vpow2.f32 %v3811_v13  ;;  %1724 = vmatpush.bf16.msra.mxu0 %v3832_v14  ;;  %v4612_v16 = vld [vmem:[#allocation8 + $0xc] sm:$0xf0]  ;;  %v3840_v37 = vor.u32 %v4617_v15, %v3839_v29  ;;  %v3825_v2 = vld [vmem:[#allocation8 + $0x18] sm:$0xf0] }
 0x26f   :  { %4826 = vrcp.f32 %v5389_v30  ;;  %v3828_v8 = vor.u32 %v4611_v0, %v3825_v2  ;;  %vm1456_vm6 = vweird.f32 %v5389_v30  ;;  %v1460_v15 = vand.u32 2147483647, %v5389_v30 }
 0x270   :  { %4828 = vrcp.f32 %v5391_v28  ;;  %v1416_v45 = vpop.f32.mrf.mxu2  ;;  %v1429_v48 = vpop.f32.mrf.mxu3  ;;  %1736 = vmatpush.bf16.msra.mxu1 %v3852_v58  ;;  %1749 = vmatpush.bf16.msra.mxu2 %v3856_v10  ;;  %vm1471_vm2 = vweird.f32 %v5391_v28  ;;  %v1475_v7 = vand.u32 2147483647, %v5391_v28  ;;  %v1477_v14 = vand.u32 2147483648, %v5391_v28 }
 0x271   :  { %1762 = vmatpush.bf16.msra.mxu3 %v3860_v9  ;;  %v3816_v48 = vor.u32 %v4612_v16, %v3815_v27  ;;  %vm1461_vm11 = vcmp.eq.f32.partialorder %v1460_v15, 8.507059e+37 }
 0x272   :  { %v1478_v27 = vor.u32 1.1754944e-38, %v1477_v14  ;;  %vm1476_vm10 = vcmp.eq.f32.partialorder %v1475_v7, 8.507059e+37  ;;  %v4044_v14 = vld [vmem:[#allocation8 + $0xc0] sm:$0xf] }
 0x273   :  { %v4823_v4 = vpop.eup %4822  ;;  %1725 = vmatpush.bf16.msra.mxu0 %v3816_v48 }
 0x274   :  { %v4825_v19 = vpop.eup %4824  ;;  %v5395_v3 = vadd.f32 1.0, %v4823_v4  ;;  %1737 = vmatpush.bf16.msra.mxu1 %v3836_v6  ;;  %1750 = vmatpush.bf16.msra.mxu2 %v3840_v37 }
 0x275   :  { %v5397_v12 = vpop.eup %4826  ;;  %v5399_v18 = vadd.f32 1.0, %v4825_v19  ;;  %1763 = vmatpush.bf16.msra.mxu3 %v3844_v40 }
 0x276   :  { %v5401_v21 = vpop.eup %4828  ;;  %4830 = vrcp.f32 %v5395_v3  ;;  %v1452_v13 = vmul.f32 %v5397_v12, %v5389_v30  ;;  %v1492_v11 = vand.u32 2147483648, %v5395_v3  ;;  %v1490_v9 = vand.u32 2147483647, %v5395_v3 }
 0x277   :  { %v1467_v53 = vmul.f32 %v5401_v21, %v5391_v28  ;;  %4832 = vrcp.f32 %v5399_v18  ;;  %vm1472_vm0 = vweird.f32 %v5401_v21  ;;  %vm1457_vm3 = vweird.f32 %v5397_v12 }
 0x278   :  { %v1453_v45 = vsub.f32 1.0, %v1452_v13  ;;  %1738 = vmatpush.bf16.msra.mxu1 %v3820_v25  ;;  %1751 = vmatpush.bf16.msra.mxu2 %v3824_v56  ;;  %vm5424_vm4 = vmor %vm1471_vm2, %vm1472_vm0  ;;  %vm1486_vm5 = vweird.f32 %v5395_v3  ;;  %v1493_v28 = vor.u32 1.1754944e-38, %v1492_v11  ;;  %vm1491_vm8 = vcmp.eq.f32.partialorder %v1490_v9, 8.507059e+37  ;;  %v4068_v11 = vld [vmem:[#allocation8 + $0xe8] sm:$0xf] }
 0x279   :  { %v1468_v36 = vsub.f32 1.0, %v1467_v53  ;;  %1764 = vmatpush.bf16.msra.mxu3 %v3828_v8  ;;  %v1462_v53 = vand.u32 2147483648, %v5389_v30  ;;  %vm1458_vm9 = vmor %vm1456_vm6, %vm1457_vm3  ;;  %v1507_v48 = vand.u32 2147483648, %v5399_v18  ;;  %vm1501_vm13 = vweird.f32 %v5399_v18  ;;  %v4670_v8 = vld [vmem:[#allocation8 + $0xe4] sm:$0xf] }
 0x27a   :  { %v1454_v10 = vmul.f32 %v5397_v12, %v1453_v45  ;;  %v4070_v9 = vld [vmem:[#allocation8 + $0xf8] sm:$0xf0] }
 0x27b   :  { %v1469_v58 = vmul.f32 %v5401_v21, %v1468_v36  ;;  %v1463_v6 = vor.u32 1.1754944e-38, %v1462_v53  ;;  %v1508_v2 = vor.u32 1.1754944e-38, %v1507_v48  ;;  %v4052_v53 = vld [vmem:[#allocation8 + $0xc8] sm:$0xf] }
 0x27c   :  { %v4831_v23 = vpop.eup %4830  ;;  %v1455_v26 = vadd.f32 %v5397_v12, %v1454_v10 }
 0x27d   :  { %v1482_v20 = vmul.f32 %v4831_v23, %v5395_v3  ;;  %v4833_v4 = vpop.eup %4832  ;;  %v1470_v52 = vadd.f32 %v5401_v21, %v1469_v58  ;;  %vm1487_vm1 = vweird.f32 %v4831_v23  ;;  %v4060_v58 = vld [vmem:[#allocation8 + $0xe0] sm:$0xf] }
 0x27e   :  { %v1497_v24 = vmul.f32 %v4833_v4, %v5399_v18  ;;  %vm1488_vm7 = vmor %vm1486_vm5, %vm1487_vm1  ;;  %v1459_v3 = vsel %vm1458_vm9, %v5397_v12, %v1455_v26  ;;  %vm1502_vm12 = vweird.f32 %v4833_v4  ;;  %v1505_v12 = vand.u32 2147483647, %v5399_v18  ;;  %v4673_v18 = vld [vmem:[#allocation8 + $0xf4] sm:$0xf0]  ;;  %v4666_v26 = vld [vmem:[#allocation8 + $0xc4] sm:$0xf] }
 0x27f   :  { %v1483_v17 = vsub.f32 1.0, %v1482_v20  ;;  %v1474_v32 = vsel %vm5424_vm4, %v5401_v21, %v1470_v52  ;;  %v1464_v60 = vsel %vm1461_vm11, %v1463_v6, %v1459_v3  ;;  %vm1503_vm14 = vmor %vm1501_vm13, %vm1502_vm12  ;;  %v4672_v20 = vld [vmem:[#allocation8 + $0xec] sm:$0xf0] }
 0x280   :  { %v1498_v36 = vsub.f32 1.0, %v1497_v24  ;;  %v1479_v37 = vsel %vm1476_vm10, %v1478_v27, %v1474_v32  ;;  %vm1506_vm15 = vcmp.eq.f32.partialorder %v1505_v12, 8.507059e+37  ;;  %v4061_v10 = vor.u32 %v4672_v20, %v4060_v58  ;;  %v4668_v24 = vld [vmem:[#allocation8 + $0xcc] sm:$0xf0]  ;;  %v4036_v12 = vld [vmem:[#allocation8 + $0xa8] sm:$0xf] }
 0x281   :  { %v1484_v19 = vmul.f32 %v4831_v23, %v1483_v17  ;;  %v1513_v42 = vmul.f32 %v1479_v37, %v5379_v61  ;;  %v4062_v17 = vld [vmem:[#allocation8 + $0xf0] sm:$0xf0]  ;;  %v4045_v29 = vor.u32 %v4668_v24, %v4044_v14  ;;  %v4028_v37 = vld [vmem:[#allocation8 + $0xa0] sm:$0xf]  ;;  %v4659_v14 = vld [vmem:[#allocation8 + $0x8c] sm:$0xf] }
 0x282   :  { %v1499_v30 = vmul.f32 %v4833_v4, %v1498_v36  ;;  %v4065_v52 = vor.u32 %v4670_v8, %v4062_v17  ;;  %2057 = vmatpush.bf16.msrb.mxu0 %v4061_v10  ;;  %v4054_v36 = vld [vmem:[#allocation8 + $0xd8] sm:$0xf0]  ;;  %v4014_v10 = vld [vmem:[#allocation8 + $0x90] sm:$0xf0]  ;;  %v4020_v17 = vld [vmem:[#allocation8 + $0x88] sm:$0xf] }
 0x283   :  { %v1485_v13 = vadd.f32 %v4831_v23, %v1484_v19  ;;  %v4671_v19 = vld [vmem:[#allocation8 + $0xec] sm:$0xf]  ;;  %v4022_v24 = vld [vmem:[#allocation8 + $0x98] sm:$0xf0] }
 0x284   :  { %v1500_v45 = vadd.f32 %v4833_v4, %v1499_v30  ;;  %v4073_v7 = vor.u32 %v4671_v19, %v4070_v9  ;;  %2070 = vmatpush.bf16.msrb.mxu1 %v4065_v52 }
 0x285   :  { %v1489_v34 = vsel %vm1488_vm7, %v4831_v23, %v1485_v13  ;;  %v4046_v13 = vld [vmem:[#allocation8 + $0xd0] sm:$0xf0] }
 0x286   :  { %v1494_v16 = vsel %vm1491_vm8, %v1493_v28, %v1489_v34  ;;  %v1504_v0 = vsel %vm1503_vm14, %v4833_v4, %v1500_v45  ;;  %v4069_v4 = vor.u32 %v4673_v18, %v4068_v11  ;;  %2096 = vmatpush.bf16.msrb.mxu3 %v4073_v7  ;;  %v4669_v28 = vld [vmem:[#allocation8 + $0xd4] sm:$0xf0]  ;;  %v4049_v34 = vor.u32 %v4666_v26, %v4046_v13  ;;  %v4030_v45 = vld [vmem:[#allocation8 + $0xb0] sm:$0xf0] }
 0x287   :  { %v1511_v22 = vmul.f32 2.0, %v1494_v16  ;;  %v1509_v25 = vsel %vm1506_vm15, %v1508_v2, %v1504_v0  ;;  %v4053_v27 = vor.u32 %v4669_v28, %v4052_v53  ;;  %v4667_v16 = vld [vmem:[#allocation8 + $0xcc] sm:$0xf]  ;;  %2058 = vmatpush.bf16.msrb.mxu0 %v4045_v29  ;;  %v4665_v0 = vld [vmem:[#allocation8 + $0xb4] sm:$0xf0]  ;;  %v4025_v26 = vor.u32 %v4659_v14, %v4022_v24 }
 0x288   :  { %2083 = vmatpush.bf16.msrb.mxu2 %v4069_v4  ;;  %v4057_v6 = vor.u32 %v4667_v16, %v4054_v36  ;;  %2071 = vmatpush.bf16.msrb.mxu1 %v4049_v34  ;;  %v4663_v2 = vld [vmem:[#allocation8 + $0xac] sm:$0xf]  ;;  %v4661_v11 = vld [vmem:[#allocation8 + $0x94] sm:$0xf0]  ;;  %v3996_v53 = vld [vmem:[#allocation8 + $0x60] sm:$0xf] }
 0x289   :  { %v3812_v40 = vadd.f32 -1.0, %v1511_v22  ;;  %v4021_v7 = vor.u32 %v4661_v11, %v4020_v17  ;;  %v4004_v36 = vld [vmem:[#allocation8 + $0x68] sm:$0xf]  ;;  %v4648_v17 = vld [vmem:[#allocation8 + $0x2c] sm:$0xf0] }
 0x28a   :  { %2097 = vmatpush.bf16.msrb.mxu3 %v4057_v6 }
 0x28b   :  { %v1514_v44 = vmul.f32 %v3812_v40, %v1464_v60  ;;  %v4664_v40 = vld [vmem:[#allocation8 + $0xac] sm:$0xf0]  ;;  %v4662_v60 = vld [vmem:[#allocation8 + $0xa4] sm:$0xf] }
 0x28c   :  { %2084 = vmatpush.bf16.msrb.mxu2 %v4053_v27  ;;  %v4033_v48 = vor.u32 %v4662_v60, %v4030_v45  ;;  %v3980_v60 = vld [vmem:[#allocation8 + $0x40] sm:$0xf] }
 0x28d   :  { %v5437_v21 = vadd.f32 %v1514_v44, %v1513_v42  ;;  %v4029_v44 = vor.u32 %v4664_v40, %v4028_v37  ;;  %v4655_v37 = vld [vmem:[#allocation8 + $0x6c] sm:$0xf]  ;;  %v4006_v40 = vld [vmem:[#allocation8 + $0x78] sm:$0xf0] }
 0x28e   :  { %2072 = vmatpush.bf16.msrb.mxu1 %v4033_v48  ;;  %v4009_v45 = vor.u32 %v4655_v37, %v4006_v40  ;;  %v4643_v40 = vld [vmem:[#allocation8 + $0xc] sm:$0xf] }
 0x28f   :  { %4834 = vtanh.f32 %v5437_v21  ;;  %2059 = vmatpush.bf16.msrb.mxu0 %v4029_v44  ;;  %v4652_v44 = vld [vmem:[#allocation8 + $0x4c] sm:$0xf0] }
 0x290   :  { %v3981_v48 = vor.u32 %v4652_v44, %v3980_v60  ;;  %v3958_v60 = vld [vmem:[#allocation8 + $0x18] sm:$0xf0] }
 0x295   :  { %v4835_v23 = vpop.eup %4834 }
 0x296   :  { %v1517_v61 = vmul.f32 %v4835_v23, %v1509_v25  ;;  %v4012_v25 = vld [vmem:[#allocation8 + $0x80] sm:$0xf] }
 0x298   :  { %v1518_v56 = vpack.c.bf16 %v1517_v61, %v1517_v61  ;;  %v4660_v61 = vld [vmem:[#allocation8 + $0x8c] sm:$0xf0] }
 0x299   :  { %v4013_v8 = vor.u32 %v4660_v61, %v4012_v25  ;;  %v4651_v61 = vld [vmem:[#allocation8 + $0x4c] sm:$0xf] }
 0x29a   :  { %1520 = vst [vmem:[#allocation11 + $0x8] sm:$0xf] %v1518_v56  ;;  %1726 = vmatmul.bf16.vlgmr.msra.gmra.mxu0 %v1518_v56  ;;  %1739 = vmatmul.bf16.vlgmr.msra.gmra.mxu1 %v1518_v56 }
 0x29b   :  { %1752 = vmatmul.bf16.vlgmr.msra.gmra.mxu2 %v1518_v56  ;;  %1765 = vmatmul.bf16.vlgmr.msra.gmra.mxu3 %v1518_v56  ;;  %v4658_v56 = vld [vmem:[#allocation8 + $0x84] sm:$0xf] }
 0x29c   :  { %v4017_v9 = vor.u32 %v4658_v56, %v4014_v10  ;;  %2060 = vmatpush.bf16.msrb.mxu0 %v4013_v8  ;;  %v3990_v56 = vld [vmem:[#allocation8 + $0x58] sm:$0xf0] }
 0x29d   :  { %v3993_v10 = vor.u32 %v4651_v61, %v3990_v56 }
 0x29e   :  { %2073 = vmatpush.bf16.msrb.mxu1 %v4017_v9  ;;  %v3966_v9 = vld [vmem:[#allocation8 + $0x30] sm:$0xf0] }
 0x317   :  { %v1727_v15 = vpop.f32.mrf.mxu0  ;;  %v1740_v32 = vpop.f32.mrf.mxu1 }
 0x318   :  { %v1770_v3 = vadd.f32 %v1727_v15, %v5207_v31  ;;  %v1771_v22 = vadd.f32 %v1740_v32, %v5210_v33  ;;  %v4037_v31 = vor.u32 %v4665_v0, %v4036_v12  ;;  %v4038_v33 = vld [vmem:[#allocation8 + $0xb8] sm:$0xf0]  ;;  %v4656_v15 = vld [vmem:[#allocation8 + $0x6c] sm:$0xf0]  ;;  %v4654_v32 = vld [vmem:[#allocation8 + $0x64] sm:$0xf] }
 0x319   :  { %v4041_v23 = vor.u32 %v4663_v2, %v4038_v33  ;;  %v3997_v27 = vor.u32 %v4656_v15, %v3996_v53  ;;  %v4650_v12 = vld [vmem:[#allocation8 + $0x44] sm:$0xf]  ;;  %v3982_v0 = vld [vmem:[#allocation8 + $0x50] sm:$0xf0]  ;;  %v4653_v33 = vld [vmem:[#allocation8 + $0x54] sm:$0xf0] }
 0x31a   :  { %v3941_v30 = vmul.f32 -1.442695, %v1770_v3  ;;  %v3942_v42 = vmul.f32 -1.442695, %v1771_v22  ;;  %2085 = vmatpush.bf16.msrb.mxu2 %v4037_v31  ;;  %v4657_v3 = vld [vmem:[#allocation8 + $0x74] sm:$0xf0]  ;;  %v3985_v2 = vor.u32 %v4650_v12, %v3982_v0  ;;  %v3961_v12 = vor.u32 %v4643_v40, %v3958_v60 }
 0x31b   :  { %2098 = vmatpush.bf16.msrb.mxu3 %v4041_v23  ;;  %v4005_v6 = vor.u32 %v4657_v3, %v4004_v36  ;;  %2061 = vmatpush.bf16.msrb.mxu0 %v3997_v27  ;;  %v3988_v31 = vld [vmem:[#allocation8 + $0x48] sm:$0xf]  ;;  %v3948_v53 = vld [vmem:[#allocation8] sm:$0xf]  ;;  %v4645_v3 = vld [vmem:[#allocation8 + $0x14] sm:$0xf0] }
 0x31c   :  { %4836 = vpow2.f32 %v3941_v30  ;;  %v3989_v25 = vor.u32 %v4653_v33, %v3988_v31  ;;  %v3956_v36 = vld [vmem:[#allocation8 + $0x8] sm:$0xf]  ;;  %v4193_v60 = vld [vmem:[#allocation8 + $0xe0] sm:$0xf] }
 0x31d   :  { %4838 = vpow2.f32 %v3942_v42  ;;  %v3957_v44 = vor.u32 %v4645_v3, %v3956_v36 }
 0x31e   :  { %v1753_v58 = vpop.f32.mrf.mxu2  ;;  %v1766_v20 = vpop.f32.mrf.mxu3  ;;  %2086 = vmatpush.bf16.msrb.mxu2 %v4021_v7  ;;  %v3972_v7 = vld [vmem:[#allocation8 + $0x28] sm:$0xf] }
 0x31f   :  { %v1772_v18 = vadd.f32 %v1753_v58, %v5213_v35  ;;  %v1773_v52 = vadd.f32 %v1766_v20, %v5216_v38  ;;  %v1729_v4 = vpop.f32.mrf.mxu0  ;;  %v1742_v19 = vpop.f32.mrf.mxu1  ;;  %v3998_v35 = vld [vmem:[#allocation8 + $0x70] sm:$0xf0]  ;;  %2099 = vmatpush.bf16.msrb.mxu3 %v4025_v26  ;;  %2062 = vmatpush.bf16.msrb.mxu0 %v3981_v48  ;;  %v3964_v58 = vld [vmem:[#allocation8 + $0x20] sm:$0xf]  ;;  %v4649_v26 = vld [vmem:[#allocation8 + $0x34] sm:$0xf0] }
 0x320   :  { %v4001_v16 = vor.u32 %v4654_v32, %v3998_v35  ;;  %v4646_v19 = vld [vmem:[#allocation8 + $0x24] sm:$0xf] }
 0x321   :  { %v3943_v29 = vmul.f32 -1.442695, %v1772_v18  ;;  %v3944_v13 = vmul.f32 -1.442695, %v1773_v52  ;;  %v3965_v52 = vor.u32 %v4648_v17, %v3964_v58  ;;  %v4642_v32 = vld [vmem:[#allocation8 + $0x4] sm:$0xf]  ;;  %v3969_v35 = vor.u32 %v4646_v19, %v3966_v9 }
 0x322   :  { %v4837_v28 = vpop.eup %4836  ;;  %2074 = vmatpush.bf16.msrb.mxu1 %v4001_v16  ;;  %2087 = vmatpush.bf16.msrb.mxu2 %v4005_v6  ;;  %v3950_v16 = vld [vmem:[#allocation8 + $0x10] sm:$0xf0] }
 0x323   :  { %v4839_v34 = vpop.eup %4838  ;;  %v5447_v38 = vadd.f32 1.0, %v4837_v28  ;;  %4840 = vpow2.f32 %v3943_v29  ;;  %2100 = vmatpush.bf16.msrb.mxu3 %v4009_v45  ;;  %2063 = vmatpush.bf16.msrb.mxu0 %v3965_v52  ;;  %v4647_v29 = vld [vmem:[#allocation8 + $0x2c] sm:$0xf]  ;;  %v4644_v28 = vld [vmem:[#allocation8 + $0xc] sm:$0xf0] }
 0x324   :  { %v5449_v22 = vadd.f32 1.0, %v4839_v34  ;;  %4842 = vpow2.f32 %v3944_v13  ;;  %v3974_v13 = vld [vmem:[#allocation8 + $0x38] sm:$0xf0]  ;;  %v3973_v34 = vor.u32 %v4649_v26, %v3972_v7  ;;  %v3949_v37 = vor.u32 %v4644_v28, %v3948_v53 }
 0x325   :  { %4844 = vrcp.f32 %v5447_v38  ;;  %v3977_v27 = vor.u32 %v4647_v29, %v3974_v13  ;;  %vm1795_vm6 = vweird.f32 %v5447_v38  ;;  %v1801_v19 = vand.u32 2147483648, %v5447_v38 }
 0x326   :  { %4846 = vrcp.f32 %v5449_v22  ;;  %v1755_v30 = vpop.f32.mrf.mxu2  ;;  %v1768_v42 = vpop.f32.mrf.mxu3  ;;  %2075 = vmatpush.bf16.msrb.mxu1 %v3985_v2  ;;  %2088 = vmatpush.bf16.msrb.mxu2 %v3989_v25  ;;  %vm1810_vm2 = vweird.f32 %v5449_v22  ;;  %v1814_v56 = vand.u32 2147483647, %v5449_v22  ;;  %v1816_v58 = vand.u32 2147483648, %v5449_v22 }
 0x327   :  { %2101 = vmatpush.bf16.msrb.mxu3 %v3993_v10  ;;  %v3953_v42 = vor.u32 %v4642_v32, %v3950_v16  ;;  %2064 = vmatpush.bf16.msrb.mxu0 %v3949_v37  ;;  %v1799_v9 = vand.u32 2147483647, %v5447_v38  ;;  %v1802_v53 = vor.u32 1.1754944e-38, %v1801_v19 }
 0x328   :  { %vm1815_vm10 = vcmp.eq.f32.partialorder %v1814_v56, 8.507059e+37 }
 0x329   :  { %v4841_v23 = vpop.eup %4840  ;;  %vm1800_vm11 = vcmp.eq.f32.partialorder %v1799_v9, 8.507059e+37  ;;  %v4699_v9 = vld [vmem:[#allocation8 + $0xcc] sm:$0xf] }
 0x32a   :  { %v4843_v20 = vpop.eup %4842  ;;  %v5453_v8 = vadd.f32 1.0, %v4841_v23  ;;  %2076 = vmatpush.bf16.msrb.mxu1 %v3969_v35  ;;  %2089 = vmatpush.bf16.msrb.mxu2 %v3973_v34 }
 0x32b   :  { %v5455_v11 = vpop.eup %4844  ;;  %v5457_v18 = vadd.f32 1.0, %v4843_v20  ;;  %2102 = vmatpush.bf16.msrb.mxu3 %v3977_v27 }
 0x32c   :  { %v5459_v4 = vpop.eup %4846  ;;  %4848 = vrcp.f32 %v5453_v8  ;;  %v1791_v14 = vmul.f32 %v5455_v11, %v5447_v38  ;;  %v1831_v33 = vand.u32 2147483648, %v5453_v8  ;;  %v1829_v61 = vand.u32 2147483647, %v5453_v8 }
 0x32d   :  { %v1806_v24 = vmul.f32 %v5459_v4, %v5449_v22  ;;  %4850 = vrcp.f32 %v5457_v18  ;;  %vm1811_vm0 = vweird.f32 %v5459_v4  ;;  %vm1796_vm3 = vweird.f32 %v5455_v11 }
 0x32e   :  { %v1792_v6 = vsub.f32 1.0, %v1791_v14  ;;  %2077 = vmatpush.bf16.msrb.mxu1 %v3953_v42  ;;  %2090 = vmatpush.bf16.msrb.mxu2 %v3957_v44  ;;  %vm5482_vm4 = vmor %vm1810_vm2, %vm1811_vm0  ;;  %vm1825_vm5 = vweird.f32 %v5453_v8  ;;  %v1832_v22 = vor.u32 1.1754944e-38, %v1831_v33  ;;  %vm1830_vm8 = vcmp.eq.f32.partialorder %v1829_v61, 8.507059e+37  ;;  %v4702_v42 = vld [vmem:[#allocation8 + $0xe4] sm:$0xf] }
 0x32f   :  { %v1807_v15 = vsub.f32 1.0, %v1806_v24  ;;  %2103 = vmatpush.bf16.msrb.mxu3 %v3961_v12  ;;  %vm1797_vm9 = vmor %vm1795_vm6, %vm1796_vm3  ;;  %v1817_v24 = vor.u32 1.1754944e-38, %v1816_v58  ;;  %v1846_v16 = vand.u32 2147483648, %v5457_v18  ;;  %vm1840_vm13 = vweird.f32 %v5457_v18  ;;  %v4698_v61 = vld [vmem:[#allocation8 + $0xc4] sm:$0xf] }
 0x330   :  { %v1793_v2 = vmul.f32 %v5455_v11, %v1792_v6  ;;  %v4179_v58 = vld [vmem:[#allocation8 + $0xd0] sm:$0xf0] }
 0x331   :  { %v1808_v45 = vmul.f32 %v5459_v4, %v1807_v15  ;;  %v1847_v3 = vor.u32 1.1754944e-38, %v1846_v16  ;;  %v4182_v19 = vor.u32 %v4698_v61, %v4179_v58  ;;  %v4686_v58 = vld [vmem:[#allocation8 + $0x64] sm:$0xf] }
 0x332   :  { %v4849_v30 = vpop.eup %4848  ;;  %v1794_v10 = vadd.f32 %v5455_v11, %v1793_v2  ;;  %v4703_v2 = vld [vmem:[#allocation8 + $0xec] sm:$0xf] }
 0x333   :  { %v1821_v48 = vmul.f32 %v4849_v30, %v5453_v8  ;;  %v4851_v0 = vpop.eup %4850  ;;  %v1809_v23 = vadd.f32 %v5459_v4, %v1808_v45  ;;  %vm1826_vm1 = vweird.f32 %v4849_v30  ;;  %v4195_v45 = vld [vmem:[#allocation8 + $0xf0] sm:$0xf0] }
 0x334   :  { %v1836_v20 = vmul.f32 %v4851_v0, %v5457_v18  ;;  %vm1827_vm7 = vmor %vm1825_vm5, %vm1826_vm1  ;;  %v1798_v8 = vsel %vm1797_vm9, %v5455_v11, %v1794_v10  ;;  %vm1841_vm12 = vweird.f32 %v4851_v0  ;;  %v1844_v11 = vand.u32 2147483647, %v5457_v18  ;;  %v4705_v18 = vld [vmem:[#allocation8 + $0xf4] sm:$0xf0] }
 0x335   :  { %v1822_v31 = vsub.f32 1.0, %v1821_v48  ;;  %v1813_v7 = vsel %vm5482_vm4, %v5459_v4, %v1809_v23  ;;  %v1803_v32 = vsel %vm1800_vm11, %v1802_v53, %v1798_v8  ;;  %vm1842_vm14 = vmor %vm1840_vm13, %vm1841_vm12  ;;  %v4201_v48 = vld [vmem:[#allocation8 + $0xe8] sm:$0xf]  ;;  %v4198_v12 = vor.u32 %v4702_v42, %v4195_v45  ;;  %v4177_v23 = vld [vmem:[#allocation8 + $0xc0] sm:$0xf] }
 0x336   :  { %v1837_v29 = vsub.f32 1.0, %v1836_v20  ;;  %v1818_v28 = vsel %vm1815_vm10, %v1817_v24, %v1813_v7  ;;  %vm1845_vm15 = vcmp.eq.f32.partialorder %v1844_v11, 8.507059e+37  ;;  %v4185_v20 = vld [vmem:[#allocation8 + $0xc8] sm:$0xf]  ;;  %v4701_v10 = vld [vmem:[#allocation8 + $0xd4] sm:$0xf0] }
 0x337   :  { %v1823_v25 = vmul.f32 %v4849_v30, %v1822_v31  ;;  %v1852_v35 = vmul.f32 %v1818_v28, %v5437_v21  ;;  %v4203_v31 = vld [vmem:[#allocation8 + $0xf8] sm:$0xf0]  ;;  %2409 = vmatpush.bf16.msra.mxu1 %v4198_v12  ;;  %v4696_v8 = vld [vmem:[#allocation8 + $0xac] sm:$0xf0]  ;;  %v4145_v11 = vld [vmem:[#allocation8 + $0x80] sm:$0xf] }
 0x338   :  { %v1838_v38 = vmul.f32 %v4851_v0, %v1837_v29  ;;  %v4206_v33 = vor.u32 %v4703_v2, %v4203_v31  ;;  %v4187_v7 = vld [vmem:[#allocation8 + $0xd8] sm:$0xf0]  ;;  %v4161_v29 = vld [vmem:[#allocation8 + $0xa0] sm:$0xf] }
 0x339   :  { %v1824_v52 = vadd.f32 %v4849_v30, %v1823_v25  ;;  %v4700_v25 = vld [vmem:[#allocation8 + $0xcc] sm:$0xf0]  ;;  %v4155_v2 = vld [vmem:[#allocation8 + $0x98] sm:$0xf0] }
 0x33a   :  { %v1839_v27 = vadd.f32 %v4851_v0, %v1838_v38  ;;  %2435 = vmatpush.bf16.msra.mxu3 %v4206_v33  ;;  %v4178_v56 = vor.u32 %v4700_v25, %v4177_v23  ;;  %v4129_v25 = vld [vmem:[#allocation8 + $0x60] sm:$0xf] }
 0x33b   :  { %v1828_v14 = vsel %vm1827_vm7, %v4849_v30, %v1824_v52  ;;  %v4704_v30 = vld [vmem:[#allocation8 + $0xec] sm:$0xf0]  ;;  %2410 = vmatpush.bf16.msra.mxu1 %v4182_v19  ;;  %v4689_v19 = vld [vmem:[#allocation8 + $0x74] sm:$0xf0] }
 0x33c   :  { %v1833_v26 = vsel %vm1830_vm8, %v1832_v22, %v1828_v14  ;;  %v1843_v36 = vsel %vm1842_vm14, %v4851_v0, %v1839_v27  ;;  %v4194_v44 = vor.u32 %v4704_v30, %v4193_v60  ;;  %v4202_v0 = vor.u32 %v4705_v18, %v4201_v48  ;;  %v4695_v27 = vld [vmem:[#allocation8 + $0xac] sm:$0xf]  ;;  %v4153_v60 = vld [vmem:[#allocation8 + $0x88] sm:$0xf]  ;;  %v4693_v30 = vld [vmem:[#allocation8 + $0x94] sm:$0xf0] }
 0x33d   :  { %v1850_v13 = vmul.f32 2.0, %v1833_v26  ;;  %v1848_v37 = vsel %vm1845_vm15, %v1847_v3, %v1843_v36  ;;  %v4186_v22 = vor.u32 %v4701_v10, %v4185_v20  ;;  %v4190_v26 = vor.u32 %v4699_v9, %v4187_v7  ;;  %v4692_v36 = vld [vmem:[#allocation8 + $0x8c] sm:$0xf0]  ;;  %v4690_v3 = vld [vmem:[#allocation8 + $0x84] sm:$0xf] }
 0x33e   :  { %2396 = vmatpush.bf16.msra.mxu0 %v4194_v44  ;;  %2422 = vmatpush.bf16.msra.mxu2 %v4202_v0  ;;  %v4154_v12 = vor.u32 %v4693_v30, %v4153_v60  ;;  %v4691_v0 = vld [vmem:[#allocation8 + $0x8c] sm:$0xf]  ;;  %v4678_v30 = vld [vmem:[#allocation8 + $0x24] sm:$0xf] }
 0x33f   :  { %v3945_v15 = vadd.f32 -1.0, %v1850_v13  ;;  %v4694_v13 = vld [vmem:[#allocation8 + $0xa4] sm:$0xf]  ;;  %2436 = vmatpush.bf16.msra.mxu3 %v4190_v26  ;;  %v4158_v31 = vor.u32 %v4691_v0, %v4155_v2  ;;  %v4687_v7 = vld [vmem:[#allocation8 + $0x6c] sm:$0xf] }
 0x340   :  { %v4107_v0 = vld [vmem:[#allocation8 + $0x38] sm:$0xf0]  ;;  %v4081_v2 = vld [vmem:[#allocation8] sm:$0xf] }
 0x341   :  { %v1853_v34 = vmul.f32 %v3945_v15, %v1803_v32  ;;  %v4162_v15 = vor.u32 %v4696_v8, %v4161_v29  ;;  %v4163_v32 = vld [vmem:[#allocation8 + $0xb0] sm:$0xf0]  ;;  %v4684_v8 = vld [vmem:[#allocation8 + $0x4c] sm:$0xf0] }
 0x342   :  { %2397 = vmatpush.bf16.msra.mxu0 %v4178_v56  ;;  %2423 = vmatpush.bf16.msra.mxu2 %v4186_v22  ;;  %v4166_v38 = vor.u32 %v4694_v13, %v4163_v32  ;;  %v4688_v56 = vld [vmem:[#allocation8 + $0x6c] sm:$0xf0] }
 0x343   :  { %v5495_v4 = vadd.f32 %v1853_v34, %v1852_v35  ;;  %v4169_v35 = vld [vmem:[#allocation8 + $0xa8] sm:$0xf]  ;;  %v4697_v34 = vld [vmem:[#allocation8 + $0xb4] sm:$0xf0]  ;;  %v4130_v10 = vor.u32 %v4688_v56, %v4129_v25 }
 0x344   :  { %2411 = vmatpush.bf16.msra.mxu1 %v4166_v38  ;;  %v4121_v38 = vld [vmem:[#allocation8 + $0x48] sm:$0xf] }
 0x345   :  { %4852 = vtanh.f32 %v5495_v4 }
 0x346   :  { %2398 = vmatpush.bf16.msra.mxu0 %v4162_v15  ;;  %v4115_v15 = vld [vmem:[#allocation8 + $0x50] sm:$0xf0] }
 0x34b   :  { %v4853_v6 = vpop.eup %4852 }
 0x34c   :  { %v1856_v21 = vmul.f32 %v4853_v6, %v1848_v37 }
 0x34e   :  { %v1857_v40 = vpack.c.bf16 %v1856_v21, %v1856_v21  ;;  %v4146_v21 = vor.u32 %v4692_v36, %v4145_v11 }
 0x350   :  { %1859 = vst [vmem:[#allocation11 + $0xc] sm:$0xf] %v1857_v40  ;;  %2065 = vmatmul.bf16.vlgmr.msrb.gmra.mxu0 %v1857_v40  ;;  %2078 = vmatmul.bf16.vlgmr.msrb.gmra.mxu1 %v1857_v40 }
 0x351   :  { %2091 = vmatmul.bf16.vlgmr.msrb.gmra.mxu2 %v1857_v40  ;;  %2104 = vmatmul.bf16.vlgmr.msrb.gmra.mxu3 %v1857_v40  ;;  %v4147_v40 = vld [vmem:[#allocation8 + $0x90] sm:$0xf0] }
 0x352   :  { %v4150_v18 = vor.u32 %v4690_v3, %v4147_v40  ;;  %2399 = vmatpush.bf16.msra.mxu0 %v4146_v21 }
 0x354   :  { %2412 = vmatpush.bf16.msra.mxu1 %v4150_v18  ;;  %v4681_v18 = vld [vmem:[#allocation8 + $0x34] sm:$0xf0] }
 0x356   :  { %2400 = vmatpush.bf16.msra.mxu0 %v4130_v10 }
 0x3cd   :  { %v2066_v17 = vpop.f32.mrf.mxu0  ;;  %v2079_v52 = vpop.f32.mrf.mxu1 }
 0x3ce   :  { %v2109_v14 = vadd.f32 %v2066_v17, %v5219_v39  ;;  %v2110_v24 = vadd.f32 %v2079_v52, %v5222_v41  ;;  %v4170_v39 = vor.u32 %v4697_v34, %v4169_v35  ;;  %v4171_v41 = vld [vmem:[#allocation8 + $0xb8] sm:$0xf0]  ;;  %v4137_v52 = vld [vmem:[#allocation8 + $0x68] sm:$0xf]  ;;  %v4685_v35 = vld [vmem:[#allocation8 + $0x54] sm:$0xf0] }
 0x3cf   :  { %v4174_v16 = vor.u32 %v4695_v27, %v4171_v41  ;;  %v4138_v9 = vor.u32 %v4689_v19, %v4137_v52  ;;  %v4122_v27 = vor.u32 %v4685_v35, %v4121_v38  ;;  %v4123_v41 = vld [vmem:[#allocation8 + $0x58] sm:$0xf0]  ;;  %v4675_v52 = vld [vmem:[#allocation8 + $0xc] sm:$0xf] }
 0x3d0   :  { %v4074_v53 = vmul.f32 -1.442695, %v2109_v14  ;;  %v4075_v28 = vmul.f32 -1.442695, %v2110_v24  ;;  %2424 = vmatpush.bf16.msra.mxu2 %v4170_v39  ;;  %v4139_v14 = vld [vmem:[#allocation8 + $0x78] sm:$0xf0] }
 0x3d1   :  { %2437 = vmatpush.bf16.msra.mxu3 %v4174_v16  ;;  %v4113_v24 = vld [vmem:[#allocation8 + $0x40] sm:$0xf]  ;;  %v4142_v13 = vor.u32 %v4687_v7, %v4139_v14  ;;  %v4683_v39 = vld [vmem:[#allocation8 + $0x4c] sm:$0xf]  ;;  %v4091_v19 = vld [vmem:[#allocation8 + $0x18] sm:$0xf0] }
 0x3d2   :  { %4854 = vpow2.f32 %v4074_v53  ;;  %v4114_v53 = vor.u32 %v4684_v8, %v4113_v24  ;;  %v4097_v16 = vld [vmem:[#allocation8 + $0x20] sm:$0xf]  ;;  %v4126_v3 = vor.u32 %v4683_v39, %v4123_v41  ;;  %v4731_v41 = vld [vmem:[#allocation8 + $0xcc] sm:$0xf] }
 0x3d3   :  { %4856 = vpow2.f32 %v4075_v28  ;;  %v4682_v28 = vld [vmem:[#allocation8 + $0x44] sm:$0xf] }
 0x3d4   :  { %v2092_v6 = vpop.f32.mrf.mxu2  ;;  %v2105_v37 = vpop.f32.mrf.mxu3  ;;  %2425 = vmatpush.bf16.msra.mxu2 %v4154_v12  ;;  %v4118_v32 = vor.u32 %v4682_v28, %v4115_v15  ;;  %2401 = vmatpush.bf16.msra.mxu0 %v4114_v53  ;;  %v4679_v12 = vld [vmem:[#allocation8 + $0x2c] sm:$0xf] }
 0x3d5   :  { %v2111_v42 = vadd.f32 %v2092_v6, %v5225_v43  ;;  %v2112_v44 = vadd.f32 %v2105_v37, %v5228_v46  ;;  %v2068_v45 = vpop.f32.mrf.mxu0  ;;  %v2081_v48 = vpop.f32.mrf.mxu1  ;;  %v4131_v43 = vld [vmem:[#allocation8 + $0x70] sm:$0xf0]  ;;  %2438 = vmatpush.bf16.msra.mxu3 %v4158_v31  ;;  %v4680_v6 = vld [vmem:[#allocation8 + $0x2c] sm:$0xf0]  ;;  %v4110_v56 = vor.u32 %v4679_v12, %v4107_v0 }
 0x3d6   :  { %v4134_v17 = vor.u32 %v4686_v58, %v4131_v43  ;;  %v4098_v40 = vor.u32 %v4680_v6, %v4097_v16  ;;  %v4676_v31 = vld [vmem:[#allocation8 + $0xc] sm:$0xf0]  ;;  %v4083_v58 = vld [vmem:[#allocation8 + $0x10] sm:$0xf0]  ;;  %v4089_v43 = vld [vmem:[#allocation8 + $0x8] sm:$0xf] }
 0x3d7   :  { %v4076_v33 = vmul.f32 -1.442695, %v2111_v42  ;;  %v4077_v23 = vmul.f32 -1.442695, %v2112_v44  ;;  %v4099_v42 = vld [vmem:[#allocation8 + $0x30] sm:$0xf0] }
 0x3d8   :  { %v4855_v61 = vpop.eup %4854  ;;  %2413 = vmatpush.bf16.msra.mxu1 %v4134_v17  ;;  %2426 = vmatpush.bf16.msra.mxu2 %v4138_v9  ;;  %v4105_v44 = vld [vmem:[#allocation8 + $0x28] sm:$0xf]  ;;  %v4102_v25 = vor.u32 %v4678_v30, %v4099_v42  ;;  %v4082_v17 = vor.u32 %v4676_v31, %v4081_v2 }
 0x3d9   :  { %v4857_v20 = vpop.eup %4856  ;;  %v5505_v46 = vadd.f32 1.0, %v4855_v61  ;;  %4858 = vpow2.f32 %v4076_v33  ;;  %2439 = vmatpush.bf16.msra.mxu3 %v4142_v13  ;;  %2402 = vmatpush.bf16.msra.mxu0 %v4098_v40  ;;  %v4106_v61 = vor.u32 %v4681_v18, %v4105_v44 }
 0x3da   :  { %v5507_v22 = vadd.f32 1.0, %v4857_v20  ;;  %4860 = vpow2.f32 %v4077_v23  ;;  %v4674_v23 = vld [vmem:[#allocation8 + $0x4] sm:$0xf]  ;;  %v4677_v20 = vld [vmem:[#allocation8 + $0x14] sm:$0xf0] }
 0x3db   :  { %4862 = vrcp.f32 %v5505_v46  ;;  %v4086_v7 = vor.u32 %v4674_v23, %v4083_v58  ;;  %v4090_v14 = vor.u32 %v4677_v20, %v4089_v43  ;;  %vm2134_vm6 = vweird.f32 %v5505_v46  ;;  %v4326_v20 = vld [vmem:[#allocation8 + $0xe0] sm:$0xf] }
 0x3dc   :  { %4864 = vrcp.f32 %v5507_v22  ;;  %v2094_v26 = vpop.f32.mrf.mxu2  ;;  %v2107_v29 = vpop.f32.mrf.mxu3  ;;  %2414 = vmatpush.bf16.msra.mxu1 %v4118_v32  ;;  %2427 = vmatpush.bf16.msra.mxu2 %v4122_v27  ;;  %vm2149_vm2 = vweird.f32 %v5507_v22  ;;  %v2153_v35 = vand.u32 2147483647, %v5507_v22 }
 0x3dd   :  { %2440 = vmatpush.bf16.msra.mxu3 %v4126_v3  ;;  %2403 = vmatpush.bf16.msra.mxu0 %v4082_v17  ;;  %v4094_v29 = vor.u32 %v4675_v52, %v4091_v19  ;;  %v2138_v3 = vand.u32 2147483647, %v5505_v46  ;;  %v4734_v17 = vld [vmem:[#allocation8 + $0xe4] sm:$0xf]  ;;  %v4328_v19 = vld [vmem:[#allocation8 + $0xf0] sm:$0xf0] }
 0x3de   :  { %vm2154_vm10 = vcmp.eq.f32.partialorder %v2153_v35, 8.507059e+37 }
 0x3df   :  { %v4859_v34 = vpop.eup %4858  ;;  %vm2139_vm11 = vcmp.eq.f32.partialorder %v2138_v3, 8.507059e+37 }
 0x3e0   :  { %v4861_v11 = vpop.eup %4860  ;;  %v5511_v36 = vadd.f32 1.0, %v4859_v34  ;;  %2415 = vmatpush.bf16.msra.mxu1 %v4102_v25  ;;  %2428 = vmatpush.bf16.msra.mxu2 %v4106_v61  ;;  %v2155_v34 = vand.u32 2147483648, %v5507_v22 }
 0x3e1   :  { %v5513_v37 = vpop.eup %4862  ;;  %v5515_v21 = vadd.f32 1.0, %v4861_v11  ;;  %2441 = vmatpush.bf16.msra.mxu3 %v4110_v56  ;;  %v2140_v11 = vand.u32 2147483648, %v5505_v46 }
 0x3e2   :  { %v5517_v60 = vpop.eup %4864  ;;  %4866 = vrcp.f32 %v5511_v36  ;;  %v2130_v45 = vmul.f32 %v5513_v37, %v5505_v46  ;;  %v2170_v28 = vand.u32 2147483648, %v5511_v36  ;;  %v2168_v38 = vand.u32 2147483647, %v5511_v36 }
 0x3e3   :  { %v2145_v48 = vmul.f32 %v5517_v60, %v5507_v22  ;;  %4868 = vrcp.f32 %v5515_v21  ;;  %vm2150_vm0 = vweird.f32 %v5517_v60  ;;  %vm2135_vm3 = vweird.f32 %v5513_v37 }
 0x3e4   :  { %v2131_v10 = vsub.f32 1.0, %v2130_v45  ;;  %2416 = vmatpush.bf16.msra.mxu1 %v4086_v7  ;;  %2429 = vmatpush.bf16.msra.mxu2 %v4090_v14  ;;  %vm5540_vm4 = vmor %vm2149_vm2, %vm2150_vm0  ;;  %vm2164_vm5 = vweird.f32 %v5511_v36  ;;  %v2171_v22 = vor.u32 1.1754944e-38, %v2170_v28  ;;  %vm2169_vm8 = vcmp.eq.f32.partialorder %v2168_v38, 8.507059e+37  ;;  %v4733_v38 = vld [vmem:[#allocation8 + $0xd4] sm:$0xf0] }
 0x3e5   :  { %v2146_v33 = vsub.f32 1.0, %v2145_v48  ;;  %2442 = vmatpush.bf16.msra.mxu3 %v4094_v29  ;;  %vm2136_vm9 = vmor %vm2134_vm6, %vm2135_vm3  ;;  %v2156_v30 = vor.u32 1.1754944e-38, %v2155_v34  ;;  %v2141_v48 = vor.u32 1.1754944e-38, %v2140_v11  ;;  %v2185_v23 = vand.u32 2147483648, %v5515_v21 }
 0x3e6   :  { %v2132_v13 = vmul.f32 %v5513_v37, %v2131_v10  ;;  %vm2179_vm13 = vweird.f32 %v5515_v21  ;;  %v4736_v10 = vld [vmem:[#allocation8 + $0xec] sm:$0xf0]  ;;  %v4331_v7 = vor.u32 %v4734_v17, %v4328_v19  ;;  %v4723_v19 = vld [vmem:[#allocation8 + $0x8c] sm:$0xf] }
 0x3e7   :  { %v2147_v24 = vmul.f32 %v5517_v60, %v2146_v33  ;;  %v2186_v61 = vor.u32 1.1754944e-38, %v2185_v23  ;;  %v4327_v52 = vor.u32 %v4736_v10, %v4326_v20 }
 0x3e8   :  { %v4867_v9 = vpop.eup %4866  ;;  %v2133_v39 = vadd.f32 %v5513_v37, %v2132_v13  ;;  %2748 = vmatpush.bf16.msrb.mxu1 %v4331_v7  ;;  %v4732_v13 = vld [vmem:[#allocation8 + $0xcc] sm:$0xf0] }
 0x3e9   :  { %v2160_v26 = vmul.f32 %v4867_v9, %v5511_v36  ;;  %v4869_v8 = vpop.eup %4868  ;;  %v2148_v15 = vadd.f32 %v5517_v60, %v2147_v24  ;;  %vm2165_vm1 = vweird.f32 %v4867_v9  ;;  %v4735_v24 = vld [vmem:[#allocation8 + $0xec] sm:$0xf]  ;;  %2735 = vmatpush.bf16.msrb.mxu0 %v4327_v52 }
 0x3ea   :  { %v2175_v27 = vmul.f32 %v4869_v8, %v5515_v21  ;;  %vm2166_vm7 = vmor %vm2164_vm5, %vm2165_vm1  ;;  %v2137_v36 = vsel %vm2136_vm9, %v5513_v37, %v2133_v39  ;;  %vm2180_vm12 = vweird.f32 %v4869_v8  ;;  %v2183_v37 = vand.u32 2147483647, %v5515_v21  ;;  %v4737_v21 = vld [vmem:[#allocation8 + $0xf4] sm:$0xf0] }
 0x3eb   :  { %v2161_v53 = vsub.f32 1.0, %v2160_v26  ;;  %v2152_v6 = vsel %vm5540_vm4, %v5517_v60, %v2148_v15  ;;  %v2142_v0 = vsel %vm2139_vm11, %v2141_v48, %v2137_v36  ;;  %vm2181_vm14 = vmor %vm2179_vm13, %vm2180_vm12  ;;  %v4336_v26 = vld [vmem:[#allocation8 + $0xf8] sm:$0xf0]  ;;  %v4312_v15 = vld [vmem:[#allocation8 + $0xd0] sm:$0xf0] }
 0x3ec   :  { %v2176_v44 = vsub.f32 1.0, %v2175_v27  ;;  %v2157_v18 = vsel %vm2154_vm10, %v2156_v30, %v2152_v6  ;;  %vm2184_vm15 = vcmp.eq.f32.partialorder %v2183_v37, 8.507059e+37  ;;  %v4339_v29 = vor.u32 %v4735_v24, %v4336_v26  ;;  %v4294_v6 = vld [vmem:[#allocation8 + $0xa0] sm:$0xf]  ;;  %v4726_v30 = vld [vmem:[#allocation8 + $0xa4] sm:$0xf] }
 0x3ed   :  { %v2162_v32 = vmul.f32 %v4867_v9, %v2161_v53  ;;  %v2191_v2 = vmul.f32 %v2157_v18, %v5495_v4  ;;  %v4730_v53 = vld [vmem:[#allocation8 + $0xc4] sm:$0xf]  ;;  %v4302_v18 = vld [vmem:[#allocation8 + $0xa8] sm:$0xf]  ;;  %v4262_v24 = vld [vmem:[#allocation8 + $0x60] sm:$0xf] }
 0x3ee   :  { %v2177_v46 = vmul.f32 %v4869_v8, %v2176_v44  ;;  %2774 = vmatpush.bf16.msrb.mxu3 %v4339_v29  ;;  %v4315_v27 = vor.u32 %v4730_v53, %v4312_v15  ;;  %v4720_v29 = vld [vmem:[#allocation8 + $0x6c] sm:$0xf0]  ;;  %v4270_v15 = vld [vmem:[#allocation8 + $0x68] sm:$0xf] }
 0x3ef   :  { %v2163_v16 = vadd.f32 %v4867_v9, %v2162_v32  ;;  %v4318_v32 = vld [vmem:[#allocation8 + $0xc8] sm:$0xf]  ;;  %v4263_v53 = vor.u32 %v4720_v29, %v4262_v24 }
 0x3f0   :  { %v2178_v33 = vadd.f32 %v4869_v8, %v2177_v46  ;;  %v4319_v39 = vor.u32 %v4733_v38, %v4318_v32  ;;  %2749 = vmatpush.bf16.msrb.mxu1 %v4315_v27  ;;  %v4721_v32 = vld [vmem:[#allocation8 + $0x74] sm:$0xf0]  ;;  %v4272_v27 = vld [vmem:[#allocation8 + $0x78] sm:$0xf0]  ;;  %v4222_v24 = vld [vmem:[#allocation8 + $0x8] sm:$0xf] }
 0x3f1   :  { %v2167_v40 = vsel %vm2166_vm7, %v4867_v9, %v2163_v16  ;;  %v4334_v9 = vld [vmem:[#allocation8 + $0xe8] sm:$0xf]  ;;  %v4320_v16 = vld [vmem:[#allocation8 + $0xd8] sm:$0xf0] }
 0x3f2   :  { %v2172_v42 = vsel %vm2169_vm8, %v2171_v22, %v2167_v40  ;;  %v2182_v25 = vsel %vm2181_vm14, %v4869_v8, %v2178_v33  ;;  %v4335_v14 = vor.u32 %v4737_v21, %v4334_v9  ;;  %v4310_v8 = vld [vmem:[#allocation8 + $0xc0] sm:$0xf]  ;;  %v4323_v3 = vor.u32 %v4731_v41, %v4320_v16  ;;  %v4728_v40 = vld [vmem:[#allocation8 + $0xac] sm:$0xf0]  ;;  %v4722_v33 = vld [vmem:[#allocation8 + $0x84] sm:$0xf] }
 0x3f3   :  { %v2189_v45 = vmul.f32 2.0, %v2172_v42  ;;  %v2187_v58 = vsel %vm2184_vm15, %v2186_v61, %v2182_v25  ;;  %v4311_v28 = vor.u32 %v4732_v13, %v4310_v8  ;;  %v4295_v36 = vor.u32 %v4728_v40, %v4294_v6  ;;  %v4280_v61 = vld [vmem:[#allocation8 + $0x90] sm:$0xf0]  ;;  %v4288_v9 = vld [vmem:[#allocation8 + $0x98] sm:$0xf0] }
 0x3f4   :  { %2761 = vmatpush.bf16.msrb.mxu2 %v4335_v14  ;;  %2775 = vmatpush.bf16.msrb.mxu3 %v4323_v3  ;;  %v4283_v17 = vor.u32 %v4722_v33, %v4280_v61  ;;  %v4291_v21 = vor.u32 %v4723_v19, %v4288_v9  ;;  %v4718_v8 = vld [vmem:[#allocation8 + $0x64] sm:$0xf]  ;;  %v4248_v40 = vld [vmem:[#allocation8 + $0x50] sm:$0xf0]  ;;  %v4238_v61 = vld [vmem:[#allocation8 + $0x28] sm:$0xf] }
 0x3f5   :  { %v4078_v12 = vadd.f32 -1.0, %v2189_v45  ;;  %2736 = vmatpush.bf16.msrb.mxu0 %v4311_v28  ;;  %v4296_v45 = vld [vmem:[#allocation8 + $0xb0] sm:$0xf0]  ;;  %v4714_v6 = vld [vmem:[#allocation8 + $0x44] sm:$0xf] }
 0x3f6   :  { %v4299_v48 = vor.u32 %v4726_v30, %v4296_v45  ;;  %v4251_v30 = vor.u32 %v4714_v6, %v4248_v40  ;;  %v4706_v19 = vld [vmem:[#allocation8 + $0x4] sm:$0xf] }
 0x3f7   :  { %v2192_v31 = vmul.f32 %v4078_v12, %v2142_v0  ;;  %v4729_v12 = vld [vmem:[#allocation8 + $0xb4] sm:$0xf0]  ;;  %v4727_v0 = vld [vmem:[#allocation8 + $0xac] sm:$0xf] }
 0x3f8   :  { %2762 = vmatpush.bf16.msrb.mxu2 %v4319_v39  ;;  %2750 = vmatpush.bf16.msrb.mxu1 %v4299_v48  ;;  %v4246_v39 = vld [vmem:[#allocation8 + $0x40] sm:$0xf]  ;;  %v4715_v48 = vld [vmem:[#allocation8 + $0x4c] sm:$0xf] }
 0x3f9   :  { %v5553_v60 = vadd.f32 %v2192_v31, %v2191_v2  ;;  %2737 = vmatpush.bf16.msrb.mxu0 %v4295_v36  ;;  %v4278_v2 = vld [vmem:[#allocation8 + $0x80] sm:$0xf]  ;;  %v4724_v31 = vld [vmem:[#allocation8 + $0x8c] sm:$0xf0] }
 0x3fa   :  { %v4279_v25 = vor.u32 %v4724_v31, %v4278_v2 }
 0x3fb   :  { %4870 = vtanh.f32 %v5553_v60 }
 0x3fc   :  { %2751 = vmatpush.bf16.msrb.mxu1 %v4283_v17  ;;  %v4708_v17 = vld [vmem:[#allocation8 + $0xc] sm:$0xf0] }
 0x3fd   :  { %2738 = vmatpush.bf16.msrb.mxu0 %v4279_v25  ;;  %v4232_v25 = vld [vmem:[#allocation8 + $0x30] sm:$0xf0] }
 0x401   :  { %v4871_v56 = vpop.eup %4870  ;;  %2739 = vmatpush.bf16.msrb.mxu0 %v4263_v53 }
 0x402   :  { %v2195_v4 = vmul.f32 %v4871_v56, %v2187_v58  ;;  %v4286_v56 = vld [vmem:[#allocation8 + $0x88] sm:$0xf]  ;;  %v4725_v58 = vld [vmem:[#allocation8 + $0x94] sm:$0xf0] }
 0x403   :  { %v4287_v52 = vor.u32 %v4725_v58, %v4286_v56 }
 0x404   :  { %v2196_v43 = vpack.c.bf16 %v2195_v4, %v2195_v4 }
 0x406   :  { %2198 = vst [vmem:[#allocation11 + $0x10] sm:$0xf] %v2196_v43  ;;  %2404 = vmatmul.bf16.vlgmr.msra.gmra.mxu0 %v2196_v43  ;;  %2417 = vmatmul.bf16.vlgmr.msra.gmra.mxu1 %v2196_v43 }
 0x407   :  { %2430 = vmatmul.bf16.vlgmr.msra.gmra.mxu2 %v2196_v43  ;;  %2443 = vmatmul.bf16.vlgmr.msra.gmra.mxu3 %v2196_v43 }
 0x483   :  { %v2405_v35 = vpop.f32.mrf.mxu0  ;;  %v2418_v34 = vpop.f32.mrf.mxu1 }
 0x484   :  { %v2448_v11 = vadd.f32 %v2405_v35, %v5231_v47  ;;  %v2449_v22 = vadd.f32 %v2418_v34, %v5234_v49  ;;  %v4303_v47 = vor.u32 %v4729_v12, %v4302_v18  ;;  %v4304_v49 = vld [vmem:[#allocation8 + $0xb8] sm:$0xf0]  ;;  %v4271_v35 = vor.u32 %v4721_v32, %v4270_v15  ;;  %v4719_v34 = vld [vmem:[#allocation8 + $0x6c] sm:$0xf]  ;;  %v4230_v12 = vld [vmem:[#allocation8 + $0x20] sm:$0xf] }
 0x485   :  { %v4307_v46 = vor.u32 %v4727_v0, %v4304_v49  ;;  %v4256_v18 = vld [vmem:[#allocation8 + $0x58] sm:$0xf0] }
 0x486   :  { %v4207_v42 = vmul.f32 -1.442695, %v2448_v11  ;;  %v4208_v44 = vmul.f32 -1.442695, %v2449_v22  ;;  %2763 = vmatpush.bf16.msrb.mxu2 %v4303_v47  ;;  %v4716_v11 = vld [vmem:[#allocation8 + $0x4c] sm:$0xf0]  ;;  %v4275_v22 = vor.u32 %v4719_v34, %v4272_v27  ;;  %v4259_v49 = vor.u32 %v4715_v48, %v4256_v18 }
 0x487   :  { %2776 = vmatpush.bf16.msrb.mxu3 %v4307_v46  ;;  %v4247_v3 = vor.u32 %v4716_v11, %v4246_v39  ;;  %v4712_v46 = vld [vmem:[#allocation8 + $0x2c] sm:$0xf0] }
 0x488   :  { %4872 = vpow2.f32 %v4207_v42  ;;  %v4254_v42 = vld [vmem:[#allocation8 + $0x48] sm:$0xf]  ;;  %v4231_v33 = vor.u32 %v4712_v46, %v4230_v12 }
 0x489   :  { %4874 = vpow2.f32 %v4208_v44  ;;  %v4717_v44 = vld [vmem:[#allocation8 + $0x54] sm:$0xf0]  ;;  %2740 = vmatpush.bf16.msrb.mxu0 %v4247_v3 }
 0x48a   :  { %v2431_v23 = vpop.f32.mrf.mxu2  ;;  %v2444_v37 = vpop.f32.mrf.mxu3  ;;  %2764 = vmatpush.bf16.msrb.mxu2 %v4287_v52  ;;  %v4255_v45 = vor.u32 %v4717_v44, %v4254_v42 }
 0x48b   :  { %v2450_v4 = vadd.f32 %v2431_v23, %v5237_v51  ;;  %v2451_v43 = vadd.f32 %v2444_v37, %v5240_v54  ;;  %v2407_v20 = vpop.f32.mrf.mxu0  ;;  %v2420_v10 = vpop.f32.mrf.mxu1  ;;  %v4264_v51 = vld [vmem:[#allocation8 + $0x70] sm:$0xf0]  ;;  %2777 = vmatpush.bf16.msrb.mxu3 %v4291_v21  ;;  %v4710_v37 = vld [vmem:[#allocation8 + $0x24] sm:$0xf] }
 0x48c   :  { %v4267_v28 = vor.u32 %v4718_v8, %v4264_v51  ;;  %v4240_v20 = vld [vmem:[#allocation8 + $0x38] sm:$0xf0]  ;;  %v4214_v10 = vld [vmem:[#allocation8] sm:$0xf]  ;;  %v4235_v9 = vor.u32 %v4710_v37, %v4232_v25  ;;  %v4707_v51 = vld [vmem:[#allocation8 + $0xc] sm:$0xf] }
 0x48d   :  { %v4209_v7 = vmul.f32 -1.442695, %v2450_v4  ;;  %v4210_v14 = vmul.f32 -1.442695, %v2451_v43  ;;  %2741 = vmatpush.bf16.msrb.mxu0 %v4231_v33  ;;  %v4713_v4 = vld [vmem:[#allocation8 + $0x34] sm:$0xf0]  ;;  %v4215_v8 = vor.u32 %v4708_v17, %v4214_v10 }
 0x48e   :  { %v4873_v26 = vpop.eup %4872  ;;  %2752 = vmatpush.bf16.msrb.mxu1 %v4267_v28  ;;  %2765 = vmatpush.bf16.msrb.mxu2 %v4271_v35  ;;  %v4711_v43 = vld [vmem:[#allocation8 + $0x2c] sm:$0xf]  ;;  %v4239_v21 = vor.u32 %v4713_v4, %v4238_v61 }
 0x48f   :  { %v4875_v13 = vpop.eup %4874  ;;  %v5563_v54 = vadd.f32 1.0, %v4873_v26  ;;  %4876 = vpow2.f32 %v4209_v7  ;;  %2778 = vmatpush.bf16.msrb.mxu3 %v4275_v22  ;;  %v4243_v7 = vor.u32 %v4711_v43, %v4240_v20  ;;  %v4709_v26 = vld [vmem:[#allocation8 + $0x14] sm:$0xf0] }
 0x490   :  { %v5565_v38 = vadd.f32 1.0, %v4875_v13  ;;  %4878 = vpow2.f32 %v4210_v14  ;;  %v4216_v14 = vld [vmem:[#allocation8 + $0x10] sm:$0xf0]  ;;  %v4224_v13 = vld [vmem:[#allocation8 + $0x18] sm:$0xf0]  ;;  %v4223_v15 = vor.u32 %v4709_v26, %v4222_v24 }
 0x491   :  { %4880 = vrcp.f32 %v5563_v54  ;;  %v4219_v28 = vor.u32 %v4706_v19, %v4216_v14  ;;  %2742 = vmatpush.bf16.msrb.mxu0 %v4215_v8  ;;  %v4227_v34 = vor.u32 %v4707_v51, %v4224_v13  ;;  %vm2473_vm6 = vweird.f32 %v5563_v54  ;;  %v4766_v14 = vld [vmem:[#allocation8 + $0xe4] sm:$0xf]  ;;  %v4461_v26 = vld [vmem:[#allocation8 + $0xf0] sm:$0xf0]  ;;  %v4767_v13 = vld [vmem:[#allocation8 + $0xec] sm:$0xf] }
 0x492   :  { %4882 = vrcp.f32 %v5565_v38  ;;  %v2433_v41 = vpop.f32.mrf.mxu2  ;;  %v2446_v16 = vpop.f32.mrf.mxu3  ;;  %2753 = vmatpush.bf16.msrb.mxu1 %v4251_v30  ;;  %2766 = vmatpush.bf16.msrb.mxu2 %v4255_v45  ;;  %vm2488_vm2 = vweird.f32 %v5565_v38  ;;  %v2492_v6 = vand.u32 2147483647, %v5565_v38  ;;  %v2494_v40 = vand.u32 2147483648, %v5565_v38 }
 0x493   :  { %2779 = vmatpush.bf16.msrb.mxu3 %v4259_v49  ;;  %v2479_v45 = vand.u32 2147483648, %v5563_v54  ;;  %v2477_v48 = vand.u32 2147483647, %v5563_v54  ;;  %v4464_v8 = vor.u32 %v4766_v14, %v4461_v26 }
 0x494   :  { %vm2493_vm10 = vcmp.eq.f32.partialorder %v2492_v6, 8.507059e+37  ;;  %v4763_v6 = vld [vmem:[#allocation8 + $0xcc] sm:$0xf] }
 0x495   :  { %v4877_v36 = vpop.eup %4876  ;;  %v2480_v37 = vor.u32 1.1754944e-38, %v2479_v45  ;;  %vm2478_vm11 = vcmp.eq.f32.partialorder %v2477_v48, 8.507059e+37  ;;  %v4760_v45 = vld [vmem:[#allocation8 + $0xac] sm:$0xf0] }
 0x496   :  { %v4879_v0 = vpop.eup %4878  ;;  %v5569_v47 = vadd.f32 1.0, %v4877_v36  ;;  %2754 = vmatpush.bf16.msrb.mxu1 %v4235_v9  ;;  %2767 = vmatpush.bf16.msrb.mxu2 %v4239_v21  ;;  %v4459_v21 = vld [vmem:[#allocation8 + $0xe0] sm:$0xf] }
 0x497   :  { %v5571_v2 = vpop.eup %4880  ;;  %v5573_v31 = vadd.f32 1.0, %v4879_v0  ;;  %2780 = vmatpush.bf16.msrb.mxu3 %v4243_v7  ;;  %v2495_v0 = vor.u32 1.1754944e-38, %v2494_v40  ;;  %v4768_v7 = vld [vmem:[#allocation8 + $0xec] sm:$0xf0]  ;;  %v4453_v40 = vld [vmem:[#allocation8 + $0xd8] sm:$0xf0] }
 0x498   :  { %v5575_v23 = vpop.eup %4882  ;;  %4884 = vrcp.f32 %v5569_v47  ;;  %v2469_v56 = vmul.f32 %v5571_v2, %v5563_v54  ;;  %v2509_v16 = vand.u32 2147483648, %v5569_v47  ;;  %v2507_v3 = vand.u32 2147483647, %v5569_v47 }
 0x499   :  { %v2484_v58 = vmul.f32 %v5575_v23, %v5565_v38  ;;  %4886 = vrcp.f32 %v5573_v31  ;;  %vm2489_vm0 = vweird.f32 %v5575_v23  ;;  %vm2474_vm3 = vweird.f32 %v5571_v2 }
 0x49a   :  { %v2470_v29 = vsub.f32 1.0, %v2469_v56  ;;  %2755 = vmatpush.bf16.msrb.mxu1 %v4219_v28  ;;  %2768 = vmatpush.bf16.msrb.mxu2 %v4223_v15  ;;  %vm5598_vm4 = vmor %vm2488_vm2, %vm2489_vm0  ;;  %vm2503_vm5 = vweird.f32 %v5569_v47  ;;  %v2510_v38 = vor.u32 1.1754944e-38, %v2509_v16  ;;  %vm2508_vm8 = vcmp.eq.f32.partialorder %v2507_v3, 8.507059e+37  ;;  %v4443_v15 = vld [vmem:[#allocation8 + $0xc0] sm:$0xf] }
 0x49b   :  { %v2485_v52 = vsub.f32 1.0, %v2484_v58  ;;  %2781 = vmatpush.bf16.msrb.mxu3 %v4227_v34  ;;  %vm2475_vm9 = vmor %vm2473_vm6, %vm2474_vm3  ;;  %v2524_v20 = vand.u32 2147483648, %v5573_v31  ;;  %vm2518_vm13 = vweird.f32 %v5573_v31  ;;  %v4460_v24 = vor.u32 %v4768_v7, %v4459_v21  ;;  %v4755_v21 = vld [vmem:[#allocation8 + $0x8c] sm:$0xf]  ;;  %v4421_v7 = vld [vmem:[#allocation8 + $0x98] sm:$0xf0] }
 0x49c   :  { %v2471_v39 = vmul.f32 %v5571_v2, %v2470_v29  ;;  %v4467_v29 = vld [vmem:[#allocation8 + $0xe8] sm:$0xf]  ;;  %v4456_v44 = vor.u32 %v4763_v6, %v4453_v40  ;;  %v4424_v14 = vor.u32 %v4755_v21, %v4421_v7  ;;  %v4746_v40 = vld [vmem:[#allocation8 + $0x44] sm:$0xf]  ;;  %v4349_v21 = vld [vmem:[#allocation8 + $0x10] sm:$0xf0] }
 0x49d   :  { %v2486_v32 = vmul.f32 %v5575_v23, %v2485_v52  ;;  %v2525_v17 = vor.u32 1.1754944e-38, %v2524_v20  ;;  %3074 = vmatpush.bf16.msra.mxu0 %v4460_v24  ;;  %v4419_v20 = vld [vmem:[#allocation8 + $0x88] sm:$0xf] }
 0x49e   :  { %v4885_v53 = vpop.eup %4884  ;;  %v2472_v42 = vadd.f32 %v5571_v2, %v2471_v39  ;;  %3087 = vmatpush.bf16.msra.mxu1 %v4464_v8  ;;  %v4451_v39 = vld [vmem:[#allocation8 + $0xc8] sm:$0xf]  ;;  %v4752_v8 = vld [vmem:[#allocation8 + $0x6c] sm:$0xf0] }
 0x49f   :  { %v2499_v35 = vmul.f32 %v4885_v53, %v5569_v47  ;;  %v4887_v27 = vpop.eup %4886  ;;  %v2487_v11 = vadd.f32 %v5575_v23, %v2486_v32  ;;  %vm2504_vm1 = vweird.f32 %v4885_v53  ;;  %v4764_v32 = vld [vmem:[#allocation8 + $0xcc] sm:$0xf0]  ;;  %v4355_v7 = vld [vmem:[#allocation8 + $0x8] sm:$0xf] }
 0x4a0   :  { %v2514_v30 = vmul.f32 %v4887_v27, %v5573_v31  ;;  %vm2505_vm7 = vmor %vm2503_vm5, %vm2504_vm1  ;;  %v2476_v47 = vsel %vm2475_vm9, %v5571_v2, %v2472_v42  ;;  %vm2519_vm12 = vweird.f32 %v4887_v27  ;;  %v2522_v2 = vand.u32 2147483647, %v5573_v31  ;;  %v4769_v31 = vld [vmem:[#allocation8 + $0xf4] sm:$0xf0] }
 0x4a1   :  { %v2500_v41 = vsub.f32 1.0, %v2499_v35  ;;  %v2491_v18 = vsel %vm5598_vm4, %v5575_v23, %v2487_v11  ;;  %v2481_v56 = vsel %vm2478_vm11, %v2480_v37, %v2476_v47  ;;  %vm2520_vm14 = vmor %vm2518_vm13, %vm2519_vm12  ;;  %v4468_v51 = vor.u32 %v4769_v31, %v4467_v29  ;;  %v4762_v35 = vld [vmem:[#allocation8 + $0xc4] sm:$0xf]  ;;  %v4761_v47 = vld [vmem:[#allocation8 + $0xb4] sm:$0xf0] }
 0x4a2   :  { %v2515_v46 = vsub.f32 1.0, %v2514_v30  ;;  %v2496_v25 = vsel %vm2493_vm10, %v2495_v0, %v2491_v18  ;;  %vm2523_vm15 = vcmp.eq.f32.partialorder %v2522_v2, 8.507059e+37  ;;  %v4444_v34 = vor.u32 %v4764_v32, %v4443_v15  ;;  %v4429_v0 = vld [vmem:[#allocation8 + $0xb0] sm:$0xf0]  ;;  %v4757_v2 = vld [vmem:[#allocation8 + $0x94] sm:$0xf0] }
 0x4a3   :  { %v2501_v22 = vmul.f32 %v4885_v53, %v2500_v41  ;;  %v2530_v58 = vmul.f32 %v2496_v25, %v5553_v60  ;;  %3100 = vmatpush.bf16.msra.mxu2 %v4468_v51  ;;  %v4765_v41 = vld [vmem:[#allocation8 + $0xd4] sm:$0xf0]  ;;  %v4411_v25 = vld [vmem:[#allocation8 + $0x80] sm:$0xf]  ;;  %v4750_v51 = vld [vmem:[#allocation8 + $0x64] sm:$0xf] }
 0x4a4   :  { %v2516_v54 = vmul.f32 %v4887_v27, %v2515_v46  ;;  %v4452_v3 = vor.u32 %v4765_v41, %v4451_v39  ;;  %3075 = vmatpush.bf16.msra.mxu0 %v4444_v34  ;;  %v4435_v46 = vld [vmem:[#allocation8 + $0xa8] sm:$0xf]  ;;  %v4395_v29 = vld [vmem:[#allocation8 + $0x60] sm:$0xf]  ;;  %v4753_v32 = vld [vmem:[#allocation8 + $0x74] sm:$0xf0] }
 0x4a5   :  { %v2502_v36 = vadd.f32 %v4885_v53, %v2501_v22  ;;  %v4403_v15 = vld [vmem:[#allocation8 + $0x68] sm:$0xf]  ;;  %v4405_v39 = vld [vmem:[#allocation8 + $0x78] sm:$0xf0]  ;;  %v4379_v41 = vld [vmem:[#allocation8 + $0x40] sm:$0xf] }
 0x4a6   :  { %v2517_v43 = vadd.f32 %v4887_v27, %v2516_v54  ;;  %v4404_v34 = vor.u32 %v4753_v32, %v4403_v15 }
 0x4a7   :  { %v2506_v12 = vsel %vm2505_vm7, %v4885_v53, %v2502_v36  ;;  %v4469_v53 = vld [vmem:[#allocation8 + $0xf8] sm:$0xf0]  ;;  %3101 = vmatpush.bf16.msra.mxu2 %v4452_v3  ;;  %v4427_v36 = vld [vmem:[#allocation8 + $0xa0] sm:$0xf] }
 0x4a8   :  { %v2511_v49 = vsel %vm2508_vm8, %v2510_v38, %v2506_v12  ;;  %v2521_v10 = vsel %vm2520_vm14, %v4887_v27, %v2517_v43  ;;  %v4472_v28 = vor.u32 %v4767_v13, %v4469_v53  ;;  %v4445_v27 = vld [vmem:[#allocation8 + $0xd0] sm:$0xf0]  ;;  %v4758_v38 = vld [vmem:[#allocation8 + $0xa4] sm:$0xf]  ;;  %v4428_v12 = vor.u32 %v4760_v45, %v4427_v36  ;;  %v4749_v36 = vld [vmem:[#allocation8 + $0x54] sm:$0xf0] }
 0x4a9   :  { %v2528_v33 = vmul.f32 2.0, %v2511_v49  ;;  %v2526_v19 = vsel %vm2523_vm15, %v2525_v17, %v2521_v10  ;;  %v4448_v22 = vor.u32 %v4762_v35, %v4445_v27  ;;  %v4432_v49 = vor.u32 %v4758_v38, %v4429_v0  ;;  %v4413_v43 = vld [vmem:[#allocation8 + $0x90] sm:$0xf0]  ;;  %v4751_v27 = vld [vmem:[#allocation8 + $0x6c] sm:$0xf] }
 0x4aa   :  { %3113 = vmatpush.bf16.msra.mxu3 %v4472_v28  ;;  %3076 = vmatpush.bf16.msra.mxu0 %v4428_v12  ;;  %v4396_v53 = vor.u32 %v4752_v8, %v4395_v29  ;;  %v4408_v3 = vor.u32 %v4751_v27, %v4405_v39  ;;  %v4363_v12 = vld [vmem:[#allocation8 + $0x20] sm:$0xf]  ;;  %v4739_v29 = vld [vmem:[#allocation8 + $0xc] sm:$0xf] }
 0x4ab   :  { %v4211_v61 = vadd.f32 -1.0, %v2528_v33  ;;  %3088 = vmatpush.bf16.msra.mxu1 %v4448_v22  ;;  %v4759_v33 = vld [vmem:[#allocation8 + $0xac] sm:$0xf]  ;;  %v4748_v22 = vld [vmem:[#allocation8 + $0x4c] sm:$0xf0] }
 0x4ac   :  { %v4380_v6 = vor.u32 %v4748_v22, %v4379_v41 }
 0x4ad   :  { %v2531_v4 = vmul.f32 %v4211_v61, %v2481_v56  ;;  %v4756_v61 = vld [vmem:[#allocation8 + $0x8c] sm:$0xf0]  ;;  %v4754_v56 = vld [vmem:[#allocation8 + $0x84] sm:$0xf] }
 0x4ae   :  { %3114 = vmatpush.bf16.msra.mxu3 %v4456_v44  ;;  %v4387_v44 = vld [vmem:[#allocation8 + $0x48] sm:$0xf] }
 0x4af   :  { %v5611_v23 = vadd.f32 %v2531_v4, %v2530_v58  ;;  %3089 = vmatpush.bf16.msra.mxu1 %v4432_v49  ;;  %v4412_v4 = vor.u32 %v4756_v61, %v4411_v25  ;;  %v4388_v38 = vor.u32 %v4749_v36, %v4387_v44  ;;  %v4742_v25 = vld [vmem:[#allocation8 + $0x24] sm:$0xf]  ;;  %v4365_v61 = vld [vmem:[#allocation8 + $0x30] sm:$0xf0] }
 0x4b1   :  { %4888 = vtanh.f32 %v5611_v23  ;;  %3077 = vmatpush.bf16.msra.mxu0 %v4412_v4  ;;  %v4745_v4 = vld [vmem:[#allocation8 + $0x34] sm:$0xf0] }
 0x4b5   :  { %3078 = vmatpush.bf16.msra.mxu0 %v4396_v53 }
 0x4b7   :  { %v4889_v52 = vpop.eup %4888 }
 0x4b8   :  { %v2534_v60 = vmul.f32 %v4889_v52, %v2526_v19 }
 0x4b9   :  { %3079 = vmatpush.bf16.msra.mxu0 %v4380_v6 }
 0x4ba   :  { %v2535_v9 = vpack.c.bf16 %v2534_v60, %v2534_v60  ;;  %v4416_v60 = vor.u32 %v4754_v56, %v4413_v43  ;;  %v4371_v56 = vld [vmem:[#allocation8 + $0x28] sm:$0xf]  ;;  %v4743_v43 = vld [vmem:[#allocation8 + $0x2c] sm:$0xf] }
 0x4bc   :  { %2537 = vst [vmem:[#allocation11 + $0x14] sm:$0xf] %v2535_v9  ;;  %2743 = vmatmul.bf16.vlgmr.msrb.gmra.mxu0 %v2535_v9  ;;  %2756 = vmatmul.bf16.vlgmr.msrb.gmra.mxu1 %v2535_v9 }
 0x4bd   :  { %2769 = vmatmul.bf16.vlgmr.msrb.gmra.mxu2 %v2535_v9  ;;  %2782 = vmatmul.bf16.vlgmr.msrb.gmra.mxu3 %v2535_v9  ;;  %v4420_v9 = vor.u32 %v4757_v2, %v4419_v20  ;;  %v4373_v20 = vld [vmem:[#allocation8 + $0x38] sm:$0xf0]  ;;  %v4347_v2 = vld [vmem:[#allocation8] sm:$0xf] }
 0x4be   :  { %3090 = vmatpush.bf16.msra.mxu1 %v4416_v60  ;;  %v4372_v60 = vor.u32 %v4745_v4, %v4371_v56 }
 0x539   :  { %v2744_v16 = vpop.f32.mrf.mxu0  ;;  %v2757_v11 = vpop.f32.mrf.mxu1 }
 0x53a   :  { %v2787_v30 = vadd.f32 %v2744_v16, %v5243_v55  ;;  %v2788_v42 = vadd.f32 %v2757_v11, %v5246_v57  ;;  %v4436_v55 = vor.u32 %v4761_v47, %v4435_v46  ;;  %v4437_v57 = vld [vmem:[#allocation8 + $0xb8] sm:$0xf0]  ;;  %v4744_v47 = vld [vmem:[#allocation8 + $0x2c] sm:$0xf0] }
 0x53b   :  { %v4440_v37 = vor.u32 %v4759_v33, %v4437_v57  ;;  %v4364_v57 = vor.u32 %v4744_v47, %v4363_v12 }
 0x53c   :  { %v4340_v48 = vmul.f32 -1.442695, %v2787_v30  ;;  %v4341_v18 = vmul.f32 -1.442695, %v2788_v42  ;;  %3102 = vmatpush.bf16.msra.mxu2 %v4436_v55  ;;  %v4381_v30 = vld [vmem:[#allocation8 + $0x50] sm:$0xf0] }
 0x53d   :  { %3115 = vmatpush.bf16.msra.mxu3 %v4440_v37  ;;  %v4384_v42 = vor.u32 %v4746_v40, %v4381_v30  ;;  %3080 = vmatpush.bf16.msra.mxu0 %v4364_v57 }
 0x53e   :  { %4890 = vpow2.f32 %v4340_v48  ;;  %v4747_v48 = vld [vmem:[#allocation8 + $0x4c] sm:$0xf] }
 0x53f   :  { %4892 = vpow2.f32 %v4341_v18  ;;  %v4389_v18 = vld [vmem:[#allocation8 + $0x58] sm:$0xf0] }
 0x540   :  { %v2770_v54 = vpop.f32.mrf.mxu2  ;;  %v2783_v58 = vpop.f32.mrf.mxu3  ;;  %3103 = vmatpush.bf16.msra.mxu2 %v4420_v9  ;;  %v4392_v46 = vor.u32 %v4747_v48, %v4389_v18  ;;  %v4376_v9 = vor.u32 %v4743_v43, %v4373_v20 }
 0x541   :  { %v2789_v10 = vadd.f32 %v2770_v54, %v5249_v59  ;;  %v2790_v17 = vadd.f32 %v2783_v58, %v5252_v62  ;;  %v2746_v52 = vpop.f32.mrf.mxu0  ;;  %v2759_v19 = vpop.f32.mrf.mxu1  ;;  %v4397_v59 = vld [vmem:[#allocation8 + $0x70] sm:$0xf0]  ;;  %3116 = vmatpush.bf16.msra.mxu3 %v4424_v14  ;;  %v4741_v14 = vld [vmem:[#allocation8 + $0x14] sm:$0xf0] }
 0x542   :  { %v4400_v28 = vor.u32 %v4750_v51, %v4397_v59  ;;  %v4738_v52 = vld [vmem:[#allocation8 + $0x4] sm:$0xf]  ;;  %v4368_v19 = vor.u32 %v4742_v25, %v4365_v61  ;;  %v4356_v59 = vor.u32 %v4741_v14, %v4355_v7 }
 0x543   :  { %v4342_v24 = vmul.f32 -1.442695, %v2789_v10  ;;  %v4343_v26 = vmul.f32 -1.442695, %v2790_v17  ;;  %v4740_v10 = vld [vmem:[#allocation8 + $0xc] sm:$0xf0]  ;;  %v4352_v51 = vor.u32 %v4738_v52, %v4349_v21 }
 0x544   :  { %v4891_v31 = vpop.eup %4890  ;;  %3091 = vmatpush.bf16.msra.mxu1 %v4400_v28  ;;  %3104 = vmatpush.bf16.msra.mxu2 %v4404_v34 }
 0x545   :  { %v4893_v13 = vpop.eup %4892  ;;  %v5621_v62 = vadd.f32 1.0, %v4891_v31  ;;  %4894 = vpow2.f32 %v4342_v24  ;;  %3117 = vmatpush.bf16.msra.mxu3 %v4408_v3  ;;  %v4357_v31 = vld [vmem:[#allocation8 + $0x18] sm:$0xf0] }
 0x546   :  { %v5623_v35 = vadd.f32 1.0, %v4893_v13  ;;  %4896 = vpow2.f32 %v4343_v26  ;;  %v4348_v26 = vor.u32 %v4740_v10, %v4347_v2  ;;  %v4360_v28 = vor.u32 %v4739_v29, %v4357_v31 }
 0x547   :  { %4898 = vrcp.f32 %v5621_v62  ;;  %vm2812_vm6 = vweird.f32 %v5621_v62  ;;  %v2816_v44 = vand.u32 2147483647, %v5621_v62 }
 0x548   :  { %4900 = vrcp.f32 %v5623_v35  ;;  %v2772_v16 = vpop.f32.mrf.mxu2  ;;  %v2785_v11 = vpop.f32.mrf.mxu3  ;;  %3092 = vmatpush.bf16.msra.mxu1 %v4384_v42  ;;  %3105 = vmatpush.bf16.msra.mxu2 %v4388_v38  ;;  %vm2827_vm2 = vweird.f32 %v5623_v35  ;;  %v2833_v22 = vand.u32 2147483648, %v5623_v35  ;;  %v2818_v42 = vand.u32 2147483648, %v5621_v62 }
 0x549   :  { %3118 = vmatpush.bf16.msra.mxu3 %v4392_v46  ;;  %3081 = vmatpush.bf16.msra.mxu0 %v4348_v26  ;;  %v2831_v11 = vand.u32 2147483647, %v5623_v35  ;;  %vm2817_vm11 = vcmp.eq.f32.partialorder %v2816_v44, 8.507059e+37 }
 0x54a   :  { %v2834_v38 = vor.u32 1.1754944e-38, %v2833_v22 }
 0x54b   :  { %v4895_v45 = vpop.eup %4894  ;;  %vm2832_vm10 = vcmp.eq.f32.partialorder %v2831_v11, 8.507059e+37 }
 0x54c   :  { %v4897_v0 = vpop.eup %4896  ;;  %v5627_v49 = vadd.f32 1.0, %v4895_v45  ;;  %3093 = vmatpush.bf16.msra.mxu1 %v4368_v19  ;;  %3106 = vmatpush.bf16.msra.mxu2 %v4372_v60 }
 0x54d   :  { %v5629_v33 = vpop.eup %4898  ;;  %v5631_v55 = vadd.f32 1.0, %v4897_v0  ;;  %3119 = vmatpush.bf16.msra.mxu3 %v4376_v9 }
 0x54e   :  { %v5633_v37 = vpop.eup %4900  ;;  %4902 = vrcp.f32 %v5627_v49  ;;  %v2808_v54 = vmul.f32 %v5629_v33, %v5621_v62  ;;  %v2848_v27 = vand.u32 2147483648, %v5627_v49  ;;  %v2846_v16 = vand.u32 2147483647, %v5627_v49 }
 0x54f   :  { %v2823_v58 = vmul.f32 %v5633_v37, %v5623_v35  ;;  %4904 = vrcp.f32 %v5631_v55  ;;  %vm2828_vm0 = vweird.f32 %v5633_v37  ;;  %vm2813_vm3 = vweird.f32 %v5629_v33 }
 0x550   :  { %v2809_v24 = vsub.f32 1.0, %v2808_v54  ;;  %3094 = vmatpush.bf16.msra.mxu1 %v4352_v51  ;;  %3107 = vmatpush.bf16.msra.mxu2 %v4356_v59  ;;  %vm5656_vm4 = vmor %vm2827_vm2, %vm2828_vm0  ;;  %vm2842_vm5 = vweird.f32 %v5627_v49  ;;  %v2849_v35 = vor.u32 1.1754944e-38, %v2848_v27  ;;  %vm2847_vm8 = vcmp.eq.f32.partialorder %v2846_v16, 8.507059e+37 }
 0x551   :  { %v2824_v17 = vsub.f32 1.0, %v2823_v58  ;;  %3120 = vmatpush.bf16.msra.mxu3 %v4360_v28  ;;  %vm2814_vm9 = vmor %vm2812_vm6, %vm2813_vm3  ;;  %v2863_v54 = vand.u32 2147483648, %v5631_v55  ;;  %vm2857_vm13 = vweird.f32 %v5631_v55 }
 0x552   :  { %v2810_v32 = vmul.f32 %v5629_v33, %v2809_v24 }
 0x553   :  { %v2825_v13 = vmul.f32 %v5633_v37, %v2824_v17  ;;  %v2864_v4 = vor.u32 1.1754944e-38, %v2863_v54 }
 0x554   :  { %v4903_v8 = vpop.eup %4902  ;;  %v2811_v6 = vadd.f32 %v5629_v33, %v2810_v32 }
 0x555   :  { %v2838_v53 = vmul.f32 %v4903_v8, %v5627_v49  ;;  %v4905_v15 = vpop.eup %4904  ;;  %v2826_v39 = vadd.f32 %v5633_v37, %v2825_v13  ;;  %vm2843_vm1 = vweird.f32 %v4903_v8  ;;  %v2819_v49 = vor.u32 1.1754944e-38, %v2818_v42 }
 0x556   :  { %v2853_v3 = vmul.f32 %v4905_v15, %v5631_v55  ;;  %vm2844_vm7 = vmor %vm2842_vm5, %vm2843_vm1  ;;  %v2815_v12 = vsel %vm2814_vm9, %v5629_v33, %v2811_v6  ;;  %vm2858_vm12 = vweird.f32 %v4905_v15  ;;  %v2861_v33 = vand.u32 2147483647, %v5631_v55 }
 0x557   :  { %v2839_v34 = vsub.f32 1.0, %v2838_v53  ;;  %v2830_v36 = vsel %vm5656_vm4, %v5633_v37, %v2826_v39  ;;  %v2820_v57 = vsel %vm2817_vm11, %v2819_v49, %v2815_v12  ;;  %vm2859_vm14 = vmor %vm2857_vm13, %vm2858_vm12 }
 0x558   :  { %v2854_v18 = vsub.f32 1.0, %v2853_v3  ;;  %v2835_v46 = vsel %vm2832_vm10, %v2834_v38, %v2830_v36  ;;  %vm2862_vm15 = vcmp.eq.f32.partialorder %v2861_v33, 8.507059e+37 }
 0x559   :  { %v2840_v41 = vmul.f32 %v4903_v8, %v2839_v34  ;;  %v2869_v25 = vmul.f32 %v2835_v46, %v5611_v23 }
 0x55a   :  { %v2855_v62 = vmul.f32 %v4905_v15, %v2854_v18 }
 0x55b   :  { %v2841_v30 = vadd.f32 %v4903_v8, %v2840_v41 }
 0x55c   :  { %v2856_v56 = vadd.f32 %v4905_v15, %v2855_v62 }
 0x55d   :  { %v2845_v45 = vsel %vm2844_vm7, %v4903_v8, %v2841_v30 }
 0x55e   :  { %v2850_v48 = vsel %vm2847_vm8, %v2849_v35, %v2845_v45  ;;  %v2860_v58 = vsel %vm2859_vm14, %v4905_v15, %v2856_v56 }
 0x55f   :  { %v2867_v0 = vmul.f32 2.0, %v2850_v48  ;;  %v2865_v20 = vsel %vm2862_vm15, %v2864_v4, %v2860_v58 }
 0x561   :  { %v4344_v47 = vadd.f32 -1.0, %v2867_v0 }
 0x563   :  { %v2870_v61 = vmul.f32 %v4344_v47, %v2820_v57 }
 0x565   :  { %v5669_v37 = vadd.f32 %v2870_v61, %v2869_v25 }
 0x567   :  { %4906 = vtanh.f32 %v5669_v37 }
 0x56d   :  { %v4907_v43 = vpop.eup %4906 }
 0x56e   :  { %v2873_v23 = vmul.f32 %v4907_v43, %v2865_v20 }
 0x570   :  { %v2874_v2 = vpack.c.bf16 %v2873_v23, %v2873_v23 }
 0x572   :  { %2876 = vst [vmem:[#allocation11 + $0x18] sm:$0xf] %v2874_v2  ;;  %3082 = vmatmul.bf16.vlgmr.msra.gmra.mxu0 %v2874_v2  ;;  %3095 = vmatmul.bf16.vlgmr.msra.gmra.mxu1 %v2874_v2 }
 0x573   :  { %3108 = vmatmul.bf16.vlgmr.msra.gmra.mxu2 %v2874_v2  ;;  %3121 = vmatmul.bf16.vlgmr.msra.gmra.mxu3 %v2874_v2 }
 0x5ef   :  { %v3083_v10 = vpop.f32.mrf.mxu0  ;;  %v3096_v17 = vpop.f32.mrf.mxu1 }
 0x5f0   :  { %v3126_v52 = vadd.f32 %v3083_v10, %v5255_v63  ;;  %v3127_v19 = vadd.f32 %v3096_v17, %v5258_v1 }
 0x5f2   :  { %v4473_v55 = vmul.f32 -1.442695, %v3126_v52  ;;  %v4474_v60 = vmul.f32 -1.442695, %v3127_v19 }
 0x5f4   :  { %4908 = vpow2.f32 %v4473_v55 }
 0x5f5   :  { %4910 = vpow2.f32 %v4474_v60 }
 0x5f6   :  { %v3109_v9 = vpop.f32.mrf.mxu2  ;;  %v3122_v21 = vpop.f32.mrf.mxu3 }
 0x5f7   :  { %v3128_v7 = vadd.f32 %v3109_v9, %v5265_v50  ;;  %v3129_v14 = vadd.f32 %v3122_v21, %v5268_v5  ;;  %v3085_v24 = vpop.f32.mrf.mxu0  ;;  %v3098_v26 = vpop.f32.mrf.mxu1 }
 0x5f9   :  { %v4475_v29 = vmul.f32 -1.442695, %v3128_v7  ;;  %v4476_v31 = vmul.f32 -1.442695, %v3129_v14 }
 0x5fa   :  { %v4909_v8 = vpop.eup %4908 }
 0x5fb   :  { %v4911_v51 = vpop.eup %4910  ;;  %v3142_v59 = vadd.f32 1.0, %v4909_v8  ;;  %4912 = vpow2.f32 %v4475_v29 }
 0x5fc   :  { %v3143_v63 = vadd.f32 1.0, %v4911_v51  ;;  %4914 = vpow2.f32 %v4476_v31 }
 0x5fd   :  { %4916 = vrcp.f32 %v3142_v59  ;;  %vm3151_vm6 = vweird.f32 %v3142_v59  ;;  %v3157_v0 = vand.u32 2147483648, %v3142_v59  ;;  %v3155_v46 = vand.u32 2147483647, %v3142_v59 }
 0x5fe   :  { %4918 = vrcp.f32 %v3143_v63  ;;  %v3111_v1 = vpop.f32.mrf.mxu2  ;;  %v3124_v13 = vpop.f32.mrf.mxu3  ;;  %vm3166_vm2 = vweird.f32 %v3143_v63  ;;  %v3170_v36 = vand.u32 2147483647, %v3143_v63  ;;  %v3172_v45 = vand.u32 2147483648, %v3143_v63 }
 0x5ff   :  { %v3158_v33 = vor.u32 1.1754944e-38, %v3157_v0  ;;  %vm3156_vm11 = vcmp.eq.f32.partialorder %v3155_v46, 8.507059e+37 }
 0x600   :  { %v3173_v62 = vor.u32 1.1754944e-38, %v3172_v45  ;;  %vm3171_vm10 = vcmp.eq.f32.partialorder %v3170_v36, 8.507059e+37 }
 0x601   :  { %v4913_v53 = vpop.eup %4912 }
 0x602   :  { %v4915_v28 = vpop.eup %4914  ;;  %v3144_v15 = vadd.f32 1.0, %v4913_v53 }
 0x603   :  { %v4917_v50 = vpop.eup %4916  ;;  %v5679_v32 = vadd.f32 1.0, %v4915_v28 }
 0x604   :  { %v4919_v5 = vpop.eup %4918  ;;  %4920 = vrcp.f32 %v3144_v15  ;;  %v3147_v34 = vmul.f32 %v4917_v50, %v3142_v59  ;;  %v3187_v30 = vand.u32 2147483648, %v3144_v15  ;;  %v3185_v44 = vand.u32 2147483647, %v3144_v15 }
 0x605   :  { %v3162_v27 = vmul.f32 %v4919_v5, %v3143_v63  ;;  %4922 = vrcp.f32 %v5679_v32  ;;  %vm3167_vm0 = vweird.f32 %v4919_v5  ;;  %vm3152_vm3 = vweird.f32 %v4917_v50 }
 0x606   :  { %v3148_v41 = vsub.f32 1.0, %v3147_v34  ;;  %vm5683_vm4 = vmor %vm3166_vm2, %vm3167_vm0  ;;  %vm3181_vm5 = vweird.f32 %v3144_v15  ;;  %v3188_v49 = vor.u32 1.1754944e-38, %v3187_v30  ;;  %vm3186_vm8 = vcmp.eq.f32.partialorder %v3185_v44, 8.507059e+37 }
 0x607   :  { %v3163_v39 = vsub.f32 1.0, %v3162_v27  ;;  %vm3153_vm9 = vmor %vm3151_vm6, %vm3152_vm3  ;;  %v3202_v52 = vand.u32 2147483648, %v5679_v32  ;;  %vm3196_vm13 = vweird.f32 %v5679_v32  ;;  %v3200_v19 = vand.u32 2147483647, %v5679_v32 }
 0x608   :  { %v3149_v6 = vmul.f32 %v4917_v50, %v3148_v41 }
 0x609   :  { %v3164_v11 = vmul.f32 %v4919_v5, %v3163_v39  ;;  %v3203_v60 = vor.u32 1.1754944e-38, %v3202_v52  ;;  %vm3201_vm15 = vcmp.eq.f32.partialorder %v3200_v19, 8.507059e+37 }
 0x60a   :  { %v4921_v16 = vpop.eup %4920  ;;  %v3150_v48 = vadd.f32 %v4917_v50, %v3149_v6 }
 0x60b   :  { %v3177_v22 = vmul.f32 %v4921_v16, %v3144_v15  ;;  %v4923_v3 = vpop.eup %4922  ;;  %v3165_v42 = vadd.f32 %v4919_v5, %v3164_v11  ;;  %vm3182_vm1 = vweird.f32 %v4921_v16 }
 0x60c   :  { %v3192_v38 = vmul.f32 %v4923_v3, %v5679_v32  ;;  %vm3183_vm7 = vmor %vm3181_vm5, %vm3182_vm1  ;;  %v3154_v56 = vsel %vm3153_vm9, %v4917_v50, %v3150_v48  ;;  %vm3197_vm12 = vweird.f32 %v4923_v3 }
 0x60d   :  { %v3178_v40 = vsub.f32 1.0, %v3177_v22  ;;  %v3169_v47 = vsel %vm5683_vm4, %v4919_v5, %v3165_v42  ;;  %v3159_v43 = vsel %vm3156_vm11, %v3158_v33, %v3154_v56  ;;  %vm3198_vm14 = vmor %vm3196_vm13, %vm3197_vm12 }
 0x60e   :  { %v3193_v61 = vsub.f32 1.0, %v3192_v38  ;;  %v3174_v58 = vsel %vm3171_vm10, %v3173_v62, %v3169_v47 }
 0x60f   :  { %v3179_v35 = vmul.f32 %v4921_v16, %v3178_v40  ;;  %v3208_v23 = vmul.f32 %v3174_v58, %v5669_v37 }
 0x610   :  { %v3194_v20 = vmul.f32 %v4923_v3, %v3193_v61 }
 0x611   :  { %v3180_v12 = vadd.f32 %v4921_v16, %v3179_v35 }
 0x612   :  { %v3195_v17 = vadd.f32 %v4923_v3, %v3194_v20 }
 0x613   :  { %v3184_v57 = vsel %vm3183_vm7, %v4921_v16, %v3180_v12 }
 0x614   :  { %v3189_v25 = vsel %vm3186_vm8, %v3188_v49, %v3184_v57  ;;  %v3199_v55 = vsel %vm3198_vm14, %v4923_v3, %v3195_v17 }
 0x615   :  { %v3206_v54 = vmul.f32 2.0, %v3189_v25  ;;  %v3204_v9 = vsel %vm3201_vm15, %v3203_v60, %v3199_v55 }
 0x617   :  { %v4477_v4 = vadd.f32 -1.0, %v3206_v54 }
 0x619   :  { %v3209_v2 = vmul.f32 %v4477_v4, %v3159_v43 }
 0x61b   :  { %v3210_v10 = vadd.f32 %v3209_v2, %v3208_v23 }
 0x61d   :  { %4924 = vtanh.f32 %v3210_v10  ;;  %3217 = vst [vmem:[#allocation14] sm:$0xff] %v3210_v10 }
 0x623   :  { %v4925_v37 = vpop.eup %4924 }
 0x624   :  { %v3212_v21 = vmul.f32 %v4925_v37, %v3204_v9 }
 0x626   :  { %v3213_v7 = vpack.c.bf16 %v3212_v21, %v3212_v21  ;;  %3216 = vst [vmem:[#allocation12] sm:$0xff] %v3212_v21 }
 0x627   :  { %3241 = dma.vmem_to_hbm [thread:$0]  %s3237_s3, 128, %s3239_s21, [#allocation13]  }
 0x628   :  { %3215 = vst [vmem:[#allocation11 + $0x1c] sm:$0xf] %v3213_v7  ;;  %3252 = dma.vmem_to_hbm [thread:$0]  %s3248_s23, 128, %s3250_s26, [#allocation13]  }
 0x629   :  { %3230 = dma.vmem_to_hbm [thread:$0]  %s3223_s28, 512, %s3225_s7, [#allocation5], %s5108_s9, %s5108_s9, %s5109_s10  }
 0x62a   :  { %5100 = dma.done.wait [#allocation5], 512  }
 0x62b   :  { %5101 = vsyncadd [#allocation5], 4294966784 }
 0x62c   :  { %5102 = dma.done.wait [#allocation13], 256  }
 0x62d   :  { %5103 = vsyncadd [#allocation13], 4294967040 }
 0x62e   :  { %3265 = vsyncpa [#allocation4], 1 }
 0x62f   :  { %3266 = vsyncpa [#allocation7], 1 }
 0x630   :  { %3267 = vsyncpa [#allocation10], 1 }
 0x631   :  { %3268 = vsyncpa [#allocation5], 1 }
 0x632   :  { %3269 = vsyncpa [#allocation13], 1 }

</bundles_post_ra>
